<compile_context>
chip_gen: v6e
topology: v6e:2x2x1
jax: 0.10.0
libtpu: 0.0.40
codegen_flags: <defaults>
</compile_context>

<pallas_src>
import functools

import jax
import jax.numpy as jnp
from jax.experimental import pallas as pl
from jax.experimental.pallas import tpu as pltpu

NUM_MOTIFS = 13
COMPRESS_DIMS = [6, 6, 6]
DIM = 32 * 2            # 64, as in the reference module
MOTIF_PAD = 128         # lane-aligned pad of each motif's hidden chunk


# --------------------------------------------------------------------------
# Single fused Pallas kernel: the entire Net.forward (eval mode)
# --------------------------------------------------------------------------

def _net_kernel(adj_ref, x_ref, batch_ref, *refs, num_graphs):
    wrefs = refs[:-2]
    o_ref = refs[-2]
    p_ref = refs[-1]                      # [N, 13*128] bf16 VMEM scratch

    h = x_ref[...]                        # [N, F] f32 (input dropout -> identity)
    n = h.shape[0]

    idx = 0
    for _stage in range(3):
        w1_ref, b1_ref, wf_ref, mb1_ref, mw2_ref, mb2_ref = wrefs[idx:idx + 6]
        idx += 6

        hb = h.astype(jnp.bfloat16)
        # Per-motif: pre-transform -> propagate -> tanh (att_act); store into
        # the lane-dense padded slab (offsets are multiples of 128 -> clean
        # unmasked stores, no relayouts).
        for m in range(NUM_MOTIFS):
            zm = (jnp.dot(hb, w1_ref[m], preferred_element_type=jnp.float32)
                  + b1_ref[m])                                        # [N, 128]
            pm = jnp.tanh(jnp.dot(adj_ref[m], zm.astype(jnp.bfloat16),
                                  preferred_element_type=jnp.float32))
            p_ref[:, m * MOTIF_PAD:(m + 1) * MOTIF_PAD] = pm.astype(p_ref.dtype)

        # concat + compress + Linear(+folded BN) fused into one MXU matmul;
        # accumulation over the 13 motifs happens inside the MXU.
        y = (jnp.dot(p_ref[...], wf_ref[...], preferred_element_type=jnp.float32)
             + mb1_ref[...])
        y = jnp.maximum(y, 0.0)
        y = (jnp.dot(y.astype(jnp.bfloat16), mw2_ref[...],
                     preferred_element_type=jnp.float32) + mb2_ref[...])
        h = jnp.maximum(y, 0.0)           # layer dropout -> identity in eval mode

    lin1_w, lin1_b, lin2_w, lin2_b = wrefs[idx:idx + 4]

    # global_add_pool: one-hot segment matrix built in-kernel, one matmul.
    batch = batch_ref[...]                                            # [1, N]
    seg = jax.lax.broadcasted_iota(jnp.int32, (num_graphs, n), 0)
    pool = (seg == batch).astype(jnp.bfloat16)                        # [G, N]
    g = jnp.dot(pool, h.astype(jnp.bfloat16), preferred_element_type=jnp.float32)

    # Head: lin1 -> ReLU -> (dropout=identity) -> lin2 -> log_softmax.
    g = (jnp.dot(g.astype(jnp.bfloat16), lin1_w[...],
                 preferred_element_type=jnp.float32) + lin1_b[...])
    g = jnp.maximum(g, 0.0)
    logits = (jnp.dot(g.astype(jnp.bfloat16), lin2_w[...],
                      preferred_element_type=jnp.float32) + lin2_b[...])

    mx = jnp.max(logits, axis=-1, keepdims=True)
    s = logits - mx
    lse = jnp.log(jnp.sum(jnp.exp(s), axis=-1, keepdims=True))
    o_ref[...] = (s - lse).astype(o_ref.dtype)


# --------------------------------------------------------------------------
# Parameter construction (deterministic, Kaiming-uniform style)
# --------------------------------------------------------------------------

def _kaiming_uniform(key, shape, fan_in):
    bound = jnp.sqrt(6.0 / fan_in)
    return jax.random.uniform(key, shape, jnp.float32, -bound, bound)


def _linear_params(key, fan_in, fan_out):
    k1, k2 = jax.random.split(key)
    w = _kaiming_uniform(k1, (fan_in, fan_out), fan_in)
    bb = 1.0 / jnp.sqrt(jnp.float32(fan_in))
    b = jax.random.uniform(k2, (fan_out,), jnp.float32, -bb, bb)
    return w, b


def _motif_conv_params(key, in_dim, hidden_dim, compress_dim):
    # TODO(synk): MotifConv's internal attention weights and motif_dropout /
    # att_dropout are not shown in the reference snippet; approximated as
    # per-motif propagate -> tanh (att_act) -> compress, concatenated over 13.
    k1, k2 = jax.random.split(key)
    return dict(
        w1=_kaiming_uniform(k1, (NUM_MOTIFS, in_dim, hidden_dim), in_dim),
        b1=jnp.zeros((NUM_MOTIFS, 1, hidden_dim), jnp.float32),
        w2=_kaiming_uniform(k2, (NUM_MOTIFS, hidden_dim, compress_dim), hidden_dim),
    )


def _mlp_params(key, in_dim):
    k1, k2 = jax.random.split(key)
    w1, b1 = _linear_params(k1, in_dim, DIM)
    w2, b2 = _linear_params(k2, DIM, DIM)
    return dict(
        w1=w1, b1=b1, w2=w2, b2=b2,
        gamma=jnp.ones((DIM,), jnp.float32), beta=jnp.zeros((DIM,), jnp.float32),
        mean=jnp.zeros((DIM,), jnp.float32), var=jnp.ones((DIM,), jnp.float32),
    )


def make_params(key, in_channel, hidden_dims, out_channel):
    ks = jax.random.split(key, 8)
    params = {
        "conv1": _motif_conv_params(ks[0], in_channel, hidden_dims[0], COMPRESS_DIMS[0]),
        "mlp1": _mlp_params(ks[1], NUM_MOTIFS * COMPRESS_DIMS[0]),
        "conv2": _motif_conv_params(ks[2], DIM, hidden_dims[1], COMPRESS_DIMS[1]),
        "mlp2": _mlp_params(ks[3], NUM_MOTIFS * COMPRESS_DIMS[1]),
        "conv3": _motif_conv_params(ks[4], DIM, hidden_dims[1], COMPRESS_DIMS[2]),
        "mlp3": _mlp_params(ks[5], NUM_MOTIFS * COMPRESS_DIMS[2]),
    }
    params["lin1_w"], params["lin1_b"] = _linear_params(ks[6], DIM, DIM)
    params["lin2_w"], params["lin2_b"] = _linear_params(ks[7], DIM, out_channel)
    return params


def _fold_bn(w, b, gamma, beta, mean, var, eps=1e-5):
    scale = gamma / jnp.sqrt(var + eps)
    return w * scale[None, :], (b - mean) * scale + beta


def prepare_params(params):
    """Pack / fold / fuse raw parameters into the flat kernel-ready list (once)."""
    flat = []
    for conv_key, mlp_key, cdim in (("conv1", "mlp1", COMPRESS_DIMS[0]),
                                    ("conv2", "mlp2", COMPRESS_DIMS[1]),
                                    ("conv3", "mlp3", COMPRESS_DIMS[2])):
        c = params[conv_key]
        w1, b1, w2 = c["w1"], c["b1"], c["w2"]        # [13,F,H],[13,1,H],[13,H,C]
        m_, f_, hdim = w1.shape
        assert hdim <= MOTIF_PAD, "hidden_dim must fit one 128-lane tile"

        # Pad each motif's hidden chunk to a 128-lane boundary so all in-kernel
        # slices / stores are tile-aligned.
        w1pad = jnp.zeros((m_, f_, MOTIF_PAD), jnp.float32).at[:, :, :hdim].set(w1)
        b1pad = jnp.zeros((m_, 1, MOTIF_PAD), jnp.float32).at[:, :, :hdim].set(b1)

        p = params[mlp_key]
        mw1, mb1 = _fold_bn(p["w1"], p["b1"], p["gamma"], p["beta"],
                            p["mean"], p["var"])
        # Fuse compress with the MLP's first (BN-folded) Linear (exact in eval):
        #   Wf[m*128 : m*128+H, :] = w2[m] @ mw1[m*C:(m+1)*C, :]
        wf = jnp.zeros((m_ * MOTIF_PAD, DIM), jnp.float32)
        for m in range(m_):
            blk = w2[m] @ mw1[m * cdim:(m + 1) * cdim, :]          # [H, 64]
            wf = wf.at[m * MOTIF_PAD:m * MOTIF_PAD + hdim, :].set(blk)

        flat += [w1pad.astype(jnp.bfloat16), b1pad,
                 wf.astype(jnp.bfloat16), mb1.reshape(1, -1),
                 p["w2"].astype(jnp.bfloat16), p["b2"].reshape(1, -1)]

    flat += [params["lin1_w"].astype(jnp.bfloat16), params["lin1_b"].reshape(1, -1),
             params["lin2_w"].astype(jnp.bfloat16), params["lin2_b"].reshape(1, -1)]
    return flat


# --------------------------------------------------------------------------
# Net.forward wrapper (single fused pallas_call)
# --------------------------------------------------------------------------

@functools.partial(jax.jit, static_argnums=(4,))
def net_forward(flat_weights, x, motif_adjs, batch, num_graphs):
    n = x.shape[0]
    out_channel = flat_weights[-1].shape[-1]
    batch2d = batch.reshape(1, n).astype(jnp.int32)
    adj_bf16 = motif_adjs.astype(jnp.bfloat16)     # 0/1 adjacency -> exact in bf16
    kern = functools.partial(_net_kernel, num_graphs=num_graphs)
    return pl.pallas_call(
        kern,
        out_shape=jax.ShapeDtypeStruct((num_graphs, out_channel), jnp.float32),
        scratch_shapes=[pltpu.VMEM((n, NUM_MOTIFS * MOTIF_PAD), jnp.bfloat16)],
        compiler_params=pltpu.CompilerParams(vmem_limit_bytes=32 * 1024 * 1024),
    )(adj_bf16, x, batch2d, *flat_weights)


# --------------------------------------------------------------------------

if __name__ == "__main__":
    key = jax.random.PRNGKey(0)
    in_channel = 16
    hidden_dims = [32, 32]
    out_channel = 4
    num_graphs = 4
    nodes_per_graph = 8
    N = num_graphs * nodes_per_graph

    k_param, k_x, k_adj = jax.random.split(key, 3)
    params = make_params(k_param, in_channel, hidden_dims, out_channel)
    flat_weights = prepare_params(params)

    x = jax.random.normal(k_x, (N, in_channel), jnp.float32)
    # synthetic dense motif adjacencies (13 motifs), symmetric 0/1
    a_raw = (jax.random.uniform(k_adj, (NUM_MOTIFS, N, N)) < 0.2).astype(jnp.float32)
    motif_adjs = jnp.clip(a_raw + jnp.transpose(a_raw, (0, 2, 1)), 0.0, 1.0)
    batch = jnp.repeat(jnp.arange(num_graphs, dtype=jnp.int32), nodes_per_graph)

    out = net_forward(flat_weights, x, motif_adjs, batch, num_graphs)
    out = jax.block_until_ready(out)
    assert out.shape == (num_graphs, out_channel)
    print("KERNEL_OK")
</pallas_src>

<mosaic_0001>
module attributes {stable_mosaic.version = 11 : i64} {
  func.func @_net_kernel(%arg0: memref<13x32x32xbf16, #tpu.memory_space<vmem>>, %arg1: memref<32x16xf32, #tpu.memory_space<vmem>>, %arg2: memref<1x32xi32, #tpu.memory_space<vmem>>, %arg3: memref<13x16x128xbf16, #tpu.memory_space<vmem>>, %arg4: memref<13x1x128xf32, #tpu.memory_space<vmem>>, %arg5: memref<1664x64xbf16, #tpu.memory_space<vmem>>, %arg6: memref<1x64xf32, #tpu.memory_space<vmem>>, %arg7: memref<64x64xbf16, #tpu.memory_space<vmem>>, %arg8: memref<1x64xf32, #tpu.memory_space<vmem>>, %arg9: memref<13x64x128xbf16, #tpu.memory_space<vmem>>, %arg10: memref<13x1x128xf32, #tpu.memory_space<vmem>>, %arg11: memref<1664x64xbf16, #tpu.memory_space<vmem>>, %arg12: memref<1x64xf32, #tpu.memory_space<vmem>>, %arg13: memref<64x64xbf16, #tpu.memory_space<vmem>>, %arg14: memref<1x64xf32, #tpu.memory_space<vmem>>, %arg15: memref<13x64x128xbf16, #tpu.memory_space<vmem>>, %arg16: memref<13x1x128xf32, #tpu.memory_space<vmem>>, %arg17: memref<1664x64xbf16, #tpu.memory_space<vmem>>, %arg18: memref<1x64xf32, #tpu.memory_space<vmem>>, %arg19: memref<64x64xbf16, #tpu.memory_space<vmem>>, %arg20: memref<1x64xf32, #tpu.memory_space<vmem>>, %arg21: memref<64x64xbf16, #tpu.memory_space<vmem>>, %arg22: memref<1x64xf32, #tpu.memory_space<vmem>>, %arg23: memref<64x4xbf16, #tpu.memory_space<vmem>>, %arg24: memref<1x4xf32, #tpu.memory_space<vmem>>, %arg25: memref<4x4xf32, #tpu.memory_space<vmem>>, %arg26: memref<32x1664xbf16, #tpu.memory_space<vmem>>) attributes {dimension_semantics = [], scalar_prefetch = 0 : i64, scratch_operands = 1 : i64, tpu.core_type = #tpu.core_type<tc>} {
    %c0 = arith.constant 0 : index
    %c0_0 = arith.constant 0 : index
    %0 = vector.load %arg1[%c0, %c0_0] : memref<32x16xf32, #tpu.memory_space<vmem>>, vector<32x16xf32>
    %1 = arith.truncf %0 : vector<32x16xf32> to vector<32x16xbf16>
    %c0_1 = arith.constant 0 : index
    %c0_2 = arith.constant 0 : index
    %c0_3 = arith.constant 0 : index
    %2 = vector.load %arg3[%c0_1, %c0_2, %c0_3] : memref<13x16x128xbf16, #tpu.memory_space<vmem>>, vector<1x16x128xbf16>
    %3 = vector.shape_cast %2 : vector<1x16x128xbf16> to vector<16x128xbf16>
    %cst = arith.constant dense<0.000000e+00> : vector<32x128xf32>
    %4 = tpu.matmul %1, %3, %cst {dimension_numbers = #tpu.dot_dimension_numbers<[1], [0], [0], [1], [0, 0, 1, 1], [], []>} : vector<32x16xbf16>, vector<16x128xbf16>, vector<32x128xf32> -> vector<32x128xf32>
    %c0_4 = arith.constant 0 : index
    %c0_5 = arith.constant 0 : index
    %c0_6 = arith.constant 0 : index
    %5 = vector.load %arg4[%c0_4, %c0_5, %c0_6] : memref<13x1x128xf32, #tpu.memory_space<vmem>>, vector<1x1x128xf32>
    %6 = vector.shape_cast %5 : vector<1x1x128xf32> to vector<1x128xf32>
    %7 = vector.broadcast %6 : vector<1x128xf32> to vector<32x128xf32>
    %8 = arith.addf %4, %7 : vector<32x128xf32>
    %c0_7 = arith.constant 0 : index
    %c0_8 = arith.constant 0 : index
    %c0_9 = arith.constant 0 : index
    %9 = vector.load %arg0[%c0_7, %c0_8, %c0_9] : memref<13x32x32xbf16, #tpu.memory_space<vmem>>, vector<1x32x32xbf16>
    %10 = vector.shape_cast %9 : vector<1x32x32xbf16> to vector<32x32xbf16>
    %11 = arith.truncf %8 : vector<32x128xf32> to vector<32x128xbf16>
    %cst_10 = arith.constant dense<0.000000e+00> : vector<32x128xf32>
    %12 = tpu.matmul %10, %11, %cst_10 {dimension_numbers = #tpu.dot_dimension_numbers<[1], [0], [0], [1], [0, 0, 1, 1], [], []>} : vector<32x32xbf16>, vector<32x128xbf16>, vector<32x128xf32> -> vector<32x128xf32>
    %13 = math.tanh %12 : vector<32x128xf32>
    %14 = arith.truncf %13 : vector<32x128xf32> to vector<32x128xbf16>
    %c0_11 = arith.constant 0 : index
    %c0_12 = arith.constant 0 : index
    %15 = vector.load %arg26[%c0_11, %c0_12] : memref<32x1664xbf16, #tpu.memory_space<vmem>>, vector<32x128xbf16>
    tpu.vector_store %arg26[%c0_11, %c0_12], %14 {strides = array<i32>} : memref<32x1664xbf16, #tpu.memory_space<vmem>>, vector<32x128xbf16>,
    %c1 = arith.constant 1 : index
    %c0_13 = arith.constant 0 : index
    %c0_14 = arith.constant 0 : index
    %16 = vector.load %arg3[%c1, %c0_13, %c0_14] : memref<13x16x128xbf16, #tpu.memory_space<vmem>>, vector<1x16x128xbf16>
    %17 = vector.shape_cast %16 : vector<1x16x128xbf16> to vector<16x128xbf16>
    %cst_15 = arith.constant dense<0.000000e+00> : vector<32x128xf32>
    %18 = tpu.matmul %1, %17, %cst_15 {dimension_numbers = #tpu.dot_dimension_numbers<[1], [0], [0], [1], [0, 0, 1, 1], [], []>} : vector<32x16xbf16>, vector<16x128xbf16>, vector<32x128xf32> -> vector<32x128xf32>
    %c1_16 = arith.constant 1 : index
    %c0_17 = arith.constant 0 : index
    %c0_18 = arith.constant 0 : index
    %19 = vector.load %arg4[%c1_16, %c0_17, %c0_18] : memref<13x1x128xf32, #tpu.memory_space<vmem>>, vector<1x1x128xf32>
    %20 = vector.shape_cast %19 : vector<1x1x128xf32> to vector<1x128xf32>
    %21 = vector.broadcast %20 : vector<1x128xf32> to vector<32x128xf32>
    %22 = arith.addf %18, %21 : vector<32x128xf32>
    %c1_19 = arith.constant 1 : index
    %c0_20 = arith.constant 0 : index
    %c0_21 = arith.constant 0 : index
    %23 = vector.load %arg0[%c1_19, %c0_20, %c0_21] : memref<13x32x32xbf16, #tpu.memory_space<vmem>>, vector<1x32x32xbf16>
    %24 = vector.shape_cast %23 : vector<1x32x32xbf16> to vector<32x32xbf16>
    %25 = arith.truncf %22 : vector<32x128xf32> to vector<32x128xbf16>
    %cst_22 = arith.constant dense<0.000000e+00> : vector<32x128xf32>
    %26 = tpu.matmul %24, %25, %cst_22 {dimension_numbers = #tpu.dot_dimension_numbers<[1], [0], [0], [1], [0, 0, 1, 1], [], []>} : vector<32x32xbf16>, vector<32x128xbf16>, vector<32x128xf32> -> vector<32x128xf32>
    %27 = math.tanh %26 : vector<32x128xf32>
    %28 = arith.truncf %27 : vector<32x128xf32> to vector<32x128xbf16>
    %c0_23 = arith.constant 0 : index
    %c128 = arith.constant 128 : index
    %29 = vector.load %arg26[%c0_23, %c128] : memref<32x1664xbf16, #tpu.memory_space<vmem>>, vector<32x128xbf16>
    tpu.vector_store %arg26[%c0_23, %c128], %28 {strides = array<i32>} : memref<32x1664xbf16, #tpu.memory_space<vmem>>, vector<32x128xbf16>,
    %c2 = arith.constant 2 : index
    %c0_24 = arith.constant 0 : index
    %c0_25 = arith.constant 0 : index
    %30 = vector.load %arg3[%c2, %c0_24, %c0_25] : memref<13x16x128xbf16, #tpu.memory_space<vmem>>, vector<1x16x128xbf16>
    %31 = vector.shape_cast %30 : vector<1x16x128xbf16> to vector<16x128xbf16>
    %cst_26 = arith.constant dense<0.000000e+00> : vector<32x128xf32>
    %32 = tpu.matmul %1, %31, %cst_26 {dimension_numbers = #tpu.dot_dimension_numbers<[1], [0], [0], [1], [0, 0, 1, 1], [], []>} : vector<32x16xbf16>, vector<16x128xbf16>, vector<32x128xf32> -> vector<32x128xf32>
    %c2_27 = arith.constant 2 : index
    %c0_28 = arith.constant 0 : index
    %c0_29 = arith.constant 0 : index
    %33 = vector.load %arg4[%c2_27, %c0_28, %c0_29] : memref<13x1x128xf32, #tpu.memory_space<vmem>>, vector<1x1x128xf32>
    %34 = vector.shape_cast %33 : vector<1x1x128xf32> to vector<1x128xf32>
    %35 = vector.broadcast %34 : vector<1x128xf32> to vector<32x128xf32>
    %36 = arith.addf %32, %35 : vector<32x128xf32>
    %c2_30 = arith.constant 2 : index
    %c0_31 = arith.constant 0 : index
    %c0_32 = arith.constant 0 : index
    %37 = vector.load %arg0[%c2_30, %c0_31, %c0_32] : memref<13x32x32xbf16, #tpu.memory_space<vmem>>, vector<1x32x32xbf16>
    %38 = vector.shape_cast %37 : vector<1x32x32xbf16> to vector<32x32xbf16>
    %39 = arith.truncf %36 : vector<32x128xf32> to vector<32x128xbf16>
    %cst_33 = arith.constant dense<0.000000e+00> : vector<32x128xf32>
    %40 = tpu.matmul %38, %39, %cst_33 {dimension_numbers = #tpu.dot_dimension_numbers<[1], [0], [0], [1], [0, 0, 1, 1], [], []>} : vector<32x32xbf16>, vector<32x128xbf16>, vector<32x128xf32> -> vector<32x128xf32>
    %41 = math.tanh %40 : vector<32x128xf32>
    %42 = arith.truncf %41 : vector<32x128xf32> to vector<32x128xbf16>
    %c0_34 = arith.constant 0 : index
    %c256 = arith.constant 256 : index
    %43 = vector.load %arg26[%c0_34, %c256] : memref<32x1664xbf16, #tpu.memory_space<vmem>>, vector<32x128xbf16>
    tpu.vector_store %arg26[%c0_34, %c256], %42 {strides = array<i32>} : memref<32x1664xbf16, #tpu.memory_space<vmem>>, vector<32x128xbf16>,
    %c3 = arith.constant 3 : index
    %c0_35 = arith.constant 0 : index
    %c0_36 = arith.constant 0 : index
    %44 = vector.load %arg3[%c3, %c0_35, %c0_36] : memref<13x16x128xbf16, #tpu.memory_space<vmem>>, vector<1x16x128xbf16>
    %45 = vector.shape_cast %44 : vector<1x16x128xbf16> to vector<16x128xbf16>
    %cst_37 = arith.constant dense<0.000000e+00> : vector<32x128xf32>
    %46 = tpu.matmul %1, %45, %cst_37 {dimension_numbers = #tpu.dot_dimension_numbers<[1], [0], [0], [1], [0, 0, 1, 1], [], []>} : vector<32x16xbf16>, vector<16x128xbf16>, vector<32x128xf32> -> vector<32x128xf32>
    %c3_38 = arith.constant 3 : index
    %c0_39 = arith.constant 0 : index
    %c0_40 = arith.constant 0 : index
    %47 = vector.load %arg4[%c3_38, %c0_39, %c0_40] : memref<13x1x128xf32, #tpu.memory_space<vmem>>, vector<1x1x128xf32>
    %48 = vector.shape_cast %47 : vector<1x1x128xf32> to vector<1x128xf32>
    %49 = vector.broadcast %48 : vector<1x128xf32> to vector<32x128xf32>
    %50 = arith.addf %46, %49 : vector<32x128xf32>
    %c3_41 = arith.constant 3 : index
    %c0_42 = arith.constant 0 : index
    %c0_43 = arith.constant 0 : index
    %51 = vector.load %arg0[%c3_41, %c0_42, %c0_43] : memref<13x32x32xbf16, #tpu.memory_space<vmem>>, vector<1x32x32xbf16>
    %52 = vector.shape_cast %51 : vector<1x32x32xbf16> to vector<32x32xbf16>
    %53 = arith.truncf %50 : vector<32x128xf32> to vector<32x128xbf16>
    %cst_44 = arith.constant dense<0.000000e+00> : vector<32x128xf32>
    %54 = tpu.matmul %52, %53, %cst_44 {dimension_numbers = #tpu.dot_dimension_numbers<[1], [0], [0], [1], [0, 0, 1, 1], [], []>} : vector<32x32xbf16>, vector<32x128xbf16>, vector<32x128xf32> -> vector<32x128xf32>
    %55 = math.tanh %54 : vector<32x128xf32>
    %56 = arith.truncf %55 : vector<32x128xf32> to vector<32x128xbf16>
    %c0_45 = arith.constant 0 : index
    %c384 = arith.constant 384 : index
    %57 = vector.load %arg26[%c0_45, %c384] : memref<32x1664xbf16, #tpu.memory_space<vmem>>, vector<32x128xbf16>
    tpu.vector_store %arg26[%c0_45, %c384], %56 {strides = array<i32>} : memref<32x1664xbf16, #tpu.memory_space<vmem>>, vector<32x128xbf16>,
    %c4 = arith.constant 4 : index
    %c0_46 = arith.constant 0 : index
    %c0_47 = arith.constant 0 : index
    %58 = vector.load %arg3[%c4, %c0_46, %c0_47] : memref<13x16x128xbf16, #tpu.memory_space<vmem>>, vector<1x16x128xbf16>
    %59 = vector.shape_cast %58 : vector<1x16x128xbf16> to vector<16x128xbf16>
    %cst_48 = arith.constant dense<0.000000e+00> : vector<32x128xf32>
    %60 = tpu.matmul %1, %59, %cst_48 {dimension_numbers = #tpu.dot_dimension_numbers<[1], [0], [0], [1], [0, 0, 1, 1], [], []>} : vector<32x16xbf16>, vector<16x128xbf16>, vector<32x128xf32> -> vector<32x128xf32>
    %c4_49 = arith.constant 4 : index
    %c0_50 = arith.constant 0 : index
    %c0_51 = arith.constant 0 : index
    %61 = vector.load %arg4[%c4_49, %c0_50, %c0_51] : memref<13x1x128xf32, #tpu.memory_space<vmem>>, vector<1x1x128xf32>
    %62 = vector.shape_cast %61 : vector<1x1x128xf32> to vector<1x128xf32>
    %63 = vector.broadcast %62 : vector<1x128xf32> to vector<32x128xf32>
    %64 = arith.addf %60, %63 : vector<32x128xf32>
    %c4_52 = arith.constant 4 : index
    %c0_53 = arith.constant 0 : index
    %c0_54 = arith.constant 0 : index
    %65 = vector.load %arg0[%c4_52, %c0_53, %c0_54] : memref<13x32x32xbf16, #tpu.memory_space<vmem>>, vector<1x32x32xbf16>
    %66 = vector.shape_cast %65 : vector<1x32x32xbf16> to vector<32x32xbf16>
    %67 = arith.truncf %64 : vector<32x128xf32> to vector<32x128xbf16>
    %cst_55 = arith.constant dense<0.000000e+00> : vector<32x128xf32>
    %68 = tpu.matmul %66, %67, %cst_55 {dimension_numbers = #tpu.dot_dimension_numbers<[1], [0], [0], [1], [0, 0, 1, 1], [], []>} : vector<32x32xbf16>, vector<32x128xbf16>, vector<32x128xf32> -> vector<32x128xf32>
    %69 = math.tanh %68 : vector<32x128xf32>
    %70 = arith.truncf %69 : vector<32x128xf32> to vector<32x128xbf16>
    %c0_56 = arith.constant 0 : index
    %c512 = arith.constant 512 : index
    %71 = vector.load %arg26[%c0_56, %c512] : memref<32x1664xbf16, #tpu.memory_space<vmem>>, vector<32x128xbf16>
    tpu.vector_store %arg26[%c0_56, %c512], %70 {strides = array<i32>} : memref<32x1664xbf16, #tpu.memory_space<vmem>>, vector<32x128xbf16>,
    %c5 = arith.constant 5 : index
    %c0_57 = arith.constant 0 : index
    %c0_58 = arith.constant 0 : index
    %72 = vector.load %arg3[%c5, %c0_57, %c0_58] : memref<13x16x128xbf16, #tpu.memory_space<vmem>>, vector<1x16x128xbf16>
    %73 = vector.shape_cast %72 : vector<1x16x128xbf16> to vector<16x128xbf16>
    %cst_59 = arith.constant dense<0.000000e+00> : vector<32x128xf32>
    %74 = tpu.matmul %1, %73, %cst_59 {dimension_numbers = #tpu.dot_dimension_numbers<[1], [0], [0], [1], [0, 0, 1, 1], [], []>} : vector<32x16xbf16>, vector<16x128xbf16>, vector<32x128xf32> -> vector<32x128xf32>
    %c5_60 = arith.constant 5 : index
    %c0_61 = arith.constant 0 : index
    %c0_62 = arith.constant 0 : index
    %75 = vector.load %arg4[%c5_60, %c0_61, %c0_62] : memref<13x1x128xf32, #tpu.memory_space<vmem>>, vector<1x1x128xf32>
    %76 = vector.shape_cast %75 : vector<1x1x128xf32> to vector<1x128xf32>
    %77 = vector.broadcast %76 : vector<1x128xf32> to vector<32x128xf32>
    %78 = arith.addf %74, %77 : vector<32x128xf32>
    %c5_63 = arith.constant 5 : index
    %c0_64 = arith.constant 0 : index
    %c0_65 = arith.constant 0 : index
    %79 = vector.load %arg0[%c5_63, %c0_64, %c0_65] : memref<13x32x32xbf16, #tpu.memory_space<vmem>>, vector<1x32x32xbf16>
    %80 = vector.shape_cast %79 : vector<1x32x32xbf16> to vector<32x32xbf16>
    %81 = arith.truncf %78 : vector<32x128xf32> to vector<32x128xbf16>
    %cst_66 = arith.constant dense<0.000000e+00> : vector<32x128xf32>
    %82 = tpu.matmul %80, %81, %cst_66 {dimension_numbers = #tpu.dot_dimension_numbers<[1], [0], [0], [1], [0, 0, 1, 1], [], []>} : vector<32x32xbf16>, vector<32x128xbf16>, vector<32x128xf32> -> vector<32x128xf32>
    %83 = math.tanh %82 : vector<32x128xf32>
    %84 = arith.truncf %83 : vector<32x128xf32> to vector<32x128xbf16>
    %c0_67 = arith.constant 0 : index
    %c640 = arith.constant 640 : index
    %85 = vector.load %arg26[%c0_67, %c640] : memref<32x1664xbf16, #tpu.memory_space<vmem>>, vector<32x128xbf16>
    tpu.vector_store %arg26[%c0_67, %c640], %84 {strides = array<i32>} : memref<32x1664xbf16, #tpu.memory_space<vmem>>, vector<32x128xbf16>,
    %c6 = arith.constant 6 : index
    %c0_68 = arith.constant 0 : index
    %c0_69 = arith.constant 0 : index
    %86 = vector.load %arg3[%c6, %c0_68, %c0_69] : memref<13x16x128xbf16, #tpu.memory_space<vmem>>, vector<1x16x128xbf16>
    %87 = vector.shape_cast %86 : vector<1x16x128xbf16> to vector<16x128xbf16>
    %cst_70 = arith.constant dense<0.000000e+00> : vector<32x128xf32>
    %88 = tpu.matmul %1, %87, %cst_70 {dimension_numbers = #tpu.dot_dimension_numbers<[1], [0], [0], [1], [0, 0, 1, 1], [], []>} : vector<32x16xbf16>, vector<16x128xbf16>, vector<32x128xf32> -> vector<32x128xf32>
    %c6_71 = arith.constant 6 : index
    %c0_72 = arith.constant 0 : index
    %c0_73 = arith.constant 0 : index
    %89 = vector.load %arg4[%c6_71, %c0_72, %c0_73] : memref<13x1x128xf32, #tpu.memory_space<vmem>>, vector<1x1x128xf32>
    %90 = vector.shape_cast %89 : vector<1x1x128xf32> to vector<1x128xf32>
    %91 = vector.broadcast %90 : vector<1x128xf32> to vector<32x128xf32>
    %92 = arith.addf %88, %91 : vector<32x128xf32>
    %c6_74 = arith.constant 6 : index
    %c0_75 = arith.constant 0 : index
    %c0_76 = arith.constant 0 : index
    %93 = vector.load %arg0[%c6_74, %c0_75, %c0_76] : memref<13x32x32xbf16, #tpu.memory_space<vmem>>, vector<1x32x32xbf16>
    %94 = vector.shape_cast %93 : vector<1x32x32xbf16> to vector<32x32xbf16>
    %95 = arith.truncf %92 : vector<32x128xf32> to vector<32x128xbf16>
    %cst_77 = arith.constant dense<0.000000e+00> : vector<32x128xf32>
    %96 = tpu.matmul %94, %95, %cst_77 {dimension_numbers = #tpu.dot_dimension_numbers<[1], [0], [0], [1], [0, 0, 1, 1], [], []>} : vector<32x32xbf16>, vector<32x128xbf16>, vector<32x128xf32> -> vector<32x128xf32>
    %97 = math.tanh %96 : vector<32x128xf32>
    %98 = arith.truncf %97 : vector<32x128xf32> to vector<32x128xbf16>
    %c0_78 = arith.constant 0 : index
    %c768 = arith.constant 768 : index
    %99 = vector.load %arg26[%c0_78, %c768] : memref<32x1664xbf16, #tpu.memory_space<vmem>>, vector<32x128xbf16>
    tpu.vector_store %arg26[%c0_78, %c768], %98 {strides = array<i32>} : memref<32x1664xbf16, #tpu.memory_space<vmem>>, vector<32x128xbf16>,
    %c7 = arith.constant 7 : index
    %c0_79 = arith.constant 0 : index
    %c0_80 = arith.constant 0 : index
    %100 = vector.load %arg3[%c7, %c0_79, %c0_80] : memref<13x16x128xbf16, #tpu.memory_space<vmem>>, vector<1x16x128xbf16>
    %101 = vector.shape_cast %100 : vector<1x16x128xbf16> to vector<16x128xbf16>
    %cst_81 = arith.constant dense<0.000000e+00> : vector<32x128xf32>
    %102 = tpu.matmul %1, %101, %cst_81 {dimension_numbers = #tpu.dot_dimension_numbers<[1], [0], [0], [1], [0, 0, 1, 1], [], []>} : vector<32x16xbf16>, vector<16x128xbf16>, vector<32x128xf32> -> vector<32x128xf32>
    %c7_82 = arith.constant 7 : index
    %c0_83 = arith.constant 0 : index
    %c0_84 = arith.constant 0 : index
    %103 = vector.load %arg4[%c7_82, %c0_83, %c0_84] : memref<13x1x128xf32, #tpu.memory_space<vmem>>, vector<1x1x128xf32>
    %104 = vector.shape_cast %103 : vector<1x1x128xf32> to vector<1x128xf32>
    %105 = vector.broadcast %104 : vector<1x128xf32> to vector<32x128xf32>
    %106 = arith.addf %102, %105 : vector<32x128xf32>
    %c7_85 = arith.constant 7 : index
    %c0_86 = arith.constant 0 : index
    %c0_87 = arith.constant 0 : index
    %107 = vector.load %arg0[%c7_85, %c0_86, %c0_87] : memref<13x32x32xbf16, #tpu.memory_space<vmem>>, vector<1x32x32xbf16>
    %108 = vector.shape_cast %107 : vector<1x32x32xbf16> to vector<32x32xbf16>
    %109 = arith.truncf %106 : vector<32x128xf32> to vector<32x128xbf16>
    %cst_88 = arith.constant dense<0.000000e+00> : vector<32x128xf32>
    %110 = tpu.matmul %108, %109, %cst_88 {dimension_numbers = #tpu.dot_dimension_numbers<[1], [0], [0], [1], [0, 0, 1, 1], [], []>} : vector<32x32xbf16>, vector<32x128xbf16>, vector<32x128xf32> -> vector<32x128xf32>
    %111 = math.tanh %110 : vector<32x128xf32>
    %112 = arith.truncf %111 : vector<32x128xf32> to vector<32x128xbf16>
    %c0_89 = arith.constant 0 : index
    %c896 = arith.constant 896 : index
    %113 = vector.load %arg26[%c0_89, %c896] : memref<32x1664xbf16, #tpu.memory_space<vmem>>, vector<32x128xbf16>
    tpu.vector_store %arg26[%c0_89, %c896], %112 {strides = array<i32>} : memref<32x1664xbf16, #tpu.memory_space<vmem>>, vector<32x128xbf16>,
    %c8 = arith.constant 8 : index
    %c0_90 = arith.constant 0 : index
    %c0_91 = arith.constant 0 : index
    %114 = vector.load %arg3[%c8, %c0_90, %c0_91] : memref<13x16x128xbf16, #tpu.memory_space<vmem>>, vector<1x16x128xbf16>
    %115 = vector.shape_cast %114 : vector<1x16x128xbf16> to vector<16x128xbf16>
    %cst_92 = arith.constant dense<0.000000e+00> : vector<32x128xf32>
    %116 = tpu.matmul %1, %115, %cst_92 {dimension_numbers = #tpu.dot_dimension_numbers<[1], [0], [0], [1], [0, 0, 1, 1], [], []>} : vector<32x16xbf16>, vector<16x128xbf16>, vector<32x128xf32> -> vector<32x128xf32>
    %c8_93 = arith.constant 8 : index
    %c0_94 = arith.constant 0 : index
    %c0_95 = arith.constant 0 : index
    %117 = vector.load %arg4[%c8_93, %c0_94, %c0_95] : memref<13x1x128xf32, #tpu.memory_space<vmem>>, vector<1x1x128xf32>
    %118 = vector.shape_cast %117 : vector<1x1x128xf32> to vector<1x128xf32>
    %119 = vector.broadcast %118 : vector<1x128xf32> to vector<32x128xf32>
    %120 = arith.addf %116, %119 : vector<32x128xf32>
    %c8_96 = arith.constant 8 : index
    %c0_97 = arith.constant 0 : index
    %c0_98 = arith.constant 0 : index
    %121 = vector.load %arg0[%c8_96, %c0_97, %c0_98] : memref<13x32x32xbf16, #tpu.memory_space<vmem>>, vector<1x32x32xbf16>
    %122 = vector.shape_cast %121 : vector<1x32x32xbf16> to vector<32x32xbf16>
    %123 = arith.truncf %120 : vector<32x128xf32> to vector<32x128xbf16>
    %cst_99 = arith.constant dense<0.000000e+00> : vector<32x128xf32>
    %124 = tpu.matmul %122, %123, %cst_99 {dimension_numbers = #tpu.dot_dimension_numbers<[1], [0], [0], [1], [0, 0, 1, 1], [], []>} : vector<32x32xbf16>, vector<32x128xbf16>, vector<32x128xf32> -> vector<32x128xf32>
    %125 = math.tanh %124 : vector<32x128xf32>
    %126 = arith.truncf %125 : vector<32x128xf32> to vector<32x128xbf16>
    %c0_100 = arith.constant 0 : index
    %c1024 = arith.constant 1024 : index
    %127 = vector.load %arg26[%c0_100, %c1024] : memref<32x1664xbf16, #tpu.memory_space<vmem>>, vector<32x128xbf16>
    tpu.vector_store %arg26[%c0_100, %c1024], %126 {strides = array<i32>} : memref<32x1664xbf16, #tpu.memory_space<vmem>>, vector<32x128xbf16>,
    %c9 = arith.constant 9 : index
    %c0_101 = arith.constant 0 : index
    %c0_102 = arith.constant 0 : index
    %128 = vector.load %arg3[%c9, %c0_101, %c0_102] : memref<13x16x128xbf16, #tpu.memory_space<vmem>>, vector<1x16x128xbf16>
    %129 = vector.shape_cast %128 : vector<1x16x128xbf16> to vector<16x128xbf16>
    %cst_103 = arith.constant dense<0.000000e+00> : vector<32x128xf32>
    %130 = tpu.matmul %1, %129, %cst_103 {dimension_numbers = #tpu.dot_dimension_numbers<[1], [0], [0], [1], [0, 0, 1, 1], [], []>} : vector<32x16xbf16>, vector<16x128xbf16>, vector<32x128xf32> -> vector<32x128xf32>
    %c9_104 = arith.constant 9 : index
    %c0_105 = arith.constant 0 : index
    %c0_106 = arith.constant 0 : index
    %131 = vector.load %arg4[%c9_104, %c0_105, %c0_106] : memref<13x1x128xf32, #tpu.memory_space<vmem>>, vector<1x1x128xf32>
    %132 = vector.shape_cast %131 : vector<1x1x128xf32> to vector<1x128xf32>
    %133 = vector.broadcast %132 : vector<1x128xf32> to vector<32x128xf32>
    %134 = arith.addf %130, %133 : vector<32x128xf32>
    %c9_107 = arith.constant 9 : index
    %c0_108 = arith.constant 0 : index
    %c0_109 = arith.constant 0 : index
    %135 = vector.load %arg0[%c9_107, %c0_108, %c0_109] : memref<13x32x32xbf16, #tpu.memory_space<vmem>>, vector<1x32x32xbf16>
    %136 = vector.shape_cast %135 : vector<1x32x32xbf16> to vector<32x32xbf16>
    %137 = arith.truncf %134 : vector<32x128xf32> to vector<32x128xbf16>
    %cst_110 = arith.constant dense<0.000000e+00> : vector<32x128xf32>
    %138 = tpu.matmul %136, %137, %cst_110 {dimension_numbers = #tpu.dot_dimension_numbers<[1], [0], [0], [1], [0, 0, 1, 1], [], []>} : vector<32x32xbf16>, vector<32x128xbf16>, vector<32x128xf32> -> vector<32x128xf32>
    %139 = math.tanh %138 : vector<32x128xf32>
    %140 = arith.truncf %139 : vector<32x128xf32> to vector<32x128xbf16>
    %c0_111 = arith.constant 0 : index
    %c1152 = arith.constant 1152 : index
    %141 = vector.load %arg26[%c0_111, %c1152] : memref<32x1664xbf16, #tpu.memory_space<vmem>>, vector<32x128xbf16>
    tpu.vector_store %arg26[%c0_111, %c1152], %140 {strides = array<i32>} : memref<32x1664xbf16, #tpu.memory_space<vmem>>, vector<32x128xbf16>,
    %c10 = arith.constant 10 : index
    %c0_112 = arith.constant 0 : index
    %c0_113 = arith.constant 0 : index
    %142 = vector.load %arg3[%c10, %c0_112, %c0_113] : memref<13x16x128xbf16, #tpu.memory_space<vmem>>, vector<1x16x128xbf16>
    %143 = vector.shape_cast %142 : vector<1x16x128xbf16> to vector<16x128xbf16>
    %cst_114 = arith.constant dense<0.000000e+00> : vector<32x128xf32>
    %144 = tpu.matmul %1, %143, %cst_114 {dimension_numbers = #tpu.dot_dimension_numbers<[1], [0], [0], [1], [0, 0, 1, 1], [], []>} : vector<32x16xbf16>, vector<16x128xbf16>, vector<32x128xf32> -> vector<32x128xf32>
    %c10_115 = arith.constant 10 : index
    %c0_116 = arith.constant 0 : index
    %c0_117 = arith.constant 0 : index
    %145 = vector.load %arg4[%c10_115, %c0_116, %c0_117] : memref<13x1x128xf32, #tpu.memory_space<vmem>>, vector<1x1x128xf32>
    %146 = vector.shape_cast %145 : vector<1x1x128xf32> to vector<1x128xf32>
    %147 = vector.broadcast %146 : vector<1x128xf32> to vector<32x128xf32>
    %148 = arith.addf %144, %147 : vector<32x128xf32>
    %c10_118 = arith.constant 10 : index
    %c0_119 = arith.constant 0 : index
    %c0_120 = arith.constant 0 : index
    %149 = vector.load %arg0[%c10_118, %c0_119, %c0_120] : memref<13x32x32xbf16, #tpu.memory_space<vmem>>, vector<1x32x32xbf16>
    %150 = vector.shape_cast %149 : vector<1x32x32xbf16> to vector<32x32xbf16>
    %151 = arith.truncf %148 : vector<32x128xf32> to vector<32x128xbf16>
    %cst_121 = arith.constant dense<0.000000e+00> : vector<32x128xf32>
    %152 = tpu.matmul %150, %151, %cst_121 {dimension_numbers = #tpu.dot_dimension_numbers<[1], [0], [0], [1], [0, 0, 1, 1], [], []>} : vector<32x32xbf16>, vector<32x128xbf16>, vector<32x128xf32> -> vector<32x128xf32>
    %153 = math.tanh %152 : vector<32x128xf32>
    %154 = arith.truncf %153 : vector<32x128xf32> to vector<32x128xbf16>
    %c0_122 = arith.constant 0 : index
    %c1280 = arith.constant 1280 : index
    %155 = vector.load %arg26[%c0_122, %c1280] : memref<32x1664xbf16, #tpu.memory_space<vmem>>, vector<32x128xbf16>
    tpu.vector_store %arg26[%c0_122, %c1280], %154 {strides = array<i32>} : memref<32x1664xbf16, #tpu.memory_space<vmem>>, vector<32x128xbf16>,
    %c11 = arith.constant 11 : index
    %c0_123 = arith.constant 0 : index
    %c0_124 = arith.constant 0 : index
    %156 = vector.load %arg3[%c11, %c0_123, %c0_124] : memref<13x16x128xbf16, #tpu.memory_space<vmem>>, vector<1x16x128xbf16>
    %157 = vector.shape_cast %156 : vector<1x16x128xbf16> to vector<16x128xbf16>
    %cst_125 = arith.constant dense<0.000000e+00> : vector<32x128xf32>
    %158 = tpu.matmul %1, %157, %cst_125 {dimension_numbers = #tpu.dot_dimension_numbers<[1], [0], [0], [1], [0, 0, 1, 1], [], []>} : vector<32x16xbf16>, vector<16x128xbf16>, vector<32x128xf32> -> vector<32x128xf32>
    %c11_126 = arith.constant 11 : index
    %c0_127 = arith.constant 0 : index
    %c0_128 = arith.constant 0 : index
    %159 = vector.load %arg4[%c11_126, %c0_127, %c0_128] : memref<13x1x128xf32, #tpu.memory_space<vmem>>, vector<1x1x128xf32>
    %160 = vector.shape_cast %159 : vector<1x1x128xf32> to vector<1x128xf32>
    %161 = vector.broadcast %160 : vector<1x128xf32> to vector<32x128xf32>
    %162 = arith.addf %158, %161 : vector<32x128xf32>
    %c11_129 = arith.constant 11 : index
    %c0_130 = arith.constant 0 : index
    %c0_131 = arith.constant 0 : index
    %163 = vector.load %arg0[%c11_129, %c0_130, %c0_131] : memref<13x32x32xbf16, #tpu.memory_space<vmem>>, vector<1x32x32xbf16>
    %164 = vector.shape_cast %163 : vector<1x32x32xbf16> to vector<32x32xbf16>
    %165 = arith.truncf %162 : vector<32x128xf32> to vector<32x128xbf16>
    %cst_132 = arith.constant dense<0.000000e+00> : vector<32x128xf32>
    %166 = tpu.matmul %164, %165, %cst_132 {dimension_numbers = #tpu.dot_dimension_numbers<[1], [0], [0], [1], [0, 0, 1, 1], [], []>} : vector<32x32xbf16>, vector<32x128xbf16>, vector<32x128xf32> -> vector<32x128xf32>
    %167 = math.tanh %166 : vector<32x128xf32>
    %168 = arith.truncf %167 : vector<32x128xf32> to vector<32x128xbf16>
    %c0_133 = arith.constant 0 : index
    %c1408 = arith.constant 1408 : index
    %169 = vector.load %arg26[%c0_133, %c1408] : memref<32x1664xbf16, #tpu.memory_space<vmem>>, vector<32x128xbf16>
    tpu.vector_store %arg26[%c0_133, %c1408], %168 {strides = array<i32>} : memref<32x1664xbf16, #tpu.memory_space<vmem>>, vector<32x128xbf16>,
    %c12 = arith.constant 12 : index
    %c0_134 = arith.constant 0 : index
    %c0_135 = arith.constant 0 : index
    %170 = vector.load %arg3[%c12, %c0_134, %c0_135] : memref<13x16x128xbf16, #tpu.memory_space<vmem>>, vector<1x16x128xbf16>
    %171 = vector.shape_cast %170 : vector<1x16x128xbf16> to vector<16x128xbf16>
    %cst_136 = arith.constant dense<0.000000e+00> : vector<32x128xf32>
    %172 = tpu.matmul %1, %171, %cst_136 {dimension_numbers = #tpu.dot_dimension_numbers<[1], [0], [0], [1], [0, 0, 1, 1], [], []>} : vector<32x16xbf16>, vector<16x128xbf16>, vector<32x128xf32> -> vector<32x128xf32>
    %c12_137 = arith.constant 12 : index
    %c0_138 = arith.constant 0 : index
    %c0_139 = arith.constant 0 : index
    %173 = vector.load %arg4[%c12_137, %c0_138, %c0_139] : memref<13x1x128xf32, #tpu.memory_space<vmem>>, vector<1x1x128xf32>
    %174 = vector.shape_cast %173 : vector<1x1x128xf32> to vector<1x128xf32>
    %175 = vector.broadcast %174 : vector<1x128xf32> to vector<32x128xf32>
    %176 = arith.addf %172, %175 : vector<32x128xf32>
    %c12_140 = arith.constant 12 : index
    %c0_141 = arith.constant 0 : index
    %c0_142 = arith.constant 0 : index
    %177 = vector.load %arg0[%c12_140, %c0_141, %c0_142] : memref<13x32x32xbf16, #tpu.memory_space<vmem>>, vector<1x32x32xbf16>
    %178 = vector.shape_cast %177 : vector<1x32x32xbf16> to vector<32x32xbf16>
    %179 = arith.truncf %176 : vector<32x128xf32> to vector<32x128xbf16>
    %cst_143 = arith.constant dense<0.000000e+00> : vector<32x128xf32>
    %180 = tpu.matmul %178, %179, %cst_143 {dimension_numbers = #tpu.dot_dimension_numbers<[1], [0], [0], [1], [0, 0, 1, 1], [], []>} : vector<32x32xbf16>, vector<32x128xbf16>, vector<32x128xf32> -> vector<32x128xf32>
    %181 = math.tanh %180 : vector<32x128xf32>
    %182 = arith.truncf %181 : vector<32x128xf32> to vector<32x128xbf16>
    %c0_144 = arith.constant 0 : index
    %c1536 = arith.constant 1536 : index
    %183 = vector.load %arg26[%c0_144, %c1536] : memref<32x1664xbf16, #tpu.memory_space<vmem>>, vector<32x128xbf16>
    tpu.vector_store %arg26[%c0_144, %c1536], %182 {strides = array<i32>} : memref<32x1664xbf16, #tpu.memory_space<vmem>>, vector<32x128xbf16>,
    %c0_145 = arith.constant 0 : index
    %c0_146 = arith.constant 0 : index
    %184 = vector.load %arg26[%c0_145, %c0_146] : memref<32x1664xbf16, #tpu.memory_space<vmem>>, vector<32x1664xbf16>
    %c0_147 = arith.constant 0 : index
    %c0_148 = arith.constant 0 : index
    %185 = vector.load %arg5[%c0_147, %c0_148] : memref<1664x64xbf16, #tpu.memory_space<vmem>>, vector<1664x64xbf16>
    %cst_149 = arith.constant dense<0.000000e+00> : vector<32x64xf32>
    %186 = tpu.matmul %184, %185, %cst_149 {dimension_numbers = #tpu.dot_dimension_numbers<[1], [0], [0], [1], [0, 0, 1, 1], [], []>} : vector<32x1664xbf16>, vector<1664x64xbf16>, vector<32x64xf32> -> vector<32x64xf32>
    %c0_150 = arith.constant 0 : index
    %c0_151 = arith.constant 0 : index
    %187 = vector.load %arg6[%c0_150, %c0_151] : memref<1x64xf32, #tpu.memory_space<vmem>>, vector<1x64xf32>
    %188 = vector.broadcast %187 : vector<1x64xf32> to vector<32x64xf32>
    %189 = arith.addf %186, %188 : vector<32x64xf32>
    %cst_152 = arith.constant 0.000000e+00 : f32
    %190 = vector.broadcast %cst_152 : f32 to vector<32x64xf32>
    %191 = arith.maximumf %189, %190 : vector<32x64xf32>
    %192 = arith.truncf %191 : vector<32x64xf32> to vector<32x64xbf16>
    %c0_153 = arith.constant 0 : index
    %c0_154 = arith.constant 0 : index
    %193 = vector.load %arg7[%c0_153, %c0_154] : memref<64x64xbf16, #tpu.memory_space<vmem>>, vector<64x64xbf16>
    %cst_155 = arith.constant dense<0.000000e+00> : vector<32x64xf32>
    %194 = tpu.matmul %192, %193, %cst_155 {dimension_numbers = #tpu.dot_dimension_numbers<[1], [0], [0], [1], [0, 0, 1, 1], [], []>} : vector<32x64xbf16>, vector<64x64xbf16>, vector<32x64xf32> -> vector<32x64xf32>
    %c0_156 = arith.constant 0 : index
    %c0_157 = arith.constant 0 : index
    %195 = vector.load %arg8[%c0_156, %c0_157] : memref<1x64xf32, #tpu.memory_space<vmem>>, vector<1x64xf32>
    %196 = vector.broadcast %195 : vector<1x64xf32> to vector<32x64xf32>
    %197 = arith.addf %194, %196 : vector<32x64xf32>
    %cst_158 = arith.constant 0.000000e+00 : f32
    %198 = vector.broadcast %cst_158 : f32 to vector<32x64xf32>
    %199 = arith.maximumf %197, %198 : vector<32x64xf32>
    %200 = arith.truncf %199 : vector<32x64xf32> to vector<32x64xbf16>
    %c0_159 = arith.constant 0 : index
    %c0_160 = arith.constant 0 : index
    %c0_161 = arith.constant 0 : index
    %201 = vector.load %arg9[%c0_159, %c0_160, %c0_161] : memref<13x64x128xbf16, #tpu.memory_space<vmem>>, vector<1x64x128xbf16>
    %202 = vector.shape_cast %201 : vector<1x64x128xbf16> to vector<64x128xbf16>
    %cst_162 = arith.constant dense<0.000000e+00> : vector<32x128xf32>
    %203 = tpu.matmul %200, %202, %cst_162 {dimension_numbers = #tpu.dot_dimension_numbers<[1], [0], [0], [1], [0, 0, 1, 1], [], []>} : vector<32x64xbf16>, vector<64x128xbf16>, vector<32x128xf32> -> vector<32x128xf32>
    %c0_163 = arith.constant 0 : index
    %c0_164 = arith.constant 0 : index
    %c0_165 = arith.constant 0 : index
    %204 = vector.load %arg10[%c0_163, %c0_164, %c0_165] : memref<13x1x128xf32, #tpu.memory_space<vmem>>, vector<1x1x128xf32>
    %205 = vector.shape_cast %204 : vector<1x1x128xf32> to vector<1x128xf32>
    %206 = vector.broadcast %205 : vector<1x128xf32> to vector<32x128xf32>
    %207 = arith.addf %203, %206 : vector<32x128xf32>
    %c0_166 = arith.constant 0 : index
    %c0_167 = arith.constant 0 : index
    %c0_168 = arith.constant 0 : index
    %208 = vector.load %arg0[%c0_166, %c0_167, %c0_168] : memref<13x32x32xbf16, #tpu.memory_space<vmem>>, vector<1x32x32xbf16>
    %209 = vector.shape_cast %208 : vector<1x32x32xbf16> to vector<32x32xbf16>
    %210 = arith.truncf %207 : vector<32x128xf32> to vector<32x128xbf16>
    %cst_169 = arith.constant dense<0.000000e+00> : vector<32x128xf32>
    %211 = tpu.matmul %209, %210, %cst_169 {dimension_numbers = #tpu.dot_dimension_numbers<[1], [0], [0], [1], [0, 0, 1, 1], [], []>} : vector<32x32xbf16>, vector<32x128xbf16>, vector<32x128xf32> -> vector<32x128xf32>
    %212 = math.tanh %211 : vector<32x128xf32>
    %213 = arith.truncf %212 : vector<32x128xf32> to vector<32x128xbf16>
    %c0_170 = arith.constant 0 : index
    %c0_171 = arith.constant 0 : index
    %214 = vector.load %arg26[%c0_170, %c0_171] : memref<32x1664xbf16, #tpu.memory_space<vmem>>, vector<32x128xbf16>
    tpu.vector_store %arg26[%c0_170, %c0_171], %213 {strides = array<i32>} : memref<32x1664xbf16, #tpu.memory_space<vmem>>, vector<32x128xbf16>,
    %c1_172 = arith.constant 1 : index
    %c0_173 = arith.constant 0 : index
    %c0_174 = arith.constant 0 : index
    %215 = vector.load %arg9[%c1_172, %c0_173, %c0_174] : memref<13x64x128xbf16, #tpu.memory_space<vmem>>, vector<1x64x128xbf16>
    %216 = vector.shape_cast %215 : vector<1x64x128xbf16> to vector<64x128xbf16>
    %cst_175 = arith.constant dense<0.000000e+00> : vector<32x128xf32>
    %217 = tpu.matmul %200, %216, %cst_175 {dimension_numbers = #tpu.dot_dimension_numbers<[1], [0], [0], [1], [0, 0, 1, 1], [], []>} : vector<32x64xbf16>, vector<64x128xbf16>, vector<32x128xf32> -> vector<32x128xf32>
    %c1_176 = arith.constant 1 : index
    %c0_177 = arith.constant 0 : index
    %c0_178 = arith.constant 0 : index
    %218 = vector.load %arg10[%c1_176, %c0_177, %c0_178] : memref<13x1x128xf32, #tpu.memory_space<vmem>>, vector<1x1x128xf32>
    %219 = vector.shape_cast %218 : vector<1x1x128xf32> to vector<1x128xf32>
    %220 = vector.broadcast %219 : vector<1x128xf32> to vector<32x128xf32>
    %221 = arith.addf %217, %220 : vector<32x128xf32>
    %c1_179 = arith.constant 1 : index
    %c0_180 = arith.constant 0 : index
    %c0_181 = arith.constant 0 : index
    %222 = vector.load %arg0[%c1_179, %c0_180, %c0_181] : memref<13x32x32xbf16, #tpu.memory_space<vmem>>, vector<1x32x32xbf16>
    %223 = vector.shape_cast %222 : vector<1x32x32xbf16> to vector<32x32xbf16>
    %224 = arith.truncf %221 : vector<32x128xf32> to vector<32x128xbf16>
    %cst_182 = arith.constant dense<0.000000e+00> : vector<32x128xf32>
    %225 = tpu.matmul %223, %224, %cst_182 {dimension_numbers = #tpu.dot_dimension_numbers<[1], [0], [0], [1], [0, 0, 1, 1], [], []>} : vector<32x32xbf16>, vector<32x128xbf16>, vector<32x128xf32> -> vector<32x128xf32>
    %226 = math.tanh %225 : vector<32x128xf32>
    %227 = arith.truncf %226 : vector<32x128xf32> to vector<32x128xbf16>
    %c0_183 = arith.constant 0 : index
    %c128_184 = arith.constant 128 : index
    %228 = vector.load %arg26[%c0_183, %c128_184] : memref<32x1664xbf16, #tpu.memory_space<vmem>>, vector<32x128xbf16>
    tpu.vector_store %arg26[%c0_183, %c128_184], %227 {strides = array<i32>} : memref<32x1664xbf16, #tpu.memory_space<vmem>>, vector<32x128xbf16>,
    %c2_185 = arith.constant 2 : index
    %c0_186 = arith.constant 0 : index
    %c0_187 = arith.constant 0 : index
    %229 = vector.load %arg9[%c2_185, %c0_186, %c0_187] : memref<13x64x128xbf16, #tpu.memory_space<vmem>>, vector<1x64x128xbf16>
    %230 = vector.shape_cast %229 : vector<1x64x128xbf16> to vector<64x128xbf16>
    %cst_188 = arith.constant dense<0.000000e+00> : vector<32x128xf32>
    %231 = tpu.matmul %200, %230, %cst_188 {dimension_numbers = #tpu.dot_dimension_numbers<[1], [0], [0], [1], [0, 0, 1, 1], [], []>} : vector<32x64xbf16>, vector<64x128xbf16>, vector<32x128xf32> -> vector<32x128xf32>
    %c2_189 = arith.constant 2 : index
    %c0_190 = arith.constant 0 : index
    %c0_191 = arith.constant 0 : index
    %232 = vector.load %arg10[%c2_189, %c0_190, %c0_191] : memref<13x1x128xf32, #tpu.memory_space<vmem>>, vector<1x1x128xf32>
    %233 = vector.shape_cast %232 : vector<1x1x128xf32> to vector<1x128xf32>
    %234 = vector.broadcast %233 : vector<1x128xf32> to vector<32x128xf32>
    %235 = arith.addf %231, %234 : vector<32x128xf32>
    %c2_192 = arith.constant 2 : index
    %c0_193 = arith.constant 0 : index
    %c0_194 = arith.constant 0 : index
    %236 = vector.load %arg0[%c2_192, %c0_193, %c0_194] : memref<13x32x32xbf16, #tpu.memory_space<vmem>>, vector<1x32x32xbf16>
    %237 = vector.shape_cast %236 : vector<1x32x32xbf16> to vector<32x32xbf16>
    %238 = arith.truncf %235 : vector<32x128xf32> to vector<32x128xbf16>
    %cst_195 = arith.constant dense<0.000000e+00> : vector<32x128xf32>
    %239 = tpu.matmul %237, %238, %cst_195 {dimension_numbers = #tpu.dot_dimension_numbers<[1], [0], [0], [1], [0, 0, 1, 1], [], []>} : vector<32x32xbf16>, vector<32x128xbf16>, vector<32x128xf32> -> vector<32x128xf32>
    %240 = math.tanh %239 : vector<32x128xf32>
    %241 = arith.truncf %240 : vector<32x128xf32> to vector<32x128xbf16>
    %c0_196 = arith.constant 0 : index
    %c256_197 = arith.constant 256 : index
    %242 = vector.load %arg26[%c0_196, %c256_197] : memref<32x1664xbf16, #tpu.memory_space<vmem>>, vector<32x128xbf16>
    tpu.vector_store %arg26[%c0_196, %c256_197], %241 {strides = array<i32>} : memref<32x1664xbf16, #tpu.memory_space<vmem>>, vector<32x128xbf16>,
    %c3_198 = arith.constant 3 : index
    %c0_199 = arith.constant 0 : index
    %c0_200 = arith.constant 0 : index
    %243 = vector.load %arg9[%c3_198, %c0_199, %c0_200] : memref<13x64x128xbf16, #tpu.memory_space<vmem>>, vector<1x64x128xbf16>
    %244 = vector.shape_cast %243 : vector<1x64x128xbf16> to vector<64x128xbf16>
    %cst_201 = arith.constant dense<0.000000e+00> : vector<32x128xf32>
    %245 = tpu.matmul %200, %244, %cst_201 {dimension_numbers = #tpu.dot_dimension_numbers<[1], [0], [0], [1], [0, 0, 1, 1], [], []>} : vector<32x64xbf16>, vector<64x128xbf16>, vector<32x128xf32> -> vector<32x128xf32>
    %c3_202 = arith.constant 3 : index
    %c0_203 = arith.constant 0 : index
    %c0_204 = arith.constant 0 : index
    %246 = vector.load %arg10[%c3_202, %c0_203, %c0_204] : memref<13x1x128xf32, #tpu.memory_space<vmem>>, vector<1x1x128xf32>
    %247 = vector.shape_cast %246 : vector<1x1x128xf32> to vector<1x128xf32>
    %248 = vector.broadcast %247 : vector<1x128xf32> to vector<32x128xf32>
    %249 = arith.addf %245, %248 : vector<32x128xf32>
    %c3_205 = arith.constant 3 : index
    %c0_206 = arith.constant 0 : index
    %c0_207 = arith.constant 0 : index
    %250 = vector.load %arg0[%c3_205, %c0_206, %c0_207] : memref<13x32x32xbf16, #tpu.memory_space<vmem>>, vector<1x32x32xbf16>
    %251 = vector.shape_cast %250 : vector<1x32x32xbf16> to vector<32x32xbf16>
    %252 = arith.truncf %249 : vector<32x128xf32> to vector<32x128xbf16>
    %cst_208 = arith.constant dense<0.000000e+00> : vector<32x128xf32>
    %253 = tpu.matmul %251, %252, %cst_208 {dimension_numbers = #tpu.dot_dimension_numbers<[1], [0], [0], [1], [0, 0, 1, 1], [], []>} : vector<32x32xbf16>, vector<32x128xbf16>, vector<32x128xf32> -> vector<32x128xf32>
    %254 = math.tanh %253 : vector<32x128xf32>
    %255 = arith.truncf %254 : vector<32x128xf32> to vector<32x128xbf16>
    %c0_209 = arith.constant 0 : index
    %c384_210 = arith.constant 384 : index
    %256 = vector.load %arg26[%c0_209, %c384_210] : memref<32x1664xbf16, #tpu.memory_space<vmem>>, vector<32x128xbf16>
    tpu.vector_store %arg26[%c0_209, %c384_210], %255 {strides = array<i32>} : memref<32x1664xbf16, #tpu.memory_space<vmem>>, vector<32x128xbf16>,
    %c4_211 = arith.constant 4 : index
    %c0_212 = arith.constant 0 : index
    %c0_213 = arith.constant 0 : index
    %257 = vector.load %arg9[%c4_211, %c0_212, %c0_213] : memref<13x64x128xbf16, #tpu.memory_space<vmem>>, vector<1x64x128xbf16>
    %258 = vector.shape_cast %257 : vector<1x64x128xbf16> to vector<64x128xbf16>
    %cst_214 = arith.constant dense<0.000000e+00> : vector<32x128xf32>
    %259 = tpu.matmul %200, %258, %cst_214 {dimension_numbers = #tpu.dot_dimension_numbers<[1], [0], [0], [1], [0, 0, 1, 1], [], []>} : vector<32x64xbf16>, vector<64x128xbf16>, vector<32x128xf32> -> vector<32x128xf32>
    %c4_215 = arith.constant 4 : index
    %c0_216 = arith.constant 0 : index
    %c0_217 = arith.constant 0 : index
    %260 = vector.load %arg10[%c4_215, %c0_216, %c0_217] : memref<13x1x128xf32, #tpu.memory_space<vmem>>, vector<1x1x128xf32>
    %261 = vector.shape_cast %260 : vector<1x1x128xf32> to vector<1x128xf32>
    %262 = vector.broadcast %261 : vector<1x128xf32> to vector<32x128xf32>
    %263 = arith.addf %259, %262 : vector<32x128xf32>
    %c4_218 = arith.constant 4 : index
    %c0_219 = arith.constant 0 : index
    %c0_220 = arith.constant 0 : index
    %264 = vector.load %arg0[%c4_218, %c0_219, %c0_220] : memref<13x32x32xbf16, #tpu.memory_space<vmem>>, vector<1x32x32xbf16>
    %265 = vector.shape_cast %264 : vector<1x32x32xbf16> to vector<32x32xbf16>
    %266 = arith.truncf %263 : vector<32x128xf32> to vector<32x128xbf16>
    %cst_221 = arith.constant dense<0.000000e+00> : vector<32x128xf32>
    %267 = tpu.matmul %265, %266, %cst_221 {dimension_numbers = #tpu.dot_dimension_numbers<[1], [0], [0], [1], [0, 0, 1, 1], [], []>} : vector<32x32xbf16>, vector<32x128xbf16>, vector<32x128xf32> -> vector<32x128xf32>
    %268 = math.tanh %267 : vector<32x128xf32>
    %269 = arith.truncf %268 : vector<32x128xf32> to vector<32x128xbf16>
    %c0_222 = arith.constant 0 : index
    %c512_223 = arith.constant 512 : index
    %270 = vector.load %arg26[%c0_222, %c512_223] : memref<32x1664xbf16, #tpu.memory_space<vmem>>, vector<32x128xbf16>
    tpu.vector_store %arg26[%c0_222, %c512_223], %269 {strides = array<i32>} : memref<32x1664xbf16, #tpu.memory_space<vmem>>, vector<32x128xbf16>,
    %c5_224 = arith.constant 5 : index
    %c0_225 = arith.constant 0 : index
    %c0_226 = arith.constant 0 : index
    %271 = vector.load %arg9[%c5_224, %c0_225, %c0_226] : memref<13x64x128xbf16, #tpu.memory_space<vmem>>, vector<1x64x128xbf16>
    %272 = vector.shape_cast %271 : vector<1x64x128xbf16> to vector<64x128xbf16>
    %cst_227 = arith.constant dense<0.000000e+00> : vector<32x128xf32>
    %273 = tpu.matmul %200, %272, %cst_227 {dimension_numbers = #tpu.dot_dimension_numbers<[1], [0], [0], [1], [0, 0, 1, 1], [], []>} : vector<32x64xbf16>, vector<64x128xbf16>, vector<32x128xf32> -> vector<32x128xf32>
    %c5_228 = arith.constant 5 : index
    %c0_229 = arith.constant 0 : index
    %c0_230 = arith.constant 0 : index
    %274 = vector.load %arg10[%c5_228, %c0_229, %c0_230] : memref<13x1x128xf32, #tpu.memory_space<vmem>>, vector<1x1x128xf32>
    %275 = vector.shape_cast %274 : vector<1x1x128xf32> to vector<1x128xf32>
    %276 = vector.broadcast %275 : vector<1x128xf32> to vector<32x128xf32>
    %277 = arith.addf %273, %276 : vector<32x128xf32>
    %c5_231 = arith.constant 5 : index
    %c0_232 = arith.constant 0 : index
    %c0_233 = arith.constant 0 : index
    %278 = vector.load %arg0[%c5_231, %c0_232, %c0_233] : memref<13x32x32xbf16, #tpu.memory_space<vmem>>, vector<1x32x32xbf16>
    %279 = vector.shape_cast %278 : vector<1x32x32xbf16> to vector<32x32xbf16>
    %280 = arith.truncf %277 : vector<32x128xf32> to vector<32x128xbf16>
    %cst_234 = arith.constant dense<0.000000e+00> : vector<32x128xf32>
    %281 = tpu.matmul %279, %280, %cst_234 {dimension_numbers = #tpu.dot_dimension_numbers<[1], [0], [0], [1], [0, 0, 1, 1], [], []>} : vector<32x32xbf16>, vector<32x128xbf16>, vector<32x128xf32> -> vector<32x128xf32>
    %282 = math.tanh %281 : vector<32x128xf32>
    %283 = arith.truncf %282 : vector<32x128xf32> to vector<32x128xbf16>
    %c0_235 = arith.constant 0 : index
    %c640_236 = arith.constant 640 : index
    %284 = vector.load %arg26[%c0_235, %c640_236] : memref<32x1664xbf16, #tpu.memory_space<vmem>>, vector<32x128xbf16>
    tpu.vector_store %arg26[%c0_235, %c640_236], %283 {strides = array<i32>} : memref<32x1664xbf16, #tpu.memory_space<vmem>>, vector<32x128xbf16>,
    %c6_237 = arith.constant 6 : index
    %c0_238 = arith.constant 0 : index
    %c0_239 = arith.constant 0 : index
    %285 = vector.load %arg9[%c6_237, %c0_238, %c0_239] : memref<13x64x128xbf16, #tpu.memory_space<vmem>>, vector<1x64x128xbf16>
    %286 = vector.shape_cast %285 : vector<1x64x128xbf16> to vector<64x128xbf16>
    %cst_240 = arith.constant dense<0.000000e+00> : vector<32x128xf32>
    %287 = tpu.matmul %200, %286, %cst_240 {dimension_numbers = #tpu.dot_dimension_numbers<[1], [0], [0], [1], [0, 0, 1, 1], [], []>} : vector<32x64xbf16>, vector<64x128xbf16>, vector<32x128xf32> -> vector<32x128xf32>
    %c6_241 = arith.constant 6 : index
    %c0_242 = arith.constant 0 : index
    %c0_243 = arith.constant 0 : index
    %288 = vector.load %arg10[%c6_241, %c0_242, %c0_243] : memref<13x1x128xf32, #tpu.memory_space<vmem>>, vector<1x1x128xf32>
    %289 = vector.shape_cast %288 : vector<1x1x128xf32> to vector<1x128xf32>
    %290 = vector.broadcast %289 : vector<1x128xf32> to vector<32x128xf32>
    %291 = arith.addf %287, %290 : vector<32x128xf32>
    %c6_244 = arith.constant 6 : index
    %c0_245 = arith.constant 0 : index
    %c0_246 = arith.constant 0 : index
    %292 = vector.load %arg0[%c6_244, %c0_245, %c0_246] : memref<13x32x32xbf16, #tpu.memory_space<vmem>>, vector<1x32x32xbf16>
    %293 = vector.shape_cast %292 : vector<1x32x32xbf16> to vector<32x32xbf16>
    %294 = arith.truncf %291 : vector<32x128xf32> to vector<32x128xbf16>
    %cst_247 = arith.constant dense<0.000000e+00> : vector<32x128xf32>
    %295 = tpu.matmul %293, %294, %cst_247 {dimension_numbers = #tpu.dot_dimension_numbers<[1], [0], [0], [1], [0, 0, 1, 1], [], []>} : vector<32x32xbf16>, vector<32x128xbf16>, vector<32x128xf32> -> vector<32x128xf32>
    %296 = math.tanh %295 : vector<32x128xf32>
    %297 = arith.truncf %296 : vector<32x128xf32> to vector<32x128xbf16>
    %c0_248 = arith.constant 0 : index
    %c768_249 = arith.constant 768 : index
    %298 = vector.load %arg26[%c0_248, %c768_249] : memref<32x1664xbf16, #tpu.memory_space<vmem>>, vector<32x128xbf16>
    tpu.vector_store %arg26[%c0_248, %c768_249], %297 {strides = array<i32>} : memref<32x1664xbf16, #tpu.memory_space<vmem>>, vector<32x128xbf16>,
    %c7_250 = arith.constant 7 : index
    %c0_251 = arith.constant 0 : index
    %c0_252 = arith.constant 0 : index
    %299 = vector.load %arg9[%c7_250, %c0_251, %c0_252] : memref<13x64x128xbf16, #tpu.memory_space<vmem>>, vector<1x64x128xbf16>
    %300 = vector.shape_cast %299 : vector<1x64x128xbf16> to vector<64x128xbf16>
    %cst_253 = arith.constant dense<0.000000e+00> : vector<32x128xf32>
    %301 = tpu.matmul %200, %300, %cst_253 {dimension_numbers = #tpu.dot_dimension_numbers<[1], [0], [0], [1], [0, 0, 1, 1], [], []>} : vector<32x64xbf16>, vector<64x128xbf16>, vector<32x128xf32> -> vector<32x128xf32>
    %c7_254 = arith.constant 7 : index
    %c0_255 = arith.constant 0 : index
    %c0_256 = arith.constant 0 : index
    %302 = vector.load %arg10[%c7_254, %c0_255, %c0_256] : memref<13x1x128xf32, #tpu.memory_space<vmem>>, vector<1x1x128xf32>
    %303 = vector.shape_cast %302 : vector<1x1x128xf32> to vector<1x128xf32>
    %304 = vector.broadcast %303 : vector<1x128xf32> to vector<32x128xf32>
    %305 = arith.addf %301, %304 : vector<32x128xf32>
    %c7_257 = arith.constant 7 : index
    %c0_258 = arith.constant 0 : index
    %c0_259 = arith.constant 0 : index
    %306 = vector.load %arg0[%c7_257, %c0_258, %c0_259] : memref<13x32x32xbf16, #tpu.memory_space<vmem>>, vector<1x32x32xbf16>
    %307 = vector.shape_cast %306 : vector<1x32x32xbf16> to vector<32x32xbf16>
    %308 = arith.truncf %305 : vector<32x128xf32> to vector<32x128xbf16>
    %cst_260 = arith.constant dense<0.000000e+00> : vector<32x128xf32>
    %309 = tpu.matmul %307, %308, %cst_260 {dimension_numbers = #tpu.dot_dimension_numbers<[1], [0], [0], [1], [0, 0, 1, 1], [], []>} : vector<32x32xbf16>, vector<32x128xbf16>, vector<32x128xf32> -> vector<32x128xf32>
    %310 = math.tanh %309 : vector<32x128xf32>
    %311 = arith.truncf %310 : vector<32x128xf32> to vector<32x128xbf16>
    %c0_261 = arith.constant 0 : index
    %c896_262 = arith.constant 896 : index
    %312 = vector.load %arg26[%c0_261, %c896_262] : memref<32x1664xbf16, #tpu.memory_space<vmem>>, vector<32x128xbf16>
    tpu.vector_store %arg26[%c0_261, %c896_262], %311 {strides = array<i32>} : memref<32x1664xbf16, #tpu.memory_space<vmem>>, vector<32x128xbf16>,
    %c8_263 = arith.constant 8 : index
    %c0_264 = arith.constant 0 : index
    %c0_265 = arith.constant 0 : index
    %313 = vector.load %arg9[%c8_263, %c0_264, %c0_265] : memref<13x64x128xbf16, #tpu.memory_space<vmem>>, vector<1x64x128xbf16>
    %314 = vector.shape_cast %313 : vector<1x64x128xbf16> to vector<64x128xbf16>
    %cst_266 = arith.constant dense<0.000000e+00> : vector<32x128xf32>
    %315 = tpu.matmul %200, %314, %cst_266 {dimension_numbers = #tpu.dot_dimension_numbers<[1], [0], [0], [1], [0, 0, 1, 1], [], []>} : vector<32x64xbf16>, vector<64x128xbf16>, vector<32x128xf32> -> vector<32x128xf32>
    %c8_267 = arith.constant 8 : index
    %c0_268 = arith.constant 0 : index
    %c0_269 = arith.constant 0 : index
    %316 = vector.load %arg10[%c8_267, %c0_268, %c0_269] : memref<13x1x128xf32, #tpu.memory_space<vmem>>, vector<1x1x128xf32>
    %317 = vector.shape_cast %316 : vector<1x1x128xf32> to vector<1x128xf32>
    %318 = vector.broadcast %317 : vector<1x128xf32> to vector<32x128xf32>
    %319 = arith.addf %315, %318 : vector<32x128xf32>
    %c8_270 = arith.constant 8 : index
    %c0_271 = arith.constant 0 : index
    %c0_272 = arith.constant 0 : index
    %320 = vector.load %arg0[%c8_270, %c0_271, %c0_272] : memref<13x32x32xbf16, #tpu.memory_space<vmem>>, vector<1x32x32xbf16>
    %321 = vector.shape_cast %320 : vector<1x32x32xbf16> to vector<32x32xbf16>
    %322 = arith.truncf %319 : vector<32x128xf32> to vector<32x128xbf16>
    %cst_273 = arith.constant dense<0.000000e+00> : vector<32x128xf32>
    %323 = tpu.matmul %321, %322, %cst_273 {dimension_numbers = #tpu.dot_dimension_numbers<[1], [0], [0], [1], [0, 0, 1, 1], [], []>} : vector<32x32xbf16>, vector<32x128xbf16>, vector<32x128xf32> -> vector<32x128xf32>
    %324 = math.tanh %323 : vector<32x128xf32>
    %325 = arith.truncf %324 : vector<32x128xf32> to vector<32x128xbf16>
    %c0_274 = arith.constant 0 : index
    %c1024_275 = arith.constant 1024 : index
    %326 = vector.load %arg26[%c0_274, %c1024_275] : memref<32x1664xbf16, #tpu.memory_space<vmem>>, vector<32x128xbf16>
    tpu.vector_store %arg26[%c0_274, %c1024_275], %325 {strides = array<i32>} : memref<32x1664xbf16, #tpu.memory_space<vmem>>, vector<32x128xbf16>,
    %c9_276 = arith.constant 9 : index
    %c0_277 = arith.constant 0 : index
    %c0_278 = arith.constant 0 : index
    %327 = vector.load %arg9[%c9_276, %c0_277, %c0_278] : memref<13x64x128xbf16, #tpu.memory_space<vmem>>, vector<1x64x128xbf16>
    %328 = vector.shape_cast %327 : vector<1x64x128xbf16> to vector<64x128xbf16>
    %cst_279 = arith.constant dense<0.000000e+00> : vector<32x128xf32>
    %329 = tpu.matmul %200, %328, %cst_279 {dimension_numbers = #tpu.dot_dimension_numbers<[1], [0], [0], [1], [0, 0, 1, 1], [], []>} : vector<32x64xbf16>, vector<64x128xbf16>, vector<32x128xf32> -> vector<32x128xf32>
    %c9_280 = arith.constant 9 : index
    %c0_281 = arith.constant 0 : index
    %c0_282 = arith.constant 0 : index
    %330 = vector.load %arg10[%c9_280, %c0_281, %c0_282] : memref<13x1x128xf32, #tpu.memory_space<vmem>>, vector<1x1x128xf32>
    %331 = vector.shape_cast %330 : vector<1x1x128xf32> to vector<1x128xf32>
    %332 = vector.broadcast %331 : vector<1x128xf32> to vector<32x128xf32>
    %333 = arith.addf %329, %332 : vector<32x128xf32>
    %c9_283 = arith.constant 9 : index
    %c0_284 = arith.constant 0 : index
    %c0_285 = arith.constant 0 : index
    %334 = vector.load %arg0[%c9_283, %c0_284, %c0_285] : memref<13x32x32xbf16, #tpu.memory_space<vmem>>, vector<1x32x32xbf16>
    %335 = vector.shape_cast %334 : vector<1x32x32xbf16> to vector<32x32xbf16>
    %336 = arith.truncf %333 : vector<32x128xf32> to vector<32x128xbf16>
    %cst_286 = arith.constant dense<0.000000e+00> : vector<32x128xf32>
    %337 = tpu.matmul %335, %336, %cst_286 {dimension_numbers = #tpu.dot_dimension_numbers<[1], [0], [0], [1], [0, 0, 1, 1], [], []>} : vector<32x32xbf16>, vector<32x128xbf16>, vector<32x128xf32> -> vector<32x128xf32>
    %338 = math.tanh %337 : vector<32x128xf32>
    %339 = arith.truncf %338 : vector<32x128xf32> to vector<32x128xbf16>
    %c0_287 = arith.constant 0 : index
    %c1152_288 = arith.constant 1152 : index
    %340 = vector.load %arg26[%c0_287, %c1152_288] : memref<32x1664xbf16, #tpu.memory_space<vmem>>, vector<32x128xbf16>
    tpu.vector_store %arg26[%c0_287, %c1152_288], %339 {strides = array<i32>} : memref<32x1664xbf16, #tpu.memory_space<vmem>>, vector<32x128xbf16>,
    %c10_289 = arith.constant 10 : index
    %c0_290 = arith.constant 0 : index
    %c0_291 = arith.constant 0 : index
    %341 = vector.load %arg9[%c10_289, %c0_290, %c0_291] : memref<13x64x128xbf16, #tpu.memory_space<vmem>>, vector<1x64x128xbf16>
    %342 = vector.shape_cast %341 : vector<1x64x128xbf16> to vector<64x128xbf16>
    %cst_292 = arith.constant dense<0.000000e+00> : vector<32x128xf32>
    %343 = tpu.matmul %200, %342, %cst_292 {dimension_numbers = #tpu.dot_dimension_numbers<[1], [0], [0], [1], [0, 0, 1, 1], [], []>} : vector<32x64xbf16>, vector<64x128xbf16>, vector<32x128xf32> -> vector<32x128xf32>
    %c10_293 = arith.constant 10 : index
    %c0_294 = arith.constant 0 : index
    %c0_295 = arith.constant 0 : index
    %344 = vector.load %arg10[%c10_293, %c0_294, %c0_295] : memref<13x1x128xf32, #tpu.memory_space<vmem>>, vector<1x1x128xf32>
    %345 = vector.shape_cast %344 : vector<1x1x128xf32> to vector<1x128xf32>
    %346 = vector.broadcast %345 : vector<1x128xf32> to vector<32x128xf32>
    %347 = arith.addf %343, %346 : vector<32x128xf32>
    %c10_296 = arith.constant 10 : index
    %c0_297 = arith.constant 0 : index
    %c0_298 = arith.constant 0 : index
    %348 = vector.load %arg0[%c10_296, %c0_297, %c0_298] : memref<13x32x32xbf16, #tpu.memory_space<vmem>>, vector<1x32x32xbf16>
    %349 = vector.shape_cast %348 : vector<1x32x32xbf16> to vector<32x32xbf16>
    %350 = arith.truncf %347 : vector<32x128xf32> to vector<32x128xbf16>
    %cst_299 = arith.constant dense<0.000000e+00> : vector<32x128xf32>
    %351 = tpu.matmul %349, %350, %cst_299 {dimension_numbers = #tpu.dot_dimension_numbers<[1], [0], [0], [1], [0, 0, 1, 1], [], []>} : vector<32x32xbf16>, vector<32x128xbf16>, vector<32x128xf32> -> vector<32x128xf32>
    %352 = math.tanh %351 : vector<32x128xf32>
    %353 = arith.truncf %352 : vector<32x128xf32> to vector<32x128xbf16>
    %c0_300 = arith.constant 0 : index
    %c1280_301 = arith.constant 1280 : index
    %354 = vector.load %arg26[%c0_300, %c1280_301] : memref<32x1664xbf16, #tpu.memory_space<vmem>>, vector<32x128xbf16>
    tpu.vector_store %arg26[%c0_300, %c1280_301], %353 {strides = array<i32>} : memref<32x1664xbf16, #tpu.memory_space<vmem>>, vector<32x128xbf16>,
    %c11_302 = arith.constant 11 : index
    %c0_303 = arith.constant 0 : index
    %c0_304 = arith.constant 0 : index
    %355 = vector.load %arg9[%c11_302, %c0_303, %c0_304] : memref<13x64x128xbf16, #tpu.memory_space<vmem>>, vector<1x64x128xbf16>
    %356 = vector.shape_cast %355 : vector<1x64x128xbf16> to vector<64x128xbf16>
    %cst_305 = arith.constant dense<0.000000e+00> : vector<32x128xf32>
    %357 = tpu.matmul %200, %356, %cst_305 {dimension_numbers = #tpu.dot_dimension_numbers<[1], [0], [0], [1], [0, 0, 1, 1], [], []>} : vector<32x64xbf16>, vector<64x128xbf16>, vector<32x128xf32> -> vector<32x128xf32>
    %c11_306 = arith.constant 11 : index
    %c0_307 = arith.constant 0 : index
    %c0_308 = arith.constant 0 : index
    %358 = vector.load %arg10[%c11_306, %c0_307, %c0_308] : memref<13x1x128xf32, #tpu.memory_space<vmem>>, vector<1x1x128xf32>
    %359 = vector.shape_cast %358 : vector<1x1x128xf32> to vector<1x128xf32>
    %360 = vector.broadcast %359 : vector<1x128xf32> to vector<32x128xf32>
    %361 = arith.addf %357, %360 : vector<32x128xf32>
    %c11_309 = arith.constant 11 : index
    %c0_310 = arith.constant 0 : index
    %c0_311 = arith.constant 0 : index
    %362 = vector.load %arg0[%c11_309, %c0_310, %c0_311] : memref<13x32x32xbf16, #tpu.memory_space<vmem>>, vector<1x32x32xbf16>
    %363 = vector.shape_cast %362 : vector<1x32x32xbf16> to vector<32x32xbf16>
    %364 = arith.truncf %361 : vector<32x128xf32> to vector<32x128xbf16>
    %cst_312 = arith.constant dense<0.000000e+00> : vector<32x128xf32>
    %365 = tpu.matmul %363, %364, %cst_312 {dimension_numbers = #tpu.dot_dimension_numbers<[1], [0], [0], [1], [0, 0, 1, 1], [], []>} : vector<32x32xbf16>, vector<32x128xbf16>, vector<32x128xf32> -> vector<32x128xf32>
    %366 = math.tanh %365 : vector<32x128xf32>
    %367 = arith.truncf %366 : vector<32x128xf32> to vector<32x128xbf16>
    %c0_313 = arith.constant 0 : index
    %c1408_314 = arith.constant 1408 : index
    %368 = vector.load %arg26[%c0_313, %c1408_314] : memref<32x1664xbf16, #tpu.memory_space<vmem>>, vector<32x128xbf16>
    tpu.vector_store %arg26[%c0_313, %c1408_314], %367 {strides = array<i32>} : memref<32x1664xbf16, #tpu.memory_space<vmem>>, vector<32x128xbf16>,
    %c12_315 = arith.constant 12 : index
    %c0_316 = arith.constant 0 : index
    %c0_317 = arith.constant 0 : index
    %369 = vector.load %arg9[%c12_315, %c0_316, %c0_317] : memref<13x64x128xbf16, #tpu.memory_space<vmem>>, vector<1x64x128xbf16>
    %370 = vector.shape_cast %369 : vector<1x64x128xbf16> to vector<64x128xbf16>
    %cst_318 = arith.constant dense<0.000000e+00> : vector<32x128xf32>
    %371 = tpu.matmul %200, %370, %cst_318 {dimension_numbers = #tpu.dot_dimension_numbers<[1], [0], [0], [1], [0, 0, 1, 1], [], []>} : vector<32x64xbf16>, vector<64x128xbf16>, vector<32x128xf32> -> vector<32x128xf32>
    %c12_319 = arith.constant 12 : index
    %c0_320 = arith.constant 0 : index
    %c0_321 = arith.constant 0 : index
    %372 = vector.load %arg10[%c12_319, %c0_320, %c0_321] : memref<13x1x128xf32, #tpu.memory_space<vmem>>, vector<1x1x128xf32>
    %373 = vector.shape_cast %372 : vector<1x1x128xf32> to vector<1x128xf32>
    %374 = vector.broadcast %373 : vector<1x128xf32> to vector<32x128xf32>
    %375 = arith.addf %371, %374 : vector<32x128xf32>
    %c12_322 = arith.constant 12 : index
    %c0_323 = arith.constant 0 : index
    %c0_324 = arith.constant 0 : index
    %376 = vector.load %arg0[%c12_322, %c0_323, %c0_324] : memref<13x32x32xbf16, #tpu.memory_space<vmem>>, vector<1x32x32xbf16>
    %377 = vector.shape_cast %376 : vector<1x32x32xbf16> to vector<32x32xbf16>
    %378 = arith.truncf %375 : vector<32x128xf32> to vector<32x128xbf16>
    %cst_325 = arith.constant dense<0.000000e+00> : vector<32x128xf32>
    %379 = tpu.matmul %377, %378, %cst_325 {dimension_numbers = #tpu.dot_dimension_numbers<[1], [0], [0], [1], [0, 0, 1, 1], [], []>} : vector<32x32xbf16>, vector<32x128xbf16>, vector<32x128xf32> -> vector<32x128xf32>
    %380 = math.tanh %379 : vector<32x128xf32>
    %381 = arith.truncf %380 : vector<32x128xf32> to vector<32x128xbf16>
    %c0_326 = arith.constant 0 : index
    %c1536_327 = arith.constant 1536 : index
    %382 = vector.load %arg26[%c0_326, %c1536_327] : memref<32x1664xbf16, #tpu.memory_space<vmem>>, vector<32x128xbf16>
    tpu.vector_store %arg26[%c0_326, %c1536_327], %381 {strides = array<i32>} : memref<32x1664xbf16, #tpu.memory_space<vmem>>, vector<32x128xbf16>,
    %c0_328 = arith.constant 0 : index
    %c0_329 = arith.constant 0 : index
    %383 = vector.load %arg26[%c0_328, %c0_329] : memref<32x1664xbf16, #tpu.memory_space<vmem>>, vector<32x1664xbf16>
    %c0_330 = arith.constant 0 : index
    %c0_331 = arith.constant 0 : index
    %384 = vector.load %arg11[%c0_330, %c0_331] : memref<1664x64xbf16, #tpu.memory_space<vmem>>, vector<1664x64xbf16>
    %cst_332 = arith.constant dense<0.000000e+00> : vector<32x64xf32>
    %385 = tpu.matmul %383, %384, %cst_332 {dimension_numbers = #tpu.dot_dimension_numbers<[1], [0], [0], [1], [0, 0, 1, 1], [], []>} : vector<32x1664xbf16>, vector<1664x64xbf16>, vector<32x64xf32> -> vector<32x64xf32>
    %c0_333 = arith.constant 0 : index
    %c0_334 = arith.constant 0 : index
    %386 = vector.load %arg12[%c0_333, %c0_334] : memref<1x64xf32, #tpu.memory_space<vmem>>, vector<1x64xf32>
    %387 = vector.broadcast %386 : vector<1x64xf32> to vector<32x64xf32>
    %388 = arith.addf %385, %387 : vector<32x64xf32>
    %cst_335 = arith.constant 0.000000e+00 : f32
    %389 = vector.broadcast %cst_335 : f32 to vector<32x64xf32>
    %390 = arith.maximumf %388, %389 : vector<32x64xf32>
    %391 = arith.truncf %390 : vector<32x64xf32> to vector<32x64xbf16>
    %c0_336 = arith.constant 0 : index
    %c0_337 = arith.constant 0 : index
    %392 = vector.load %arg13[%c0_336, %c0_337] : memref<64x64xbf16, #tpu.memory_space<vmem>>, vector<64x64xbf16>
    %cst_338 = arith.constant dense<0.000000e+00> : vector<32x64xf32>
    %393 = tpu.matmul %391, %392, %cst_338 {dimension_numbers = #tpu.dot_dimension_numbers<[1], [0], [0], [1], [0, 0, 1, 1], [], []>} : vector<32x64xbf16>, vector<64x64xbf16>, vector<32x64xf32> -> vector<32x64xf32>
    %c0_339 = arith.constant 0 : index
    %c0_340 = arith.constant 0 : index
    %394 = vector.load %arg14[%c0_339, %c0_340] : memref<1x64xf32, #tpu.memory_space<vmem>>, vector<1x64xf32>
    %395 = vector.broadcast %394 : vector<1x64xf32> to vector<32x64xf32>
    %396 = arith.addf %393, %395 : vector<32x64xf32>
    %cst_341 = arith.constant 0.000000e+00 : f32
    %397 = vector.broadcast %cst_341 : f32 to vector<32x64xf32>
    %398 = arith.maximumf %396, %397 : vector<32x64xf32>
    %399 = arith.truncf %398 : vector<32x64xf32> to vector<32x64xbf16>
    %c0_342 = arith.constant 0 : index
    %c0_343 = arith.constant 0 : index
    %c0_344 = arith.constant 0 : index
    %400 = vector.load %arg15[%c0_342, %c0_343, %c0_344] : memref<13x64x128xbf16, #tpu.memory_space<vmem>>, vector<1x64x128xbf16>
    %401 = vector.shape_cast %400 : vector<1x64x128xbf16> to vector<64x128xbf16>
    %cst_345 = arith.constant dense<0.000000e+00> : vector<32x128xf32>
    %402 = tpu.matmul %399, %401, %cst_345 {dimension_numbers = #tpu.dot_dimension_numbers<[1], [0], [0], [1], [0, 0, 1, 1], [], []>} : vector<32x64xbf16>, vector<64x128xbf16>, vector<32x128xf32> -> vector<32x128xf32>
    %c0_346 = arith.constant 0 : index
    %c0_347 = arith.constant 0 : index
    %c0_348 = arith.constant 0 : index
    %403 = vector.load %arg16[%c0_346, %c0_347, %c0_348] : memref<13x1x128xf32, #tpu.memory_space<vmem>>, vector<1x1x128xf32>
    %404 = vector.shape_cast %403 : vector<1x1x128xf32> to vector<1x128xf32>
    %405 = vector.broadcast %404 : vector<1x128xf32> to vector<32x128xf32>
    %406 = arith.addf %402, %405 : vector<32x128xf32>
    %c0_349 = arith.constant 0 : index
    %c0_350 = arith.constant 0 : index
    %c0_351 = arith.constant 0 : index
    %407 = vector.load %arg0[%c0_349, %c0_350, %c0_351] : memref<13x32x32xbf16, #tpu.memory_space<vmem>>, vector<1x32x32xbf16>
    %408 = vector.shape_cast %407 : vector<1x32x32xbf16> to vector<32x32xbf16>
    %409 = arith.truncf %406 : vector<32x128xf32> to vector<32x128xbf16>
    %cst_352 = arith.constant dense<0.000000e+00> : vector<32x128xf32>
    %410 = tpu.matmul %408, %409, %cst_352 {dimension_numbers = #tpu.dot_dimension_numbers<[1], [0], [0], [1], [0, 0, 1, 1], [], []>} : vector<32x32xbf16>, vector<32x128xbf16>, vector<32x128xf32> -> vector<32x128xf32>
    %411 = math.tanh %410 : vector<32x128xf32>
    %412 = arith.truncf %411 : vector<32x128xf32> to vector<32x128xbf16>
    %c0_353 = arith.constant 0 : index
    %c0_354 = arith.constant 0 : index
    %413 = vector.load %arg26[%c0_353, %c0_354] : memref<32x1664xbf16, #tpu.memory_space<vmem>>, vector<32x128xbf16>
    tpu.vector_store %arg26[%c0_353, %c0_354], %412 {strides = array<i32>} : memref<32x1664xbf16, #tpu.memory_space<vmem>>, vector<32x128xbf16>,
    %c1_355 = arith.constant 1 : index
    %c0_356 = arith.constant 0 : index
    %c0_357 = arith.constant 0 : index
    %414 = vector.load %arg15[%c1_355, %c0_356, %c0_357] : memref<13x64x128xbf16, #tpu.memory_space<vmem>>, vector<1x64x128xbf16>
    %415 = vector.shape_cast %414 : vector<1x64x128xbf16> to vector<64x128xbf16>
    %cst_358 = arith.constant dense<0.000000e+00> : vector<32x128xf32>
    %416 = tpu.matmul %399, %415, %cst_358 {dimension_numbers = #tpu.dot_dimension_numbers<[1], [0], [0], [1], [0, 0, 1, 1], [], []>} : vector<32x64xbf16>, vector<64x128xbf16>, vector<32x128xf32> -> vector<32x128xf32>
    %c1_359 = arith.constant 1 : index
    %c0_360 = arith.constant 0 : index
    %c0_361 = arith.constant 0 : index
    %417 = vector.load %arg16[%c1_359, %c0_360, %c0_361] : memref<13x1x128xf32, #tpu.memory_space<vmem>>, vector<1x1x128xf32>
    %418 = vector.shape_cast %417 : vector<1x1x128xf32> to vector<1x128xf32>
    %419 = vector.broadcast %418 : vector<1x128xf32> to vector<32x128xf32>
    %420 = arith.addf %416, %419 : vector<32x128xf32>
    %c1_362 = arith.constant 1 : index
    %c0_363 = arith.constant 0 : index
    %c0_364 = arith.constant 0 : index
    %421 = vector.load %arg0[%c1_362, %c0_363, %c0_364] : memref<13x32x32xbf16, #tpu.memory_space<vmem>>, vector<1x32x32xbf16>
    %422 = vector.shape_cast %421 : vector<1x32x32xbf16> to vector<32x32xbf16>
    %423 = arith.truncf %420 : vector<32x128xf32> to vector<32x128xbf16>
    %cst_365 = arith.constant dense<0.000000e+00> : vector<32x128xf32>
    %424 = tpu.matmul %422, %423, %cst_365 {dimension_numbers = #tpu.dot_dimension_numbers<[1], [0], [0], [1], [0, 0, 1, 1], [], []>} : vector<32x32xbf16>, vector<32x128xbf16>, vector<32x128xf32> -> vector<32x128xf32>
    %425 = math.tanh %424 : vector<32x128xf32>
    %426 = arith.truncf %425 : vector<32x128xf32> to vector<32x128xbf16>
    %c0_366 = arith.constant 0 : index
    %c128_367 = arith.constant 128 : index
    %427 = vector.load %arg26[%c0_366, %c128_367] : memref<32x1664xbf16, #tpu.memory_space<vmem>>, vector<32x128xbf16>
    tpu.vector_store %arg26[%c0_366, %c128_367], %426 {strides = array<i32>} : memref<32x1664xbf16, #tpu.memory_space<vmem>>, vector<32x128xbf16>,
    %c2_368 = arith.constant 2 : index
    %c0_369 = arith.constant 0 : index
    %c0_370 = arith.constant 0 : index
    %428 = vector.load %arg15[%c2_368, %c0_369, %c0_370] : memref<13x64x128xbf16, #tpu.memory_space<vmem>>, vector<1x64x128xbf16>
    %429 = vector.shape_cast %428 : vector<1x64x128xbf16> to vector<64x128xbf16>
    %cst_371 = arith.constant dense<0.000000e+00> : vector<32x128xf32>
    %430 = tpu.matmul %399, %429, %cst_371 {dimension_numbers = #tpu.dot_dimension_numbers<[1], [0], [0], [1], [0, 0, 1, 1], [], []>} : vector<32x64xbf16>, vector<64x128xbf16>, vector<32x128xf32> -> vector<32x128xf32>
    %c2_372 = arith.constant 2 : index
    %c0_373 = arith.constant 0 : index
    %c0_374 = arith.constant 0 : index
    %431 = vector.load %arg16[%c2_372, %c0_373, %c0_374] : memref<13x1x128xf32, #tpu.memory_space<vmem>>, vector<1x1x128xf32>
    %432 = vector.shape_cast %431 : vector<1x1x128xf32> to vector<1x128xf32>
    %433 = vector.broadcast %432 : vector<1x128xf32> to vector<32x128xf32>
    %434 = arith.addf %430, %433 : vector<32x128xf32>
    %c2_375 = arith.constant 2 : index
    %c0_376 = arith.constant 0 : index
    %c0_377 = arith.constant 0 : index
    %435 = vector.load %arg0[%c2_375, %c0_376, %c0_377] : memref<13x32x32xbf16, #tpu.memory_space<vmem>>, vector<1x32x32xbf16>
    %436 = vector.shape_cast %435 : vector<1x32x32xbf16> to vector<32x32xbf16>
    %437 = arith.truncf %434 : vector<32x128xf32> to vector<32x128xbf16>
    %cst_378 = arith.constant dense<0.000000e+00> : vector<32x128xf32>
    %438 = tpu.matmul %436, %437, %cst_378 {dimension_numbers = #tpu.dot_dimension_numbers<[1], [0], [0], [1], [0, 0, 1, 1], [], []>} : vector<32x32xbf16>, vector<32x128xbf16>, vector<32x128xf32> -> vector<32x128xf32>
    %439 = math.tanh %438 : vector<32x128xf32>
    %440 = arith.truncf %439 : vector<32x128xf32> to vector<32x128xbf16>
    %c0_379 = arith.constant 0 : index
    %c256_380 = arith.constant 256 : index
    %441 = vector.load %arg26[%c0_379, %c256_380] : memref<32x1664xbf16, #tpu.memory_space<vmem>>, vector<32x128xbf16>
    tpu.vector_store %arg26[%c0_379, %c256_380], %440 {strides = array<i32>} : memref<32x1664xbf16, #tpu.memory_space<vmem>>, vector<32x128xbf16>,
    %c3_381 = arith.constant 3 : index
    %c0_382 = arith.constant 0 : index
    %c0_383 = arith.constant 0 : index
    %442 = vector.load %arg15[%c3_381, %c0_382, %c0_383] : memref<13x64x128xbf16, #tpu.memory_space<vmem>>, vector<1x64x128xbf16>
    %443 = vector.shape_cast %442 : vector<1x64x128xbf16> to vector<64x128xbf16>
    %cst_384 = arith.constant dense<0.000000e+00> : vector<32x128xf32>
    %444 = tpu.matmul %399, %443, %cst_384 {dimension_numbers = #tpu.dot_dimension_numbers<[1], [0], [0], [1], [0, 0, 1, 1], [], []>} : vector<32x64xbf16>, vector<64x128xbf16>, vector<32x128xf32> -> vector<32x128xf32>
    %c3_385 = arith.constant 3 : index
    %c0_386 = arith.constant 0 : index
    %c0_387 = arith.constant 0 : index
    %445 = vector.load %arg16[%c3_385, %c0_386, %c0_387] : memref<13x1x128xf32, #tpu.memory_space<vmem>>, vector<1x1x128xf32>
    %446 = vector.shape_cast %445 : vector<1x1x128xf32> to vector<1x128xf32>
    %447 = vector.broadcast %446 : vector<1x128xf32> to vector<32x128xf32>
    %448 = arith.addf %444, %447 : vector<32x128xf32>
    %c3_388 = arith.constant 3 : index
    %c0_389 = arith.constant 0 : index
    %c0_390 = arith.constant 0 : index
    %449 = vector.load %arg0[%c3_388, %c0_389, %c0_390] : memref<13x32x32xbf16, #tpu.memory_space<vmem>>, vector<1x32x32xbf16>
    %450 = vector.shape_cast %449 : vector<1x32x32xbf16> to vector<32x32xbf16>
    %451 = arith.truncf %448 : vector<32x128xf32> to vector<32x128xbf16>
    %cst_391 = arith.constant dense<0.000000e+00> : vector<32x128xf32>
    %452 = tpu.matmul %450, %451, %cst_391 {dimension_numbers = #tpu.dot_dimension_numbers<[1], [0], [0], [1], [0, 0, 1, 1], [], []>} : vector<32x32xbf16>, vector<32x128xbf16>, vector<32x128xf32> -> vector<32x128xf32>
    %453 = math.tanh %452 : vector<32x128xf32>
    %454 = arith.truncf %453 : vector<32x128xf32> to vector<32x128xbf16>
    %c0_392 = arith.constant 0 : index
    %c384_393 = arith.constant 384 : index
    %455 = vector.load %arg26[%c0_392, %c384_393] : memref<32x1664xbf16, #tpu.memory_space<vmem>>, vector<32x128xbf16>
    tpu.vector_store %arg26[%c0_392, %c384_393], %454 {strides = array<i32>} : memref<32x1664xbf16, #tpu.memory_space<vmem>>, vector<32x128xbf16>,
    %c4_394 = arith.constant 4 : index
    %c0_395 = arith.constant 0 : index
    %c0_396 = arith.constant 0 : index
    %456 = vector.load %arg15[%c4_394, %c0_395, %c0_396] : memref<13x64x128xbf16, #tpu.memory_space<vmem>>, vector<1x64x128xbf16>
    %457 = vector.shape_cast %456 : vector<1x64x128xbf16> to vector<64x128xbf16>
    %cst_397 = arith.constant dense<0.000000e+00> : vector<32x128xf32>
    %458 = tpu.matmul %399, %457, %cst_397 {dimension_numbers = #tpu.dot_dimension_numbers<[1], [0], [0], [1], [0, 0, 1, 1], [], []>} : vector<32x64xbf16>, vector<64x128xbf16>, vector<32x128xf32> -> vector<32x128xf32>
    %c4_398 = arith.constant 4 : index
    %c0_399 = arith.constant 0 : index
    %c0_400 = arith.constant 0 : index
    %459 = vector.load %arg16[%c4_398, %c0_399, %c0_400] : memref<13x1x128xf32, #tpu.memory_space<vmem>>, vector<1x1x128xf32>
    %460 = vector.shape_cast %459 : vector<1x1x128xf32> to vector<1x128xf32>
    %461 = vector.broadcast %460 : vector<1x128xf32> to vector<32x128xf32>
    %462 = arith.addf %458, %461 : vector<32x128xf32>
    %c4_401 = arith.constant 4 : index
    %c0_402 = arith.constant 0 : index
    %c0_403 = arith.constant 0 : index
    %463 = vector.load %arg0[%c4_401, %c0_402, %c0_403] : memref<13x32x32xbf16, #tpu.memory_space<vmem>>, vector<1x32x32xbf16>
    %464 = vector.shape_cast %463 : vector<1x32x32xbf16> to vector<32x32xbf16>
    %465 = arith.truncf %462 : vector<32x128xf32> to vector<32x128xbf16>
    %cst_404 = arith.constant dense<0.000000e+00> : vector<32x128xf32>
    %466 = tpu.matmul %464, %465, %cst_404 {dimension_numbers = #tpu.dot_dimension_numbers<[1], [0], [0], [1], [0, 0, 1, 1], [], []>} : vector<32x32xbf16>, vector<32x128xbf16>, vector<32x128xf32> -> vector<32x128xf32>
    %467 = math.tanh %466 : vector<32x128xf32>
    %468 = arith.truncf %467 : vector<32x128xf32> to vector<32x128xbf16>
    %c0_405 = arith.constant 0 : index
    %c512_406 = arith.constant 512 : index
    %469 = vector.load %arg26[%c0_405, %c512_406] : memref<32x1664xbf16, #tpu.memory_space<vmem>>, vector<32x128xbf16>
    tpu.vector_store %arg26[%c0_405, %c512_406], %468 {strides = array<i32>} : memref<32x1664xbf16, #tpu.memory_space<vmem>>, vector<32x128xbf16>,
    %c5_407 = arith.constant 5 : index
    %c0_408 = arith.constant 0 : index
    %c0_409 = arith.constant 0 : index
    %470 = vector.load %arg15[%c5_407, %c0_408, %c0_409] : memref<13x64x128xbf16, #tpu.memory_space<vmem>>, vector<1x64x128xbf16>
    %471 = vector.shape_cast %470 : vector<1x64x128xbf16> to vector<64x128xbf16>
    %cst_410 = arith.constant dense<0.000000e+00> : vector<32x128xf32>
    %472 = tpu.matmul %399, %471, %cst_410 {dimension_numbers = #tpu.dot_dimension_numbers<[1], [0], [0], [1], [0, 0, 1, 1], [], []>} : vector<32x64xbf16>, vector<64x128xbf16>, vector<32x128xf32> -> vector<32x128xf32>
    %c5_411 = arith.constant 5 : index
    %c0_412 = arith.constant 0 : index
    %c0_413 = arith.constant 0 : index
    %473 = vector.load %arg16[%c5_411, %c0_412, %c0_413] : memref<13x1x128xf32, #tpu.memory_space<vmem>>, vector<1x1x128xf32>
    %474 = vector.shape_cast %473 : vector<1x1x128xf32> to vector<1x128xf32>
    %475 = vector.broadcast %474 : vector<1x128xf32> to vector<32x128xf32>
    %476 = arith.addf %472, %475 : vector<32x128xf32>
    %c5_414 = arith.constant 5 : index
    %c0_415 = arith.constant 0 : index
    %c0_416 = arith.constant 0 : index
    %477 = vector.load %arg0[%c5_414, %c0_415, %c0_416] : memref<13x32x32xbf16, #tpu.memory_space<vmem>>, vector<1x32x32xbf16>
    %478 = vector.shape_cast %477 : vector<1x32x32xbf16> to vector<32x32xbf16>
    %479 = arith.truncf %476 : vector<32x128xf32> to vector<32x128xbf16>
    %cst_417 = arith.constant dense<0.000000e+00> : vector<32x128xf32>
    %480 = tpu.matmul %478, %479, %cst_417 {dimension_numbers = #tpu.dot_dimension_numbers<[1], [0], [0], [1], [0, 0, 1, 1], [], []>} : vector<32x32xbf16>, vector<32x128xbf16>, vector<32x128xf32> -> vector<32x128xf32>
    %481 = math.tanh %480 : vector<32x128xf32>
    %482 = arith.truncf %481 : vector<32x128xf32> to vector<32x128xbf16>
    %c0_418 = arith.constant 0 : index
    %c640_419 = arith.constant 640 : index
    %483 = vector.load %arg26[%c0_418, %c640_419] : memref<32x1664xbf16, #tpu.memory_space<vmem>>, vector<32x128xbf16>
    tpu.vector_store %arg26[%c0_418, %c640_419], %482 {strides = array<i32>} : memref<32x1664xbf16, #tpu.memory_space<vmem>>, vector<32x128xbf16>,
    %c6_420 = arith.constant 6 : index
    %c0_421 = arith.constant 0 : index
    %c0_422 = arith.constant 0 : index
    %484 = vector.load %arg15[%c6_420, %c0_421, %c0_422] : memref<13x64x128xbf16, #tpu.memory_space<vmem>>, vector<1x64x128xbf16>
    %485 = vector.shape_cast %484 : vector<1x64x128xbf16> to vector<64x128xbf16>
    %cst_423 = arith.constant dense<0.000000e+00> : vector<32x128xf32>
    %486 = tpu.matmul %399, %485, %cst_423 {dimension_numbers = #tpu.dot_dimension_numbers<[1], [0], [0], [1], [0, 0, 1, 1], [], []>} : vector<32x64xbf16>, vector<64x128xbf16>, vector<32x128xf32> -> vector<32x128xf32>
    %c6_424 = arith.constant 6 : index
    %c0_425 = arith.constant 0 : index
    %c0_426 = arith.constant 0 : index
    %487 = vector.load %arg16[%c6_424, %c0_425, %c0_426] : memref<13x1x128xf32, #tpu.memory_space<vmem>>, vector<1x1x128xf32>
    %488 = vector.shape_cast %487 : vector<1x1x128xf32> to vector<1x128xf32>
    %489 = vector.broadcast %488 : vector<1x128xf32> to vector<32x128xf32>
    %490 = arith.addf %486, %489 : vector<32x128xf32>
    %c6_427 = arith.constant 6 : index
    %c0_428 = arith.constant 0 : index
    %c0_429 = arith.constant 0 : index
    %491 = vector.load %arg0[%c6_427, %c0_428, %c0_429] : memref<13x32x32xbf16, #tpu.memory_space<vmem>>, vector<1x32x32xbf16>
    %492 = vector.shape_cast %491 : vector<1x32x32xbf16> to vector<32x32xbf16>
    %493 = arith.truncf %490 : vector<32x128xf32> to vector<32x128xbf16>
    %cst_430 = arith.constant dense<0.000000e+00> : vector<32x128xf32>
    %494 = tpu.matmul %492, %493, %cst_430 {dimension_numbers = #tpu.dot_dimension_numbers<[1], [0], [0], [1], [0, 0, 1, 1], [], []>} : vector<32x32xbf16>, vector<32x128xbf16>, vector<32x128xf32> -> vector<32x128xf32>
    %495 = math.tanh %494 : vector<32x128xf32>
    %496 = arith.truncf %495 : vector<32x128xf32> to vector<32x128xbf16>
    %c0_431 = arith.constant 0 : index
    %c768_432 = arith.constant 768 : index
    %497 = vector.load %arg26[%c0_431, %c768_432] : memref<32x1664xbf16, #tpu.memory_space<vmem>>, vector<32x128xbf16>
    tpu.vector_store %arg26[%c0_431, %c768_432], %496 {strides = array<i32>} : memref<32x1664xbf16, #tpu.memory_space<vmem>>, vector<32x128xbf16>,
    %c7_433 = arith.constant 7 : index
    %c0_434 = arith.constant 0 : index
    %c0_435 = arith.constant 0 : index
    %498 = vector.load %arg15[%c7_433, %c0_434, %c0_435] : memref<13x64x128xbf16, #tpu.memory_space<vmem>>, vector<1x64x128xbf16>
    %499 = vector.shape_cast %498 : vector<1x64x128xbf16> to vector<64x128xbf16>
    %cst_436 = arith.constant dense<0.000000e+00> : vector<32x128xf32>
    %500 = tpu.matmul %399, %499, %cst_436 {dimension_numbers = #tpu.dot_dimension_numbers<[1], [0], [0], [1], [0, 0, 1, 1], [], []>} : vector<32x64xbf16>, vector<64x128xbf16>, vector<32x128xf32> -> vector<32x128xf32>
    %c7_437 = arith.constant 7 : index
    %c0_438 = arith.constant 0 : index
    %c0_439 = arith.constant 0 : index
    %501 = vector.load %arg16[%c7_437, %c0_438, %c0_439] : memref<13x1x128xf32, #tpu.memory_space<vmem>>, vector<1x1x128xf32>
    %502 = vector.shape_cast %501 : vector<1x1x128xf32> to vector<1x128xf32>
    %503 = vector.broadcast %502 : vector<1x128xf32> to vector<32x128xf32>
    %504 = arith.addf %500, %503 : vector<32x128xf32>
    %c7_440 = arith.constant 7 : index
    %c0_441 = arith.constant 0 : index
    %c0_442 = arith.constant 0 : index
    %505 = vector.load %arg0[%c7_440, %c0_441, %c0_442] : memref<13x32x32xbf16, #tpu.memory_space<vmem>>, vector<1x32x32xbf16>
    %506 = vector.shape_cast %505 : vector<1x32x32xbf16> to vector<32x32xbf16>
    %507 = arith.truncf %504 : vector<32x128xf32> to vector<32x128xbf16>
    %cst_443 = arith.constant dense<0.000000e+00> : vector<32x128xf32>
    %508 = tpu.matmul %506, %507, %cst_443 {dimension_numbers = #tpu.dot_dimension_numbers<[1], [0], [0], [1], [0, 0, 1, 1], [], []>} : vector<32x32xbf16>, vector<32x128xbf16>, vector<32x128xf32> -> vector<32x128xf32>
    %509 = math.tanh %508 : vector<32x128xf32>
    %510 = arith.truncf %509 : vector<32x128xf32> to vector<32x128xbf16>
    %c0_444 = arith.constant 0 : index
    %c896_445 = arith.constant 896 : index
    %511 = vector.load %arg26[%c0_444, %c896_445] : memref<32x1664xbf16, #tpu.memory_space<vmem>>, vector<32x128xbf16>
    tpu.vector_store %arg26[%c0_444, %c896_445], %510 {strides = array<i32>} : memref<32x1664xbf16, #tpu.memory_space<vmem>>, vector<32x128xbf16>,
    %c8_446 = arith.constant 8 : index
    %c0_447 = arith.constant 0 : index
    %c0_448 = arith.constant 0 : index
    %512 = vector.load %arg15[%c8_446, %c0_447, %c0_448] : memref<13x64x128xbf16, #tpu.memory_space<vmem>>, vector<1x64x128xbf16>
    %513 = vector.shape_cast %512 : vector<1x64x128xbf16> to vector<64x128xbf16>
    %cst_449 = arith.constant dense<0.000000e+00> : vector<32x128xf32>
    %514 = tpu.matmul %399, %513, %cst_449 {dimension_numbers = #tpu.dot_dimension_numbers<[1], [0], [0], [1], [0, 0, 1, 1], [], []>} : vector<32x64xbf16>, vector<64x128xbf16>, vector<32x128xf32> -> vector<32x128xf32>
    %c8_450 = arith.constant 8 : index
    %c0_451 = arith.constant 0 : index
    %c0_452 = arith.constant 0 : index
    %515 = vector.load %arg16[%c8_450, %c0_451, %c0_452] : memref<13x1x128xf32, #tpu.memory_space<vmem>>, vector<1x1x128xf32>
    %516 = vector.shape_cast %515 : vector<1x1x128xf32> to vector<1x128xf32>
    %517 = vector.broadcast %516 : vector<1x128xf32> to vector<32x128xf32>
    %518 = arith.addf %514, %517 : vector<32x128xf32>
    %c8_453 = arith.constant 8 : index
    %c0_454 = arith.constant 0 : index
    %c0_455 = arith.constant 0 : index
    %519 = vector.load %arg0[%c8_453, %c0_454, %c0_455] : memref<13x32x32xbf16, #tpu.memory_space<vmem>>, vector<1x32x32xbf16>
    %520 = vector.shape_cast %519 : vector<1x32x32xbf16> to vector<32x32xbf16>
    %521 = arith.truncf %518 : vector<32x128xf32> to vector<32x128xbf16>
    %cst_456 = arith.constant dense<0.000000e+00> : vector<32x128xf32>
    %522 = tpu.matmul %520, %521, %cst_456 {dimension_numbers = #tpu.dot_dimension_numbers<[1], [0], [0], [1], [0, 0, 1, 1], [], []>} : vector<32x32xbf16>, vector<32x128xbf16>, vector<32x128xf32> -> vector<32x128xf32>
    %523 = math.tanh %522 : vector<32x128xf32>
    %524 = arith.truncf %523 : vector<32x128xf32> to vector<32x128xbf16>
    %c0_457 = arith.constant 0 : index
    %c1024_458 = arith.constant 1024 : index
    %525 = vector.load %arg26[%c0_457, %c1024_458] : memref<32x1664xbf16, #tpu.memory_space<vmem>>, vector<32x128xbf16>
    tpu.vector_store %arg26[%c0_457, %c1024_458], %524 {strides = array<i32>} : memref<32x1664xbf16, #tpu.memory_space<vmem>>, vector<32x128xbf16>,
    %c9_459 = arith.constant 9 : index
    %c0_460 = arith.constant 0 : index
    %c0_461 = arith.constant 0 : index
    %526 = vector.load %arg15[%c9_459, %c0_460, %c0_461] : memref<13x64x128xbf16, #tpu.memory_space<vmem>>, vector<1x64x128xbf16>
    %527 = vector.shape_cast %526 : vector<1x64x128xbf16> to vector<64x128xbf16>
    %cst_462 = arith.constant dense<0.000000e+00> : vector<32x128xf32>
    %528 = tpu.matmul %399, %527, %cst_462 {dimension_numbers = #tpu.dot_dimension_numbers<[1], [0], [0], [1], [0, 0, 1, 1], [], []>} : vector<32x64xbf16>, vector<64x128xbf16>, vector<32x128xf32> -> vector<32x128xf32>
    %c9_463 = arith.constant 9 : index
    %c0_464 = arith.constant 0 : index
    %c0_465 = arith.constant 0 : index
    %529 = vector.load %arg16[%c9_463, %c0_464, %c0_465] : memref<13x1x128xf32, #tpu.memory_space<vmem>>, vector<1x1x128xf32>
    %530 = vector.shape_cast %529 : vector<1x1x128xf32> to vector<1x128xf32>
    %531 = vector.broadcast %530 : vector<1x128xf32> to vector<32x128xf32>
    %532 = arith.addf %528, %531 : vector<32x128xf32>
    %c9_466 = arith.constant 9 : index
    %c0_467 = arith.constant 0 : index
    %c0_468 = arith.constant 0 : index
    %533 = vector.load %arg0[%c9_466, %c0_467, %c0_468] : memref<13x32x32xbf16, #tpu.memory_space<vmem>>, vector<1x32x32xbf16>
    %534 = vector.shape_cast %533 : vector<1x32x32xbf16> to vector<32x32xbf16>
    %535 = arith.truncf %532 : vector<32x128xf32> to vector<32x128xbf16>
    %cst_469 = arith.constant dense<0.000000e+00> : vector<32x128xf32>
    %536 = tpu.matmul %534, %535, %cst_469 {dimension_numbers = #tpu.dot_dimension_numbers<[1], [0], [0], [1], [0, 0, 1, 1], [], []>} : vector<32x32xbf16>, vector<32x128xbf16>, vector<32x128xf32> -> vector<32x128xf32>
    %537 = math.tanh %536 : vector<32x128xf32>
    %538 = arith.truncf %537 : vector<32x128xf32> to vector<32x128xbf16>
    %c0_470 = arith.constant 0 : index
    %c1152_471 = arith.constant 1152 : index
    %539 = vector.load %arg26[%c0_470, %c1152_471] : memref<32x1664xbf16, #tpu.memory_space<vmem>>, vector<32x128xbf16>
    tpu.vector_store %arg26[%c0_470, %c1152_471], %538 {strides = array<i32>} : memref<32x1664xbf16, #tpu.memory_space<vmem>>, vector<32x128xbf16>,
    %c10_472 = arith.constant 10 : index
    %c0_473 = arith.constant 0 : index
    %c0_474 = arith.constant 0 : index
    %540 = vector.load %arg15[%c10_472, %c0_473, %c0_474] : memref<13x64x128xbf16, #tpu.memory_space<vmem>>, vector<1x64x128xbf16>
    %541 = vector.shape_cast %540 : vector<1x64x128xbf16> to vector<64x128xbf16>
    %cst_475 = arith.constant dense<0.000000e+00> : vector<32x128xf32>
    %542 = tpu.matmul %399, %541, %cst_475 {dimension_numbers = #tpu.dot_dimension_numbers<[1], [0], [0], [1], [0, 0, 1, 1], [], []>} : vector<32x64xbf16>, vector<64x128xbf16>, vector<32x128xf32> -> vector<32x128xf32>
    %c10_476 = arith.constant 10 : index
    %c0_477 = arith.constant 0 : index
    %c0_478 = arith.constant 0 : index
    %543 = vector.load %arg16[%c10_476, %c0_477, %c0_478] : memref<13x1x128xf32, #tpu.memory_space<vmem>>, vector<1x1x128xf32>
    %544 = vector.shape_cast %543 : vector<1x1x128xf32> to vector<1x128xf32>
    %545 = vector.broadcast %544 : vector<1x128xf32> to vector<32x128xf32>
    %546 = arith.addf %542, %545 : vector<32x128xf32>
    %c10_479 = arith.constant 10 : index
    %c0_480 = arith.constant 0 : index
    %c0_481 = arith.constant 0 : index
    %547 = vector.load %arg0[%c10_479, %c0_480, %c0_481] : memref<13x32x32xbf16, #tpu.memory_space<vmem>>, vector<1x32x32xbf16>
    %548 = vector.shape_cast %547 : vector<1x32x32xbf16> to vector<32x32xbf16>
    %549 = arith.truncf %546 : vector<32x128xf32> to vector<32x128xbf16>
    %cst_482 = arith.constant dense<0.000000e+00> : vector<32x128xf32>
    %550 = tpu.matmul %548, %549, %cst_482 {dimension_numbers = #tpu.dot_dimension_numbers<[1], [0], [0], [1], [0, 0, 1, 1], [], []>} : vector<32x32xbf16>, vector<32x128xbf16>, vector<32x128xf32> -> vector<32x128xf32>
    %551 = math.tanh %550 : vector<32x128xf32>
    %552 = arith.truncf %551 : vector<32x128xf32> to vector<32x128xbf16>
    %c0_483 = arith.constant 0 : index
    %c1280_484 = arith.constant 1280 : index
    %553 = vector.load %arg26[%c0_483, %c1280_484] : memref<32x1664xbf16, #tpu.memory_space<vmem>>, vector<32x128xbf16>
    tpu.vector_store %arg26[%c0_483, %c1280_484], %552 {strides = array<i32>} : memref<32x1664xbf16, #tpu.memory_space<vmem>>, vector<32x128xbf16>,
    %c11_485 = arith.constant 11 : index
    %c0_486 = arith.constant 0 : index
    %c0_487 = arith.constant 0 : index
    %554 = vector.load %arg15[%c11_485, %c0_486, %c0_487] : memref<13x64x128xbf16, #tpu.memory_space<vmem>>, vector<1x64x128xbf16>
    %555 = vector.shape_cast %554 : vector<1x64x128xbf16> to vector<64x128xbf16>
    %cst_488 = arith.constant dense<0.000000e+00> : vector<32x128xf32>
    %556 = tpu.matmul %399, %555, %cst_488 {dimension_numbers = #tpu.dot_dimension_numbers<[1], [0], [0], [1], [0, 0, 1, 1], [], []>} : vector<32x64xbf16>, vector<64x128xbf16>, vector<32x128xf32> -> vector<32x128xf32>
    %c11_489 = arith.constant 11 : index
    %c0_490 = arith.constant 0 : index
    %c0_491 = arith.constant 0 : index
    %557 = vector.load %arg16[%c11_489, %c0_490, %c0_491] : memref<13x1x128xf32, #tpu.memory_space<vmem>>, vector<1x1x128xf32>
    %558 = vector.shape_cast %557 : vector<1x1x128xf32> to vector<1x128xf32>
    %559 = vector.broadcast %558 : vector<1x128xf32> to vector<32x128xf32>
    %560 = arith.addf %556, %559 : vector<32x128xf32>
    %c11_492 = arith.constant 11 : index
    %c0_493 = arith.constant 0 : index
    %c0_494 = arith.constant 0 : index
    %561 = vector.load %arg0[%c11_492, %c0_493, %c0_494] : memref<13x32x32xbf16, #tpu.memory_space<vmem>>, vector<1x32x32xbf16>
    %562 = vector.shape_cast %561 : vector<1x32x32xbf16> to vector<32x32xbf16>
    %563 = arith.truncf %560 : vector<32x128xf32> to vector<32x128xbf16>
    %cst_495 = arith.constant dense<0.000000e+00> : vector<32x128xf32>
    %564 = tpu.matmul %562, %563, %cst_495 {dimension_numbers = #tpu.dot_dimension_numbers<[1], [0], [0], [1], [0, 0, 1, 1], [], []>} : vector<32x32xbf16>, vector<32x128xbf16>, vector<32x128xf32> -> vector<32x128xf32>
    %565 = math.tanh %564 : vector<32x128xf32>
    %566 = arith.truncf %565 : vector<32x128xf32> to vector<32x128xbf16>
    %c0_496 = arith.constant 0 : index
    %c1408_497 = arith.constant 1408 : index
    %567 = vector.load %arg26[%c0_496, %c1408_497] : memref<32x1664xbf16, #tpu.memory_space<vmem>>, vector<32x128xbf16>
    tpu.vector_store %arg26[%c0_496, %c1408_497], %566 {strides = array<i32>} : memref<32x1664xbf16, #tpu.memory_space<vmem>>, vector<32x128xbf16>,
    %c12_498 = arith.constant 12 : index
    %c0_499 = arith.constant 0 : index
    %c0_500 = arith.constant 0 : index
    %568 = vector.load %arg15[%c12_498, %c0_499, %c0_500] : memref<13x64x128xbf16, #tpu.memory_space<vmem>>, vector<1x64x128xbf16>
    %569 = vector.shape_cast %568 : vector<1x64x128xbf16> to vector<64x128xbf16>
    %cst_501 = arith.constant dense<0.000000e+00> : vector<32x128xf32>
    %570 = tpu.matmul %399, %569, %cst_501 {dimension_numbers = #tpu.dot_dimension_numbers<[1], [0], [0], [1], [0, 0, 1, 1], [], []>} : vector<32x64xbf16>, vector<64x128xbf16>, vector<32x128xf32> -> vector<32x128xf32>
    %c12_502 = arith.constant 12 : index
    %c0_503 = arith.constant 0 : index
    %c0_504 = arith.constant 0 : index
    %571 = vector.load %arg16[%c12_502, %c0_503, %c0_504] : memref<13x1x128xf32, #tpu.memory_space<vmem>>, vector<1x1x128xf32>
    %572 = vector.shape_cast %571 : vector<1x1x128xf32> to vector<1x128xf32>
    %573 = vector.broadcast %572 : vector<1x128xf32> to vector<32x128xf32>
    %574 = arith.addf %570, %573 : vector<32x128xf32>
    %c12_505 = arith.constant 12 : index
    %c0_506 = arith.constant 0 : index
    %c0_507 = arith.constant 0 : index
    %575 = vector.load %arg0[%c12_505, %c0_506, %c0_507] : memref<13x32x32xbf16, #tpu.memory_space<vmem>>, vector<1x32x32xbf16>
    %576 = vector.shape_cast %575 : vector<1x32x32xbf16> to vector<32x32xbf16>
    %577 = arith.truncf %574 : vector<32x128xf32> to vector<32x128xbf16>
    %cst_508 = arith.constant dense<0.000000e+00> : vector<32x128xf32>
    %578 = tpu.matmul %576, %577, %cst_508 {dimension_numbers = #tpu.dot_dimension_numbers<[1], [0], [0], [1], [0, 0, 1, 1], [], []>} : vector<32x32xbf16>, vector<32x128xbf16>, vector<32x128xf32> -> vector<32x128xf32>
    %579 = math.tanh %578 : vector<32x128xf32>
    %580 = arith.truncf %579 : vector<32x128xf32> to vector<32x128xbf16>
    %c0_509 = arith.constant 0 : index
    %c1536_510 = arith.constant 1536 : index
    %581 = vector.load %arg26[%c0_509, %c1536_510] : memref<32x1664xbf16, #tpu.memory_space<vmem>>, vector<32x128xbf16>
    tpu.vector_store %arg26[%c0_509, %c1536_510], %580 {strides = array<i32>} : memref<32x1664xbf16, #tpu.memory_space<vmem>>, vector<32x128xbf16>,
    %c0_511 = arith.constant 0 : index
    %c0_512 = arith.constant 0 : index
    %582 = vector.load %arg26[%c0_511, %c0_512] : memref<32x1664xbf16, #tpu.memory_space<vmem>>, vector<32x1664xbf16>
    %c0_513 = arith.constant 0 : index
    %c0_514 = arith.constant 0 : index
    %583 = vector.load %arg17[%c0_513, %c0_514] : memref<1664x64xbf16, #tpu.memory_space<vmem>>, vector<1664x64xbf16>
    %cst_515 = arith.constant dense<0.000000e+00> : vector<32x64xf32>
    %584 = tpu.matmul %582, %583, %cst_515 {dimension_numbers = #tpu.dot_dimension_numbers<[1], [0], [0], [1], [0, 0, 1, 1], [], []>} : vector<32x1664xbf16>, vector<1664x64xbf16>, vector<32x64xf32> -> vector<32x64xf32>
    %c0_516 = arith.constant 0 : index
    %c0_517 = arith.constant 0 : index
    %585 = vector.load %arg18[%c0_516, %c0_517] : memref<1x64xf32, #tpu.memory_space<vmem>>, vector<1x64xf32>
    %586 = vector.broadcast %585 : vector<1x64xf32> to vector<32x64xf32>
    %587 = arith.addf %584, %586 : vector<32x64xf32>
    %cst_518 = arith.constant 0.000000e+00 : f32
    %588 = vector.broadcast %cst_518 : f32 to vector<32x64xf32>
    %589 = arith.maximumf %587, %588 : vector<32x64xf32>
    %590 = arith.truncf %589 : vector<32x64xf32> to vector<32x64xbf16>
    %c0_519 = arith.constant 0 : index
    %c0_520 = arith.constant 0 : index
    %591 = vector.load %arg19[%c0_519, %c0_520] : memref<64x64xbf16, #tpu.memory_space<vmem>>, vector<64x64xbf16>
    %cst_521 = arith.constant dense<0.000000e+00> : vector<32x64xf32>
    %592 = tpu.matmul %590, %591, %cst_521 {dimension_numbers = #tpu.dot_dimension_numbers<[1], [0], [0], [1], [0, 0, 1, 1], [], []>} : vector<32x64xbf16>, vector<64x64xbf16>, vector<32x64xf32> -> vector<32x64xf32>
    %c0_522 = arith.constant 0 : index
    %c0_523 = arith.constant 0 : index
    %593 = vector.load %arg20[%c0_522, %c0_523] : memref<1x64xf32, #tpu.memory_space<vmem>>, vector<1x64xf32>
    %594 = vector.broadcast %593 : vector<1x64xf32> to vector<32x64xf32>
    %595 = arith.addf %592, %594 : vector<32x64xf32>
    %cst_524 = arith.constant 0.000000e+00 : f32
    %596 = vector.broadcast %cst_524 : f32 to vector<32x64xf32>
    %597 = arith.maximumf %595, %596 : vector<32x64xf32>
    %c0_525 = arith.constant 0 : index
    %c0_526 = arith.constant 0 : index
    %598 = vector.load %arg2[%c0_525, %c0_526] : memref<1x32xi32, #tpu.memory_space<vmem>>, vector<1x32xi32>
    %599 = tpu.iota {dimensions = array<i32: 0>} : vector<4x32xi32>
    %600 = vector.broadcast %598 : vector<1x32xi32> to vector<4x32xi32>
    %601 = arith.cmpi eq, %599, %600 : vector<4x32xi32>
    %602 = arith.extui %601 : vector<4x32xi1> to vector<4x32xi32>
    %603 = arith.sitofp %602 : vector<4x32xi32> to vector<4x32xf32>
    %604 = arith.truncf %603 : vector<4x32xf32> to vector<4x32xbf16>
    %605 = arith.truncf %597 : vector<32x64xf32> to vector<32x64xbf16>
    %cst_527 = arith.constant dense<0.000000e+00> : vector<4x64xf32>
    %606 = tpu.matmul %604, %605, %cst_527 {dimension_numbers = #tpu.dot_dimension_numbers<[1], [0], [0], [1], [0, 0, 1, 1], [], []>} : vector<4x32xbf16>, vector<32x64xbf16>, vector<4x64xf32> -> vector<4x64xf32>
    %607 = arith.truncf %606 : vector<4x64xf32> to vector<4x64xbf16>
    %c0_528 = arith.constant 0 : index
    %c0_529 = arith.constant 0 : index
    %608 = vector.load %arg21[%c0_528, %c0_529] : memref<64x64xbf16, #tpu.memory_space<vmem>>, vector<64x64xbf16>
    %cst_530 = arith.constant dense<0.000000e+00> : vector<4x64xf32>
    %609 = tpu.matmul %607, %608, %cst_530 {dimension_numbers = #tpu.dot_dimension_numbers<[1], [0], [0], [1], [0, 0, 1, 1], [], []>} : vector<4x64xbf16>, vector<64x64xbf16>, vector<4x64xf32> -> vector<4x64xf32>
    %c0_531 = arith.constant 0 : index
    %c0_532 = arith.constant 0 : index
    %610 = vector.load %arg22[%c0_531, %c0_532] : memref<1x64xf32, #tpu.memory_space<vmem>>, vector<1x64xf32>
    %611 = vector.broadcast %610 : vector<1x64xf32> to vector<4x64xf32>
    %612 = arith.addf %609, %611 : vector<4x64xf32>
    %cst_533 = arith.constant 0.000000e+00 : f32
    %613 = vector.broadcast %cst_533 : f32 to vector<4x64xf32>
    %614 = arith.maximumf %612, %613 : vector<4x64xf32>
    %615 = arith.truncf %614 : vector<4x64xf32> to vector<4x64xbf16>
    %c0_534 = arith.constant 0 : index
    %c0_535 = arith.constant 0 : index
    %616 = vector.load %arg23[%c0_534, %c0_535] : memref<64x4xbf16, #tpu.memory_space<vmem>>, vector<64x4xbf16>
    %cst_536 = arith.constant dense<0.000000e+00> : vector<4x4xf32>
    %617 = tpu.matmul %615, %616, %cst_536 {dimension_numbers = #tpu.dot_dimension_numbers<[1], [0], [0], [1], [0, 0, 1, 1], [], []>} : vector<4x64xbf16>, vector<64x4xbf16>, vector<4x4xf32> -> vector<4x4xf32>
    %c0_537 = arith.constant 0 : index
    %c0_538 = arith.constant 0 : index
    %618 = vector.load %arg24[%c0_537, %c0_538] : memref<1x4xf32, #tpu.memory_space<vmem>>, vector<1x4xf32>
    %619 = vector.broadcast %618 : vector<1x4xf32> to vector<4x4xf32>
    %620 = arith.addf %617, %619 : vector<4x4xf32>
    %cst_539 = arith.constant dense<0xFF800000> : vector<4xf32>
    %621 = vector.multi_reduction <maximumf>, %620, %cst_539 [1] : vector<4x4xf32> to vector<4xf32>
    %622 = vector.shape_cast %621 : vector<4xf32> to vector<4x1xf32>
    %623 = vector.broadcast %622 : vector<4x1xf32> to vector<4x4xf32>
    %624 = arith.subf %620, %623 : vector<4x4xf32>
    %625 = math.exp %624 : vector<4x4xf32>
    %cst_540 = arith.constant dense<0.000000e+00> : vector<4xf32>
    %626 = vector.multi_reduction <add>, %625, %cst_540 [1] : vector<4x4xf32> to vector<4xf32>
    %627 = vector.shape_cast %626 : vector<4xf32> to vector<4x1xf32>
    %628 = math.log %627 : vector<4x1xf32>
    %629 = vector.broadcast %628 : vector<4x1xf32> to vector<4x4xf32>
    %630 = arith.subf %624, %629 : vector<4x4xf32>
    %c0_541 = arith.constant 0 : index
    %c0_542 = arith.constant 0 : index
    %631 = vector.load %arg25[%c0_541, %c0_542] : memref<4x4xf32, #tpu.memory_space<vmem>>, vector<4x4xf32>
    tpu.vector_store %arg25[%c0_541, %c0_542], %630 {strides = array<i32>} : memref<4x4xf32, #tpu.memory_space<vmem>>, vector<4x4xf32>,
    return
  }
}

</mosaic_0001>

<bundles_post_ra>
// kernel: net_forward.1
= control target key start
LH: loop header
LB: loop body
LE: loop exit
PB: predicated region body
PF: predicated region fallthrough
CT: control target
= control target key end

     0   :  { %s18008_s0 = inlined_call_operand.vmem [shape: bf16[13,32,32], index: 0, kind: input, shape index: {}]   ;;  %s18009_s1 = inlined_call_operand.vmem [shape: f32[32,16], index: 1, kind: input, shape index: {}]   ;;  %s18010_s2 = inlined_call_operand.vmem [shape: s32[1,32], index: 2, kind: input, shape index: {}]   ;;  %s18011_s3 = inlined_call_operand.vmem [shape: bf16[13,16,128], index: 3, kind: input, shape index: {}]   ;;  %s18012_s4 = inlined_call_operand.vmem [shape: f32[13,1,128], index: 4, kind: input, shape index: {}]   ;;  %s18013_s5 = inlined_call_operand.vmem [shape: bf16[1664,64], index: 5, kind: input, shape index: {}]   ;;  %s18014_s6 = inlined_call_operand.vmem [shape: f32[1,64], index: 6, kind: input, shape index: {}]   ;;  %s18015_s7 = inlined_call_operand.vmem [shape: bf16[64,64], index: 7, kind: input, shape index: {}]   ;;  %s18016_s8 = inlined_call_operand.vmem [shape: f32[1,64], index: 8, kind: input, shape index: {}]   ;;  %s18017_s9 = inlined_call_operand.vmem [shape: bf16[13,64,128], index: 9, kind: input, shape index: {}]   ;;  %s18018_s10 = inlined_call_operand.vmem [shape: f32[13,1,128], index: 10, kind: input, shape index: {}]   ;;  %s18019_s11 = inlined_call_operand.vmem [shape: bf16[1664,64], index: 11, kind: input, shape index: {}]   ;;  %s18020_s12 = inlined_call_operand.vmem [shape: f32[1,64], index: 12, kind: input, shape index: {}]   ;;  %s18021_s13 = inlined_call_operand.vmem [shape: bf16[64,64], index: 13, kind: input, shape index: {}]   ;;  %s18022_s14 = inlined_call_operand.vmem [shape: f32[1,64], index: 14, kind: input, shape index: {}]   ;;  %s18023_s15 = inlined_call_operand.vmem [shape: bf16[13,64,128], index: 15, kind: input, shape index: {}]   ;;  %s18024_s16 = inlined_call_operand.vmem [shape: f32[13,1,128], index: 16, kind: input, shape index: {}]   ;;  %s18025_s17 = inlined_call_operand.vmem [shape: bf16[1664,64], index: 17, kind: input, shape index: {}]   ;;  %s18026_s18 = inlined_call_operand.vmem [shape: f32[1,64], index: 18, kind: input, shape index: {}]   ;;  %s18027_s19 = inlined_call_operand.vmem [shape: bf16[64,64], index: 19, kind: input, shape index: {}]   ;;  %s18028_s20 = inlined_call_operand.vmem [shape: f32[1,64], index: 20, kind: input, shape index: {}]   ;;  %s18029_s21 = inlined_call_operand.vmem [shape: bf16[64,64], index: 21, kind: input, shape index: {}]   ;;  %s18030_s22 = inlined_call_operand.vmem [shape: f32[1,64], index: 22, kind: input, shape index: {}]   ;;  %s18031_s23 = inlined_call_operand.vmem [shape: bf16[64,4], index: 23, kind: input, shape index: {}]   ;;  %s18032_s24 = inlined_call_operand.vmem [shape: f32[1,4], index: 24, kind: input, shape index: {}]   ;;  %s18033_s25 = inlined_call_operand.hbm [shape: f32[4,4], index: 25, kind: output, shape index: {}]  }
   0x1   :  { %18041 = sst [smem:[#allocation6_spill]] %s18008_s0 }
   0x2   :  { %18042 = sst [smem:[#allocation7_spill]] %s18009_s1 }
   0x3   :  { %18043 = sst [smem:[#allocation8_spill]] %s18010_s2 }
   0x4   :  { %18044 = sst [smem:[#allocation9_spill]] %s18011_s3 }
   0x5   :  { %18045 = sst [smem:[#allocation10_spill]] %s18012_s4 }
   0x6   :  { %18046 = sst [smem:[#allocation11_spill]] %s18013_s5 }
   0x7   :  { %18047 = sst [smem:[#allocation12_spill]] %s18014_s6 }
   0x8   :  { %18048 = sst [smem:[#allocation13_spill]] %s18015_s7 }
   0x9   :  { %18049 = sst [smem:[#allocation14_spill]] %s18016_s8 }
   0xa   :  { %18050 = sst [smem:[#allocation15_spill]] %s18017_s9 }
   0xb   :  { %18051 = sst [smem:[#allocation16_spill]] %s18028_s20 }
   0xc   :  { %s18052_s6 = sld [smem:[#allocation9_spill]]  ;;  %vm103_vm0 = vcmask 130048   ;;  %vm175_vm1 = vcmask 261120  }
   0xd   :  { %s18053_s20 = sld [smem:[#allocation7_spill]] }
   0xe   :  { %s18054_s1 = sld [smem:[#allocation6_spill]] }
   0xf   :  { %s18055_s27 = sld [smem:[#allocation10_spill]] }
  0x10   :  { %s18056_s30 = sld [smem:[#allocation11_spill]] }
  0x12   :  { %v14887_v0 = vld [vmem:[%s18052_s6] sm:$0xff]   ;;  %v14888_v7 = vld [vmem:[%s18052_s6 + $0x8] sm:$0xff]   ;;  %v14889_v8 = vld [vmem:[%s18052_s6 + $0x10] sm:$0xff]  }
  0x13   :  { %v82_v1 = vld [vmem:[%s18053_s20] sm:$0xff]  ;;  %v83_v2 = vld [vmem:[%s18053_s20 + $0x8] sm:$0xff]  ;;  %v84_v3 = vld [vmem:[%s18053_s20 + $0x10] sm:$0xff]  ;;  %14054 = vmatprep.subr.bf16.mxu0 %v14887_v0 }
  0x14   :  { %v16011_v4 = vpack.c.bf16 %v83_v2, %v82_v1  ;;  %v85_v5 = vld [vmem:[%s18053_s20 + $0x18] sm:$0xff]  ;;  %14055 = vmatpush3.bf16.msra.mxu0 %v14887_v0  ;;  %v14891_v10 = vld [vmem:[%s18052_s6 + $0x20] sm:$0xff]   ;;  %v14892_v11 = vld [vmem:[%s18052_s6 + $0x28] sm:$0xff]  }
  0x15   :  { %v16016_v6 = vpack.c.bf16 %v85_v5, %v84_v3  ;;  %14068 = vmatprep.subr.bf16.mxu0 %v14888_v7  ;;  %v14890_v9 = vld [vmem:[%s18052_s6 + $0x18] sm:$0xff]   ;;  %v14893_v12 = vld [vmem:[%s18052_s6 + $0x30] sm:$0xff]   ;;  %v14895_v14 = vld [vmem:[%s18052_s6 + $0x40] sm:$0xff]  }
  0x16   :  { %14056 = vmatprep.mubr.msk.bf16.mxu0 %vm103_vm0, %v16011_v4  ;;  %v14894_v13 = vld [vmem:[%s18052_s6 + $0x38] sm:$0xff]   ;;  %v14896_v15 = vld [vmem:[%s18052_s6 + $0x48] sm:$0xff]   ;;  %v14897_v16 = vld [vmem:[%s18052_s6 + $0x50] sm:$0xff]  }
  0x17   :  { %14057 = vmatmul.mubr.msk.bf16.vlgmr.msra.gmra.mxu0 %vm103_vm0, %v16016_v6  ;;  %v14898_v17 = vld [vmem:[%s18052_s6 + $0x58] sm:$0xff]   ;;  %v14899_v18 = vld [vmem:[%s18052_s6 + $0x60] sm:$0xff]   ;;  %v14901_v34 = vld [vmem:[%s18054_s1 + $0x8] sm:$0xff]  }
  0x18   :  { %14069 = vmatpush3.bf16.msra.mxu0 %v14888_v7  ;;  %14070 = vmatprep.mubr.msk.bf16.mxu0 %vm103_vm0, %v16011_v4  ;;  %v14900_v19 = vld [vmem:[%s18054_s1] sm:$0xff]   ;;  %v14902_v36 = vld [vmem:[%s18054_s1 + $0x10] sm:$0xff]   ;;  %v14903_v47 = vld [vmem:[%s18054_s1 + $0x18] sm:$0xff]  }
  0x19   :  { %14082 = vmatprep.subr.bf16.mxu0 %v14889_v8  ;;  %14064 = vmatprep.mubr.msk.bf16.mxu1 %vm175_vm1, %v14900_v19  ;;  %v11611_v21 = vld [vmem:[%s18055_s27] ss:$0 sm:$0xff]  ;;  %v11626_v31 = vld [vmem:[%s18055_s27 + $0x1] ss:$0 sm:$0xff]  ;;  %v11645_v44 = vld [vmem:[%s18055_s27 + $0x2] ss:$0 sm:$0xff] }
  0x1a   :  { %v14904_v49 = vld [vmem:[%s18054_s1 + $0x20] sm:$0xff]   ;;  %v14905_v60 = vld [vmem:[%s18054_s1 + $0x28] sm:$0xff]   ;;  %v14906_v62 = vld [vmem:[%s18054_s1 + $0x30] sm:$0xff]  }
  0x1b   :  { %v11664_v57 = vld [vmem:[%s18055_s27 + $0x3] ss:$0 sm:$0xff]  ;;  %v11702_v19 = vld [vmem:[%s18055_s27 + $0x5] ss:$0 sm:$0xff] }
  0x1f   :  { %14071 = vmatmul.mubr.msk.bf16.vlgmr.msra.gmra.mxu0 %vm103_vm0, %v16016_v6 }
  0x20   :  { %14083 = vmatpush3.bf16.msra.mxu0 %v14889_v8  ;;  %14084 = vmatprep.mubr.msk.bf16.mxu0 %vm103_vm0, %v16011_v4 }
  0x21   :  { %14096 = vmatprep.subr.bf16.mxu0 %v14890_v9 }
  0x27   :  { %14085 = vmatmul.mubr.msk.bf16.vlgmr.msra.gmra.mxu0 %vm103_vm0, %v16016_v6 }
  0x28   :  { %14097 = vmatpush3.bf16.msra.mxu0 %v14890_v9  ;;  %14098 = vmatprep.mubr.msk.bf16.mxu0 %vm103_vm0, %v16011_v4  ;;  %v14907_v9 = vld [vmem:[%s18054_s1 + $0x38] sm:$0xff]  }
  0x29   :  { %14110 = vmatprep.subr.bf16.mxu0 %v14891_v10 }
  0x2f   :  { %14099 = vmatmul.mubr.msk.bf16.vlgmr.msra.gmra.mxu0 %vm103_vm0, %v16016_v6 }
  0x30   :  { %14111 = vmatpush3.bf16.msra.mxu0 %v14891_v10  ;;  %14112 = vmatprep.mubr.msk.bf16.mxu0 %vm103_vm0, %v16011_v4 }
  0x31   :  { %14124 = vmatprep.subr.bf16.mxu0 %v14892_v11 }
  0x37   :  { %14113 = vmatmul.mubr.msk.bf16.vlgmr.msra.gmra.mxu0 %vm103_vm0, %v16016_v6 }
  0x38   :  { %14125 = vmatpush3.bf16.msra.mxu0 %v14892_v11  ;;  %14126 = vmatprep.mubr.msk.bf16.mxu0 %vm103_vm0, %v16011_v4  ;;  %v14908_v11 = vld [vmem:[%s18054_s1 + $0x40] sm:$0xff]  }
  0x39   :  { %14138 = vmatprep.subr.bf16.mxu0 %v14893_v12 }
  0x3f   :  { %14127 = vmatmul.mubr.msk.bf16.vlgmr.msra.gmra.mxu0 %vm103_vm0, %v16016_v6 }
  0x40   :  { %14139 = vmatpush3.bf16.msra.mxu0 %v14893_v12  ;;  %14140 = vmatprep.mubr.msk.bf16.mxu0 %vm103_vm0, %v16011_v4 }
  0x41   :  { %14152 = vmatprep.subr.bf16.mxu0 %v14894_v13 }
  0x47   :  { %14141 = vmatmul.mubr.msk.bf16.vlgmr.msra.gmra.mxu0 %vm103_vm0, %v16016_v6 }
  0x48   :  { %14153 = vmatpush3.bf16.msra.mxu0 %v14894_v13  ;;  %14154 = vmatprep.mubr.msk.bf16.mxu0 %vm103_vm0, %v16011_v4 }
  0x49   :  { %14166 = vmatprep.subr.bf16.mxu0 %v14895_v14 }
  0x4f   :  { %14155 = vmatmul.mubr.msk.bf16.vlgmr.msra.gmra.mxu0 %vm103_vm0, %v16016_v6 }
  0x50   :  { %14167 = vmatpush3.bf16.msra.mxu0 %v14895_v14  ;;  %14168 = vmatprep.mubr.msk.bf16.mxu0 %vm103_vm0, %v16011_v4 }
  0x51   :  { %14180 = vmatprep.subr.bf16.mxu0 %v14896_v15 }
  0x57   :  { %14169 = vmatmul.mubr.msk.bf16.vlgmr.msra.gmra.mxu0 %vm103_vm0, %v16016_v6 }
  0x58   :  { %14181 = vmatpush3.bf16.msra.mxu0 %v14896_v15  ;;  %14182 = vmatprep.mubr.msk.bf16.mxu0 %vm103_vm0, %v16011_v4 }
  0x59   :  { %14194 = vmatprep.subr.bf16.mxu0 %v14897_v16 }
  0x5f   :  { %14183 = vmatmul.mubr.msk.bf16.vlgmr.msra.gmra.mxu0 %vm103_vm0, %v16016_v6 }
  0x60   :  { %14195 = vmatpush3.bf16.msra.mxu0 %v14897_v16  ;;  %14196 = vmatprep.mubr.msk.bf16.mxu0 %vm103_vm0, %v16011_v4 }
  0x61   :  { %14208 = vmatprep.subr.bf16.mxu0 %v14898_v17 }
  0x67   :  { %14197 = vmatmul.mubr.msk.bf16.vlgmr.msra.gmra.mxu0 %vm103_vm0, %v16016_v6 }
  0x68   :  { %14209 = vmatpush3.bf16.msra.mxu0 %v14898_v17  ;;  %14210 = vmatprep.mubr.msk.bf16.mxu0 %vm103_vm0, %v16011_v4 }
  0x69   :  { %14222 = vmatprep.subr.bf16.mxu0 %v14899_v18 }
  0x6f   :  { %14211 = vmatmul.mubr.msk.bf16.vlgmr.msra.gmra.mxu0 %vm103_vm0, %v16016_v6 }
  0x70   :  { %14223 = vmatpush3.bf16.msra.mxu0 %v14899_v18  ;;  %14224 = vmatprep.mubr.msk.bf16.mxu0 %vm103_vm0, %v16011_v4 }
  0x77   :  { %14225 = vmatmul.mubr.msk.bf16.vlgmr.msra.gmra.mxu0 %vm103_vm0, %v16016_v6  ;;  %v11683_v6 = vld [vmem:[%s18055_s27 + $0x4] ss:$0 sm:$0xff] }
  0xd7   :  { %v14058_v20 = vpop.f32.mrf.mxu0 }
  0xd8   :  { %v153_v24 = vadd.f32 %v14058_v20, %v11611_v21 }
  0xd9   :  { %v144_v22 = vpop.f32.mrf.mxu0 }
  0xda   :  { %v145_v27 = vadd.f32 %v11611_v21, %v144_v22  ;;  %v14909_v22 = vld [vmem:[%s18054_s1 + $0x48] sm:$0xff]  }
  0xdb   :  { %v14059_v23 = vpop.f32.mrf.mxu0 }
  0xdc   :  { %v156_v25 = vadd.f32 %v14059_v23, %v11611_v21 }
  0xdd   :  { %v147_v26 = vpop.f32.mrf.mxu0 }
  0xde   :  { %v148_v28 = vadd.f32 %v11611_v21, %v147_v26  ;;  %v164_v29 = vpack.c.bf16 %v156_v25, %v153_v24  ;;  %v14910_v24 = vld [vmem:[%s18054_s1 + $0x50] sm:$0xff]  }
  0xdf   :  { %v14072_v30 = vpop.f32.mrf.mxu0 }
  0xe0   :  { %v163_v32 = vpack.c.bf16 %v148_v28, %v145_v27  ;;  %14060 = vmatprep.subr.bf16.mxu1 %v164_v29  ;;  %v315_v37 = vadd.f32 %v14072_v30, %v11626_v31 }
  0xe1   :  { %14061 = vmatpush3.bf16.msra.mxu1 %v164_v29  ;;  %v306_v33 = vpop.f32.mrf.mxu0 }
  0xe2   :  { %14062 = vmatprep.subr.bf16.mxu1 %v163_v32  ;;  %v307_v40 = vadd.f32 %v11626_v31, %v306_v33 }
  0xe3   :  { %v14073_v35 = vpop.f32.mrf.mxu0 }
  0xe4   :  { %v318_v38 = vadd.f32 %v14073_v35, %v11626_v31  ;;  %v14911_v35 = vld [vmem:[%s18054_s1 + $0x58] sm:$0xff]  }
  0xe5   :  { %14063 = vmatpush3.bf16.msra.mxu1 %v163_v32  ;;  %v309_v39 = vpop.f32.mrf.mxu0  ;;  %v11721_v32 = vld [vmem:[%s18055_s27 + $0x6] ss:$0 sm:$0xff] }
  0xe6   :  { %v327_v41 = vpack.c.bf16 %v318_v38, %v315_v37  ;;  %v310_v42 = vadd.f32 %v11626_v31, %v309_v39  ;;  %v14912_v37 = vld [vmem:[%s18054_s1 + $0x60] sm:$0xff]  }
  0xe7   :  { %v14086_v43 = vpop.f32.mrf.mxu0 }
  0xe8   :  { %v326_v45 = vpack.c.bf16 %v310_v42, %v307_v40  ;;  %14065 = vmatmul.mubr.msk.bf16.vlgmr.msra.gmra.mxu1 %vm175_vm1, %v14901_v34  ;;  %14074 = vmatprep.subr.bf16.mxu1 %v327_v41  ;;  %v477_v50 = vadd.f32 %v14086_v43, %v11645_v44 }
  0xe9   :  { %14075 = vmatpush3.bf16.msra.mxu1 %v327_v41  ;;  %v468_v46 = vpop.f32.mrf.mxu0  ;;  %14078 = vmatprep.mubr.msk.bf16.mxu1 %vm175_vm1, %v14902_v36 }
  0xea   :  { %14076 = vmatprep.subr.bf16.mxu1 %v326_v45  ;;  %v469_v53 = vadd.f32 %v11645_v44, %v468_v46 }
  0xeb   :  { %v14087_v48 = vpop.f32.mrf.mxu0 }
  0xec   :  { %v480_v51 = vadd.f32 %v14087_v48, %v11645_v44  ;;  %v14913_v48 = vld [vmem:[%s18054_s1 + $0x68] sm:$0xff]  }
  0xed   :  { %14077 = vmatpush3.bf16.msra.mxu1 %v326_v45  ;;  %v471_v52 = vpop.f32.mrf.mxu0  ;;  %v11740_v45 = vld [vmem:[%s18055_s27 + $0x7] ss:$0 sm:$0xff] }
  0xee   :  { %v489_v54 = vpack.c.bf16 %v480_v51, %v477_v50  ;;  %v472_v55 = vadd.f32 %v11645_v44, %v471_v52  ;;  %v14914_v50 = vld [vmem:[%s18054_s1 + $0x70] sm:$0xff]  }
  0xef   :  { %v14100_v56 = vpop.f32.mrf.mxu0 }
  0xf0   :  { %v488_v58 = vpack.c.bf16 %v472_v55, %v469_v53  ;;  %14079 = vmatmul.mubr.msk.bf16.vlgmr.msra.gmra.mxu1 %vm175_vm1, %v14903_v47  ;;  %14088 = vmatprep.subr.bf16.mxu1 %v489_v54  ;;  %v639_v63 = vadd.f32 %v14100_v56, %v11664_v57 }
  0xf1   :  { %14089 = vmatpush3.bf16.msra.mxu1 %v489_v54  ;;  %v630_v59 = vpop.f32.mrf.mxu0  ;;  %14092 = vmatprep.mubr.msk.bf16.mxu1 %vm175_vm1, %v14904_v49 }
  0xf2   :  { %14090 = vmatprep.subr.bf16.mxu1 %v488_v58  ;;  %v631_v2 = vadd.f32 %v11664_v57, %v630_v59 }
  0xf3   :  { %v14101_v61 = vpop.f32.mrf.mxu0 }
  0xf4   :  { %v642_v0 = vadd.f32 %v14101_v61, %v11664_v57  ;;  %v14915_v61 = vld [vmem:[%s18054_s1 + $0x78] sm:$0xff]  }
  0xf5   :  { %14091 = vmatpush3.bf16.msra.mxu1 %v488_v58  ;;  %v633_v1 = vpop.f32.mrf.mxu0  ;;  %v11759_v58 = vld [vmem:[%s18055_s27 + $0x8] ss:$0 sm:$0xff] }
  0xf6   :  { %v651_v3 = vpack.c.bf16 %v642_v0, %v639_v63  ;;  %v634_v4 = vadd.f32 %v11664_v57, %v633_v1  ;;  %v14916_v63 = vld [vmem:[%s18054_s1 + $0x80] sm:$0xff]  }
  0xf7   :  { %v14114_v5 = vpop.f32.mrf.mxu0 }
  0xf8   :  { %v650_v7 = vpack.c.bf16 %v634_v4, %v631_v2  ;;  %14093 = vmatmul.mubr.msk.bf16.vlgmr.msra.gmra.mxu1 %vm175_vm1, %v14905_v60  ;;  %14102 = vmatprep.subr.bf16.mxu1 %v651_v3  ;;  %v801_v12 = vadd.f32 %v14114_v5, %v11683_v6 }
  0xf9   :  { %14103 = vmatpush3.bf16.msra.mxu1 %v651_v3  ;;  %v792_v8 = vpop.f32.mrf.mxu0  ;;  %14106 = vmatprep.mubr.msk.bf16.mxu1 %vm175_vm1, %v14906_v62 }
  0xfa   :  { %14104 = vmatprep.subr.bf16.mxu1 %v650_v7  ;;  %v793_v15 = vadd.f32 %v11683_v6, %v792_v8 }
  0xfb   :  { %v14115_v10 = vpop.f32.mrf.mxu0 }
  0xfc   :  { %v804_v13 = vadd.f32 %v14115_v10, %v11683_v6  ;;  %v14917_v10 = vld [vmem:[%s18054_s1 + $0x88] sm:$0xff]  }
  0xfd   :  { %14105 = vmatpush3.bf16.msra.mxu1 %v650_v7  ;;  %v795_v14 = vpop.f32.mrf.mxu0  ;;  %v11778_v7 = vld [vmem:[%s18055_s27 + $0x9] ss:$0 sm:$0xff] }
  0xfe   :  { %v813_v16 = vpack.c.bf16 %v804_v13, %v801_v12  ;;  %v796_v17 = vadd.f32 %v11683_v6, %v795_v14  ;;  %v14918_v12 = vld [vmem:[%s18054_s1 + $0x90] sm:$0xff]  }
  0xff   :  { %v14128_v18 = vpop.f32.mrf.mxu0 }
 0x100   :  { %v812_v20 = vpack.c.bf16 %v796_v17, %v793_v15  ;;  %14107 = vmatmul.mubr.msk.bf16.vlgmr.msra.gmra.mxu1 %vm175_vm1, %v14907_v9  ;;  %14116 = vmatprep.subr.bf16.mxu1 %v813_v16  ;;  %v963_v25 = vadd.f32 %v14128_v18, %v11702_v19 }
 0x101   :  { %14117 = vmatpush3.bf16.msra.mxu1 %v813_v16  ;;  %v954_v21 = vpop.f32.mrf.mxu0  ;;  %14120 = vmatprep.mubr.msk.bf16.mxu1 %vm175_vm1, %v14908_v11  ;;  %v11797_v16 = vld [vmem:[%s18055_s27 + $0xa] ss:$0 sm:$0xff] }
 0x102   :  { %14118 = vmatprep.subr.bf16.mxu1 %v812_v20  ;;  %v955_v28 = vadd.f32 %v11702_v19, %v954_v21 }
 0x103   :  { %v14129_v23 = vpop.f32.mrf.mxu0 }
 0x104   :  { %v966_v26 = vadd.f32 %v14129_v23, %v11702_v19 }
 0x105   :  { %14119 = vmatpush3.bf16.msra.mxu1 %v812_v20  ;;  %v957_v27 = vpop.f32.mrf.mxu0 }
 0x106   :  { %v975_v29 = vpack.c.bf16 %v966_v26, %v963_v25  ;;  %v958_v30 = vadd.f32 %v11702_v19, %v957_v27  ;;  %v14920_v26 = vld [vmem:[%s18054_s1 + $0xa0] sm:$0xff]  }
 0x107   :  { %v14142_v31 = vpop.f32.mrf.mxu0 }
 0x108   :  { %v974_v33 = vpack.c.bf16 %v958_v30, %v955_v28  ;;  %14121 = vmatmul.mubr.msk.bf16.vlgmr.msra.gmra.mxu1 %vm175_vm1, %v14909_v22  ;;  %14130 = vmatprep.subr.bf16.mxu1 %v975_v29  ;;  %v1125_v38 = vadd.f32 %v14142_v31, %v11721_v32 }
 0x109   :  { %14131 = vmatpush3.bf16.msra.mxu1 %v975_v29  ;;  %v1116_v34 = vpop.f32.mrf.mxu0  ;;  %14134 = vmatprep.mubr.msk.bf16.mxu1 %vm175_vm1, %v14910_v24  ;;  %v14919_v24 = vld [vmem:[%s18054_s1 + $0x98] sm:$0xff]   ;;  %v11816_v29 = vld [vmem:[%s18055_s27 + $0xb] ss:$0 sm:$0xff] }
 0x10a   :  { %14132 = vmatprep.subr.bf16.mxu1 %v974_v33  ;;  %v1117_v41 = vadd.f32 %v11721_v32, %v1116_v34 }
 0x10b   :  { %v14143_v36 = vpop.f32.mrf.mxu0 }
 0x10c   :  { %v1128_v39 = vadd.f32 %v14143_v36, %v11721_v32 }
 0x10d   :  { %14133 = vmatpush3.bf16.msra.mxu1 %v974_v33  ;;  %v1119_v40 = vpop.f32.mrf.mxu0  ;;  %v14926_v33 = vld [vmem:[%s18056_s30 + $0x78] sm:$0xff]  }
 0x10e   :  { %v1137_v42 = vpack.c.bf16 %v1128_v39, %v1125_v38  ;;  %v1120_v43 = vadd.f32 %v11721_v32, %v1119_v40  ;;  %v14921_v39 = vld [vmem:[%s18054_s1 + $0xa8] sm:$0xff]   ;;  %13229 = vmatprep.subr.bf16.mxu0 %v14926_v33  ;;  %v14928_v40 = vld [vmem:[%s18056_s30 + $0x70] sm:$0xff]  }
 0x10f   :  { %v14156_v44 = vpop.f32.mrf.mxu0 }
 0x110   :  { %v1136_v46 = vpack.c.bf16 %v1120_v43, %v1117_v41  ;;  %14135 = vmatmul.mubr.msk.bf16.vlgmr.msra.gmra.mxu1 %vm175_vm1, %v14911_v35  ;;  %14144 = vmatprep.subr.bf16.mxu1 %v1137_v42  ;;  %v1287_v51 = vadd.f32 %v14156_v44, %v11740_v45  ;;  %v14927_v35 = vld [vmem:[%s18056_s30 + $0x38] sm:$0xff]   ;;  %v14929_v43 = vld [vmem:[%s18056_s30 + $0x30] sm:$0xff]  }
 0x111   :  { %14145 = vmatpush3.bf16.msra.mxu1 %v1137_v42  ;;  %v1278_v47 = vpop.f32.mrf.mxu0  ;;  %14148 = vmatprep.mubr.msk.bf16.mxu1 %vm175_vm1, %v14912_v37  ;;  %v14922_v42 = vld [vmem:[%s18054_s1 + $0xb0] sm:$0xff]  }
 0x112   :  { %14146 = vmatprep.subr.bf16.mxu1 %v1136_v46  ;;  %v1279_v54 = vadd.f32 %v11740_v45, %v1278_v47  ;;  %13230 = vmatpush3.bf16.msra.mxu0 %v14927_v35 }
 0x113   :  { %v14157_v49 = vpop.f32.mrf.mxu0  ;;  %13231 = vmatprep.subr.bf16.mxu0 %v14928_v40 }
 0x114   :  { %v1290_v52 = vadd.f32 %v14157_v49, %v11740_v45 }
 0x115   :  { %14147 = vmatpush3.bf16.msra.mxu1 %v1136_v46  ;;  %v1281_v53 = vpop.f32.mrf.mxu0  ;;  %v11835_v46 = vld [vmem:[%s18055_s27 + $0xc] ss:$0 sm:$0xff] }
 0x116   :  { %v1299_v55 = vpack.c.bf16 %v1290_v52, %v1287_v51  ;;  %v1282_v56 = vadd.f32 %v11740_v45, %v1281_v53  ;;  %13232 = vmatpush3.bf16.msra.mxu0 %v14929_v43  ;;  %v14931_v52 = vld [vmem:[%s18056_s30 + $0x28] sm:$0xff]  }
 0x117   :  { %v14170_v57 = vpop.f32.mrf.mxu0 }
 0x118   :  { %v1298_v59 = vpack.c.bf16 %v1282_v56, %v1279_v54  ;;  %14149 = vmatmul.mubr.msk.bf16.vlgmr.msra.gmra.mxu1 %vm175_vm1, %v14913_v48  ;;  %14158 = vmatprep.subr.bf16.mxu1 %v1299_v55  ;;  %v1449_v0 = vadd.f32 %v14170_v57, %v11759_v58  ;;  %v14923_v56 = vld [vmem:[%s18054_s1 + $0xb8] sm:$0xff]   ;;  %v14932_v57 = vld [vmem:[%s18056_s30 + $0x60] sm:$0xff]  }
 0x119   :  { %14159 = vmatpush3.bf16.msra.mxu1 %v1299_v55  ;;  %v1440_v60 = vpop.f32.mrf.mxu0  ;;  %14162 = vmatprep.mubr.msk.bf16.mxu1 %vm175_vm1, %v14914_v50  ;;  %v14930_v50 = vld [vmem:[%s18056_s30 + $0x68] sm:$0xff]  }
 0x11a   :  { %14160 = vmatprep.subr.bf16.mxu1 %v1298_v59  ;;  %v1441_v3 = vadd.f32 %v11759_v58, %v1440_v60  ;;  %13233 = vmatprep.subr.bf16.mxu0 %v14930_v50  ;;  %v14933_v60 = vld [vmem:[%s18056_s30 + $0x20] sm:$0xff]  }
 0x11b   :  { %v14171_v62 = vpop.f32.mrf.mxu0  ;;  %13234 = vmatpush3.bf16.msra.mxu0 %v14931_v52 }
 0x11c   :  { %v1452_v1 = vadd.f32 %v14171_v62, %v11759_v58  ;;  %13235 = vmatprep.subr.bf16.mxu0 %v14932_v57 }
 0x11d   :  { %14161 = vmatpush3.bf16.msra.mxu1 %v1298_v59  ;;  %v1443_v2 = vpop.f32.mrf.mxu0  ;;  %v14924_v59 = vld [vmem:[%s18054_s1 + $0xc0] sm:$0xff]  }
 0x11e   :  { %v1461_v4 = vpack.c.bf16 %v1452_v1, %v1449_v0  ;;  %v1444_v5 = vadd.f32 %v11759_v58, %v1443_v2  ;;  %v14934_v2 = vld [vmem:[%s18056_s30 + $0x58] sm:$0xff]  }
 0x11f   :  { %v14184_v6 = vpop.f32.mrf.mxu0  ;;  %13236 = vmatpush3.bf16.msra.mxu0 %v14933_v60 }
 0x120   :  { %v1460_v8 = vpack.c.bf16 %v1444_v5, %v1441_v3  ;;  %14163 = vmatmul.mubr.msk.bf16.vlgmr.msra.gmra.mxu1 %vm175_vm1, %v14915_v61  ;;  %14172 = vmatprep.subr.bf16.mxu1 %v1461_v4  ;;  %v1611_v13 = vadd.f32 %v14184_v6, %v11778_v7  ;;  %v14935_v3 = vld [vmem:[%s18056_s30 + $0x18] sm:$0xff]   ;;  %v14925_v6 = vld [vmem:[%s18054_s1 + $0xc8] sm:$0xff]  }
 0x121   :  { %14173 = vmatpush3.bf16.msra.mxu1 %v1461_v4  ;;  %v1602_v9 = vpop.f32.mrf.mxu0  ;;  %14176 = vmatprep.mubr.msk.bf16.mxu1 %vm175_vm1, %v14916_v63  ;;  %v14936_v5 = vld [vmem:[%s18056_s30 + $0xf8] sm:$0xff]  }
 0x122   :  { %14174 = vmatprep.subr.bf16.mxu1 %v1460_v8  ;;  %v1603_v17 = vadd.f32 %v11778_v7, %v1602_v9  ;;  %13237 = vmatprep.subr.bf16.mxu0 %v14934_v2  ;;  %v14939_v9 = vld [vmem:[%s18056_s30 + $0x10] sm:$0xff]  }
 0x123   :  { %v14185_v11 = vpop.f32.mrf.mxu0  ;;  %13238 = vmatpush3.bf16.msra.mxu0 %v14935_v3 }
 0x124   :  { %v1614_v14 = vadd.f32 %v14185_v11, %v11778_v7  ;;  %v14942_v11 = vld [vmem:[%s18056_s30 + $0x48] sm:$0xff]  }
 0x125   :  { %14175 = vmatpush3.bf16.msra.mxu1 %v1460_v8  ;;  %v1605_v15 = vpop.f32.mrf.mxu0  ;;  %v14937_v8 = vld [vmem:[%s18056_s30 + $0xb8] sm:$0xff]  }
 0x126   :  { %v1623_v18 = vpack.c.bf16 %v1614_v14, %v1611_v13  ;;  %v1606_v19 = vadd.f32 %v11778_v7, %v1605_v15  ;;  %v14938_v7 = vld [vmem:[%s18056_s30 + $0x50] sm:$0xff]   ;;  %v14943_v13 = vld [vmem:[%s18056_s30 + $0x8] sm:$0xff]   ;;  %v14946_v15 = vld [vmem:[%s18056_s30 + $0x40] sm:$0xff]  }
 0x127   :  { %v14198_v20 = vpop.f32.mrf.mxu0  ;;  %13239 = vmatprep.subr.bf16.mxu0 %v14938_v7  ;;  %v14944_v14 = vld [vmem:[%s18056_s30 + $0xe8] sm:$0xff]  }
 0x128   :  { %v1622_v21 = vpack.c.bf16 %v1606_v19, %v1603_v17  ;;  %14177 = vmatmul.mubr.msk.bf16.vlgmr.msra.gmra.mxu1 %vm175_vm1, %v14917_v10  ;;  %14186 = vmatprep.subr.bf16.mxu1 %v1623_v18  ;;  %v1773_v23 = vadd.f32 %v14198_v20, %v11797_v16  ;;  %v14940_v10 = vld [vmem:[%s18056_s30 + $0xf0] sm:$0xff]   ;;  %v14947_v17 = vld [vmem:[%s18056_s30] sm:$0xff]   ;;  %v14952_v19 = vld [vmem:[%s18056_s30 + $0x178] sm:$0xff]  }
 0x129   :  { %14187 = vmatpush3.bf16.msra.mxu1 %v1623_v18  ;;  %v1764_v22 = vpop.f32.mrf.mxu0  ;;  %14190 = vmatprep.mubr.msk.bf16.mxu1 %vm175_vm1, %v14918_v12  ;;  %v14941_v12 = vld [vmem:[%s18056_s30 + $0xb0] sm:$0xff]   ;;  %v14948_v18 = vld [vmem:[%s18056_s30 + $0xe0] sm:$0xff]  }
 0x12a   :  { %14188 = vmatprep.subr.bf16.mxu1 %v1622_v21  ;;  %v1765_v30 = vadd.f32 %v11797_v16, %v1764_v22  ;;  %13240 = vmatpush3.bf16.msra.mxu0 %v14939_v9  ;;  %v14949_v20 = vld [vmem:[%s18056_s30 + $0xa0] sm:$0xff]   ;;  %v14958_v22 = vld [vmem:[%s18056_s30 + $0x98] sm:$0xff]  }
 0x12b   :  { %v14199_v25 = vpop.f32.mrf.mxu0  ;;  %13241 = vmatprep.subr.bf16.mxu0 %v14942_v11 }
 0x12c   :  { %v1776_v27 = vadd.f32 %v14199_v25, %v11797_v16  ;;  %v14965_v25 = vld [vmem:[%s18056_s30 + $0xc8] sm:$0xff]  }
 0x12d   :  { %14189 = vmatpush3.bf16.msra.mxu1 %v1622_v21  ;;  %v1767_v28 = vpop.f32.mrf.mxu0  ;;  %v14954_v21 = vld [vmem:[%s18056_s30 + $0xd8] sm:$0xff]  }
 0x12e   :  { %v1785_v31 = vpack.c.bf16 %v1776_v27, %v1773_v23  ;;  %v1768_v32 = vadd.f32 %v11797_v16, %v1767_v28  ;;  %13242 = vmatpush3.bf16.msra.mxu0 %v14943_v13  ;;  %v14945_v16 = vld [vmem:[%s18056_s30 + $0xa8] sm:$0xff]   ;;  %v14960_v23 = vld [vmem:[%s18056_s30 + $0xd0] sm:$0xff]   ;;  %v14969_v27 = vld [vmem:[%s18056_s30 + $0xc0] sm:$0xff]  }
 0x12f   :  { %v14212_v34 = vpop.f32.mrf.mxu0  ;;  %13243 = vmatprep.subr.bf16.mxu0 %v14946_v15  ;;  %v14971_v28 = vld [vmem:[%s18056_s30 + $0x80] sm:$0xff]  }
 0x130   :  { %v1784_v36 = vpack.c.bf16 %v1768_v32, %v1765_v30  ;;  %14191 = vmatmul.mubr.msk.bf16.vlgmr.msra.gmra.mxu1 %vm175_vm1, %v14919_v24  ;;  %14200 = vmatprep.subr.bf16.mxu1 %v1785_v31  ;;  %v1935_v38 = vadd.f32 %v14212_v34, %v11816_v29  ;;  %v14962_v24 = vld [vmem:[%s18056_s30 + $0x90] sm:$0xff]  }
 0x131   :  { %14201 = vmatpush3.bf16.msra.mxu1 %v1785_v31  ;;  %v1926_v37 = vpop.f32.mrf.mxu0  ;;  %14204 = vmatprep.mubr.msk.bf16.mxu1 %vm175_vm1, %v14920_v26  ;;  %v14967_v26 = vld [vmem:[%s18056_s30 + $0x88] sm:$0xff]  }
 0x132   :  { %14202 = vmatprep.subr.bf16.mxu1 %v1784_v36  ;;  %v1927_v47 = vadd.f32 %v11816_v29, %v1926_v37  ;;  %13244 = vmatpush3.bf16.msra.mxu0 %v14947_v17 }
 0x133   :  { %v14213_v41 = vpop.f32.mrf.mxu0  ;;  %13285 = vmatprep.subr.bf16.mxu0 %v14952_v19 }
 0x134   :  { %v1938_v44 = vadd.f32 %v14213_v41, %v11816_v29 }
 0x135   :  { %14203 = vmatpush3.bf16.msra.mxu1 %v1784_v36  ;;  %v1929_v45 = vpop.f32.mrf.mxu0 }
 0x136   :  { %v1947_v48 = vpack.c.bf16 %v1938_v44, %v1935_v38  ;;  %v1930_v49 = vadd.f32 %v11816_v29, %v1929_v45  ;;  %v14977_v29 = vld [vmem:[%s18056_s30 + $0x1f8] sm:$0xff]  }
 0x137   :  { %v14226_v51 = vpop.f32.mrf.mxu0 }
 0x138   :  { %v1946_v53 = vpack.c.bf16 %v1930_v49, %v1927_v47  ;;  %14205 = vmatmul.mubr.msk.bf16.vlgmr.msra.gmra.mxu1 %vm175_vm1, %v14921_v39  ;;  %14214 = vmatprep.subr.bf16.mxu1 %v1947_v48  ;;  %v2097_v55 = vadd.f32 %v14226_v51, %v11835_v46 }
 0x139   :  { %14215 = vmatpush3.bf16.msra.mxu1 %v1947_v48  ;;  %v2088_v54 = vpop.f32.mrf.mxu0  ;;  %14218 = vmatprep.mubr.msk.bf16.mxu1 %vm175_vm1, %v14922_v42 }
 0x13a   :  { %14216 = vmatprep.subr.bf16.mxu1 %v1946_v53  ;;  %v2089_v61 = vadd.f32 %v11835_v46, %v2088_v54 }
 0x13b   :  { %v14227_v58 = vpop.f32.mrf.mxu0 }
 0x13c   :  { %v2100_v62 = vadd.f32 %v14227_v58, %v11835_v46 }
 0x13d   :  { %14217 = vmatpush3.bf16.msra.mxu1 %v1946_v53  ;;  %v2091_v63 = vpop.f32.mrf.mxu0 }
 0x13e   :  { %v2109_v0 = vpack.c.bf16 %v2100_v62, %v2097_v55  ;;  %v2092_v1 = vadd.f32 %v11835_v46, %v2091_v63 }
 0x140   :  { %v2108_v4 = vpack.c.bf16 %v2092_v1, %v2089_v61  ;;  %14219 = vmatmul.mubr.msk.bf16.vlgmr.msra.gmra.mxu1 %vm175_vm1, %v14923_v56  ;;  %14228 = vmatprep.subr.bf16.mxu1 %v2109_v0 }
 0x141   :  { %14229 = vmatpush3.bf16.msra.mxu1 %v2109_v0  ;;  %14232 = vmatprep.mubr.msk.bf16.mxu1 %vm175_vm1, %v14924_v59 }
 0x142   :  { %14230 = vmatprep.subr.bf16.mxu1 %v2108_v4 }
 0x145   :  { %14231 = vmatpush3.bf16.msra.mxu1 %v2108_v4 }
 0x146   :  { %13257 = vmatprep.subr.bf16.mxu1 %v14936_v5 }
 0x148   :  { %14233 = vmatmul.mubr.msk.bf16.vlgmr.msra.gmra.mxu1 %vm175_vm1, %v14925_v6 }
 0x149   :  { %13258 = vmatpush3.bf16.msra.mxu1 %v14937_v8 }
 0x14a   :  { %13259 = vmatprep.subr.bf16.mxu1 %v14940_v10 }
 0x14d   :  { %13260 = vmatpush3.bf16.msra.mxu1 %v14941_v12 }
 0x14e   :  { %13261 = vmatprep.subr.bf16.mxu1 %v14944_v14 }
 0x151   :  { %13262 = vmatpush3.bf16.msra.mxu1 %v14945_v16 }
 0x152   :  { %13263 = vmatprep.subr.bf16.mxu1 %v14948_v18 }
 0x155   :  { %13264 = vmatpush3.bf16.msra.mxu1 %v14949_v20 }
 0x156   :  { %13265 = vmatprep.subr.bf16.mxu1 %v14954_v21 }
 0x159   :  { %13266 = vmatpush3.bf16.msra.mxu1 %v14958_v22 }
 0x15a   :  { %13267 = vmatprep.subr.bf16.mxu1 %v14960_v23 }
 0x15d   :  { %13268 = vmatpush3.bf16.msra.mxu1 %v14962_v24 }
 0x15e   :  { %13269 = vmatprep.subr.bf16.mxu1 %v14965_v25 }
 0x161   :  { %13270 = vmatpush3.bf16.msra.mxu1 %v14967_v26 }
 0x162   :  { %13271 = vmatprep.subr.bf16.mxu1 %v14969_v27 }
 0x165   :  { %13272 = vmatpush3.bf16.msra.mxu1 %v14971_v28 }
 0x166   :  { %13313 = vmatprep.subr.bf16.mxu1 %v14977_v29 }
 0x167   :  { %30 = vsyncpa [#allocation4], 0  ;;  %v14955_v9 = vld [vmem:[%s18056_s30 + $0x138] sm:$0xff]   ;;  %v14959_v15 = vld [vmem:[%s18056_s30 + $0x170] sm:$0xff]   ;;  %s18057_s20 = sld [smem:[#allocation13_spill]]  ;;  %vm3586_vm2 = vcmask 523264  }
 0x168   :  { %v14961_v22 = vld [vmem:[%s18056_s30 + $0x130] sm:$0xff]   ;;  %v14963_v24 = vld [vmem:[%s18056_s30 + $0x168] sm:$0xff]   ;;  %s18058_s8 = sld [smem:[#allocation15_spill]]  ;;  %vm15867_vm3 = vmmov 0   ;;  %vm11583_vm5 = vcmask 27648  }
 0x169   :  { %s18059_s9 = sld [smem:[#allocation12_spill]] }
 0x16a   :  { %s18060_s6 = sld [smem:[#allocation14_spill]] }
 0x1a8   :  { %v14066_v30 = vpop.f32.mrf.mxu1 }
 0x1a9   :  { %15528 = vtanh.f32 %v14066_v30  ;;  %v14966_v30 = vld [vmem:[%s18056_s30 + $0x128] sm:$0xff]  }
 0x1aa   :  { %v216_v31 = vpop.f32.mrf.mxu1 }
 0x1ab   :  { %15530 = vtanh.f32 %v216_v31 }
 0x1ac   :  { %v14067_v32 = vpop.f32.mrf.mxu1 }
 0x1ad   :  { %15532 = vtanh.f32 %v14067_v32 }
 0x1ae   :  { %v219_v33 = vpop.f32.mrf.mxu1 }
 0x1af   :  { %15534 = vtanh.f32 %v219_v33  ;;  %v14968_v33 = vld [vmem:[%s18056_s30 + $0x160] sm:$0xff]  }
 0x1b0   :  { %v14080_v34 = vpop.f32.mrf.mxu1 }
 0x1b1   :  { %15536 = vtanh.f32 %v14080_v34 }
 0x1b2   :  { %v378_v35 = vpop.f32.mrf.mxu1 }
 0x1b3   :  { %15538 = vtanh.f32 %v378_v35 }
 0x1b4   :  { %v14081_v36 = vpop.f32.mrf.mxu1 }
 0x1b5   :  { %15540 = vtanh.f32 %v14081_v36 }
 0x1b6   :  { %v15529_v37 = vpop.eup %15528  ;;  %v381_v38 = vpop.f32.mrf.mxu1 }
 0x1b7   :  { %v12984_v39 = vpack.c.bf16 %v15529_v37, %v15529_v37  ;;  %15542 = vtanh.f32 %v381_v38 }
 0x1b8   :  { %v15531_v40 = vpop.eup %15530  ;;  %v14094_v41 = vpop.f32.mrf.mxu1 }
 0x1b9   :  { %253 = vst [vmem:[#allocation2 + $0x68] sm:$0xf] %v12984_v39  ;;  %v12982_v42 = vpack.c.bf16 %v15531_v40, %v15531_v40  ;;  %15544 = vtanh.f32 %v14094_v41  ;;  %v14970_v39 = vld [vmem:[%s18056_s30 + $0x120] sm:$0xff]   ;;  %v14974_v41 = vld [vmem:[%s18056_s30 + $0x158] sm:$0xff]  }
 0x1ba   :  { %v15533_v43 = vpop.eup %15532  ;;  %v540_v44 = vpop.f32.mrf.mxu1 }
 0x1bb   :  { %251 = vst [vmem:[#allocation2] sm:$0xf] %v12982_v42  ;;  %v12985_v45 = vpack.c.bf16 %v15533_v43, %v15533_v43  ;;  %15546 = vtanh.f32 %v540_v44 }
 0x1bc   :  { %v15535_v46 = vpop.eup %15534  ;;  %v14095_v47 = vpop.f32.mrf.mxu1 }
 0x1bd   :  { %254 = vst [vmem:[#allocation2 + $0x9c] sm:$0xf] %v12985_v45  ;;  %v12983_v48 = vpack.c.bf16 %v15535_v46, %v15535_v46  ;;  %15548 = vtanh.f32 %v14095_v47  ;;  %v14976_v45 = vld [vmem:[%s18056_s30 + $0x118] sm:$0xff]  }
 0x1be   :  { %v15537_v49 = vpop.eup %15536  ;;  %v543_v50 = vpop.f32.mrf.mxu1 }
 0x1bf   :  { %252 = vst [vmem:[#allocation2 + $0x34] sm:$0xf] %v12983_v48  ;;  %v12988_v51 = vpack.c.bf16 %v15537_v49, %v15537_v49  ;;  %15550 = vtanh.f32 %v543_v50 }
 0x1c0   :  { %v15539_v52 = vpop.eup %15538  ;;  %v14108_v53 = vpop.f32.mrf.mxu1 }
 0x1c1   :  { %415 = vst [vmem:[#allocation2 + $0x6c] sm:$0xf] %v12988_v51  ;;  %v12986_v54 = vpack.c.bf16 %v15539_v52, %v15539_v52  ;;  %15552 = vtanh.f32 %v14108_v53  ;;  %v14980_v51 = vld [vmem:[%s18056_s30 + $0x1b8] sm:$0xff]   ;;  %v14981_v52 = vld [vmem:[%s18056_s30 + $0x150] sm:$0xff]  }
 0x1c2   :  { %v15541_v55 = vpop.eup %15540  ;;  %v702_v56 = vpop.f32.mrf.mxu1 }
 0x1c3   :  { %413 = vst [vmem:[#allocation2 + $0x4] sm:$0xf] %v12986_v54  ;;  %v12989_v57 = vpack.c.bf16 %v15541_v55, %v15541_v55  ;;  %15554 = vtanh.f32 %v702_v56  ;;  %v14983_v56 = vld [vmem:[%s18056_s30 + $0x1f0] sm:$0xff]  }
 0x1c4   :  { %v15543_v58 = vpop.eup %15542  ;;  %v14109_v59 = vpop.f32.mrf.mxu1  ;;  %v14964_v32 = vld [vmem:[#allocation2 + $0x68] ss:$52 sps:$4 sm:$0xff]  }
 0x1c5   :  { %416 = vst [vmem:[#allocation2 + $0xa0] sm:$0xf] %v12989_v57  ;;  %v12987_v60 = vpack.c.bf16 %v15543_v58, %v15543_v58  ;;  %15556 = vtanh.f32 %v14109_v59 }
 0x1c6   :  { %v15545_v61 = vpop.eup %15544  ;;  %v705_v62 = vpop.f32.mrf.mxu1  ;;  %v14953_v13 = vld [vmem:[#allocation2] ss:$52 sps:$4 sm:$0xff]  }
 0x1c7   :  { %414 = vst [vmem:[#allocation2 + $0x38] sm:$0xf] %v12987_v60  ;;  %v12992_v63 = vpack.c.bf16 %v15545_v61, %v15545_v61  ;;  %15558 = vtanh.f32 %v705_v62  ;;  %v14982_v60 = vld [vmem:[%s18056_s30 + $0x110] sm:$0xff]  }
 0x1c8   :  { %v15547_v0 = vpop.eup %15546  ;;  %v14122_v1 = vpop.f32.mrf.mxu1  ;;  %v14984_v62 = vld [vmem:[%s18056_s30 + $0x1b0] sm:$0xff]  }
 0x1c9   :  { %577 = vst [vmem:[#allocation2 + $0x70] sm:$0xf] %v12992_v63  ;;  %v12990_v2 = vpack.c.bf16 %v15547_v0, %v15547_v0  ;;  %15560 = vtanh.f32 %v14122_v1  ;;  %v14985_v63 = vld [vmem:[%s18056_s30 + $0x148] sm:$0xff]  }
 0x1ca   :  { %v15549_v3 = vpop.eup %15548  ;;  %v864_v4 = vpop.f32.mrf.mxu1 }
 0x1cb   :  { %575 = vst [vmem:[#allocation2 + $0x8] sm:$0xf] %v12990_v2  ;;  %v12993_v5 = vpack.c.bf16 %v15549_v3, %v15549_v3  ;;  %15562 = vtanh.f32 %v864_v4  ;;  %v14988_v2 = vld [vmem:[%s18056_s30 + $0x1e8] sm:$0xff]  }
 0x1cc   :  { %v15551_v6 = vpop.eup %15550  ;;  %v14123_v7 = vpop.f32.mrf.mxu1  ;;  %v14956_v18 = vld [vmem:[#allocation2 + $0x6c] ss:$52 sps:$4 sm:$0xff]  }
 0x1cd   :  { %578 = vst [vmem:[#allocation2 + $0xa4] sm:$0xf] %v12993_v5  ;;  %v12991_v8 = vpack.c.bf16 %v15551_v6, %v15551_v6  ;;  %15564 = vtanh.f32 %v14123_v7  ;;  %v14987_v6 = vld [vmem:[%s18056_s30 + $0x108] sm:$0xff]  }
 0x1ce   :  { %v15553_v10 = vpop.eup %15552  ;;  %v867_v11 = vpop.f32.mrf.mxu1  ;;  %v14950_v12 = vld [vmem:[#allocation2 + $0x4] ss:$52 sps:$4 sm:$0xff]  }
 0x1cf   :  { %576 = vst [vmem:[#allocation2 + $0x3c] sm:$0xf] %v12991_v8  ;;  %v12996_v14 = vpack.c.bf16 %v15553_v10, %v15553_v10  ;;  %15566 = vtanh.f32 %v867_v11  ;;  %3230 = vmatprep.mubr.bf16.mxu0 %v14950_v12  ;;  %v14990_v10 = vld [vmem:[%s18056_s30 + $0x140] sm:$0xff]  }
 0x1d0   :  { %v15555_v16 = vpop.eup %15554  ;;  %v14136_v17 = vpop.f32.mrf.mxu1  ;;  %3231 = vmatmul.mubr.bf16.vlgmr.msra.gmra.mxu0 %v14953_v13  ;;  %v14992_v13 = vld [vmem:[%s18056_s30 + $0x1e0] sm:$0xff]  }
 0x1d1   :  { %739 = vst [vmem:[#allocation2 + $0x74] sm:$0xf] %v12996_v14  ;;  %v12994_v19 = vpack.c.bf16 %v15555_v16, %v15555_v16  ;;  %15568 = vtanh.f32 %v14136_v17  ;;  %13286 = vmatpush3.bf16.msra.mxu0 %v14955_v9  ;;  %3238 = vmatprep.mubr.bf16.mxu0 %v14956_v18  ;;  %v14989_v9 = vld [vmem:[%s18056_s30 + $0x1a8] sm:$0xff]   ;;  %v14991_v17 = vld [vmem:[%s18056_s30 + $0x100] sm:$0xff]  }
 0x1d2   :  { %v15557_v20 = vpop.eup %15556  ;;  %v1026_v21 = vpop.f32.mrf.mxu1  ;;  %13287 = vmatprep.subr.bf16.mxu0 %v14959_v15 }
 0x1d3   :  { %737 = vst [vmem:[#allocation2 + $0xc] sm:$0xf] %v12994_v19  ;;  %v12997_v23 = vpack.c.bf16 %v15557_v20, %v15557_v20  ;;  %15570 = vtanh.f32 %v1026_v21  ;;  %v14993_v19 = vld [vmem:[%s18056_s30 + $0x1a0] sm:$0xff]   ;;  %v14996_v20 = vld [vmem:[%s18056_s30 + $0x278] sm:$0xff]  }
 0x1d4   :  { %v15559_v25 = vpop.eup %15558  ;;  %v14137_v26 = vpop.f32.mrf.mxu1  ;;  %v14986_v8 = vld [vmem:[#allocation2 + $0x70] ss:$52 sps:$4 sm:$0xff]  }
 0x1d5   :  { %740 = vst [vmem:[#allocation2 + $0xa8] sm:$0xf] %v12997_v23  ;;  %v12995_v27 = vpack.c.bf16 %v15559_v25, %v15559_v25  ;;  %15572 = vtanh.f32 %v14137_v26  ;;  %13288 = vmatpush3.bf16.msra.mxu0 %v14961_v22  ;;  %v14998_v23 = vld [vmem:[%s18056_s30 + $0x1d8] sm:$0xff]  }
 0x1d6   :  { %v15561_v28 = vpop.eup %15560  ;;  %v1029_v29 = vpop.f32.mrf.mxu1  ;;  %13289 = vmatprep.subr.bf16.mxu0 %v14963_v24  ;;  %v14975_v49 = vld [vmem:[#allocation2 + $0x8] ss:$52 sps:$4 sm:$0xff]  }
 0x1d7   :  { %738 = vst [vmem:[#allocation2 + $0x40] sm:$0xf] %v12995_v27  ;;  %v13000_v31 = vpack.c.bf16 %v15561_v28, %v15561_v28  ;;  %15574 = vtanh.f32 %v1029_v29  ;;  %v14999_v25 = vld [vmem:[%s18056_s30 + $0x238] sm:$0xff]  }
 0x1d8   :  { %v15563_v34 = vpop.eup %15562  ;;  %v14150_v35 = vpop.f32.mrf.mxu1  ;;  %3239 = vmatmul.mubr.bf16.gmra.mxu0 %v14964_v32  ;;  %v15003_v32 = vld [vmem:[%s18056_s30 + $0x270] sm:$0xff]  }
 0x1d9   :  { %901 = vst [vmem:[#allocation2 + $0x78] sm:$0xf] %v13000_v31  ;;  %v12998_v36 = vpack.c.bf16 %v15563_v34, %v15563_v34  ;;  %15576 = vtanh.f32 %v14150_v35  ;;  %13290 = vmatpush3.bf16.msra.mxu0 %v14966_v30  ;;  %v15002_v31 = vld [vmem:[%s18056_s30 + $0x198] sm:$0xff]  }
 0x1da   :  { %v15565_v37 = vpop.eup %15564  ;;  %v1188_v38 = vpop.f32.mrf.mxu1  ;;  %13291 = vmatprep.subr.bf16.mxu0 %v14968_v33 }
 0x1db   :  { %899 = vst [vmem:[#allocation2 + $0x10] sm:$0xf] %v12998_v36  ;;  %v13001_v40 = vpack.c.bf16 %v15565_v37, %v15565_v37  ;;  %15578 = vtanh.f32 %v1188_v38  ;;  %v15004_v36 = vld [vmem:[%s18056_s30 + $0x1d0] sm:$0xff]  }
 0x1dc   :  { %v15567_v42 = vpop.eup %15566  ;;  %v14151_v43 = vpop.f32.mrf.mxu1  ;;  %v14978_v55 = vld [vmem:[#allocation2 + $0x74] ss:$52 sps:$4 sm:$0xff]  }
 0x1dd   :  { %902 = vst [vmem:[#allocation2 + $0xac] sm:$0xf] %v13001_v40  ;;  %v12999_v44 = vpack.c.bf16 %v15567_v42, %v15567_v42  ;;  %15580 = vtanh.f32 %v14151_v43  ;;  %13292 = vmatpush3.bf16.msra.mxu0 %v14970_v39  ;;  %v15005_v40 = vld [vmem:[%s18056_s30 + $0x230] sm:$0xff]   ;;  %v15007_v43 = vld [vmem:[%s18056_s30 + $0x268] sm:$0xff]  }
 0x1de   :  { %v15569_v46 = vpop.eup %15568  ;;  %v1191_v47 = vpop.f32.mrf.mxu1  ;;  %v14972_v48 = vld [vmem:[#allocation2 + $0xc] ss:$52 sps:$4 sm:$0xff]   ;;  %13293 = vmatprep.subr.bf16.mxu0 %v14974_v41  ;;  %v15006_v42 = vld [vmem:[%s18056_s30 + $0x190] sm:$0xff]  }
 0x1df   :  { %900 = vst [vmem:[#allocation2 + $0x44] sm:$0xf] %v12999_v44  ;;  %v13004_v50 = vpack.c.bf16 %v15569_v46, %v15569_v46  ;;  %15582 = vtanh.f32 %v1191_v47  ;;  %3279 = vmatprep.mubr.bf16.mxu1 %v14972_v48  ;;  %v15009_v46 = vld [vmem:[%s18056_s30 + $0x1c8] sm:$0xff]  }
 0x1e0   :  { %v15571_v53 = vpop.eup %15570  ;;  %v14164_v54 = vpop.f32.mrf.mxu1  ;;  %3280 = vmatmul.mubr.bf16.vlgmr.msra.gmra.mxu1 %v14975_v49 }
 0x1e1   :  { %1063 = vst [vmem:[#allocation2 + $0x7c] sm:$0xf] %v13004_v50  ;;  %v13002_v57 = vpack.c.bf16 %v15571_v53, %v15571_v53  ;;  %15584 = vtanh.f32 %v14164_v54  ;;  %13294 = vmatpush3.bf16.msra.mxu0 %v14976_v45  ;;  %3287 = vmatprep.mubr.bf16.mxu1 %v14978_v55  ;;  %v15010_v50 = vld [vmem:[%s18056_s30 + $0x228] sm:$0xff]   ;;  %v15012_v54 = vld [vmem:[%s18056_s30 + $0x260] sm:$0xff]  }
 0x1e2   :  { %v15573_v58 = vpop.eup %15572  ;;  %v1350_v59 = vpop.f32.mrf.mxu1  ;;  %13314 = vmatpush3.bf16.msra.mxu1 %v14980_v51  ;;  %13295 = vmatprep.subr.bf16.mxu0 %v14981_v52  ;;  %v15011_v53 = vld [vmem:[%s18056_s30 + $0x188] sm:$0xff]  }
 0x1e3   :  { %1061 = vst [vmem:[#allocation2 + $0x14] sm:$0xf] %v13002_v57  ;;  %v13005_v61 = vpack.c.bf16 %v15573_v58, %v15573_v58  ;;  %15586 = vtanh.f32 %v1350_v59  ;;  %13315 = vmatprep.subr.bf16.mxu1 %v14983_v56  ;;  %v15013_v57 = vld [vmem:[%s18056_s30 + $0x1c0] sm:$0xff]  }
 0x1e4   :  { %v15575_v0 = vpop.eup %15574  ;;  %v14165_v1 = vpop.f32.mrf.mxu1  ;;  %v15008_v52 = vld [vmem:[#allocation2 + $0x78] ss:$52 sps:$4 sm:$0xff]  }
 0x1e5   :  { %1064 = vst [vmem:[#allocation2 + $0xb0] sm:$0xf] %v13005_v61  ;;  %v13003_v3 = vpack.c.bf16 %v15575_v0, %v15575_v0  ;;  %15588 = vtanh.f32 %v14165_v1  ;;  %13296 = vmatpush3.bf16.msra.mxu0 %v14982_v60  ;;  %v15014_v61 = vld [vmem:[%s18056_s30 + $0x220] sm:$0xff]   ;;  %v15018_v0 = vld [vmem:[%s18056_s30 + $0x258] sm:$0xff]  }
 0x1e6   :  { %v15577_v4 = vpop.eup %15576  ;;  %v1353_v5 = vpop.f32.mrf.mxu1  ;;  %13316 = vmatpush3.bf16.msra.mxu1 %v14984_v62  ;;  %13297 = vmatprep.subr.bf16.mxu0 %v14985_v63  ;;  %v14997_v29 = vld [vmem:[#allocation2 + $0x10] ss:$52 sps:$4 sm:$0xff]  }
 0x1e7   :  { %1062 = vst [vmem:[#allocation2 + $0x48] sm:$0xf] %v13003_v3  ;;  %v13008_v7 = vpack.c.bf16 %v15577_v4, %v15577_v4  ;;  %15590 = vtanh.f32 %v1353_v5  ;;  %13317 = vmatprep.subr.bf16.mxu1 %v14988_v2  ;;  %v15015_v63 = vld [vmem:[%s18056_s30 + $0x180] sm:$0xff]   ;;  %v15021_v3 = vld [vmem:[%s18056_s30 + $0x2f8] sm:$0xff]  }
 0x1e8   :  { %v15579_v11 = vpop.eup %15578  ;;  %v14178_v12 = vpop.f32.mrf.mxu1  ;;  %3288 = vmatmul.mubr.bf16.gmra.mxu1 %v14986_v8  ;;  %v15020_v5 = vld [vmem:[%s18056_s30 + $0x218] sm:$0xff]  }
 0x1e9   :  { %1225 = vst [vmem:[#allocation2 + $0x80] sm:$0xf] %v13008_v7  ;;  %v13006_v14 = vpack.c.bf16 %v15579_v11, %v15579_v11  ;;  %15592 = vtanh.f32 %v14178_v12  ;;  %13298 = vmatpush3.bf16.msra.mxu0 %v14987_v6  ;;  %v15024_v11 = vld [vmem:[%s18056_s30 + $0x2b8] sm:$0xff]  }
 0x1ea   :  { %v15581_v15 = vpop.eup %15580  ;;  %v1512_v16 = vpop.f32.mrf.mxu1  ;;  %13318 = vmatpush3.bf16.msra.mxu1 %v14989_v9  ;;  %13299 = vmatprep.subr.bf16.mxu0 %v14990_v10 }
 0x1eb   :  { %1223 = vst [vmem:[#allocation2 + $0x18] sm:$0xf] %v13006_v14  ;;  %v13009_v18 = vpack.c.bf16 %v15581_v15, %v15581_v15  ;;  %15594 = vtanh.f32 %v1512_v16  ;;  %13319 = vmatprep.subr.bf16.mxu1 %v14992_v13  ;;  %v15025_v14 = vld [vmem:[%s18056_s30 + $0x250] sm:$0xff]  }
 0x1ec   :  { %v15583_v21 = vpop.eup %15582  ;;  %v14179_v22 = vpop.f32.mrf.mxu1  ;;  %v15000_v35 = vld [vmem:[#allocation2 + $0x7c] ss:$52 sps:$4 sm:$0xff]  }
 0x1ed   :  { %1226 = vst [vmem:[#allocation2 + $0xb4] sm:$0xf] %v13009_v18  ;;  %v13007_v24 = vpack.c.bf16 %v15583_v21, %v15583_v21  ;;  %15596 = vtanh.f32 %v14179_v22  ;;  %13300 = vmatpush3.bf16.msra.mxu0 %v14991_v17  ;;  %v15027_v15 = vld [vmem:[%s18056_s30 + $0x2f0] sm:$0xff]  }
 0x1ee   :  { %v15585_v26 = vpop.eup %15584  ;;  %v1515_v27 = vpop.f32.mrf.mxu1  ;;  %v14994_v28 = vld [vmem:[#allocation2 + $0x14] ss:$52 sps:$4 sm:$0xff]   ;;  %13320 = vmatpush3.bf16.msra.mxu1 %v14993_v19  ;;  %13341 = vmatprep.subr.bf16.mxu0 %v14996_v20 }
 0x1ef   :  { %1224 = vst [vmem:[#allocation2 + $0x4c] sm:$0xf] %v13007_v24  ;;  %v13012_v30 = vpack.c.bf16 %v15585_v26, %v15585_v26  ;;  %15598 = vtanh.f32 %v1515_v27  ;;  %3328 = vmatprep.mubr.bf16.mxu0 %v14994_v28  ;;  %13321 = vmatprep.subr.bf16.mxu1 %v14998_v23  ;;  %v15026_v20 = vld [vmem:[%s18056_s30 + $0x210] sm:$0xff]   ;;  %v15029_v23 = vld [vmem:[%s18056_s30 + $0x248] sm:$0xff]  }
 0x1f0   :  { %v15587_v33 = vpop.eup %15586  ;;  %v14192_v34 = vpop.f32.mrf.mxu1  ;;  %3329 = vmatmul.mubr.bf16.vlgmr.msra.gmra.mxu0 %v14997_v29  ;;  %v15028_v22 = vld [vmem:[%s18056_s30 + $0x2b0] sm:$0xff]   ;;  %v15032_v26 = vld [vmem:[%s18056_s30 + $0x2e8] sm:$0xff]  }
 0x1f1   :  { %1387 = vst [vmem:[#allocation2 + $0x84] sm:$0xf] %v13012_v30  ;;  %v13010_v37 = vpack.c.bf16 %v15587_v33, %v15587_v33  ;;  %15600 = vtanh.f32 %v14192_v34  ;;  %13342 = vmatpush3.bf16.msra.mxu0 %v14999_v25  ;;  %3336 = vmatprep.mubr.bf16.mxu0 %v15000_v35  ;;  %v15031_v30 = vld [vmem:[%s18056_s30 + $0x208] sm:$0xff]   ;;  %v15034_v33 = vld [vmem:[%s18056_s30 + $0x240] sm:$0xff]  }
 0x1f2   :  { %v15589_v38 = vpop.eup %15588  ;;  %v1674_v39 = vpop.f32.mrf.mxu1  ;;  %13322 = vmatpush3.bf16.msra.mxu1 %v15002_v31  ;;  %13343 = vmatprep.subr.bf16.mxu0 %v15003_v32  ;;  %v15033_v32 = vld [vmem:[%s18056_s30 + $0x2a8] sm:$0xff]  }
 0x1f3   :  { %1385 = vst [vmem:[#allocation2 + $0x1c] sm:$0xf] %v13010_v37  ;;  %v13013_v41 = vpack.c.bf16 %v15589_v38, %v15589_v38  ;;  %15602 = vtanh.f32 %v1674_v39  ;;  %13323 = vmatprep.subr.bf16.mxu1 %v15004_v36  ;;  %v15036_v37 = vld [vmem:[%s18056_s30 + $0x2e0] sm:$0xff]  }
 0x1f4   :  { %v15591_v44 = vpop.eup %15590  ;;  %v14193_v45 = vpop.f32.mrf.mxu1  ;;  %v15030_v36 = vld [vmem:[#allocation2 + $0x80] ss:$52 sps:$4 sm:$0xff]  }
 0x1f5   :  { %1388 = vst [vmem:[#allocation2 + $0xb8] sm:$0xf] %v13013_v41  ;;  %v13011_v47 = vpack.c.bf16 %v15591_v44, %v15591_v44  ;;  %15604 = vtanh.f32 %v14193_v45  ;;  %13344 = vmatpush3.bf16.msra.mxu0 %v15005_v40  ;;  %v15035_v41 = vld [vmem:[%s18056_s30 + $0x200] sm:$0xff]   ;;  %v15040_v44 = vld [vmem:[%s18056_s30 + $0x338] sm:$0xff]  }
 0x1f6   :  { %v15593_v48 = vpop.eup %15592  ;;  %v1677_v49 = vpop.f32.mrf.mxu1  ;;  %13324 = vmatpush3.bf16.msra.mxu1 %v15006_v42  ;;  %13345 = vmatprep.subr.bf16.mxu0 %v15007_v43  ;;  %v15019_v9 = vld [vmem:[#allocation2 + $0x18] ss:$52 sps:$4 sm:$0xff]   ;;  %v15037_v43 = vld [vmem:[%s18056_s30 + $0x2a0] sm:$0xff]  }
 0x1f7   :  { %1386 = vst [vmem:[#allocation2 + $0x50] sm:$0xf] %v13011_v47  ;;  %v13016_v51 = vpack.c.bf16 %v15593_v48, %v15593_v48  ;;  %15606 = vtanh.f32 %v1677_v49  ;;  %13325 = vmatprep.subr.bf16.mxu1 %v15009_v46  ;;  %v15042_v47 = vld [vmem:[%s18056_s30 + $0x2d8] sm:$0xff]  }
 0x1f8   :  { %v15595_v55 = vpop.eup %15594  ;;  %v14206_v56 = vpop.f32.mrf.mxu1  ;;  %3337 = vmatmul.mubr.bf16.gmra.mxu0 %v15008_v52 }
 0x1f9   :  { %1549 = vst [vmem:[#allocation2 + $0x88] sm:$0xf] %v13016_v51  ;;  %v13014_v58 = vpack.c.bf16 %v15595_v55, %v15595_v55  ;;  %15608 = vtanh.f32 %v14206_v56  ;;  %13346 = vmatpush3.bf16.msra.mxu0 %v15010_v50  ;;  %v15046_v55 = vld [vmem:[%s18056_s30 + $0x330] sm:$0xff]  }
 0x1fa   :  { %v15597_v59 = vpop.eup %15596  ;;  %v1836_v60 = vpop.f32.mrf.mxu1  ;;  %13326 = vmatpush3.bf16.msra.mxu1 %v15011_v53  ;;  %13347 = vmatprep.subr.bf16.mxu0 %v15012_v54  ;;  %v15045_v54 = vld [vmem:[%s18056_s30 + $0x298] sm:$0xff]  }
 0x1fb   :  { %1547 = vst [vmem:[#allocation2 + $0x20] sm:$0xf] %v13014_v58  ;;  %v13017_v62 = vpack.c.bf16 %v15597_v59, %v15597_v59  ;;  %15610 = vtanh.f32 %v1836_v60  ;;  %13327 = vmatprep.subr.bf16.mxu1 %v15013_v57  ;;  %v15047_v58 = vld [vmem:[%s18056_s30 + $0x2d0] sm:$0xff]  }
 0x1fc   :  { %v15599_v1 = vpop.eup %15598  ;;  %v14207_v2 = vpop.f32.mrf.mxu1  ;;  %v15022_v17 = vld [vmem:[#allocation2 + $0x84] ss:$52 sps:$4 sm:$0xff]  }
 0x1fd   :  { %1550 = vst [vmem:[#allocation2 + $0xbc] sm:$0xf] %v13017_v62  ;;  %v13015_v4 = vpack.c.bf16 %v15599_v1, %v15599_v1  ;;  %15612 = vtanh.f32 %v14207_v2  ;;  %13348 = vmatpush3.bf16.msra.mxu0 %v15014_v61  ;;  %v15048_v62 = vld [vmem:[%s18056_s30 + $0x290] sm:$0xff]   ;;  %v15051_v1 = vld [vmem:[%s18056_s30 + $0x2c8] sm:$0xff]  }
 0x1fe   :  { %v15601_v6 = vpop.eup %15600  ;;  %v1839_v7 = vpop.f32.mrf.mxu1  ;;  %v15016_v8 = vld [vmem:[#allocation2 + $0x1c] ss:$52 sps:$4 sm:$0xff]   ;;  %13328 = vmatpush3.bf16.msra.mxu1 %v15015_v63  ;;  %13349 = vmatprep.subr.bf16.mxu0 %v15018_v0  ;;  %v15049_v63 = vld [vmem:[%s18056_s30 + $0x328] sm:$0xff]  }
 0x1ff   :  { %1548 = vst [vmem:[#allocation2 + $0x54] sm:$0xf] %v13015_v4  ;;  %v13020_v10 = vpack.c.bf16 %v15601_v6, %v15601_v6  ;;  %15614 = vtanh.f32 %v1839_v7  ;;  %3377 = vmatprep.mubr.bf16.mxu1 %v15016_v8  ;;  %13369 = vmatprep.subr.bf16.mxu1 %v15021_v3  ;;  %v15052_v6 = vld [vmem:[%s18056_s30 + $0x288] sm:$0xff]   ;;  %v15053_v7 = vld [vmem:[%s18056_s30 + $0x320] sm:$0xff]  }
 0x200   :  { %v15603_v12 = vpop.eup %15602  ;;  %v14220_v13 = vpop.f32.mrf.mxu1 }
 0x201   :  { %1711 = vst [vmem:[#allocation2 + $0x8c] sm:$0xf] %v13020_v10  ;;  %v13018_v16 = vpack.c.bf16 %v15603_v12, %v15603_v12  ;;  %15616 = vtanh.f32 %v14220_v13  ;;  %3378 = vmatmul.mubr.bf16.vlgmr.msra.gmra.mxu1 %v15019_v9  ;;  %13350 = vmatpush3.bf16.msra.mxu0 %v15020_v5  ;;  %v15054_v9 = vld [vmem:[%s18056_s30 + $0x2c0] sm:$0xff]  }
 0x202   :  { %v15605_v18 = vpop.eup %15604  ;;  %v1998_v19 = vpop.f32.mrf.mxu1  ;;  %3385 = vmatprep.mubr.bf16.mxu1 %v15022_v17  ;;  %13370 = vmatpush3.bf16.msra.mxu1 %v15024_v11  ;;  %v15055_v13 = vld [vmem:[%s18056_s30 + $0x280] sm:$0xff]  }
 0x203   :  { %1709 = vst [vmem:[#allocation2 + $0x24] sm:$0xf] %v13018_v16  ;;  %v13021_v21 = vpack.c.bf16 %v15605_v18, %v15605_v18  ;;  %15618 = vtanh.f32 %v1998_v19  ;;  %13351 = vmatprep.subr.bf16.mxu0 %v15025_v14  ;;  %13371 = vmatprep.subr.bf16.mxu1 %v15027_v15  ;;  %v15058_v14 = vld [vmem:[%s18056_s30 + $0x318] sm:$0xff]   ;;  %v15062_v19 = vld [vmem:[%s18056_s30 + $0x310] sm:$0xff]  }
 0x204   :  { %v15607_v24 = vpop.eup %15606  ;;  %v14221_v25 = vpop.f32.mrf.mxu1  ;;  %v15050_v5 = vld [vmem:[#allocation2 + $0x88] ss:$52 sps:$4 sm:$0xff]  }
 0x205   :  { %1712 = vst [vmem:[#allocation2 + $0xc0] sm:$0xf] %v13021_v21  ;;  %v13019_v27 = vpack.c.bf16 %v15607_v24, %v15607_v24  ;;  %15620 = vtanh.f32 %v14221_v25  ;;  %13352 = vmatpush3.bf16.msra.mxu0 %v15026_v20  ;;  %v15063_v21 = vld [vmem:[%s18056_s30 + $0x308] sm:$0xff]  }
 0x206   :  { %v15609_v28 = vpop.eup %15608  ;;  %v2001_v29 = vpop.f32.mrf.mxu1  ;;  %13372 = vmatpush3.bf16.msra.mxu1 %v15028_v22  ;;  %13353 = vmatprep.subr.bf16.mxu0 %v15029_v23  ;;  %v15041_v52 = vld [vmem:[#allocation2 + $0x20] ss:$52 sps:$4 sm:$0xff]  }
 0x207   :  { %1710 = vst [vmem:[#allocation2 + $0x58] sm:$0xf] %v13019_v27  ;;  %v13024_v31 = vpack.c.bf16 %v15609_v28, %v15609_v28  ;;  %15622 = vtanh.f32 %v2001_v29  ;;  %13373 = vmatprep.subr.bf16.mxu1 %v15032_v26  ;;  %v15066_v23 = vld [vmem:[%s18056_s30 + $0x300] sm:$0xff]   ;;  %v15068_v26 = vld [vmem:[%s18057_s20 + $0x18] sm:$0xff]   ;;  %v15069_v27 = vld [vmem:[%s18057_s20 + $0x10] sm:$0xff]  }
 0x208   :  { %v15611_v34 = vpop.eup %15610  ;;  %v14234_v35 = vpop.f32.mrf.mxu1  ;;  %v15070_v28 = vld [vmem:[%s18057_s20 + $0x8] sm:$0xff]   ;;  %v15071_v29 = vld [vmem:[%s18057_s20] sm:$0xff]  }
 0x209   :  { %1873 = vst [vmem:[#allocation2 + $0x90] sm:$0xf] %v13024_v31  ;;  %v13022_v38 = vpack.c.bf16 %v15611_v34, %v15611_v34  ;;  %15624 = vtanh.f32 %v14234_v35  ;;  %3386 = vmatmul.mubr.bf16.gmra.mxu1 %v15030_v36  ;;  %13354 = vmatpush3.bf16.msra.mxu0 %v15031_v30  ;;  %v16576_v30 = vld [vmem:[%s18058_s8 + $0x18] sm:$0xff]  }
 0x20a   :  { %v15613_v39 = vpop.eup %15612  ;;  %v2160_v40 = vpop.f32.mrf.mxu1  ;;  %13374 = vmatpush3.bf16.msra.mxu1 %v15033_v32  ;;  %13355 = vmatprep.subr.bf16.mxu0 %v15034_v33 }
 0x20b   :  { %1871 = vst [vmem:[#allocation2 + $0x28] sm:$0xf] %v13022_v38  ;;  %v13025_v42 = vpack.c.bf16 %v15613_v39, %v15613_v39  ;;  %15626 = vtanh.f32 %v2160_v40  ;;  %13375 = vmatprep.subr.bf16.mxu1 %v15036_v37 }
 0x20c   :  { %v15615_v45 = vpop.eup %15614  ;;  %v14235_v46 = vpop.f32.mrf.mxu1  ;;  %v15043_v57 = vld [vmem:[#allocation2 + $0x8c] ss:$52 sps:$4 sm:$0xff]  }
 0x20d   :  { %1874 = vst [vmem:[#allocation2 + $0xc4] sm:$0xf] %v13025_v42  ;;  %v13023_v48 = vpack.c.bf16 %v15615_v45, %v15615_v45  ;;  %15628 = vtanh.f32 %v14235_v46  ;;  %13356 = vmatpush3.bf16.msra.mxu0 %v15035_v41 }
 0x20e   :  { %v15617_v49 = vpop.eup %15616  ;;  %v2163_v50 = vpop.f32.mrf.mxu1  ;;  %v15038_v51 = vld [vmem:[#allocation2 + $0x24] ss:$52 sps:$4 sm:$0xff]   ;;  %13376 = vmatpush3.bf16.msra.mxu1 %v15037_v43  ;;  %14236 = vmatprep.subr.bf16.mxu0 %v15040_v44 }
 0x20f   :  { %1872 = vst [vmem:[#allocation2 + $0x5c] sm:$0xf] %v13023_v48  ;;  %v13028_v53 = vpack.c.bf16 %v15617_v49, %v15617_v49  ;;  %15630 = vtanh.f32 %v2163_v50  ;;  %3426 = vmatprep.mubr.bf16.mxu0 %v15038_v51  ;;  %13377 = vmatprep.subr.bf16.mxu1 %v15042_v47 }
 0x210   :  { %v15619_v56 = vpop.eup %15618  ;;  %3427 = vmatmul.mubr.bf16.vlgmr.msra.gmra.mxu0 %v15041_v52 }
 0x211   :  { %2035 = vst [vmem:[#allocation2 + $0x94] sm:$0xf] %v13028_v53  ;;  %v13026_v59 = vpack.c.bf16 %v15619_v56, %v15619_v56  ;;  %14237 = vmatpush3.bf16.msra.mxu0 %v15040_v44  ;;  %3434 = vmatprep.mubr.bf16.mxu0 %v15043_v57 }
 0x212   :  { %v15621_v60 = vpop.eup %15620  ;;  %13378 = vmatpush3.bf16.msra.mxu1 %v15045_v54  ;;  %14238 = vmatprep.subr.bf16.mxu0 %v15046_v55 }
 0x213   :  { %2033 = vst [vmem:[#allocation2 + $0x2c] sm:$0xf] %v13026_v59  ;;  %v13029_v61 = vpack.c.bf16 %v15621_v60, %v15621_v60  ;;  %13379 = vmatprep.subr.bf16.mxu1 %v15047_v58 }
 0x214   :  { %v15623_v0 = vpop.eup %15622  ;;  %v15064_v24 = vld [vmem:[#allocation2 + $0x90] ss:$52 sps:$4 sm:$0xff]  }
 0x215   :  { %2036 = vst [vmem:[#allocation2 + $0xc8] sm:$0xf] %v13029_v61  ;;  %v13027_v2 = vpack.c.bf16 %v15623_v0, %v15623_v0  ;;  %14239 = vmatpush3.bf16.msra.mxu0 %v15046_v55 }
 0x216   :  { %v15625_v3 = vpop.eup %15624  ;;  %13380 = vmatpush3.bf16.msra.mxu1 %v15048_v62  ;;  %14240 = vmatprep.subr.bf16.mxu0 %v15049_v63  ;;  %v15059_v18 = vld [vmem:[#allocation2 + $0x28] ss:$52 sps:$4 sm:$0xff]  }
 0x217   :  { %2034 = vst [vmem:[#allocation2 + $0x60] sm:$0xf] %v13027_v2  ;;  %v13032_v4 = vpack.c.bf16 %v15625_v3, %v15625_v3  ;;  %13381 = vmatprep.subr.bf16.mxu1 %v15051_v1 }
 0x218   :  { %v15627_v8 = vpop.eup %15626  ;;  %3435 = vmatmul.mubr.bf16.gmra.mxu0 %v15050_v5 }
 0x219   :  { %2197 = vst [vmem:[#allocation2 + $0x98] sm:$0xf] %v13032_v4  ;;  %v13030_v10 = vpack.c.bf16 %v15627_v8, %v15627_v8  ;;  %14241 = vmatpush3.bf16.msra.mxu0 %v15049_v63 }
 0x21a   :  { %v15629_v11 = vpop.eup %15628  ;;  %13382 = vmatpush3.bf16.msra.mxu1 %v15052_v6  ;;  %14242 = vmatprep.subr.bf16.mxu0 %v15053_v7 }
 0x21b   :  { %2195 = vst [vmem:[#allocation2 + $0x30] sm:$0xf] %v13030_v10  ;;  %v13033_v12 = vpack.c.bf16 %v15629_v11, %v15629_v11  ;;  %13383 = vmatprep.subr.bf16.mxu1 %v15054_v9 }
 0x21c   :  { %v15631_v15 = vpop.eup %15630  ;;  %v15060_v20 = vld [vmem:[#allocation2 + $0x94] ss:$52 sps:$4 sm:$0xff]  }
 0x21d   :  { %2198 = vst [vmem:[#allocation2 + $0xcc] sm:$0xf] %v13033_v12  ;;  %v13031_v16 = vpack.c.bf16 %v15631_v15, %v15631_v15  ;;  %14243 = vmatpush3.bf16.msra.mxu0 %v15053_v7  ;;  %v11851_v12 = vld [vmem:[%s18059_s9] ss:$0 sm:$0xff] }
 0x21e   :  { %v15056_v17 = vld [vmem:[#allocation2 + $0x2c] ss:$52 sps:$4 sm:$0xff]   ;;  %13384 = vmatpush3.bf16.msra.mxu1 %v15055_v13  ;;  %14244 = vmatprep.subr.bf16.mxu0 %v15058_v14 }
 0x21f   :  { %2196 = vst [vmem:[#allocation2 + $0x64] sm:$0xf] %v13031_v16  ;;  %3475 = vmatprep.mubr.bf16.mxu1 %v15056_v17  ;;  %14256 = vmatprep.subr.bf16.mxu1 %v15068_v26 }
 0x221   :  { %3476 = vmatmul.mubr.bf16.vlgmr.msra.gmra.mxu1 %v15059_v18  ;;  %14245 = vmatpush3.bf16.msra.mxu0 %v15058_v14 }
 0x222   :  { %3483 = vmatprep.mubr.bf16.mxu1 %v15060_v20  ;;  %14246 = vmatprep.subr.bf16.mxu0 %v15062_v19 }
 0x223   :  { %14257 = vmatpush3.bf16.msra.mxu1 %v15068_v26 }
 0x224   :  { %v15067_v25 = vld [vmem:[#allocation2 + $0x98] ss:$52 sps:$4 sm:$0xff]   ;;  %14258 = vmatprep.subr.bf16.mxu1 %v15069_v27 }
 0x225   :  { %14247 = vmatpush3.bf16.msra.mxu0 %v15062_v19 }
 0x226   :  { %v15065_v22 = vld [vmem:[#allocation2 + $0x30] ss:$52 sps:$4 sm:$0xff]   ;;  %14248 = vmatprep.subr.bf16.mxu0 %v15063_v21 }
 0x227   :  { %14252 = vmatprep.mubr.bf16.mxu0 %v15065_v22  ;;  %14259 = vmatpush3.bf16.msra.mxu1 %v15069_v27 }
 0x228   :  { %14260 = vmatprep.subr.bf16.mxu1 %v15070_v28 }
 0x229   :  { %3484 = vmatmul.mubr.bf16.gmra.mxu1 %v15064_v24  ;;  %14249 = vmatpush3.bf16.msra.mxu0 %v15063_v21 }
 0x22a   :  { %14250 = vmatprep.subr.bf16.mxu0 %v15066_v23 }
 0x22b   :  { %14261 = vmatpush3.bf16.msra.mxu1 %v15070_v28 }
 0x22c   :  { %14262 = vmatprep.subr.bf16.mxu1 %v15071_v29 }
 0x22d   :  { %14251 = vmatpush3.bf16.msra.mxu0 %v15066_v23 }
 0x22f   :  { %14263 = vmatpush3.bf16.msra.mxu1 %v15071_v29 }
 0x230   :  { %14253 = vmatmul.mubr.bf16.vlgmr.msra.gmra.mxu0 %v15067_v25  ;;  %14268 = vmatprep.subr.bf16.mxu1 %v16576_v30 }
 0x290   :  { %v13245_v31 = vpop.f32.mrf.mxu0 }
 0x292   :  { %v13246_v32 = vpop.f32.mrf.mxu0 }
 0x293   :  { %v13247_v9 = vadd.f32 %v13246_v32, %v13245_v31 }
 0x294   :  { %v13248_v33 = vpop.f32.mrf.mxu0 }
 0x295   :  { %v3233_v22 = vadd.f32 %v13247_v9, %v11851_v12 }
 0x296   :  { %v13249_v34 = vpop.f32.mrf.mxu0 }
 0x297   :  { %v13250_v15 = vadd.f32 %v13249_v34, %v13248_v33 }
 0x298   :  { %v13251_v35 = vpop.f32.mrf.mxu0 }
 0x299   :  { %v3236_v32 = vadd.f32 %v13250_v15, %v11851_v12 }
 0x29a   :  { %v13252_v37 = vpop.f32.mrf.mxu0 }
 0x29b   :  { %v13253_v7 = vadd.f32 %v13252_v37, %v13251_v35 }
 0x29c   :  { %v13254_v39 = vpop.f32.mrf.mxu0 }
 0x29d   :  { %v3241_v18 = vadd.f32 %v13253_v7, %v11851_v12 }
 0x29e   :  { %v13255_v41 = vpop.f32.mrf.mxu0 }
 0x29f   :  { %v13256_v8 = vadd.f32 %v13255_v41, %v13254_v39 }
 0x2a0   :  { %v13273_v36 = vpop.f32.mrf.mxu1 }
 0x2a1   :  { %v3244_v19 = vadd.f32 %v13256_v8, %v11851_v12 }
 0x2a2   :  { %v13274_v38 = vpop.f32.mrf.mxu1 }
 0x2a3   :  { %v13275_v16 = vadd.f32 %v13274_v38, %v13273_v36 }
 0x2a4   :  { %v13276_v40 = vpop.f32.mrf.mxu1 }
 0x2a5   :  { %v3282_v35 = vadd.f32 %v13275_v16, %v3233_v22  ;;  %v15074_v16 = vld [vmem:[%s18058_s8 + $0x8] sm:$0xff]  }
 0x2a6   :  { %v13277_v42 = vpop.f32.mrf.mxu1 }
 0x2a7   :  { %v13278_v23 = vadd.f32 %v13277_v42, %v13276_v40 }
 0x2a8   :  { %v13279_v44 = vpop.f32.mrf.mxu1 }
 0x2aa   :  { %v13280_v46 = vpop.f32.mrf.mxu1 }
 0x2ab   :  { %v13281_v13 = vadd.f32 %v13280_v46, %v13279_v44  ;;  %v3285_v44 = vadd.f32 %v13278_v23, %v3236_v32 }
 0x2ac   :  { %v13282_v48 = vpop.f32.mrf.mxu1 }
 0x2ad   :  { %v3290_v27 = vadd.f32 %v13281_v13, %v3241_v18 }
 0x2ae   :  { %v13283_v50 = vpop.f32.mrf.mxu1 }
 0x2af   :  { %v13284_v14 = vadd.f32 %v13283_v50, %v13282_v48 }
 0x2b0   :  { %v13301_v43 = vpop.f32.mrf.mxu0 }
 0x2b1   :  { %v3293_v28 = vadd.f32 %v13284_v14, %v3244_v19 }
 0x2b2   :  { %v13302_v45 = vpop.f32.mrf.mxu0 }
 0x2b3   :  { %v13303_v24 = vadd.f32 %v13302_v45, %v13301_v43 }
 0x2b4   :  { %v13304_v47 = vpop.f32.mrf.mxu0 }
 0x2b5   :  { %v3331_v46 = vadd.f32 %v13303_v24, %v3282_v35 }
 0x2b6   :  { %v13305_v49 = vpop.f32.mrf.mxu0 }
 0x2b7   :  { %v13306_v37 = vadd.f32 %v13305_v49, %v13304_v47 }
 0x2b8   :  { %v13307_v51 = vpop.f32.mrf.mxu0 }
 0x2ba   :  { %v13308_v53 = vpop.f32.mrf.mxu0 }
 0x2bb   :  { %v13309_v20 = vadd.f32 %v13308_v53, %v13307_v51  ;;  %v3334_v51 = vadd.f32 %v13306_v37, %v3285_v44  ;;  %v15077_v37 = vld [vmem:[%s18058_s8 + $0x30] sm:$0xff]  }
 0x2bc   :  { %v13310_v55 = vpop.f32.mrf.mxu0 }
 0x2bd   :  { %v3339_v34 = vadd.f32 %v13309_v20, %v3290_v27  ;;  %v11982_v20 = vld [vmem:[%s18060_s6] ss:$0 sm:$0xff] }
 0x2be   :  { %v13311_v57 = vpop.f32.mrf.mxu0 }
 0x2bf   :  { %v13312_v21 = vadd.f32 %v13311_v57, %v13310_v55 }
 0x2c1   :  { %v13329_v52 = vpop.f32.mrf.mxu1  ;;  %v3342_v36 = vadd.f32 %v13312_v21, %v3293_v28 }
 0x2c3   :  { %v13330_v54 = vpop.f32.mrf.mxu1 }
 0x2c4   :  { %v13331_v39 = vadd.f32 %v13330_v54, %v13329_v52 }
 0x2c5   :  { %v13332_v56 = vpop.f32.mrf.mxu1 }
 0x2c6   :  { %v3380_v53 = vadd.f32 %v13331_v39, %v3331_v46  ;;  %v15078_v39 = vld [vmem:[%s18058_s8 + $0x28] sm:$0xff]  }
 0x2c7   :  { %v13333_v58 = vpop.f32.mrf.mxu1 }
 0x2c8   :  { %v13334_v48 = vadd.f32 %v13333_v58, %v13332_v56 }
 0x2c9   :  { %v13335_v61 = vpop.f32.mrf.mxu1 }
 0x2cb   :  { %v13336_v63 = vpop.f32.mrf.mxu1 }
 0x2cc   :  { %v13337_v29 = vadd.f32 %v13336_v63, %v13335_v61  ;;  %v3383_v63 = vadd.f32 %v13334_v48, %v3334_v51  ;;  %v15081_v51 = vld [vmem:[%s18054_s1 + $0x8] sm:$0xff]  }
 0x2cd   :  { %v13338_v1 = vpop.f32.mrf.mxu1 }
 0x2ce   :  { %v3388_v43 = vadd.f32 %v13337_v29, %v3339_v34  ;;  %v15080_v34 = vld [vmem:[%s18054_s1] sm:$0xff]  }
 0x2cf   :  { %v13339_v3 = vpop.f32.mrf.mxu1  ;;  %14284 = vmatprep.mubr.msk.bf16.mxu0 %vm175_vm1, %v15080_v34 }
 0x2d0   :  { %v13357_v59 = vpop.f32.mrf.mxu0  ;;  %v13340_v31 = vadd.f32 %v13339_v3, %v13338_v1 }
 0x2d2   :  { %v13358_v60 = vpop.f32.mrf.mxu0  ;;  %v3391_v45 = vadd.f32 %v13340_v31, %v3342_v36 }
 0x2d3   :  { %v13359_v40 = vadd.f32 %v13358_v60, %v13357_v59 }
 0x2d4   :  { %v13360_v62 = vpop.f32.mrf.mxu0 }
 0x2d5   :  { %v3429_v1 = vadd.f32 %v13359_v40, %v3380_v53  ;;  %v15082_v53 = vld [vmem:[%s18054_s1 + $0x10] sm:$0xff]  }
 0x2d6   :  { %v13361_v0 = vpop.f32.mrf.mxu0 }
 0x2d7   :  { %v13362_v55 = vadd.f32 %v13361_v0, %v13360_v62 }
 0x2d8   :  { %v13363_v2 = vpop.f32.mrf.mxu0 }
 0x2d9   :  { %v3432_v58 = vadd.f32 %v13362_v55, %v3383_v63 }
 0x2da   :  { %v13364_v4 = vpop.f32.mrf.mxu0 }
 0x2db   :  { %v13365_v38 = vadd.f32 %v13364_v4, %v13363_v2 }
 0x2dc   :  { %v13366_v10 = vpop.f32.mrf.mxu0 }
 0x2dd   :  { %v3437_v47 = vadd.f32 %v13365_v38, %v3388_v43  ;;  %v11989_v38 = vld [vmem:[%s18018_s10] ss:$0 sm:$0xff] }
 0x2de   :  { %v13367_v25 = vpop.f32.mrf.mxu0 }
 0x2df   :  { %v13368_v41 = vadd.f32 %v13367_v25, %v13366_v10 }
 0x2e1   :  { %v13385_v5 = vpop.f32.mrf.mxu1  ;;  %v3440_v49 = vadd.f32 %v13368_v41, %v3391_v45 }
 0x2e3   :  { %v13386_v6 = vpop.f32.mrf.mxu1 }
 0x2e4   :  { %v13387_v57 = vadd.f32 %v13386_v6, %v13385_v5 }
 0x2e5   :  { %v13388_v11 = vpop.f32.mrf.mxu1 }
 0x2e6   :  { %v3478_v59 = vadd.f32 %v13387_v57, %v3429_v1  ;;  %v12013_v57 = vld [vmem:[%s18018_s10 + $0x1] ss:$0 sm:$0xff] }
 0x2e7   :  { %v13389_v17 = vpop.f32.mrf.mxu1 }
 0x2e8   :  { %v13390_v2 = vadd.f32 %v13389_v17, %v13388_v11  ;;  %v15073_v11 = vld [vmem:[%s18058_s8 + $0x10] sm:$0xff]   ;;  %v15075_v17 = vld [vmem:[%s18058_s8] sm:$0xff]  }
 0x2e9   :  { %v13391_v26 = vpop.f32.mrf.mxu1 }
 0x2ea   :  { %v3481_v9 = vadd.f32 %v13390_v2, %v3432_v58  ;;  %v15085_v58 = vld [vmem:[%s18058_s8 + $0x50] sm:$0xff]  }
 0x2eb   :  { %v13392_v33 = vpop.f32.mrf.mxu1 }
 0x2ec   :  { %v13393_v50 = vadd.f32 %v13392_v33, %v13391_v26  ;;  %v15079_v33 = vld [vmem:[%s18058_s8 + $0x20] sm:$0xff]  }
 0x2ed   :  { %v13394_v42 = vpop.f32.mrf.mxu1 }
 0x2ee   :  { %v3486_v3 = vadd.f32 %v13393_v50, %v3437_v47 }
 0x2ef   :  { %v13395_v61 = vpop.f32.mrf.mxu1 }
 0x2f0   :  { %v13396_v52 = vadd.f32 %v13395_v61, %v13394_v42  ;;  %v14254_v54 = vpop.f32.mrf.mxu0 }
 0x2f1   :  { %v3535_v10 = vadd.f32 %v14254_v54, %v3486_v3 }
 0x2f2   :  { %v3526_v4 = vpop.f32.mrf.mxu0  ;;  %v3489_v56 = vadd.f32 %v13396_v52, %v3440_v49 }
 0x2f3   :  { %v3527_v7 = vadd.f32 %v3526_v4, %v3478_v59  ;;  %v3543_v13 = vmax.f32 %v3535_v10, 0.0  ;;  %v15084_v4 = vld [vmem:[%s18058_s8 + $0x58] sm:$0xff]   ;;  %v15086_v59 = vld [vmem:[%s18058_s8 + $0x48] sm:$0xff]  }
 0x2f4   :  { %v14255_v60 = vpop.f32.mrf.mxu0 }
 0x2f5   :  { %v3538_v8 = vadd.f32 %v14255_v60, %v3489_v56  ;;  %v3541_v6 = vmax.f32 %v3527_v7, 0.0  ;;  %v15083_v56 = vld [vmem:[%s18054_s1 + $0x18] sm:$0xff]   ;;  %v15087_v60 = vld [vmem:[%s18058_s8 + $0x40] sm:$0xff]  }
 0x2f6   :  { %v3529_v62 = vpop.f32.mrf.mxu0  ;;  %v15088_v7 = vld [vmem:[%s18054_s1 + $0x20] sm:$0xff]  }
 0x2f7   :  { %v3530_v0 = vadd.f32 %v3529_v62, %v3481_v9  ;;  %v3544_v5 = vmax.f32 %v3538_v8, 0.0 }
 0x2f9   :  { %v3542_v12 = vmax.f32 %v3530_v0, 0.0  ;;  %v3546_v15 = vpack.c.bf16 %v3544_v5, %v3543_v13 }
 0x2fb   :  { %v3545_v14 = vpack.c.bf16 %v3542_v12, %v3541_v6 }
 0x2fd   :  { %14264 = vmatprep.mubr.msk.bf16.mxu1 %vm3586_vm2, %v3545_v14 }
 0x2fe   :  { %14265 = vmatmul.mubr.msk.bf16.vlgmr.msra.gmra.mxu1 %vm3586_vm2, %v3546_v15 }
 0x2ff   :  { %14269 = vmatpush3.bf16.msra.mxu1 %v16576_v30  ;;  %v15076_v30 = vld [vmem:[%s18058_s8 + $0x38] sm:$0xff]  }
 0x300   :  { %14270 = vmatprep.subr.bf16.mxu1 %v15073_v11 }
 0x303   :  { %14271 = vmatpush3.bf16.msra.mxu1 %v15073_v11 }
 0x304   :  { %14272 = vmatprep.subr.bf16.mxu1 %v15074_v16 }
 0x307   :  { %14273 = vmatpush3.bf16.msra.mxu1 %v15074_v16 }
 0x308   :  { %14274 = vmatprep.subr.bf16.mxu1 %v15075_v17 }
 0x30b   :  { %14275 = vmatpush3.bf16.msra.mxu1 %v15075_v17 }
 0x30c   :  { %14288 = vmatprep.subr.bf16.mxu1 %v15076_v30 }
 0x3be   :  { %v14266_v18 = vpop.f32.mrf.mxu1 }
 0x3bf   :  { %v3636_v24 = vadd.f32 %v14266_v18, %v11982_v20 }
 0x3c0   :  { %v3627_v19 = vpop.f32.mrf.mxu1 }
 0x3c1   :  { %v3628_v22 = vadd.f32 %v11982_v20, %v3627_v19  ;;  %v3644_v31 = vmax.f32 %v3636_v24, 0.0 }
 0x3c2   :  { %v14267_v21 = vpop.f32.mrf.mxu1 }
 0x3c3   :  { %v3639_v23 = vadd.f32 %v14267_v21, %v11982_v20  ;;  %v3642_v28 = vmax.f32 %v3628_v22, 0.0 }
 0x3c4   :  { %v3630_v25 = vpop.f32.mrf.mxu1 }
 0x3c5   :  { %v3631_v26 = vadd.f32 %v11982_v20, %v3630_v25  ;;  %v3645_v27 = vmax.f32 %v3639_v23, 0.0  ;;  %v12041_v25 = vld [vmem:[%s18018_s10 + $0x2] ss:$0 sm:$0xff] }
 0x3c7   :  { %v3643_v29 = vmax.f32 %v3631_v26, 0.0  ;;  %v16602_v35 = vpack.c.bf16 %v3645_v27, %v3644_v31 }
 0x3c9   :  { %v16600_v32 = vpack.c.bf16 %v3643_v29, %v3642_v28 }
 0x3cb   :  { %14276 = vmatprep.mubr.msk.bf16.mxu1 %vm3586_vm2, %v16600_v32 }
 0x3cc   :  { %14277 = vmatmul.mubr.msk.bf16.vlgmr.msra.gmra.mxu1 %vm3586_vm2, %v16602_v35 }
 0x3cd   :  { %14289 = vmatpush3.bf16.msra.mxu1 %v15076_v30  ;;  %14296 = vmatprep.mubr.msk.bf16.mxu1 %vm3586_vm2, %v16600_v32 }
 0x3ce   :  { %14290 = vmatprep.subr.bf16.mxu1 %v15077_v37 }
 0x3d1   :  { %14291 = vmatpush3.bf16.msra.mxu1 %v15077_v37 }
 0x3d2   :  { %14292 = vmatprep.subr.bf16.mxu1 %v15078_v39 }
 0x3d5   :  { %14293 = vmatpush3.bf16.msra.mxu1 %v15078_v39 }
 0x3d6   :  { %14294 = vmatprep.subr.bf16.mxu1 %v15079_v33 }
 0x3d9   :  { %14295 = vmatpush3.bf16.msra.mxu1 %v15079_v33 }
 0x3dc   :  { %14297 = vmatmul.mubr.msk.bf16.vlgmr.msra.gmra.mxu1 %vm3586_vm2, %v16602_v35 }
 0x3dd   :  { %14324 = vmatprep.mubr.msk.bf16.mxu1 %vm175_vm1, %v15088_v7 }
 0x48c   :  { %v14278_v36 = vpop.f32.mrf.mxu1 }
 0x48d   :  { %v3736_v46 = vadd.f32 %v14278_v36, %v11989_v38 }
 0x48e   :  { %v3727_v41 = vpop.f32.mrf.mxu1 }
 0x48f   :  { %v3728_v42 = vadd.f32 %v11989_v38, %v3727_v41 }
 0x490   :  { %v14279_v44 = vpop.f32.mrf.mxu1 }
 0x491   :  { %v3739_v48 = vadd.f32 %v14279_v44, %v11989_v38  ;;  %v15090_v44 = vld [vmem:[%s18058_s8 + $0x78] sm:$0xff]  }
 0x492   :  { %v3730_v40 = vpop.f32.mrf.mxu1 }
 0x493   :  { %v3747_v43 = vpack.c.bf16 %v3739_v48, %v3736_v46  ;;  %v3731_v45 = vadd.f32 %v11989_v38, %v3730_v40  ;;  %v15089_v46 = vld [vmem:[%s18054_s1 + $0x28] sm:$0xff]   ;;  %v15091_v48 = vld [vmem:[%s18058_s8 + $0x70] sm:$0xff]  }
 0x494   :  { %v15092_v40 = vld [vmem:[%s18058_s8 + $0x68] sm:$0xff]  }
 0x495   :  { %v3746_v50 = vpack.c.bf16 %v3731_v45, %v3728_v42  ;;  %14280 = vmatprep.subr.bf16.mxu0 %v3747_v43  ;;  %v15093_v42 = vld [vmem:[%s18058_s8 + $0x60] sm:$0xff]  }
 0x496   :  { %14281 = vmatpush3.bf16.msra.mxu0 %v3747_v43  ;;  %v15094_v43 = vld [vmem:[%s18054_s1 + $0x30] sm:$0xff]  }
 0x497   :  { %14282 = vmatprep.subr.bf16.mxu0 %v3746_v50 }
 0x49a   :  { %14283 = vmatpush3.bf16.msra.mxu0 %v3746_v50 }
 0x49c   :  { %v14298_v55 = vpop.f32.mrf.mxu1 }
 0x49d   :  { %14285 = vmatmul.mubr.msk.bf16.vlgmr.msra.gmra.mxu0 %vm175_vm1, %v15081_v51  ;;  %v3921_v49 = vadd.f32 %v14298_v55, %v12013_v57 }
 0x49e   :  { %v3912_v61 = vpop.f32.mrf.mxu1  ;;  %14304 = vmatprep.mubr.msk.bf16.mxu0 %vm175_vm1, %v15082_v53 }
 0x49f   :  { %v3913_v63 = vadd.f32 %v12013_v57, %v3912_v61 }
 0x4a0   :  { %v14299_v47 = vpop.f32.mrf.mxu1 }
 0x4a1   :  { %v3924_v52 = vadd.f32 %v14299_v47, %v12013_v57 }
 0x4a2   :  { %v3915_v54 = vpop.f32.mrf.mxu1 }
 0x4a3   :  { %v3932_v1 = vpack.c.bf16 %v3924_v52, %v3921_v49  ;;  %v3916_v2 = vadd.f32 %v12013_v57, %v3915_v54  ;;  %v12069_v54 = vld [vmem:[%s18018_s10 + $0x3] ss:$0 sm:$0xff] }
 0x4a5   :  { %v3931_v3 = vpack.c.bf16 %v3916_v2, %v3913_v63  ;;  %14300 = vmatprep.subr.bf16.mxu0 %v3932_v1 }
 0x4a6   :  { %14301 = vmatpush3.bf16.msra.mxu0 %v3932_v1 }
 0x4a7   :  { %14302 = vmatprep.subr.bf16.mxu0 %v3931_v3 }
 0x4aa   :  { %14303 = vmatpush3.bf16.msra.mxu0 %v3931_v3 }
 0x4ab   :  { %14308 = vmatprep.subr.bf16.mxu0 %v15084_v4 }
 0x4ad   :  { %14305 = vmatmul.mubr.msk.bf16.vlgmr.msra.gmra.mxu0 %vm175_vm1, %v15083_v56 }
 0x4ae   :  { %14309 = vmatpush3.bf16.msra.mxu0 %v15084_v4  ;;  %14316 = vmatprep.mubr.msk.bf16.mxu0 %vm3586_vm2, %v16600_v32 }
 0x4af   :  { %14310 = vmatprep.subr.bf16.mxu0 %v15085_v58 }
 0x4b2   :  { %14311 = vmatpush3.bf16.msra.mxu0 %v15085_v58 }
 0x4b3   :  { %14312 = vmatprep.subr.bf16.mxu0 %v15086_v59 }
 0x4b6   :  { %14313 = vmatpush3.bf16.msra.mxu0 %v15086_v59 }
 0x4b7   :  { %14314 = vmatprep.subr.bf16.mxu0 %v15087_v60 }
 0x4ba   :  { %14315 = vmatpush3.bf16.msra.mxu0 %v15087_v60 }
 0x4bd   :  { %14317 = vmatmul.mubr.msk.bf16.vlgmr.msra.gmra.mxu0 %vm3586_vm2, %v16602_v35 }
 0x4be   :  { %14344 = vmatprep.mubr.msk.bf16.mxu0 %vm175_vm1, %v15094_v43 }
 0x55d   :  { %v14286_v8 = vpop.f32.mrf.mxu0 }
 0x55e   :  { %15632 = vtanh.f32 %v14286_v8 }
 0x55f   :  { %v3798_v9 = vpop.f32.mrf.mxu0 }
 0x560   :  { %15634 = vtanh.f32 %v3798_v9 }
 0x561   :  { %v14287_v10 = vpop.f32.mrf.mxu0 }
 0x562   :  { %15636 = vtanh.f32 %v14287_v10  ;;  %v15096_v10 = vld [vmem:[%s18058_s8 + $0x98] sm:$0xff]  }
 0x563   :  { %v3801_v62 = vpop.f32.mrf.mxu0 }
 0x564   :  { %15638 = vtanh.f32 %v3801_v62  ;;  %v15095_v62 = vld [vmem:[%s18054_s1 + $0x38] sm:$0xff]  }
 0x56b   :  { %v15633_v0 = vpop.eup %15632 }
 0x56c   :  { %v13036_v5 = vpack.c.bf16 %v15633_v0, %v15633_v0  ;;  %v15097_v0 = vld [vmem:[%s18058_s8 + $0x90] sm:$0xff]  }
 0x56d   :  { %v15635_v6 = vpop.eup %15634  ;;  %v14306_v12 = vpop.f32.mrf.mxu0 }
 0x56e   :  { %3835 = vst [vmem:[#allocation2 + $0x68] sm:$0xf] %v13036_v5  ;;  %v13034_v13 = vpack.c.bf16 %v15635_v6, %v15635_v6  ;;  %15640 = vtanh.f32 %v14306_v12  ;;  %v15098_v5 = vld [vmem:[%s18058_s8 + $0x88] sm:$0xff]   ;;  %v15099_v6 = vld [vmem:[%s18058_s8 + $0x80] sm:$0xff]  }
 0x56f   :  { %v15637_v14 = vpop.eup %15636  ;;  %v3983_v15 = vpop.f32.mrf.mxu0  ;;  %v15100_v12 = vld [vmem:[%s18054_s1 + $0x40] sm:$0xff]  }
 0x570   :  { %3833 = vst [vmem:[#allocation2] sm:$0xf] %v13034_v13  ;;  %v13037_v11 = vpack.c.bf16 %v15637_v14, %v15637_v14  ;;  %15642 = vtanh.f32 %v3983_v15 }
 0x571   :  { %v15639_v16 = vpop.eup %15638  ;;  %v14307_v17 = vpop.f32.mrf.mxu0 }
 0x572   :  { %3836 = vst [vmem:[#allocation2 + $0x9c] sm:$0xf] %v13037_v11  ;;  %v13035_v30 = vpack.c.bf16 %v15639_v16, %v15639_v16  ;;  %15644 = vtanh.f32 %v14307_v17 }
 0x573   :  { %v3986_v18 = vpop.f32.mrf.mxu0 }
 0x574   :  { %3834 = vst [vmem:[#allocation2 + $0x34] sm:$0xf] %v13035_v30  ;;  %15646 = vtanh.f32 %v3986_v18 }
 0x57b   :  { %v15641_v19 = vpop.eup %15640 }
 0x57c   :  { %v13040_v20 = vpack.c.bf16 %v15641_v19, %v15641_v19 }
 0x57d   :  { %v15643_v21 = vpop.eup %15642  ;;  %v14318_v22 = vpop.f32.mrf.mxu0 }
 0x57e   :  { %4020 = vst [vmem:[#allocation2 + $0x6c] sm:$0xf] %v13040_v20  ;;  %v13038_v23 = vpack.c.bf16 %v15643_v21, %v15643_v21  ;;  %v4106_v37 = vadd.f32 %v14318_v22, %v12041_v25  ;;  %v12097_v21 = vld [vmem:[%s18018_s10 + $0x4] ss:$0 sm:$0xff] }
 0x57f   :  { %v15645_v24 = vpop.eup %15644  ;;  %v4097_v26 = vpop.f32.mrf.mxu0 }
 0x580   :  { %4018 = vst [vmem:[#allocation2 + $0x4] sm:$0xf] %v13038_v23  ;;  %v13041_v27 = vpack.c.bf16 %v15645_v24, %v15645_v24  ;;  %v4098_v34 = vadd.f32 %v12041_v25, %v4097_v26 }
 0x581   :  { %v15647_v28 = vpop.eup %15646  ;;  %v14319_v29 = vpop.f32.mrf.mxu0 }
 0x582   :  { %4021 = vst [vmem:[#allocation2 + $0xa0] sm:$0xf] %v13041_v27  ;;  %v13039_v31 = vpack.c.bf16 %v15647_v28, %v15647_v28  ;;  %v4109_v39 = vadd.f32 %v14319_v29, %v12041_v25 }
 0x583   :  { %v4100_v33 = vpop.f32.mrf.mxu0 }
 0x584   :  { %4019 = vst [vmem:[#allocation2 + $0x38] sm:$0xf] %v13039_v31  ;;  %v4117_v36 = vpack.c.bf16 %v4109_v39, %v4106_v37  ;;  %v4101_v38 = vadd.f32 %v12041_v25, %v4100_v33 }
 0x586   :  { %v4116_v41 = vpack.c.bf16 %v4101_v38, %v4098_v34  ;;  %14320 = vmatprep.subr.bf16.mxu1 %v4117_v36  ;;  %v15102_v34 = vld [vmem:[%s18058_s8 + $0xb8] sm:$0xff]   ;;  %v15103_v38 = vld [vmem:[%s18058_s8 + $0xb0] sm:$0xff]  }
 0x587   :  { %14321 = vmatpush3.bf16.msra.mxu1 %v4117_v36  ;;  %v15101_v36 = vld [vmem:[%s18054_s1 + $0x48] sm:$0xff]  }
 0x588   :  { %14322 = vmatprep.subr.bf16.mxu1 %v4116_v41 }
 0x58b   :  { %14323 = vmatpush3.bf16.msra.mxu1 %v4116_v41  ;;  %v15104_v41 = vld [vmem:[%s18058_s8 + $0xa8] sm:$0xff]  }
 0x58c   :  { %14328 = vmatprep.subr.bf16.mxu1 %v15090_v44 }
 0x58e   :  { %14325 = vmatmul.mubr.msk.bf16.vlgmr.msra.gmra.mxu1 %vm175_vm1, %v15089_v46  ;;  %v15106_v46 = vld [vmem:[%s18054_s1 + $0x50] sm:$0xff]  }
 0x58f   :  { %14329 = vmatpush3.bf16.msra.mxu1 %v15090_v44  ;;  %14336 = vmatprep.mubr.msk.bf16.mxu1 %vm3586_vm2, %v16600_v32  ;;  %v15105_v44 = vld [vmem:[%s18058_s8 + $0xa0] sm:$0xff]  }
 0x590   :  { %14330 = vmatprep.subr.bf16.mxu1 %v15091_v48 }
 0x593   :  { %14331 = vmatpush3.bf16.msra.mxu1 %v15091_v48 }
 0x594   :  { %14332 = vmatprep.subr.bf16.mxu1 %v15092_v40 }
 0x597   :  { %14333 = vmatpush3.bf16.msra.mxu1 %v15092_v40 }
 0x598   :  { %14334 = vmatprep.subr.bf16.mxu1 %v15093_v42 }
 0x59b   :  { %14335 = vmatpush3.bf16.msra.mxu1 %v15093_v42 }
 0x59e   :  { %14337 = vmatmul.mubr.msk.bf16.vlgmr.msra.gmra.mxu1 %vm3586_vm2, %v16602_v35 }
 0x59f   :  { %14364 = vmatprep.mubr.msk.bf16.mxu1 %vm175_vm1, %v15100_v12 }
 0x64e   :  { %v14326_v45 = vpop.f32.mrf.mxu1 }
 0x64f   :  { %15648 = vtanh.f32 %v14326_v45 }
 0x650   :  { %v4168_v50 = vpop.f32.mrf.mxu1 }
 0x651   :  { %15650 = vtanh.f32 %v4168_v50 }
 0x652   :  { %v14327_v51 = vpop.f32.mrf.mxu1 }
 0x653   :  { %15652 = vtanh.f32 %v14327_v51 }
 0x654   :  { %v4171_v53 = vpop.f32.mrf.mxu1 }
 0x655   :  { %15654 = vtanh.f32 %v4171_v53 }
 0x65c   :  { %v15649_v55 = vpop.eup %15648 }
 0x65d   :  { %v13044_v57 = vpack.c.bf16 %v15649_v55, %v15649_v55 }
 0x65e   :  { %v15651_v61 = vpop.eup %15650  ;;  %v14338_v47 = vpop.f32.mrf.mxu1 }
 0x65f   :  { %4205 = vst [vmem:[#allocation2 + $0x70] sm:$0xf] %v13044_v57  ;;  %v13042_v49 = vpack.c.bf16 %v15651_v61, %v15651_v61  ;;  %v4291_v56 = vadd.f32 %v14338_v47, %v12069_v54  ;;  %v12125_v61 = vld [vmem:[%s18018_s10 + $0x5] ss:$0 sm:$0xff] }
 0x660   :  { %v15653_v52 = vpop.eup %15652  ;;  %v4282_v63 = vpop.f32.mrf.mxu1 }
 0x661   :  { %4203 = vst [vmem:[#allocation2 + $0x8] sm:$0xf] %v13042_v49  ;;  %v13045_v1 = vpack.c.bf16 %v15653_v52, %v15653_v52  ;;  %v4283_v60 = vadd.f32 %v12069_v54, %v4282_v63 }
 0x662   :  { %v15655_v2 = vpop.eup %15654  ;;  %v14339_v3 = vpop.f32.mrf.mxu1 }
 0x663   :  { %4206 = vst [vmem:[#allocation2 + $0xa4] sm:$0xf] %v13045_v1  ;;  %v13043_v4 = vpack.c.bf16 %v15655_v2, %v15655_v2  ;;  %v4294_v58 = vadd.f32 %v14339_v3, %v12069_v54 }
 0x664   :  { %v4285_v59 = vpop.f32.mrf.mxu1 }
 0x665   :  { %4204 = vst [vmem:[#allocation2 + $0x3c] sm:$0xf] %v13043_v4  ;;  %v4302_v7 = vpack.c.bf16 %v4294_v58, %v4291_v56  ;;  %v4286_v8 = vadd.f32 %v12069_v54, %v4285_v59 }
 0x667   :  { %v4301_v9 = vpack.c.bf16 %v4286_v8, %v4283_v60  ;;  %14340 = vmatprep.subr.bf16.mxu0 %v4302_v7  ;;  %v15108_v60 = vld [vmem:[%s18058_s8 + $0xd8] sm:$0xff]   ;;  %v15109_v8 = vld [vmem:[%s18058_s8 + $0xd0] sm:$0xff]  }
 0x668   :  { %14341 = vmatpush3.bf16.msra.mxu0 %v4302_v7  ;;  %v15107_v7 = vld [vmem:[%s18054_s1 + $0x58] sm:$0xff]  }
 0x669   :  { %14342 = vmatprep.subr.bf16.mxu0 %v4301_v9 }
 0x66c   :  { %14343 = vmatpush3.bf16.msra.mxu0 %v4301_v9  ;;  %v15110_v9 = vld [vmem:[%s18058_s8 + $0xc8] sm:$0xff]  }
 0x66d   :  { %14348 = vmatprep.subr.bf16.mxu0 %v15096_v10 }
 0x66f   :  { %14345 = vmatmul.mubr.msk.bf16.vlgmr.msra.gmra.mxu0 %vm175_vm1, %v15095_v62  ;;  %v15112_v62 = vld [vmem:[%s18054_s1 + $0x60] sm:$0xff]  }
 0x670   :  { %14349 = vmatpush3.bf16.msra.mxu0 %v15096_v10  ;;  %14356 = vmatprep.mubr.msk.bf16.mxu0 %vm3586_vm2, %v16600_v32  ;;  %v15111_v10 = vld [vmem:[%s18058_s8 + $0xc0] sm:$0xff]  }
 0x671   :  { %14350 = vmatprep.subr.bf16.mxu0 %v15097_v0 }
 0x674   :  { %14351 = vmatpush3.bf16.msra.mxu0 %v15097_v0 }
 0x675   :  { %14352 = vmatprep.subr.bf16.mxu0 %v15098_v5 }
 0x678   :  { %14353 = vmatpush3.bf16.msra.mxu0 %v15098_v5 }
 0x679   :  { %14354 = vmatprep.subr.bf16.mxu0 %v15099_v6 }
 0x67c   :  { %14355 = vmatpush3.bf16.msra.mxu0 %v15099_v6 }
 0x67f   :  { %14357 = vmatmul.mubr.msk.bf16.vlgmr.msra.gmra.mxu0 %vm3586_vm2, %v16602_v35 }
 0x680   :  { %14384 = vmatprep.mubr.msk.bf16.mxu0 %vm175_vm1, %v15106_v46 }
 0x72f   :  { %v14346_v13 = vpop.f32.mrf.mxu0 }
 0x730   :  { %15656 = vtanh.f32 %v14346_v13 }
 0x731   :  { %v4353_v14 = vpop.f32.mrf.mxu0 }
 0x732   :  { %15658 = vtanh.f32 %v4353_v14 }
 0x733   :  { %v14347_v15 = vpop.f32.mrf.mxu0 }
 0x734   :  { %15660 = vtanh.f32 %v14347_v15 }
 0x735   :  { %v4356_v11 = vpop.f32.mrf.mxu0 }
 0x736   :  { %15662 = vtanh.f32 %v4356_v11 }
 0x73d   :  { %v15657_v16 = vpop.eup %15656 }
 0x73e   :  { %v13048_v17 = vpack.c.bf16 %v15657_v16, %v15657_v16 }
 0x73f   :  { %v15659_v30 = vpop.eup %15658  ;;  %v14358_v18 = vpop.f32.mrf.mxu0 }
 0x740   :  { %4390 = vst [vmem:[#allocation2 + $0x74] sm:$0xf] %v13048_v17  ;;  %v13046_v19 = vpack.c.bf16 %v15659_v30, %v15659_v30  ;;  %v4476_v27 = vadd.f32 %v14358_v18, %v12097_v21  ;;  %v12153_v30 = vld [vmem:[%s18018_s10 + $0x6] ss:$0 sm:$0xff] }
 0x741   :  { %v15661_v20 = vpop.eup %15660  ;;  %v4467_v22 = vpop.f32.mrf.mxu0 }
 0x742   :  { %4388 = vst [vmem:[#allocation2 + $0xc] sm:$0xf] %v13046_v19  ;;  %v13049_v23 = vpack.c.bf16 %v15661_v20, %v15661_v20  ;;  %v4468_v31 = vadd.f32 %v12097_v21, %v4467_v22 }
 0x743   :  { %v15663_v24 = vpop.eup %15662  ;;  %v14359_v25 = vpop.f32.mrf.mxu0 }
 0x744   :  { %4391 = vst [vmem:[#allocation2 + $0xa8] sm:$0xf] %v13049_v23  ;;  %v13047_v26 = vpack.c.bf16 %v15663_v24, %v15663_v24  ;;  %v4479_v28 = vadd.f32 %v14359_v25, %v12097_v21 }
 0x745   :  { %v4470_v29 = vpop.f32.mrf.mxu0 }
 0x746   :  { %4389 = vst [vmem:[#allocation2 + $0x40] sm:$0xf] %v13047_v26  ;;  %v4487_v37 = vpack.c.bf16 %v4479_v28, %v4476_v27  ;;  %v4471_v39 = vadd.f32 %v12097_v21, %v4470_v29 }
 0x748   :  { %v4486_v33 = vpack.c.bf16 %v4471_v39, %v4468_v31  ;;  %14360 = vmatprep.subr.bf16.mxu1 %v4487_v37  ;;  %v15114_v31 = vld [vmem:[%s18058_s8 + $0xf8] sm:$0xff]   ;;  %v15115_v39 = vld [vmem:[%s18058_s8 + $0xf0] sm:$0xff]  }
 0x749   :  { %14361 = vmatpush3.bf16.msra.mxu1 %v4487_v37  ;;  %v15113_v37 = vld [vmem:[%s18054_s1 + $0x68] sm:$0xff]  }
 0x74a   :  { %14362 = vmatprep.subr.bf16.mxu1 %v4486_v33 }
 0x74d   :  { %14363 = vmatpush3.bf16.msra.mxu1 %v4486_v33  ;;  %v15116_v33 = vld [vmem:[%s18058_s8 + $0xe8] sm:$0xff]  }
 0x74e   :  { %14368 = vmatprep.subr.bf16.mxu1 %v15102_v34 }
 0x750   :  { %14365 = vmatmul.mubr.msk.bf16.vlgmr.msra.gmra.mxu1 %vm175_vm1, %v15101_v36  ;;  %v15118_v36 = vld [vmem:[%s18054_s1 + $0x70] sm:$0xff]  }
 0x751   :  { %14369 = vmatpush3.bf16.msra.mxu1 %v15102_v34  ;;  %14376 = vmatprep.mubr.msk.bf16.mxu1 %vm3586_vm2, %v16600_v32  ;;  %v15117_v34 = vld [vmem:[%s18058_s8 + $0xe0] sm:$0xff]  }
 0x752   :  { %14370 = vmatprep.subr.bf16.mxu1 %v15103_v38 }
 0x755   :  { %14371 = vmatpush3.bf16.msra.mxu1 %v15103_v38 }
 0x756   :  { %14372 = vmatprep.subr.bf16.mxu1 %v15104_v41 }
 0x759   :  { %14373 = vmatpush3.bf16.msra.mxu1 %v15104_v41 }
 0x75a   :  { %14374 = vmatprep.subr.bf16.mxu1 %v15105_v44 }
 0x75d   :  { %14375 = vmatpush3.bf16.msra.mxu1 %v15105_v44 }
 0x760   :  { %14377 = vmatmul.mubr.msk.bf16.vlgmr.msra.gmra.mxu1 %vm3586_vm2, %v16602_v35 }
 0x761   :  { %14404 = vmatprep.mubr.msk.bf16.mxu1 %vm175_vm1, %v15112_v62 }
 0x810   :  { %v14366_v48 = vpop.f32.mrf.mxu1 }
 0x811   :  { %15664 = vtanh.f32 %v14366_v48 }
 0x812   :  { %v4538_v40 = vpop.f32.mrf.mxu1 }
 0x813   :  { %15666 = vtanh.f32 %v4538_v40 }
 0x814   :  { %v14367_v42 = vpop.f32.mrf.mxu1 }
 0x815   :  { %15668 = vtanh.f32 %v14367_v42 }
 0x816   :  { %v4541_v43 = vpop.f32.mrf.mxu1 }
 0x817   :  { %15670 = vtanh.f32 %v4541_v43 }
 0x81e   :  { %v15665_v45 = vpop.eup %15664 }
 0x81f   :  { %v13052_v50 = vpack.c.bf16 %v15665_v45, %v15665_v45 }
 0x820   :  { %v15667_v51 = vpop.eup %15666  ;;  %v14378_v53 = vpop.f32.mrf.mxu1 }
 0x821   :  { %4575 = vst [vmem:[#allocation2 + $0x78] sm:$0xf] %v13052_v50  ;;  %v13050_v55 = vpack.c.bf16 %v15667_v51, %v15667_v51  ;;  %v4661_v1 = vadd.f32 %v14378_v53, %v12125_v61  ;;  %v12181_v51 = vld [vmem:[%s18018_s10 + $0x7] ss:$0 sm:$0xff] }
 0x822   :  { %v15669_v57 = vpop.eup %15668  ;;  %v4652_v47 = vpop.f32.mrf.mxu1 }
 0x823   :  { %4573 = vst [vmem:[#allocation2 + $0x10] sm:$0xf] %v13050_v55  ;;  %v13053_v49 = vpack.c.bf16 %v15669_v57, %v15669_v57  ;;  %v4653_v4 = vadd.f32 %v12125_v61, %v4652_v47 }
 0x824   :  { %v15671_v52 = vpop.eup %15670  ;;  %v14379_v54 = vpop.f32.mrf.mxu1 }
 0x825   :  { %4576 = vst [vmem:[#allocation2 + $0xac] sm:$0xf] %v13053_v49  ;;  %v13051_v63 = vpack.c.bf16 %v15671_v52, %v15671_v52  ;;  %v4664_v2 = vadd.f32 %v14379_v54, %v12125_v61 }
 0x826   :  { %v4655_v3 = vpop.f32.mrf.mxu1 }
 0x827   :  { %4574 = vst [vmem:[#allocation2 + $0x44] sm:$0xf] %v13051_v63  ;;  %v4672_v56 = vpack.c.bf16 %v4664_v2, %v4661_v1  ;;  %v4656_v58 = vadd.f32 %v12125_v61, %v4655_v3 }
 0x829   :  { %v4671_v59 = vpack.c.bf16 %v4656_v58, %v4653_v4  ;;  %14380 = vmatprep.subr.bf16.mxu0 %v4672_v56  ;;  %v15120_v4 = vld [vmem:[%s18058_s8 + $0x118] sm:$0xff]   ;;  %v15121_v58 = vld [vmem:[%s18058_s8 + $0x110] sm:$0xff]  }
 0x82a   :  { %14381 = vmatpush3.bf16.msra.mxu0 %v4672_v56  ;;  %v15119_v56 = vld [vmem:[%s18054_s1 + $0x78] sm:$0xff]  }
 0x82b   :  { %14382 = vmatprep.subr.bf16.mxu0 %v4671_v59 }
 0x82e   :  { %14383 = vmatpush3.bf16.msra.mxu0 %v4671_v59  ;;  %v15122_v59 = vld [vmem:[%s18058_s8 + $0x108] sm:$0xff]  }
 0x82f   :  { %14388 = vmatprep.subr.bf16.mxu0 %v15108_v60 }
 0x831   :  { %14385 = vmatmul.mubr.msk.bf16.vlgmr.msra.gmra.mxu0 %vm175_vm1, %v15107_v7  ;;  %v15124_v7 = vld [vmem:[%s18054_s1 + $0x80] sm:$0xff]  }
 0x832   :  { %14389 = vmatpush3.bf16.msra.mxu0 %v15108_v60  ;;  %14396 = vmatprep.mubr.msk.bf16.mxu0 %vm3586_vm2, %v16600_v32  ;;  %v15123_v60 = vld [vmem:[%s18058_s8 + $0x100] sm:$0xff]  }
 0x833   :  { %14390 = vmatprep.subr.bf16.mxu0 %v15109_v8 }
 0x836   :  { %14391 = vmatpush3.bf16.msra.mxu0 %v15109_v8 }
 0x837   :  { %14392 = vmatprep.subr.bf16.mxu0 %v15110_v9 }
 0x83a   :  { %14393 = vmatpush3.bf16.msra.mxu0 %v15110_v9 }
 0x83b   :  { %14394 = vmatprep.subr.bf16.mxu0 %v15111_v10 }
 0x83e   :  { %14395 = vmatpush3.bf16.msra.mxu0 %v15111_v10 }
 0x841   :  { %14397 = vmatmul.mubr.msk.bf16.vlgmr.msra.gmra.mxu0 %vm3586_vm2, %v16602_v35 }
 0x842   :  { %14424 = vmatprep.mubr.msk.bf16.mxu0 %vm175_vm1, %v15118_v36 }
 0x8f1   :  { %v14386_v0 = vpop.f32.mrf.mxu0 }
 0x8f2   :  { %15672 = vtanh.f32 %v14386_v0 }
 0x8f3   :  { %v4723_v5 = vpop.f32.mrf.mxu0 }
 0x8f4   :  { %15674 = vtanh.f32 %v4723_v5 }
 0x8f5   :  { %v14387_v6 = vpop.f32.mrf.mxu0 }
 0x8f6   :  { %15676 = vtanh.f32 %v14387_v6 }
 0x8f7   :  { %v4726_v12 = vpop.f32.mrf.mxu0 }
 0x8f8   :  { %15678 = vtanh.f32 %v4726_v12 }
 0x8ff   :  { %v15673_v13 = vpop.eup %15672 }
 0x900   :  { %v13056_v14 = vpack.c.bf16 %v15673_v13, %v15673_v13 }
 0x901   :  { %v15675_v15 = vpop.eup %15674  ;;  %v14398_v11 = vpop.f32.mrf.mxu0 }
 0x902   :  { %4760 = vst [vmem:[#allocation2 + $0x7c] sm:$0xf] %v13056_v14  ;;  %v13054_v16 = vpack.c.bf16 %v15675_v15, %v15675_v15  ;;  %v4846_v23 = vadd.f32 %v14398_v11, %v12153_v30  ;;  %v12209_v15 = vld [vmem:[%s18018_s10 + $0x8] ss:$0 sm:$0xff] }
 0x903   :  { %v15677_v17 = vpop.eup %15676  ;;  %v4837_v18 = vpop.f32.mrf.mxu0 }
 0x904   :  { %4758 = vst [vmem:[#allocation2 + $0x14] sm:$0xf] %v13054_v16  ;;  %v13057_v19 = vpack.c.bf16 %v15677_v17, %v15677_v17  ;;  %v4838_v26 = vadd.f32 %v12153_v30, %v4837_v18 }
 0x905   :  { %v15679_v20 = vpop.eup %15678  ;;  %v14399_v21 = vpop.f32.mrf.mxu0 }
 0x906   :  { %4761 = vst [vmem:[#allocation2 + $0xb0] sm:$0xf] %v13057_v19  ;;  %v13055_v22 = vpack.c.bf16 %v15679_v20, %v15679_v20  ;;  %v4849_v24 = vadd.f32 %v14399_v21, %v12153_v30 }
 0x907   :  { %v4840_v25 = vpop.f32.mrf.mxu0 }
 0x908   :  { %4759 = vst [vmem:[#allocation2 + $0x48] sm:$0xf] %v13055_v22  ;;  %v4857_v27 = vpack.c.bf16 %v4849_v24, %v4846_v23  ;;  %v4841_v28 = vadd.f32 %v12153_v30, %v4840_v25 }
 0x90a   :  { %v4856_v29 = vpack.c.bf16 %v4841_v28, %v4838_v26  ;;  %14400 = vmatprep.subr.bf16.mxu1 %v4857_v27  ;;  %v15126_v26 = vld [vmem:[%s18058_s8 + $0x138] sm:$0xff]   ;;  %v15127_v28 = vld [vmem:[%s18058_s8 + $0x130] sm:$0xff]  }
 0x90b   :  { %14401 = vmatpush3.bf16.msra.mxu1 %v4857_v27  ;;  %v15125_v27 = vld [vmem:[%s18054_s1 + $0x88] sm:$0xff]  }
 0x90c   :  { %14402 = vmatprep.subr.bf16.mxu1 %v4856_v29 }
 0x90f   :  { %14403 = vmatpush3.bf16.msra.mxu1 %v4856_v29  ;;  %v15128_v29 = vld [vmem:[%s18058_s8 + $0x128] sm:$0xff]  }
 0x910   :  { %14408 = vmatprep.subr.bf16.mxu1 %v15114_v31 }
 0x912   :  { %14405 = vmatmul.mubr.msk.bf16.vlgmr.msra.gmra.mxu1 %vm175_vm1, %v15113_v37  ;;  %v15130_v37 = vld [vmem:[%s18054_s1 + $0x90] sm:$0xff]  }
 0x913   :  { %14409 = vmatpush3.bf16.msra.mxu1 %v15114_v31  ;;  %14416 = vmatprep.mubr.msk.bf16.mxu1 %vm3586_vm2, %v16600_v32  ;;  %v15129_v31 = vld [vmem:[%s18058_s8 + $0x120] sm:$0xff]  }
 0x914   :  { %14410 = vmatprep.subr.bf16.mxu1 %v15115_v39 }
 0x917   :  { %14411 = vmatpush3.bf16.msra.mxu1 %v15115_v39 }
 0x918   :  { %14412 = vmatprep.subr.bf16.mxu1 %v15116_v33 }
 0x91b   :  { %14413 = vmatpush3.bf16.msra.mxu1 %v15116_v33 }
 0x91c   :  { %14414 = vmatprep.subr.bf16.mxu1 %v15117_v34 }
 0x91f   :  { %14415 = vmatpush3.bf16.msra.mxu1 %v15117_v34 }
 0x922   :  { %14417 = vmatmul.mubr.msk.bf16.vlgmr.msra.gmra.mxu1 %vm3586_vm2, %v16602_v35 }
 0x923   :  { %14444 = vmatprep.mubr.msk.bf16.mxu1 %vm175_vm1, %v15124_v7 }
 0x9d2   :  { %v14406_v38 = vpop.f32.mrf.mxu1 }
 0x9d3   :  { %15680 = vtanh.f32 %v14406_v38 }
 0x9d4   :  { %v4908_v41 = vpop.f32.mrf.mxu1 }
 0x9d5   :  { %15682 = vtanh.f32 %v4908_v41 }
 0x9d6   :  { %v14407_v44 = vpop.f32.mrf.mxu1 }
 0x9d7   :  { %15684 = vtanh.f32 %v14407_v44 }
 0x9d8   :  { %v4911_v46 = vpop.f32.mrf.mxu1 }
 0x9d9   :  { %15686 = vtanh.f32 %v4911_v46 }
 0x9e0   :  { %v15681_v48 = vpop.eup %15680 }
 0x9e1   :  { %v13060_v40 = vpack.c.bf16 %v15681_v48, %v15681_v48 }
 0x9e2   :  { %v15683_v42 = vpop.eup %15682  ;;  %v14418_v43 = vpop.f32.mrf.mxu1 }
 0x9e3   :  { %4945 = vst [vmem:[#allocation2 + $0x80] sm:$0xf] %v13060_v40  ;;  %v13058_v45 = vpack.c.bf16 %v15683_v42, %v15683_v42  ;;  %v5031_v49 = vadd.f32 %v14418_v43, %v12181_v51  ;;  %v12237_v42 = vld [vmem:[%s18018_s10 + $0x9] ss:$0 sm:$0xff] }
 0x9e4   :  { %v15685_v50 = vpop.eup %15684  ;;  %v5022_v53 = vpop.f32.mrf.mxu1 }
 0x9e5   :  { %4943 = vst [vmem:[#allocation2 + $0x18] sm:$0xf] %v13058_v45  ;;  %v13061_v55 = vpack.c.bf16 %v15685_v50, %v15685_v50  ;;  %v5023_v63 = vadd.f32 %v12181_v51, %v5022_v53 }
 0x9e6   :  { %v15687_v57 = vpop.eup %15686  ;;  %v14419_v61 = vpop.f32.mrf.mxu1 }
 0x9e7   :  { %4946 = vst [vmem:[#allocation2 + $0xb4] sm:$0xf] %v13061_v55  ;;  %v13059_v47 = vpack.c.bf16 %v15687_v57, %v15687_v57  ;;  %v5034_v52 = vadd.f32 %v14419_v61, %v12181_v51 }
 0x9e8   :  { %v5025_v54 = vpop.f32.mrf.mxu1 }
 0x9e9   :  { %4944 = vst [vmem:[#allocation2 + $0x4c] sm:$0xf] %v13059_v47  ;;  %v5042_v1 = vpack.c.bf16 %v5034_v52, %v5031_v49  ;;  %v5026_v2 = vadd.f32 %v12181_v51, %v5025_v54 }
 0x9eb   :  { %v5041_v3 = vpack.c.bf16 %v5026_v2, %v5023_v63  ;;  %14420 = vmatprep.subr.bf16.mxu0 %v5042_v1  ;;  %v15132_v63 = vld [vmem:[%s18058_s8 + $0x158] sm:$0xff]   ;;  %v15133_v2 = vld [vmem:[%s18058_s8 + $0x150] sm:$0xff]  }
 0x9ec   :  { %14421 = vmatpush3.bf16.msra.mxu0 %v5042_v1  ;;  %v15131_v1 = vld [vmem:[%s18054_s1 + $0x98] sm:$0xff]  }
 0x9ed   :  { %14422 = vmatprep.subr.bf16.mxu0 %v5041_v3 }
 0x9f0   :  { %14423 = vmatpush3.bf16.msra.mxu0 %v5041_v3  ;;  %v15134_v3 = vld [vmem:[%s18058_s8 + $0x148] sm:$0xff]  }
 0x9f1   :  { %14428 = vmatprep.subr.bf16.mxu0 %v15120_v4 }
 0x9f3   :  { %14425 = vmatmul.mubr.msk.bf16.vlgmr.msra.gmra.mxu0 %vm175_vm1, %v15119_v56  ;;  %v15136_v56 = vld [vmem:[%s18054_s1 + $0xa0] sm:$0xff]  }
 0x9f4   :  { %14429 = vmatpush3.bf16.msra.mxu0 %v15120_v4  ;;  %14436 = vmatprep.mubr.msk.bf16.mxu0 %vm3586_vm2, %v16600_v32  ;;  %v15135_v4 = vld [vmem:[%s18058_s8 + $0x140] sm:$0xff]  }
 0x9f5   :  { %14430 = vmatprep.subr.bf16.mxu0 %v15121_v58 }
 0x9f8   :  { %14431 = vmatpush3.bf16.msra.mxu0 %v15121_v58 }
 0x9f9   :  { %14432 = vmatprep.subr.bf16.mxu0 %v15122_v59 }
 0x9fc   :  { %14433 = vmatpush3.bf16.msra.mxu0 %v15122_v59 }
 0x9fd   :  { %14434 = vmatprep.subr.bf16.mxu0 %v15123_v60 }
 0xa00   :  { %14435 = vmatpush3.bf16.msra.mxu0 %v15123_v60 }
 0xa03   :  { %14437 = vmatmul.mubr.msk.bf16.vlgmr.msra.gmra.mxu0 %vm3586_vm2, %v16602_v35 }
 0xa04   :  { %14464 = vmatprep.mubr.msk.bf16.mxu0 %vm175_vm1, %v15130_v37 }
 0xab3   :  { %v14426_v8 = vpop.f32.mrf.mxu0 }
 0xab4   :  { %15688 = vtanh.f32 %v14426_v8 }
 0xab5   :  { %v5093_v9 = vpop.f32.mrf.mxu0 }
 0xab6   :  { %15690 = vtanh.f32 %v5093_v9 }
 0xab7   :  { %v14427_v10 = vpop.f32.mrf.mxu0 }
 0xab8   :  { %15692 = vtanh.f32 %v14427_v10 }
 0xab9   :  { %v5096_v62 = vpop.f32.mrf.mxu0 }
 0xaba   :  { %15694 = vtanh.f32 %v5096_v62 }
 0xac1   :  { %v15689_v0 = vpop.eup %15688 }
 0xac2   :  { %v13064_v5 = vpack.c.bf16 %v15689_v0, %v15689_v0 }
 0xac3   :  { %v15691_v6 = vpop.eup %15690  ;;  %v14438_v12 = vpop.f32.mrf.mxu0 }
 0xac4   :  { %5130 = vst [vmem:[#allocation2 + $0x84] sm:$0xf] %v13064_v5  ;;  %v13062_v13 = vpack.c.bf16 %v15691_v6, %v15691_v6  ;;  %v5216_v19 = vadd.f32 %v14438_v12, %v12209_v15  ;;  %v12265_v6 = vld [vmem:[%s18018_s10 + $0xa] ss:$0 sm:$0xff] }
 0xac5   :  { %v15693_v14 = vpop.eup %15692  ;;  %v5207_v11 = vpop.f32.mrf.mxu0 }
 0xac6   :  { %5128 = vst [vmem:[#allocation2 + $0x1c] sm:$0xf] %v13062_v13  ;;  %v13065_v16 = vpack.c.bf16 %v15693_v14, %v15693_v14  ;;  %v5208_v22 = vadd.f32 %v12209_v15, %v5207_v11 }
 0xac7   :  { %v15695_v17 = vpop.eup %15694  ;;  %v14439_v30 = vpop.f32.mrf.mxu0 }
 0xac8   :  { %5131 = vst [vmem:[#allocation2 + $0xb8] sm:$0xf] %v13065_v16  ;;  %v13063_v18 = vpack.c.bf16 %v15695_v17, %v15695_v17  ;;  %v5219_v20 = vadd.f32 %v14439_v30, %v12209_v15 }
 0xac9   :  { %v5210_v21 = vpop.f32.mrf.mxu0 }
 0xaca   :  { %5129 = vst [vmem:[#allocation2 + $0x50] sm:$0xf] %v13063_v18  ;;  %v5227_v23 = vpack.c.bf16 %v5219_v20, %v5216_v19  ;;  %v5211_v24 = vadd.f32 %v12209_v15, %v5210_v21 }
 0xacc   :  { %v5226_v25 = vpack.c.bf16 %v5211_v24, %v5208_v22  ;;  %14440 = vmatprep.subr.bf16.mxu1 %v5227_v23  ;;  %v15138_v22 = vld [vmem:[%s18058_s8 + $0x178] sm:$0xff]   ;;  %v15139_v24 = vld [vmem:[%s18058_s8 + $0x170] sm:$0xff]  }
 0xacd   :  { %14441 = vmatpush3.bf16.msra.mxu1 %v5227_v23  ;;  %v15137_v23 = vld [vmem:[%s18054_s1 + $0xa8] sm:$0xff]  }
 0xace   :  { %14442 = vmatprep.subr.bf16.mxu1 %v5226_v25 }
 0xad1   :  { %14443 = vmatpush3.bf16.msra.mxu1 %v5226_v25  ;;  %v15140_v25 = vld [vmem:[%s18058_s8 + $0x168] sm:$0xff]  }
 0xad2   :  { %14448 = vmatprep.subr.bf16.mxu1 %v15126_v26 }
 0xad4   :  { %14445 = vmatmul.mubr.msk.bf16.vlgmr.msra.gmra.mxu1 %vm175_vm1, %v15125_v27  ;;  %v15142_v27 = vld [vmem:[%s18054_s1 + $0xb0] sm:$0xff]  }
 0xad5   :  { %14449 = vmatpush3.bf16.msra.mxu1 %v15126_v26  ;;  %14456 = vmatprep.mubr.msk.bf16.mxu1 %vm3586_vm2, %v16600_v32  ;;  %v15141_v26 = vld [vmem:[%s18058_s8 + $0x160] sm:$0xff]  }
 0xad6   :  { %14450 = vmatprep.subr.bf16.mxu1 %v15127_v28 }
 0xad9   :  { %14451 = vmatpush3.bf16.msra.mxu1 %v15127_v28 }
 0xada   :  { %14452 = vmatprep.subr.bf16.mxu1 %v15128_v29 }
 0xadd   :  { %14453 = vmatpush3.bf16.msra.mxu1 %v15128_v29 }
 0xade   :  { %14454 = vmatprep.subr.bf16.mxu1 %v15129_v31 }
 0xae1   :  { %14455 = vmatpush3.bf16.msra.mxu1 %v15129_v31 }
 0xae4   :  { %14457 = vmatmul.mubr.msk.bf16.vlgmr.msra.gmra.mxu1 %vm3586_vm2, %v16602_v35 }
 0xae5   :  { %14484 = vmatprep.mubr.msk.bf16.mxu1 %vm175_vm1, %v15136_v56  ;;  %v15154_v56 = vld [vmem:[%s18019_s11 + $0xe8] sm:$0xff]  }
 0xb94   :  { %v14446_v39 = vpop.f32.mrf.mxu1 }
 0xb95   :  { %15696 = vtanh.f32 %v14446_v39 }
 0xb96   :  { %v5278_v33 = vpop.f32.mrf.mxu1 }
 0xb97   :  { %15698 = vtanh.f32 %v5278_v33 }
 0xb98   :  { %v14447_v34 = vpop.f32.mrf.mxu1 }
 0xb99   :  { %15700 = vtanh.f32 %v14447_v34 }
 0xb9a   :  { %v5281_v36 = vpop.f32.mrf.mxu1 }
 0xb9b   :  { %15702 = vtanh.f32 %v5281_v36 }
 0xba2   :  { %v15697_v38 = vpop.eup %15696 }
 0xba3   :  { %v13068_v41 = vpack.c.bf16 %v15697_v38, %v15697_v38 }
 0xba4   :  { %v15699_v44 = vpop.eup %15698  ;;  %v14458_v46 = vpop.f32.mrf.mxu1 }
 0xba5   :  { %5315 = vst [vmem:[#allocation2 + $0x88] sm:$0xf] %v13068_v41  ;;  %v13066_v48 = vpack.c.bf16 %v15699_v44, %v15699_v44  ;;  %v5401_v55 = vadd.f32 %v14458_v46, %v12237_v42  ;;  %v12293_v44 = vld [vmem:[%s18018_s10 + $0xb] ss:$0 sm:$0xff] }
 0xba6   :  { %v15701_v40 = vpop.eup %15700  ;;  %v5392_v43 = vpop.f32.mrf.mxu1 }
 0xba7   :  { %5313 = vst [vmem:[#allocation2 + $0x20] sm:$0xf] %v13066_v48  ;;  %v13069_v45 = vpack.c.bf16 %v15701_v40, %v15701_v40  ;;  %v5393_v47 = vadd.f32 %v12237_v42, %v5392_v43 }
 0xba8   :  { %v15703_v50 = vpop.eup %15702  ;;  %v14459_v51 = vpop.f32.mrf.mxu1 }
 0xba9   :  { %5316 = vst [vmem:[#allocation2 + $0xbc] sm:$0xf] %v13069_v45  ;;  %v13067_v53 = vpack.c.bf16 %v15703_v50, %v15703_v50  ;;  %v5404_v57 = vadd.f32 %v14459_v51, %v12237_v42 }
 0xbaa   :  { %v5395_v61 = vpop.f32.mrf.mxu1 }
 0xbab   :  { %5314 = vst [vmem:[#allocation2 + $0x54] sm:$0xf] %v13067_v53  ;;  %v5412_v49 = vpack.c.bf16 %v5404_v57, %v5401_v55  ;;  %v5396_v52 = vadd.f32 %v12237_v42, %v5395_v61 }
 0xbad   :  { %v5411_v54 = vpack.c.bf16 %v5396_v52, %v5393_v47  ;;  %14460 = vmatprep.subr.bf16.mxu0 %v5412_v49  ;;  %v15144_v47 = vld [vmem:[%s18058_s8 + $0x198] sm:$0xff]   ;;  %v15145_v52 = vld [vmem:[%s18058_s8 + $0x190] sm:$0xff]  }
 0xbae   :  { %14461 = vmatpush3.bf16.msra.mxu0 %v5412_v49  ;;  %v15143_v49 = vld [vmem:[%s18054_s1 + $0xb8] sm:$0xff]  }
 0xbaf   :  { %14462 = vmatprep.subr.bf16.mxu0 %v5411_v54 }
 0xbb2   :  { %14463 = vmatpush3.bf16.msra.mxu0 %v5411_v54  ;;  %v15146_v54 = vld [vmem:[%s18058_s8 + $0x188] sm:$0xff]  }
 0xbb3   :  { %14468 = vmatprep.subr.bf16.mxu0 %v15132_v63 }
 0xbb5   :  { %14465 = vmatmul.mubr.msk.bf16.vlgmr.msra.gmra.mxu0 %vm175_vm1, %v15131_v1  ;;  %v15148_v1 = vld [vmem:[%s18019_s11 + $0xf8] sm:$0xff]  }
 0xbb6   :  { %14469 = vmatpush3.bf16.msra.mxu0 %v15132_v63  ;;  %14476 = vmatprep.mubr.msk.bf16.mxu0 %vm3586_vm2, %v16600_v32  ;;  %v15147_v63 = vld [vmem:[%s18058_s8 + $0x180] sm:$0xff]  }
 0xbb7   :  { %14470 = vmatprep.subr.bf16.mxu0 %v15133_v2 }
 0xbba   :  { %14471 = vmatpush3.bf16.msra.mxu0 %v15133_v2  ;;  %v15152_v2 = vld [vmem:[%s18019_s11 + $0xf0] sm:$0xff]  }
 0xbbb   :  { %14472 = vmatprep.subr.bf16.mxu0 %v15134_v3 }
 0xbbe   :  { %14473 = vmatpush3.bf16.msra.mxu0 %v15134_v3  ;;  %v15150_v3 = vld [vmem:[#allocation2 + $0xc] ss:$52 sps:$4 sm:$0xff]  }
 0xbbf   :  { %14474 = vmatprep.subr.bf16.mxu0 %v15135_v4 }
 0xbc2   :  { %14475 = vmatpush3.bf16.msra.mxu0 %v15135_v4  ;;  %v15153_v4 = vld [vmem:[%s18019_s11 + $0xb0] sm:$0xff]  }
 0xbc5   :  { %14477 = vmatmul.mubr.msk.bf16.vlgmr.msra.gmra.mxu0 %vm3586_vm2, %v16602_v35 }
 0xbc6   :  { %14504 = vmatprep.mubr.msk.bf16.mxu0 %vm175_vm1, %v15142_v27  ;;  %v15187_v27 = vld [vmem:[%s18019_s11 + $0x1c0] sm:$0xff]  }
 0xc75   :  { %v14466_v58 = vpop.f32.mrf.mxu0 }
 0xc76   :  { %15704 = vtanh.f32 %v14466_v58  ;;  %v15155_v58 = vld [vmem:[%s18019_s11 + $0xa8] sm:$0xff]  }
 0xc77   :  { %v5463_v59 = vpop.f32.mrf.mxu0 }
 0xc78   :  { %15706 = vtanh.f32 %v5463_v59  ;;  %v15157_v59 = vld [vmem:[%s18019_s11 + $0xa0] sm:$0xff]  }
 0xc79   :  { %v14467_v60 = vpop.f32.mrf.mxu0 }
 0xc7a   :  { %15708 = vtanh.f32 %v14467_v60  ;;  %v15158_v60 = vld [vmem:[%s18019_s11 + $0xd8] sm:$0xff]  }
 0xc7b   :  { %v5466_v7 = vpop.f32.mrf.mxu0 }
 0xc7c   :  { %15710 = vtanh.f32 %v5466_v7  ;;  %v15159_v7 = vld [vmem:[%s18019_s11 + $0x98] sm:$0xff]  }
 0xc83   :  { %v15705_v8 = vpop.eup %15704 }
 0xc84   :  { %v13072_v9 = vpack.c.bf16 %v15705_v8, %v15705_v8  ;;  %v15160_v8 = vld [vmem:[%s18019_s11 + $0xd0] sm:$0xff]  }
 0xc85   :  { %v15707_v10 = vpop.eup %15706  ;;  %v14478_v62 = vpop.f32.mrf.mxu0 }
 0xc86   :  { %5500 = vst [vmem:[#allocation2 + $0x8c] sm:$0xf] %v13072_v9  ;;  %v13070_v0 = vpack.c.bf16 %v15707_v10, %v15707_v10  ;;  %v5586_v16 = vadd.f32 %v14478_v62, %v12265_v6  ;;  %v15161_v9 = vld [vmem:[%s18019_s11 + $0x90] sm:$0xff]   ;;  %v15162_v10 = vld [vmem:[%s18019_s11 + $0xc8] sm:$0xff]  }
 0xc87   :  { %v15709_v5 = vpop.eup %15708  ;;  %v5577_v12 = vpop.f32.mrf.mxu0  ;;  %v15163_v62 = vld [vmem:[%s18019_s11 + $0x88] sm:$0xff]  }
 0xc88   :  { %5498 = vst [vmem:[#allocation2 + $0x24] sm:$0xf] %v13070_v0  ;;  %v13073_v13 = vpack.c.bf16 %v15709_v5, %v15709_v5  ;;  %v5578_v18 = vadd.f32 %v12265_v6, %v5577_v12  ;;  %v15164_v0 = vld [vmem:[%s18019_s11 + $0xc0] sm:$0xff]   ;;  %v15170_v12 = vld [vmem:[%s18019_s11 + $0x1b8] sm:$0xff]  }
 0xc89   :  { %v15711_v14 = vpop.eup %15710  ;;  %v14479_v15 = vpop.f32.mrf.mxu0  ;;  %v15165_v5 = vld [vmem:[%s18019_s11 + $0x80] sm:$0xff]  }
 0xc8a   :  { %5501 = vst [vmem:[#allocation2 + $0xc0] sm:$0xf] %v13073_v13  ;;  %v13071_v11 = vpack.c.bf16 %v15711_v14, %v15711_v14  ;;  %v5589_v17 = vadd.f32 %v14479_v15, %v12265_v6  ;;  %v15166_v13 = vld [vmem:[#allocation2 + $0x8] ss:$52 sps:$4 sm:$0xff]   ;;  %v15171_v14 = vld [vmem:[%s18019_s11 + $0x1f0] sm:$0xff]  }
 0xc8b   :  { %v5580_v30 = vpop.f32.mrf.mxu0  ;;  %v15168_v15 = vld [vmem:[#allocation2 + $0x74] ss:$52 sps:$4 sm:$0xff]  }
 0xc8c   :  { %5499 = vst [vmem:[#allocation2 + $0x58] sm:$0xf] %v13071_v11  ;;  %v5597_v19 = vpack.c.bf16 %v5589_v17, %v5586_v16  ;;  %v5581_v20 = vadd.f32 %v12265_v6, %v5580_v30  ;;  %v15167_v6 = vld [vmem:[%s18019_s11 + $0x1f8] sm:$0xff]   ;;  %v15172_v11 = vld [vmem:[%s18019_s11 + $0x1b0] sm:$0xff]   ;;  %v15174_v16 = vld [vmem:[%s18019_s11 + $0x1e8] sm:$0xff]  }
 0xc8d   :  { %v15175_v17 = vld [vmem:[%s18019_s11 + $0x1a8] sm:$0xff]   ;;  %v15173_v30 = vld [vmem:[#allocation2 + $0x70] ss:$52 sps:$4 sm:$0xff]  }
 0xc8e   :  { %v5596_v21 = vpack.c.bf16 %v5581_v20, %v5578_v18  ;;  %14480 = vmatprep.subr.bf16.mxu1 %v5597_v19  ;;  %v15179_v18 = vld [vmem:[%s18019_s11 + $0x1e0] sm:$0xff]  }
 0xc8f   :  { %14481 = vmatpush3.bf16.msra.mxu1 %v5597_v19  ;;  %v15178_v19 = vld [vmem:[#allocation2 + $0x1c] ss:$52 sps:$4 sm:$0xff]   ;;  %v15180_v20 = vld [vmem:[%s18019_s11 + $0x1a0] sm:$0xff]  }
 0xc90   :  { %14482 = vmatprep.subr.bf16.mxu1 %v5596_v21 }
 0xc93   :  { %14483 = vmatpush3.bf16.msra.mxu1 %v5596_v21  ;;  %v15181_v21 = vld [vmem:[%s18019_s11 + $0x1d8] sm:$0xff]  }
 0xc94   :  { %14488 = vmatprep.subr.bf16.mxu1 %v15138_v22 }
 0xc96   :  { %14485 = vmatmul.mubr.msk.bf16.vlgmr.msra.gmra.mxu1 %vm175_vm1, %v15137_v23  ;;  %v15183_v23 = vld [vmem:[%s18019_s11 + $0x1d0] sm:$0xff]  }
 0xc97   :  { %14489 = vmatpush3.bf16.msra.mxu1 %v15138_v22  ;;  %14496 = vmatprep.mubr.msk.bf16.mxu1 %vm3586_vm2, %v16600_v32  ;;  %v15182_v22 = vld [vmem:[%s18019_s11 + $0x198] sm:$0xff]  }
 0xc98   :  { %14490 = vmatprep.subr.bf16.mxu1 %v15139_v24 }
 0xc9b   :  { %14491 = vmatpush3.bf16.msra.mxu1 %v15139_v24  ;;  %v15184_v24 = vld [vmem:[%s18019_s11 + $0x190] sm:$0xff]  }
 0xc9c   :  { %14492 = vmatprep.subr.bf16.mxu1 %v15140_v25 }
 0xc9f   :  { %14493 = vmatpush3.bf16.msra.mxu1 %v15140_v25  ;;  %v15185_v25 = vld [vmem:[%s18019_s11 + $0x1c8] sm:$0xff]  }
 0xca0   :  { %14494 = vmatprep.subr.bf16.mxu1 %v15141_v26 }
 0xca3   :  { %14495 = vmatpush3.bf16.msra.mxu1 %v15141_v26  ;;  %v15186_v26 = vld [vmem:[%s18019_s11 + $0x188] sm:$0xff]  }
 0xca6   :  { %14497 = vmatmul.mubr.msk.bf16.vlgmr.msra.gmra.mxu1 %vm3586_vm2, %v16602_v35 }
 0xd56   :  { %v14486_v28 = vpop.f32.mrf.mxu1 }
 0xd57   :  { %15712 = vtanh.f32 %v14486_v28  ;;  %v15188_v28 = vld [vmem:[%s18019_s11 + $0x180] sm:$0xff]  }
 0xd58   :  { %v5648_v29 = vpop.f32.mrf.mxu1 }
 0xd59   :  { %15714 = vtanh.f32 %v5648_v29  ;;  %v15192_v29 = vld [vmem:[%s18019_s11 + $0x2f8] sm:$0xff]  }
 0xd5a   :  { %v14487_v31 = vpop.f32.mrf.mxu1 }
 0xd5b   :  { %15716 = vtanh.f32 %v14487_v31  ;;  %v15193_v31 = vld [vmem:[%s18019_s11 + $0x2b8] sm:$0xff]  }
 0xd5c   :  { %v5651_v37 = vpop.f32.mrf.mxu1 }
 0xd5d   :  { %15718 = vtanh.f32 %v5651_v37  ;;  %v15176_v37 = vld [vmem:[#allocation2 + $0x18] ss:$52 sps:$4 sm:$0xff]  }
 0xd64   :  { %v15713_v39 = vpop.eup %15712 }
 0xd65   :  { %v13076_v33 = vpack.c.bf16 %v15713_v39, %v15713_v39  ;;  %v15194_v39 = vld [vmem:[%s18019_s11 + $0x2f0] sm:$0xff]  }
 0xd66   :  { %v15715_v34 = vpop.eup %15714  ;;  %v14498_v36 = vpop.f32.mrf.mxu1 }
 0xd67   :  { %5685 = vst [vmem:[#allocation2 + $0x90] sm:$0xf] %v13076_v33  ;;  %v13074_v38 = vpack.c.bf16 %v15715_v34, %v15715_v34  ;;  %v5771_v45 = vadd.f32 %v14498_v36, %v12293_v44  ;;  %v15189_v33 = vld [vmem:[#allocation2 + $0x84] ss:$52 sps:$4 sm:$0xff]   ;;  %v15195_v34 = vld [vmem:[%s18019_s11 + $0x2b0] sm:$0xff]   ;;  %v15196_v36 = vld [vmem:[%s18019_s11 + $0x2e8] sm:$0xff]  }
 0xd68   :  { %v15717_v41 = vpop.eup %15716  ;;  %v5762_v46 = vpop.f32.mrf.mxu1 }
 0xd69   :  { %5683 = vst [vmem:[#allocation2 + $0x28] sm:$0xf] %v13074_v38  ;;  %v13077_v48 = vpack.c.bf16 %v15717_v41, %v15717_v41  ;;  %v5763_v53 = vadd.f32 %v12293_v44, %v5762_v46  ;;  %v15197_v38 = vld [vmem:[%s18019_s11 + $0x2a8] sm:$0xff]   ;;  %v15191_v41 = vld [vmem:[#allocation2 + $0x80] ss:$52 sps:$4 sm:$0xff]  }
 0xd6a   :  { %v15719_v40 = vpop.eup %15718  ;;  %v14499_v42 = vpop.f32.mrf.mxu1  ;;  %v15199_v46 = vld [vmem:[%s18019_s11 + $0x2a0] sm:$0xff]  }
 0xd6b   :  { %5686 = vst [vmem:[#allocation2 + $0xc4] sm:$0xf] %v13077_v48  ;;  %v13075_v43 = vpack.c.bf16 %v15719_v40, %v15719_v40  ;;  %v5774_v50 = vadd.f32 %v14499_v42, %v12293_v44  ;;  %v15200_v48 = vld [vmem:[%s18019_s11 + $0x2d8] sm:$0xff]   ;;  %v15202_v42 = vld [vmem:[%s18019_s11 + $0x2d0] sm:$0xff]  }
 0xd6c   :  { %v5765_v51 = vpop.f32.mrf.mxu1  ;;  %v15201_v40 = vld [vmem:[%s18019_s11 + $0x298] sm:$0xff]  }
 0xd6d   :  { %5684 = vst [vmem:[#allocation2 + $0x5c] sm:$0xf] %v13075_v43  ;;  %v5782_v55 = vpack.c.bf16 %v5774_v50, %v5771_v45  ;;  %v5766_v57 = vadd.f32 %v12293_v44, %v5765_v51  ;;  %v15198_v44 = vld [vmem:[%s18019_s11 + $0x2e0] sm:$0xff]   ;;  %v15203_v45 = vld [vmem:[%s18019_s11 + $0x290] sm:$0xff]   ;;  %v15204_v50 = vld [vmem:[%s18019_s11 + $0x2c8] sm:$0xff]  }
 0xd6e   :  { %v15208_v43 = vld [vmem:[%s18054_s1 + $0xc0] sm:$0xff]   ;;  %v15205_v51 = vld [vmem:[%s18019_s11 + $0x288] sm:$0xff]  }
 0xd6f   :  { %v5781_v61 = vpack.c.bf16 %v5766_v57, %v5763_v53  ;;  %14500 = vmatprep.subr.bf16.mxu0 %v5782_v55  ;;  %14524 = vmatprep.mubr.msk.bf16.mxu1 %vm175_vm1, %v15208_v43  ;;  %v15206_v53 = vld [vmem:[%s18019_s11 + $0x2c0] sm:$0xff]   ;;  %v15250_v43 = vld [vmem:[%s18019_s11 + $0x118] sm:$0xff]  }
 0xd70   :  { %14501 = vmatpush3.bf16.msra.mxu0 %v5782_v55  ;;  %v15207_v55 = vld [vmem:[%s18019_s11 + $0x280] sm:$0xff]  }
 0xd71   :  { %14502 = vmatprep.subr.bf16.mxu0 %v5781_v61 }
 0xd74   :  { %14503 = vmatpush3.bf16.msra.mxu0 %v5781_v61 }
 0xd75   :  { %14508 = vmatprep.subr.bf16.mxu0 %v15144_v47 }
 0xd77   :  { %14505 = vmatmul.mubr.msk.bf16.vlgmr.msra.gmra.mxu0 %vm175_vm1, %v15143_v49 }
 0xd78   :  { %14509 = vmatpush3.bf16.msra.mxu0 %v15144_v47  ;;  %14516 = vmatprep.mubr.msk.bf16.mxu0 %vm3586_vm2, %v16600_v32  ;;  %v15149_v32 = vld [vmem:[%s18019_s11 + $0xb8] sm:$0xff]  }
 0xd79   :  { %14510 = vmatprep.subr.bf16.mxu0 %v15145_v52 }
 0xd7c   :  { %14511 = vmatpush3.bf16.msra.mxu0 %v15145_v52 }
 0xd7d   :  { %14512 = vmatprep.subr.bf16.mxu0 %v15146_v54 }
 0xd80   :  { %14513 = vmatpush3.bf16.msra.mxu0 %v15146_v54 }
 0xd81   :  { %14514 = vmatprep.subr.bf16.mxu0 %v15147_v63 }
 0xd84   :  { %14515 = vmatpush3.bf16.msra.mxu0 %v15147_v63 }
 0xd85   :  { %13571 = vmatprep.subr.bf16.mxu0 %v15148_v1 }
 0xd87   :  { %14517 = vmatmul.mubr.msk.bf16.vlgmr.msra.gmra.mxu0 %vm3586_vm2, %v16602_v35  ;;  %v15156_v35 = vld [vmem:[%s18019_s11 + $0xe0] sm:$0xff]  }
 0xd88   :  { %13572 = vmatpush3.bf16.msra.mxu0 %v15149_v32  ;;  %7137 = vmatprep.mubr.bf16.mxu0 %v15150_v3  ;;  %v12321_v3 = vld [vmem:[%s18018_s10 + $0xc] ss:$0 sm:$0xff] }
 0xd89   :  { %13573 = vmatprep.subr.bf16.mxu0 %v15152_v2 }
 0xd8c   :  { %13574 = vmatpush3.bf16.msra.mxu0 %v15153_v4 }
 0xd8d   :  { %13575 = vmatprep.subr.bf16.mxu0 %v15154_v56 }
 0xd90   :  { %13576 = vmatpush3.bf16.msra.mxu0 %v15155_v58 }
 0xd91   :  { %13577 = vmatprep.subr.bf16.mxu0 %v15156_v35 }
 0xd94   :  { %13578 = vmatpush3.bf16.msra.mxu0 %v15157_v59 }
 0xd95   :  { %13579 = vmatprep.subr.bf16.mxu0 %v15158_v60 }
 0xd98   :  { %13580 = vmatpush3.bf16.msra.mxu0 %v15159_v7 }
 0xd99   :  { %13581 = vmatprep.subr.bf16.mxu0 %v15160_v8 }
 0xd9c   :  { %13582 = vmatpush3.bf16.msra.mxu0 %v15161_v9 }
 0xd9d   :  { %13583 = vmatprep.subr.bf16.mxu0 %v15162_v10 }
 0xda0   :  { %13584 = vmatpush3.bf16.msra.mxu0 %v15163_v62 }
 0xda1   :  { %13585 = vmatprep.subr.bf16.mxu0 %v15164_v0 }
 0xda4   :  { %13586 = vmatpush3.bf16.msra.mxu0 %v15165_v5  ;;  %v15210_v5 = vld [vmem:[%s18019_s11 + $0x78] sm:$0xff]  }
 0xda5   :  { %13627 = vmatprep.subr.bf16.mxu0 %v15167_v6  ;;  %v15209_v6 = vld [vmem:[%s18054_s1 + $0xc8] sm:$0xff]  }
 0xda7   :  { %7138 = vmatmul.mubr.bf16.vlgmr.msra.gmra.mxu0 %v15166_v13  ;;  %v15211_v13 = vld [vmem:[#allocation2 + $0x28] ss:$52 sps:$4 sm:$0xff]  }
 0xda8   :  { %7145 = vmatprep.mubr.bf16.mxu0 %v15168_v15  ;;  %13628 = vmatpush3.bf16.msra.mxu0 %v15170_v12  ;;  %v15214_v12 = vld [vmem:[%s18019_s11 + $0x38] sm:$0xff]   ;;  %v15219_v15 = vld [vmem:[%s18019_s11 + $0x70] sm:$0xff]  }
 0xda9   :  { %13629 = vmatprep.subr.bf16.mxu0 %v15171_v14 }
 0xdac   :  { %13630 = vmatpush3.bf16.msra.mxu0 %v15172_v11  ;;  %v15215_v11 = vld [vmem:[#allocation2 + $0x4] ss:$52 sps:$4 sm:$0xff]  }
 0xdad   :  { %13631 = vmatprep.subr.bf16.mxu0 %v15174_v16 }
 0xdaf   :  { %7146 = vmatmul.mubr.bf16.gmra.mxu0 %v15173_v30  ;;  %v15221_v30 = vld [vmem:[%s18019_s11 + $0x68] sm:$0xff]  }
 0xdb0   :  { %13632 = vmatpush3.bf16.msra.mxu0 %v15175_v17  ;;  %7235 = vmatprep.mubr.bf16.mxu0 %v15178_v19  ;;  %v15220_v17 = vld [vmem:[%s18019_s11 + $0x30] sm:$0xff]  }
 0xdb1   :  { %13633 = vmatprep.subr.bf16.mxu0 %v15179_v18  ;;  %v15222_v18 = vld [vmem:[%s18019_s11 + $0x28] sm:$0xff]   ;;  %v15223_v19 = vld [vmem:[#allocation2 + $0x90] ss:$52 sps:$4 sm:$0xff]  }
 0xdb4   :  { %13634 = vmatpush3.bf16.msra.mxu0 %v15180_v20  ;;  %v15224_v20 = vld [vmem:[%s18019_s11 + $0x60] sm:$0xff]  }
 0xdb5   :  { %13635 = vmatprep.subr.bf16.mxu0 %v15181_v21  ;;  %v15225_v21 = vld [vmem:[%s18019_s11 + $0x20] sm:$0xff]  }
 0xdb8   :  { %13636 = vmatpush3.bf16.msra.mxu0 %v15182_v22  ;;  %v15226_v22 = vld [vmem:[%s18019_s11 + $0x58] sm:$0xff]  }
 0xdb9   :  { %13637 = vmatprep.subr.bf16.mxu0 %v15183_v23  ;;  %v15227_v23 = vld [vmem:[%s18019_s11 + $0x18] sm:$0xff]  }
 0xdbc   :  { %13638 = vmatpush3.bf16.msra.mxu0 %v15184_v24  ;;  %v15228_v24 = vld [vmem:[%s18019_s11 + $0x50] sm:$0xff]  }
 0xdbd   :  { %13639 = vmatprep.subr.bf16.mxu0 %v15185_v25  ;;  %v15229_v25 = vld [vmem:[%s18019_s11 + $0x10] sm:$0xff]  }
 0xdc0   :  { %13640 = vmatpush3.bf16.msra.mxu0 %v15186_v26  ;;  %v15230_v26 = vld [vmem:[%s18019_s11 + $0x48] sm:$0xff]  }
 0xdc1   :  { %13641 = vmatprep.subr.bf16.mxu0 %v15187_v27  ;;  %v15231_v27 = vld [vmem:[%s18019_s11 + $0x8] sm:$0xff]  }
 0xdc4   :  { %13642 = vmatpush3.bf16.msra.mxu0 %v15188_v28  ;;  %v15232_v28 = vld [vmem:[%s18019_s11 + $0x40] sm:$0xff]  }
 0xdc5   :  { %13683 = vmatprep.subr.bf16.mxu0 %v15192_v29  ;;  %v15233_v29 = vld [vmem:[%s18019_s11] sm:$0xff]  }
 0xdc7   :  { %7236 = vmatmul.mubr.bf16.vlgmr.msra.gmra.mxu0 %v15176_v37  ;;  %v15238_v37 = vld [vmem:[%s18019_s11 + $0x138] sm:$0xff]  }
 0xdc8   :  { %7243 = vmatprep.mubr.bf16.mxu0 %v15189_v33  ;;  %13684 = vmatpush3.bf16.msra.mxu0 %v15193_v31  ;;  %v15235_v31 = vld [vmem:[%s18019_s11 + $0x178] sm:$0xff]   ;;  %v15239_v33 = vld [vmem:[%s18019_s11 + $0x170] sm:$0xff]  }
 0xdc9   :  { %13685 = vmatprep.subr.bf16.mxu0 %v15194_v39  ;;  %v15234_v39 = vld [vmem:[#allocation2] ss:$52 sps:$4 sm:$0xff]  }
 0xdcc   :  { %13686 = vmatpush3.bf16.msra.mxu0 %v15195_v34  ;;  %v15236_v34 = vld [vmem:[#allocation2 + $0x6c] ss:$52 sps:$4 sm:$0xff]  }
 0xdcd   :  { %13687 = vmatprep.subr.bf16.mxu0 %v15196_v36  ;;  %v15240_v36 = vld [vmem:[%s18019_s11 + $0x130] sm:$0xff]  }
 0xdcf   :  { %7244 = vmatmul.mubr.bf16.gmra.mxu0 %v15191_v41  ;;  %v15243_v41 = vld [vmem:[%s18019_s11 + $0x128] sm:$0xff]  }
 0xdd0   :  { %13688 = vmatpush3.bf16.msra.mxu0 %v15197_v38  ;;  %v15242_v38 = vld [vmem:[%s18019_s11 + $0x168] sm:$0xff]  }
 0xdd1   :  { %13689 = vmatprep.subr.bf16.mxu0 %v15198_v44  ;;  %v15241_v44 = vld [vmem:[#allocation2 + $0x68] ss:$52 sps:$4 sm:$0xff]  }
 0xdd4   :  { %13690 = vmatpush3.bf16.msra.mxu0 %v15199_v46  ;;  %v15247_v46 = vld [vmem:[%s18019_s11 + $0x160] sm:$0xff]  }
 0xdd5   :  { %13691 = vmatprep.subr.bf16.mxu0 %v15200_v48  ;;  %v15246_v48 = vld [vmem:[#allocation2 + $0x14] ss:$52 sps:$4 sm:$0xff]  }
 0xdd8   :  { %13692 = vmatpush3.bf16.msra.mxu0 %v15201_v40  ;;  %v15248_v40 = vld [vmem:[%s18019_s11 + $0x120] sm:$0xff]  }
 0xdd9   :  { %13693 = vmatprep.subr.bf16.mxu0 %v15202_v42  ;;  %v15249_v42 = vld [vmem:[%s18019_s11 + $0x158] sm:$0xff]  }
 0xddc   :  { %13694 = vmatpush3.bf16.msra.mxu0 %v15203_v45  ;;  %v15251_v45 = vld [vmem:[%s18019_s11 + $0x150] sm:$0xff]  }
 0xddd   :  { %13695 = vmatprep.subr.bf16.mxu0 %v15204_v50  ;;  %v15252_v50 = vld [vmem:[%s18019_s11 + $0x110] sm:$0xff]  }
 0xde0   :  { %13696 = vmatpush3.bf16.msra.mxu0 %v15205_v51  ;;  %v15253_v51 = vld [vmem:[%s18019_s11 + $0x148] sm:$0xff]  }
 0xde1   :  { %13697 = vmatprep.subr.bf16.mxu0 %v15206_v53  ;;  %v15254_v53 = vld [vmem:[%s18019_s11 + $0x108] sm:$0xff]  }
 0xde4   :  { %13698 = vmatpush3.bf16.msra.mxu0 %v15207_v55  ;;  %v15255_v55 = vld [vmem:[%s18019_s11 + $0x140] sm:$0xff]  }
 0xe37   :  { %v14506_v57 = vpop.f32.mrf.mxu0 }
 0xe38   :  { %15720 = vtanh.f32 %v14506_v57  ;;  %v15256_v57 = vld [vmem:[%s18019_s11 + $0x100] sm:$0xff]  }
 0xe39   :  { %v5833_v61 = vpop.f32.mrf.mxu0 }
 0xe3a   :  { %15722 = vtanh.f32 %v5833_v61  ;;  %v15257_v61 = vld [vmem:[%s18019_s11 + $0x278] sm:$0xff]  }
 0xe3b   :  { %v14507_v47 = vpop.f32.mrf.mxu0 }
 0xe3c   :  { %15724 = vtanh.f32 %v14507_v47  ;;  %v15260_v47 = vld [vmem:[%s18019_s11 + $0x238] sm:$0xff]  }
 0xe3d   :  { %v5836_v49 = vpop.f32.mrf.mxu0 }
 0xe3e   :  { %15726 = vtanh.f32 %v5836_v49  ;;  %v15244_v49 = vld [vmem:[#allocation2 + $0x10] ss:$52 sps:$4 sm:$0xff]  }
 0xe45   :  { %v15721_v52 = vpop.eup %15720 }
 0xe46   :  { %v13080_v54 = vpack.c.bf16 %v15721_v52, %v15721_v52  ;;  %v15261_v52 = vld [vmem:[%s18019_s11 + $0x270] sm:$0xff]  }
 0xe47   :  { %v15723_v63 = vpop.eup %15722  ;;  %v14518_v1 = vpop.f32.mrf.mxu0 }
 0xe48   :  { %5870 = vst [vmem:[#allocation2 + $0x94] sm:$0xf] %v13080_v54  ;;  %v13078_v32 = vpack.c.bf16 %v15723_v63, %v15723_v63  ;;  %v5956_v60 = vadd.f32 %v14518_v1, %v12321_v3  ;;  %v15258_v54 = vld [vmem:[#allocation2 + $0x7c] ss:$52 sps:$4 sm:$0xff]   ;;  %v15264_v1 = vld [vmem:[%s18019_s11 + $0x268] sm:$0xff]  }
 0xe49   :  { %v15725_v2 = vpop.eup %15724  ;;  %v5947_v4 = vpop.f32.mrf.mxu0  ;;  %v15262_v63 = vld [vmem:[%s18019_s11 + $0x230] sm:$0xff]  }
 0xe4a   :  { %5868 = vst [vmem:[#allocation2 + $0x2c] sm:$0xf] %v13078_v32  ;;  %v13081_v56 = vpack.c.bf16 %v15725_v2, %v15725_v2  ;;  %v5948_v9 = vadd.f32 %v12321_v3, %v5947_v4  ;;  %v15265_v32 = vld [vmem:[%s18019_s11 + $0x228] sm:$0xff]   ;;  %v15268_v4 = vld [vmem:[#allocation2 + $0x24] ss:$52 sps:$4 sm:$0xff]  }
 0xe4b   :  { %v15727_v58 = vpop.eup %15726  ;;  %v14519_v35 = vpop.f32.mrf.mxu0  ;;  %v15263_v2 = vld [vmem:[#allocation2 + $0x78] ss:$52 sps:$4 sm:$0xff]  }
 0xe4c   :  { %5871 = vst [vmem:[#allocation2 + $0xc8] sm:$0xf] %v13081_v56  ;;  %v13079_v59 = vpack.c.bf16 %v15727_v58, %v15727_v58  ;;  %v5959_v7 = vadd.f32 %v14519_v35, %v12321_v3  ;;  %v15270_v56 = vld [vmem:[%s18019_s11 + $0x220] sm:$0xff]   ;;  %v15271_v58 = vld [vmem:[%s18019_s11 + $0x258] sm:$0xff]  }
 0xe4d   :  { %v5950_v8 = vpop.f32.mrf.mxu0  ;;  %v15272_v35 = vld [vmem:[%s18019_s11 + $0x218] sm:$0xff]  }
 0xe4e   :  { %5869 = vst [vmem:[#allocation2 + $0x60] sm:$0xf] %v13079_v59  ;;  %v5967_v10 = vpack.c.bf16 %v5959_v7, %v5956_v60  ;;  %v5951_v62 = vadd.f32 %v12321_v3, %v5950_v8  ;;  %v15269_v3 = vld [vmem:[%s18019_s11 + $0x260] sm:$0xff]   ;;  %v15273_v59 = vld [vmem:[%s18019_s11 + $0x250] sm:$0xff]   ;;  %v15275_v7 = vld [vmem:[%s18019_s11 + $0x248] sm:$0xff]  }
 0xe4f   :  { %v15274_v60 = vld [vmem:[%s18019_s11 + $0x210] sm:$0xff]   ;;  %v15276_v8 = vld [vmem:[%s18019_s11 + $0x208] sm:$0xff]  }
 0xe50   :  { %v5966_v0 = vpack.c.bf16 %v5951_v62, %v5948_v9  ;;  %14520 = vmatprep.subr.bf16.mxu1 %v5967_v10  ;;  %v15277_v9 = vld [vmem:[%s18019_s11 + $0x240] sm:$0xff]   ;;  %v15282_v62 = vld [vmem:[%s18019_s11 + $0x338] sm:$0xff]  }
 0xe51   :  { %14521 = vmatpush3.bf16.msra.mxu1 %v5967_v10  ;;  %v15278_v10 = vld [vmem:[%s18019_s11 + $0x200] sm:$0xff]  }
 0xe52   :  { %14522 = vmatprep.subr.bf16.mxu1 %v5966_v0 }
 0xe53   :  { %v15217_v16 = vld [vmem:[#allocation2 + $0x94] ss:$52 sps:$4 sm:$0xff]  }
 0xe55   :  { %14523 = vmatpush3.bf16.msra.mxu1 %v5966_v0  ;;  %v15213_v14 = vld [vmem:[#allocation2 + $0x2c] ss:$52 sps:$4 sm:$0xff]  }
 0xe56   :  { %13543 = vmatprep.subr.bf16.mxu1 %v15210_v5  ;;  %7333 = vmatprep.mubr.bf16.mxu0 %v15213_v14  ;;  %v15266_v0 = vld [vmem:[#allocation2 + $0x20] ss:$52 sps:$4 sm:$0xff]  }
 0xe57   :  { %7334 = vmatmul.mubr.bf16.vlgmr.msra.gmra.mxu0 %v15211_v13  ;;  %v15283_v5 = vld [vmem:[%s18019_s11 + $0x330] sm:$0xff]   ;;  %v15281_v13 = vld [vmem:[#allocation2 + $0x88] ss:$52 sps:$4 sm:$0xff]   ;;  %v15285_v14 = vld [vmem:[%s18019_s11 + $0x320] sm:$0xff]  }
 0xe58   :  { %14525 = vmatmul.mubr.msk.bf16.vlgmr.msra.gmra.mxu1 %vm175_vm1, %v15209_v6  ;;  %7341 = vmatprep.mubr.bf16.mxu0 %v15217_v16  ;;  %v15279_v6 = vld [vmem:[#allocation2 + $0x8c] ss:$52 sps:$4 sm:$0xff]  }
 0xe59   :  { %13544 = vmatpush3.bf16.msra.mxu1 %v15214_v12  ;;  %7088 = vmatprep.mubr.bf16.mxu1 %v15215_v11  ;;  %v15284_v12 = vld [vmem:[%s18019_s11 + $0x328] sm:$0xff]   ;;  %v15287_v11 = vld [vmem:[%s18019_s11 + $0x310] sm:$0xff]  }
 0xe5a   :  { %13545 = vmatprep.subr.bf16.mxu1 %v15219_v15  ;;  %v15286_v15 = vld [vmem:[%s18019_s11 + $0x318] sm:$0xff]   ;;  %v15288_v16 = vld [vmem:[%s18019_s11 + $0x308] sm:$0xff]  }
 0xe5d   :  { %13546 = vmatpush3.bf16.msra.mxu1 %v15220_v17  ;;  %v15289_v17 = vld [vmem:[%s18019_s11 + $0x300] sm:$0xff]  }
 0xe5e   :  { %13547 = vmatprep.subr.bf16.mxu1 %v15221_v30  ;;  %v15292_v30 = vld [vmem:[%s18021_s13 + $0x18] sm:$0xff]  }
 0xe5f   :  { %7342 = vmatmul.mubr.bf16.gmra.mxu0 %v15223_v19  ;;  %14548 = vmatprep.subr.bf16.mxu0 %v15292_v30 }
 0xe60   :  { %14549 = vmatpush3.bf16.msra.mxu0 %v15292_v30 }
 0xe61   :  { %13548 = vmatpush3.bf16.msra.mxu1 %v15222_v18 }
 0xe62   :  { %13549 = vmatprep.subr.bf16.mxu1 %v15224_v20 }
 0xe65   :  { %13550 = vmatpush3.bf16.msra.mxu1 %v15225_v21 }
 0xe66   :  { %13551 = vmatprep.subr.bf16.mxu1 %v15226_v22 }
 0xe69   :  { %13552 = vmatpush3.bf16.msra.mxu1 %v15227_v23 }
 0xe6a   :  { %13553 = vmatprep.subr.bf16.mxu1 %v15228_v24 }
 0xe6d   :  { %13554 = vmatpush3.bf16.msra.mxu1 %v15229_v25 }
 0xe6e   :  { %13555 = vmatprep.subr.bf16.mxu1 %v15230_v26 }
 0xe71   :  { %13556 = vmatpush3.bf16.msra.mxu1 %v15231_v27 }
 0xe72   :  { %13557 = vmatprep.subr.bf16.mxu1 %v15232_v28 }
 0xe75   :  { %13558 = vmatpush3.bf16.msra.mxu1 %v15233_v29 }
 0xe76   :  { %13599 = vmatprep.subr.bf16.mxu1 %v15235_v31 }
 0xe78   :  { %7089 = vmatmul.mubr.bf16.vlgmr.msra.gmra.mxu1 %v15234_v39  ;;  %v15293_v39 = vld [vmem:[%s18021_s13 + $0x10] sm:$0xff]  }
 0xe79   :  { %7096 = vmatprep.mubr.bf16.mxu1 %v15236_v34  ;;  %13600 = vmatpush3.bf16.msra.mxu1 %v15238_v37  ;;  %v15295_v34 = vld [vmem:[%s18021_s13] sm:$0xff]  }
 0xe7a   :  { %13601 = vmatprep.subr.bf16.mxu1 %v15239_v33  ;;  %14550 = vmatprep.subr.bf16.mxu0 %v15293_v39  ;;  %v15294_v33 = vld [vmem:[%s18021_s13 + $0x8] sm:$0xff]  }
 0xe7b   :  { %14551 = vmatpush3.bf16.msra.mxu0 %v15293_v39 }
 0xe7c   :  { %14552 = vmatprep.subr.bf16.mxu0 %v15294_v33 }
 0xe7d   :  { %13602 = vmatpush3.bf16.msra.mxu1 %v15240_v36  ;;  %v17267_v36 = vld [vmem:[%s18023_s15 + $0x18] sm:$0xff]  }
 0xe7e   :  { %13603 = vmatprep.subr.bf16.mxu1 %v15242_v38 }
 0xe7f   :  { %14553 = vmatpush3.bf16.msra.mxu0 %v15294_v33 }
 0xe80   :  { %7097 = vmatmul.mubr.bf16.gmra.mxu1 %v15241_v44  ;;  %14554 = vmatprep.subr.bf16.mxu0 %v15295_v34  ;;  %v13587_v44 = vpop.f32.mrf.mxu0 }
 0xe81   :  { %13604 = vmatpush3.bf16.msra.mxu1 %v15243_v41  ;;  %7186 = vmatprep.mubr.bf16.mxu1 %v15246_v48 }
 0xe82   :  { %13605 = vmatprep.subr.bf16.mxu1 %v15247_v46  ;;  %v13588_v48 = vpop.f32.mrf.mxu0 }
 0xe83   :  { %14555 = vmatpush3.bf16.msra.mxu0 %v15295_v34 }
 0xe84   :  { %14560 = vmatprep.subr.bf16.mxu0 %v17267_v36 }
 0xe85   :  { %13606 = vmatpush3.bf16.msra.mxu1 %v15248_v40 }
 0xe86   :  { %13607 = vmatprep.subr.bf16.mxu1 %v15249_v42  ;;  %v13590_v42 = vpop.f32.mrf.mxu0 }
 0xe89   :  { %13608 = vmatpush3.bf16.msra.mxu1 %v15250_v43 }
 0xe8a   :  { %13609 = vmatprep.subr.bf16.mxu1 %v15251_v45  ;;  %v13591_v45 = vpop.f32.mrf.mxu0 }
 0xe8b   :  { %v13592_v39 = vadd.f32 %v13591_v45, %v13590_v42 }
 0xe8d   :  { %13610 = vmatpush3.bf16.msra.mxu1 %v15252_v50 }
 0xe8e   :  { %13611 = vmatprep.subr.bf16.mxu1 %v15253_v51  ;;  %v13593_v51 = vpop.f32.mrf.mxu0 }
 0xe91   :  { %13612 = vmatpush3.bf16.msra.mxu1 %v15254_v53 }
 0xe92   :  { %13613 = vmatprep.subr.bf16.mxu1 %v15255_v55  ;;  %v13594_v55 = vpop.f32.mrf.mxu0 }
 0xe95   :  { %13614 = vmatpush3.bf16.msra.mxu1 %v15256_v57 }
 0xe96   :  { %13655 = vmatprep.subr.bf16.mxu1 %v15257_v61  ;;  %v13596_v61 = vpop.f32.mrf.mxu0 }
 0xe98   :  { %7187 = vmatmul.mubr.bf16.vlgmr.msra.gmra.mxu1 %v15244_v49  ;;  %v13597_v49 = vpop.f32.mrf.mxu0 }
 0xe99   :  { %7194 = vmatprep.mubr.bf16.mxu1 %v15258_v54  ;;  %13656 = vmatpush3.bf16.msra.mxu1 %v15260_v47 }
 0xe9a   :  { %13657 = vmatprep.subr.bf16.mxu1 %v15261_v52  ;;  %v13643_v54 = vpop.f32.mrf.mxu0 }
 0xe9d   :  { %13658 = vmatpush3.bf16.msra.mxu1 %v15262_v63 }
 0xe9e   :  { %13659 = vmatprep.subr.bf16.mxu1 %v15264_v1  ;;  %v13644_v1 = vpop.f32.mrf.mxu0 }
 0xea0   :  { %7195 = vmatmul.mubr.bf16.gmra.mxu1 %v15263_v2  ;;  %v13646_v2 = vpop.f32.mrf.mxu0 }
 0xea1   :  { %13660 = vmatpush3.bf16.msra.mxu1 %v15265_v32  ;;  %7284 = vmatprep.mubr.bf16.mxu1 %v15268_v4 }
 0xea2   :  { %13661 = vmatprep.subr.bf16.mxu1 %v15269_v3  ;;  %v13647_v4 = vpop.f32.mrf.mxu0 }
 0xea5   :  { %13662 = vmatpush3.bf16.msra.mxu1 %v15270_v56 }
 0xea6   :  { %13663 = vmatprep.subr.bf16.mxu1 %v15271_v58  ;;  %v13649_v58 = vpop.f32.mrf.mxu0 }
 0xea9   :  { %13664 = vmatpush3.bf16.msra.mxu1 %v15272_v35 }
 0xeaa   :  { %13665 = vmatprep.subr.bf16.mxu1 %v15273_v59  ;;  %v13650_v59 = vpop.f32.mrf.mxu0 }
 0xead   :  { %13666 = vmatpush3.bf16.msra.mxu1 %v15274_v60 }
 0xeae   :  { %13667 = vmatprep.subr.bf16.mxu1 %v15275_v7  ;;  %v13652_v7 = vpop.f32.mrf.mxu0 }
 0xeb1   :  { %13668 = vmatpush3.bf16.msra.mxu1 %v15276_v8 }
 0xeb2   :  { %13669 = vmatprep.subr.bf16.mxu1 %v15277_v9  ;;  %v13653_v9 = vpop.f32.mrf.mxu0 }
 0xeb5   :  { %13670 = vmatpush3.bf16.msra.mxu1 %v15278_v10 }
 0xeb6   :  { %14528 = vmatprep.subr.bf16.mxu1 %v15282_v62 }
 0xeb8   :  { %7285 = vmatmul.mubr.bf16.vlgmr.msra.gmra.mxu1 %v15266_v0 }
 0xeb9   :  { %7292 = vmatprep.mubr.bf16.mxu1 %v15279_v6  ;;  %14529 = vmatpush3.bf16.msra.mxu1 %v15282_v62 }
 0xeba   :  { %14530 = vmatprep.subr.bf16.mxu1 %v15283_v5 }
 0xebd   :  { %14531 = vmatpush3.bf16.msra.mxu1 %v15283_v5 }
 0xebe   :  { %14532 = vmatprep.subr.bf16.mxu1 %v15284_v12 }
 0xec0   :  { %7293 = vmatmul.mubr.bf16.gmra.mxu1 %v15281_v13 }
 0xec1   :  { %14533 = vmatpush3.bf16.msra.mxu1 %v15284_v12 }
 0xec2   :  { %14534 = vmatprep.subr.bf16.mxu1 %v15285_v14 }
 0xec5   :  { %14535 = vmatpush3.bf16.msra.mxu1 %v15285_v14 }
 0xec6   :  { %14536 = vmatprep.subr.bf16.mxu1 %v15286_v15 }
 0xec9   :  { %14537 = vmatpush3.bf16.msra.mxu1 %v15286_v15 }
 0xeca   :  { %14538 = vmatprep.subr.bf16.mxu1 %v15287_v11 }
 0xecd   :  { %14539 = vmatpush3.bf16.msra.mxu1 %v15287_v11 }
 0xece   :  { %14540 = vmatprep.subr.bf16.mxu1 %v15288_v16 }
 0xed1   :  { %14541 = vmatpush3.bf16.msra.mxu1 %v15288_v16  ;;  %v12340_v16 = vld [vmem:[%s18020_s12] ss:$0 sm:$0xff]  ;;  %s18062_s12 = sld [smem:[#allocation8_spill]] }
 0xed2   :  { %14542 = vmatprep.subr.bf16.mxu1 %v15289_v17 }
 0xed5   :  { %14543 = vmatpush3.bf16.msra.mxu1 %v15289_v17 }
 0xf17   :  { %v13699_v62 = vpop.f32.mrf.mxu0 }
 0xf18   :  { %v14526_v18 = vpop.f32.mrf.mxu1 }
 0xf19   :  { %15728 = vtanh.f32 %v14526_v18  ;;  %v13700_v5 = vpop.f32.mrf.mxu0 }
 0xf1a   :  { %v6018_v19 = vpop.f32.mrf.mxu1 }
 0xf1b   :  { %15730 = vtanh.f32 %v6018_v19  ;;  %v13702_v12 = vpop.f32.mrf.mxu0 }
 0xf1c   :  { %v14527_v20 = vpop.f32.mrf.mxu1 }
 0xf1d   :  { %15732 = vtanh.f32 %v14527_v20  ;;  %v13703_v14 = vpop.f32.mrf.mxu0 }
 0xf1e   :  { %v6021_v21 = vpop.f32.mrf.mxu1 }
 0xf1f   :  { %15734 = vtanh.f32 %v6021_v21  ;;  %v13705_v19 = vpop.f32.mrf.mxu0 }
 0xf26   :  { %v15729_v22 = vpop.eup %15728 }
 0xf27   :  { %v13084_v23 = vpack.c.bf16 %v15729_v22, %v15729_v22  ;;  %v13589_v22 = vadd.f32 %v13588_v48, %v13587_v44 }
 0xf28   :  { %v15731_v24 = vpop.eup %15730 }
 0xf29   :  { %6055 = vst [vmem:[#allocation2 + $0x98] sm:$0xf] %v13084_v23  ;;  %v13082_v25 = vpack.c.bf16 %v15731_v24, %v15731_v24 }
 0xf2a   :  { %v15733_v26 = vpop.eup %15732 }
 0xf2b   :  { %6053 = vst [vmem:[#allocation2 + $0x30] sm:$0xf] %v13082_v25  ;;  %v13085_v27 = vpack.c.bf16 %v15733_v26, %v15733_v26  ;;  %v13598_v25 = vadd.f32 %v13597_v49, %v13596_v61 }
 0xf2c   :  { %v15735_v28 = vpop.eup %15734 }
 0xf2d   :  { %6056 = vst [vmem:[#allocation2 + $0xcc] sm:$0xf] %v13085_v27  ;;  %v13083_v29 = vpack.c.bf16 %v15735_v28, %v15735_v28 }
 0xf2f   :  { %6054 = vst [vmem:[#allocation2 + $0x64] sm:$0xf] %v13083_v29  ;;  %v13595_v29 = vadd.f32 %v13594_v55, %v13593_v51  ;;  %v13648_v55 = vadd.f32 %v13647_v4, %v13646_v2 }
 0xf34   :  { %v15291_v37 = vld [vmem:[#allocation2 + $0x98] ss:$52 sps:$4 sm:$0xff]  }
 0xf36   :  { %v15290_v31 = vld [vmem:[#allocation2 + $0x30] ss:$52 sps:$4 sm:$0xff]  }
 0xf37   :  { %14544 = vmatprep.mubr.bf16.mxu1 %v15290_v31  ;;  %v13706_v31 = vpop.f32.mrf.mxu0 }
 0xf38   :  { %14545 = vmatmul.mubr.bf16.vlgmr.msra.gmra.mxu1 %v15291_v37  ;;  %v13559_v38 = vpop.f32.mrf.mxu1 }
 0xf39   :  { %v13708_v44 = vpop.f32.mrf.mxu0 }
 0xf3a   :  { %v13560_v41 = vpop.f32.mrf.mxu1 }
 0xf3b   :  { %v13561_v15 = vadd.f32 %v13560_v41, %v13559_v38 }
 0xf3c   :  { %v13562_v46 = vpop.f32.mrf.mxu1 }
 0xf3d   :  { %v7091_v20 = vadd.f32 %v13561_v15, %v12340_v16 }
 0xf3e   :  { %v13563_v40 = vpop.f32.mrf.mxu1 }
 0xf3f   :  { %v13564_v18 = vadd.f32 %v13563_v40, %v13562_v46  ;;  %v7140_v33 = vadd.f32 %v13589_v22, %v7091_v20 }
 0xf40   :  { %v13565_v43 = vpop.f32.mrf.mxu1 }
 0xf41   :  { %v7094_v26 = vadd.f32 %v13564_v18, %v12340_v16 }
 0xf42   :  { %v13566_v50 = vpop.f32.mrf.mxu1 }
 0xf43   :  { %v13567_v17 = vadd.f32 %v13566_v50, %v13565_v43  ;;  %v7143_v40 = vadd.f32 %v13592_v39, %v7094_v26 }
 0xf44   :  { %v13568_v53 = vpop.f32.mrf.mxu1 }
 0xf45   :  { %v7099_v23 = vadd.f32 %v13567_v17, %v12340_v16 }
 0xf46   :  { %v13569_v57 = vpop.f32.mrf.mxu1 }
 0xf47   :  { %v13570_v11 = vadd.f32 %v13569_v57, %v13568_v53  ;;  %v7148_v41 = vadd.f32 %v13595_v29, %v7099_v23  ;;  %v13645_v53 = vadd.f32 %v13644_v1, %v13643_v54  ;;  %v13654_v57 = vadd.f32 %v13653_v9, %v13652_v7 }
 0xf48   :  { %v13701_v54 = vadd.f32 %v13700_v5, %v13699_v62  ;;  %v13707_v7 = vadd.f32 %v13706_v31, %v13705_v19  ;;  %v15299_v19 = vld [vmem:[%s18023_s15] sm:$0xff]  }
 0xf49   :  { %v7102_v21 = vadd.f32 %v13570_v11, %v12340_v16 }
 0xf4b   :  { %v7151_v38 = vadd.f32 %v13598_v25, %v7102_v21  ;;  %v12471_v25 = vld [vmem:[%s18022_s14] ss:$0 sm:$0xff] }
 0xf58   :  { %v13615_v47 = vpop.f32.mrf.mxu1 }
 0xf5a   :  { %v13616_v52 = vpop.f32.mrf.mxu1 }
 0xf5b   :  { %v13617_v27 = vadd.f32 %v13616_v52, %v13615_v47  ;;  %v13651_v52 = vadd.f32 %v13650_v59, %v13649_v58 }
 0xf5c   :  { %v13618_v63 = vpop.f32.mrf.mxu1 }
 0xf5d   :  { %v7189_v46 = vadd.f32 %v13617_v27, %v7140_v33 }
 0xf5e   :  { %v13619_v32 = vpop.f32.mrf.mxu1 }
 0xf5f   :  { %v13620_v34 = vadd.f32 %v13619_v32, %v13618_v63  ;;  %v13709_v63 = vpop.f32.mrf.mxu0 }
 0xf60   :  { %v13621_v3 = vpop.f32.mrf.mxu1  ;;  %v13710_v1 = vadd.f32 %v13709_v63, %v13708_v44  ;;  %v15306_v63 = vld [vmem:[%s18054_s1 + $0x10] sm:$0xff]  }
 0xf61   :  { %v7192_v61 = vadd.f32 %v13620_v34, %v7143_v40  ;;  %v15302_v40 = vld [vmem:[%s18023_s15 + $0x28] sm:$0xff]  }
 0xf62   :  { %v13622_v56 = vpop.f32.mrf.mxu1 }
 0xf63   :  { %v13623_v37 = vadd.f32 %v13622_v56, %v13621_v3  ;;  %v7238_v3 = vadd.f32 %v13645_v53, %v7189_v46  ;;  %v15301_v46 = vld [vmem:[%s18023_s15 + $0x30] sm:$0xff]   ;;  %v15304_v53 = vld [vmem:[%s18054_s1] sm:$0xff]  }
 0xf64   :  { %v13624_v35 = vpop.f32.mrf.mxu1  ;;  %14576 = vmatprep.mubr.msk.bf16.mxu1 %vm175_vm1, %v15304_v53 }
 0xf65   :  { %v7197_v48 = vadd.f32 %v13623_v37, %v7148_v41 }
 0xf66   :  { %v13625_v60 = vpop.f32.mrf.mxu1 }
 0xf67   :  { %v13626_v28 = vadd.f32 %v13625_v60, %v13624_v35  ;;  %v7246_v32 = vadd.f32 %v13651_v52, %v7197_v48  ;;  %v7241_v35 = vadd.f32 %v13648_v55, %v7192_v61  ;;  %v12478_v48 = vld [vmem:[%s18024_s16] ss:$0 sm:$0xff] }
 0xf69   :  { %v7200_v50 = vadd.f32 %v13626_v28, %v7151_v38 }
 0xf6b   :  { %v7249_v45 = vadd.f32 %v13654_v57, %v7200_v50  ;;  %v15303_v50 = vld [vmem:[%s18023_s15 + $0x20] sm:$0xff]  }
 0xf78   :  { %v13671_v8 = vpop.f32.mrf.mxu1 }
 0xf7a   :  { %v13672_v10 = vpop.f32.mrf.mxu1 }
 0xf7b   :  { %v13673_v49 = vadd.f32 %v13672_v10, %v13671_v8  ;;  %v13704_v8 = vadd.f32 %v13703_v14, %v13702_v12  ;;  %v15297_v12 = vld [vmem:[%s18023_s15 + $0x10] sm:$0xff]   ;;  %v15298_v14 = vld [vmem:[%s18023_s15 + $0x8] sm:$0xff]  }
 0xf7c   :  { %v13674_v0 = vpop.f32.mrf.mxu1 }
 0xf7d   :  { %v7287_v56 = vadd.f32 %v13673_v49, %v7238_v3 }
 0xf7e   :  { %v13675_v6 = vpop.f32.mrf.mxu1 }
 0xf7f   :  { %v13676_v42 = vadd.f32 %v13675_v6, %v13674_v0  ;;  %v7336_v10 = vadd.f32 %v13701_v54, %v7287_v56  ;;  %v12502_v56 = vld [vmem:[%s18024_s16 + $0x1] ss:$0 sm:$0xff] }
 0xf80   :  { %v13677_v13 = vpop.f32.mrf.mxu1 }
 0xf81   :  { %v7290_v16 = vadd.f32 %v13676_v42, %v7241_v35 }
 0xf82   :  { %v13678_v30 = vpop.f32.mrf.mxu1 }
 0xf83   :  { %v13679_v51 = vadd.f32 %v13678_v30, %v13677_v13  ;;  %v7339_v6 = vadd.f32 %v13704_v8, %v7290_v16  ;;  %v15308_v8 = vld [vmem:[%s18023_s15 + $0x58] sm:$0xff]  }
 0xf84   :  { %v13680_v24 = vpop.f32.mrf.mxu1 }
 0xf85   :  { %v7295_v15 = vadd.f32 %v13679_v51, %v7246_v32 }
 0xf86   :  { %v13681_v43 = vpop.f32.mrf.mxu1 }
 0xf87   :  { %v13682_v47 = vadd.f32 %v13681_v43, %v13680_v24  ;;  %v7344_v59 = vadd.f32 %v13707_v7, %v7295_v15 }
 0xf89   :  { %v7298_v60 = vadd.f32 %v13682_v47, %v7249_v45  ;;  %v15305_v45 = vld [vmem:[%s18054_s1 + $0x8] sm:$0xff]  }
 0xf8b   :  { %v7347_v58 = vadd.f32 %v13710_v1, %v7298_v60 }
 0xff8   :  { %v14546_v11 = vpop.f32.mrf.mxu1 }
 0xff9   :  { %v7393_v13 = vadd.f32 %v14546_v11, %v7344_v59  ;;  %v15310_v59 = vld [vmem:[%s18023_s15 + $0x48] sm:$0xff]  }
 0xffa   :  { %v7384_v9 = vpop.f32.mrf.mxu1 }
 0xffb   :  { %v7385_v4 = vadd.f32 %v7384_v9, %v7336_v10  ;;  %v7401_v22 = vmax.f32 %v7393_v13, 0.0  ;;  %v15307_v10 = vld [vmem:[%s18054_s1 + $0x18] sm:$0xff]  }
 0xffc   :  { %v14547_v2 = vpop.f32.mrf.mxu1 }
 0xffd   :  { %v7396_v0 = vadd.f32 %v14547_v2, %v7347_v58  ;;  %v7399_v20 = vmax.f32 %v7385_v4, 0.0  ;;  %v15309_v58 = vld [vmem:[%s18023_s15 + $0x50] sm:$0xff]   ;;  %v15311_v2 = vld [vmem:[%s18023_s15 + $0x40] sm:$0xff]  }
 0xffe   :  { %v7387_v17 = vpop.f32.mrf.mxu1  ;;  %v15312_v4 = vld [vmem:[%s18054_s1 + $0x20] sm:$0xff]  }
 0xfff   :  { %v7388_v30 = vadd.f32 %v7387_v17, %v7339_v6  ;;  %v7402_v18 = vmax.f32 %v7396_v0, 0.0 }
0x1001   :  { %v7400_v21 = vmax.f32 %v7388_v30, 0.0  ;;  %v7404_v5 = vpack.c.bf16 %v7402_v18, %v7401_v22 }
0x1003   :  { %v7403_v62 = vpack.c.bf16 %v7400_v21, %v7399_v20 }
0x1005   :  { %14556 = vmatprep.mubr.msk.bf16.mxu0 %vm3586_vm2, %v7403_v62 }
0x1006   :  { %14557 = vmatmul.mubr.msk.bf16.vlgmr.msra.gmra.mxu0 %vm3586_vm2, %v7404_v5 }
0x1007   :  { %14561 = vmatpush3.bf16.msra.mxu0 %v17267_v36  ;;  %v15300_v36 = vld [vmem:[%s18023_s15 + $0x38] sm:$0xff]  }
0x1008   :  { %14562 = vmatprep.subr.bf16.mxu0 %v15297_v12 }
0x100b   :  { %14563 = vmatpush3.bf16.msra.mxu0 %v15297_v12 }
0x100c   :  { %14564 = vmatprep.subr.bf16.mxu0 %v15298_v14 }
0x100f   :  { %14565 = vmatpush3.bf16.msra.mxu0 %v15298_v14 }
0x1010   :  { %14566 = vmatprep.subr.bf16.mxu0 %v15299_v19 }
0x1013   :  { %14567 = vmatpush3.bf16.msra.mxu0 %v15299_v19 }
0x1014   :  { %14580 = vmatprep.subr.bf16.mxu0 %v15300_v36 }
0x10c6   :  { %v14558_v23 = vpop.f32.mrf.mxu0 }
0x10c7   :  { %v7493_v29 = vadd.f32 %v14558_v23, %v12471_v25 }
0x10c8   :  { %v7484_v24 = vpop.f32.mrf.mxu0 }
0x10c9   :  { %v7485_v27 = vadd.f32 %v12471_v25, %v7484_v24  ;;  %v7501_v38 = vmax.f32 %v7493_v29, 0.0 }
0x10ca   :  { %v14559_v26 = vpop.f32.mrf.mxu0 }
0x10cb   :  { %v7496_v28 = vadd.f32 %v14559_v26, %v12471_v25  ;;  %v7499_v33 = vmax.f32 %v7485_v27, 0.0 }
0x10cc   :  { %v7487_v31 = vpop.f32.mrf.mxu0 }
0x10cd   :  { %v7488_v37 = vadd.f32 %v12471_v25, %v7487_v31  ;;  %v7502_v39 = vmax.f32 %v7496_v28, 0.0  ;;  %v12530_v31 = vld [vmem:[%s18024_s16 + $0x2] ss:$0 sm:$0xff] }
0x10cf   :  { %v7500_v34 = vmax.f32 %v7488_v37, 0.0  ;;  %v17293_v43 = vpack.c.bf16 %v7502_v39, %v7501_v38 }
0x10d1   :  { %v17291_v41 = vpack.c.bf16 %v7500_v34, %v7499_v33 }
0x10d3   :  { %14568 = vmatprep.mubr.msk.bf16.mxu0 %vm3586_vm2, %v17291_v41 }
0x10d4   :  { %14569 = vmatmul.mubr.msk.bf16.vlgmr.msra.gmra.mxu0 %vm3586_vm2, %v17293_v43 }
0x10d5   :  { %14581 = vmatpush3.bf16.msra.mxu0 %v15300_v36  ;;  %14588 = vmatprep.mubr.msk.bf16.mxu0 %vm3586_vm2, %v17291_v41 }
0x10d6   :  { %14582 = vmatprep.subr.bf16.mxu0 %v15301_v46 }
0x10d9   :  { %14583 = vmatpush3.bf16.msra.mxu0 %v15301_v46 }
0x10da   :  { %14584 = vmatprep.subr.bf16.mxu0 %v15302_v40 }
0x10dd   :  { %14585 = vmatpush3.bf16.msra.mxu0 %v15302_v40 }
0x10de   :  { %14586 = vmatprep.subr.bf16.mxu0 %v15303_v50 }
0x10e1   :  { %14587 = vmatpush3.bf16.msra.mxu0 %v15303_v50 }
0x10e4   :  { %14589 = vmatmul.mubr.msk.bf16.vlgmr.msra.gmra.mxu0 %vm3586_vm2, %v17293_v43 }
0x10e5   :  { %14616 = vmatprep.mubr.msk.bf16.mxu0 %vm175_vm1, %v15312_v4 }
0x1194   :  { %v14570_v44 = vpop.f32.mrf.mxu0 }
0x1195   :  { %v7593_v49 = vadd.f32 %v14570_v44, %v12478_v48 }
0x1196   :  { %v7584_v57 = vpop.f32.mrf.mxu0 }
0x1197   :  { %v7585_v51 = vadd.f32 %v12478_v48, %v7584_v57 }
0x1198   :  { %v14571_v61 = vpop.f32.mrf.mxu0 }
0x1199   :  { %v7596_v47 = vadd.f32 %v14571_v61, %v12478_v48  ;;  %v15314_v61 = vld [vmem:[%s18023_s15 + $0x78] sm:$0xff]  }
0x119a   :  { %v7587_v52 = vpop.f32.mrf.mxu0 }
0x119b   :  { %v7604_v55 = vpack.c.bf16 %v7596_v47, %v7593_v49  ;;  %v7588_v3 = vadd.f32 %v12478_v48, %v7587_v52  ;;  %v15313_v49 = vld [vmem:[%s18054_s1 + $0x28] sm:$0xff]   ;;  %v15315_v47 = vld [vmem:[%s18023_s15 + $0x70] sm:$0xff]  }
0x119c   :  { %v15316_v52 = vld [vmem:[%s18023_s15 + $0x68] sm:$0xff]  }
0x119d   :  { %v7603_v42 = vpack.c.bf16 %v7588_v3, %v7585_v51  ;;  %14572 = vmatprep.subr.bf16.mxu1 %v7604_v55  ;;  %v15317_v51 = vld [vmem:[%s18023_s15 + $0x60] sm:$0xff]  }
0x119e   :  { %14573 = vmatpush3.bf16.msra.mxu1 %v7604_v55  ;;  %v15318_v55 = vld [vmem:[%s18054_s1 + $0x30] sm:$0xff]  }
0x119f   :  { %14574 = vmatprep.subr.bf16.mxu1 %v7603_v42 }
0x11a2   :  { %14575 = vmatpush3.bf16.msra.mxu1 %v7603_v42 }
0x11a4   :  { %v14590_v32 = vpop.f32.mrf.mxu0 }
0x11a5   :  { %14577 = vmatmul.mubr.msk.bf16.vlgmr.msra.gmra.mxu1 %vm175_vm1, %v15305_v45  ;;  %v7778_v15 = vadd.f32 %v14590_v32, %v12502_v56 }
0x11a6   :  { %v7769_v35 = vpop.f32.mrf.mxu0  ;;  %14596 = vmatprep.mubr.msk.bf16.mxu1 %vm175_vm1, %v15306_v63 }
0x11a7   :  { %v7770_v1 = vadd.f32 %v12502_v56, %v7769_v35 }
0x11a8   :  { %v14591_v60 = vpop.f32.mrf.mxu0 }
0x11a9   :  { %v7781_v11 = vadd.f32 %v14591_v60, %v12502_v56 }
0x11aa   :  { %v7772_v54 = vpop.f32.mrf.mxu0 }
0x11ab   :  { %v7789_v16 = vpack.c.bf16 %v7781_v11, %v7778_v15  ;;  %v7773_v7 = vadd.f32 %v12502_v56, %v7772_v54  ;;  %v12558_v54 = vld [vmem:[%s18024_s16 + $0x3] ss:$0 sm:$0xff] }
0x11ad   :  { %v7788_v9 = vpack.c.bf16 %v7773_v7, %v7770_v1  ;;  %14592 = vmatprep.subr.bf16.mxu1 %v7789_v16 }
0x11ae   :  { %14593 = vmatpush3.bf16.msra.mxu1 %v7789_v16 }
0x11af   :  { %14594 = vmatprep.subr.bf16.mxu1 %v7788_v9 }
0x11b2   :  { %14595 = vmatpush3.bf16.msra.mxu1 %v7788_v9 }
0x11b3   :  { %14600 = vmatprep.subr.bf16.mxu1 %v15308_v8 }
0x11b5   :  { %14597 = vmatmul.mubr.msk.bf16.vlgmr.msra.gmra.mxu1 %vm175_vm1, %v15307_v10 }
0x11b6   :  { %14601 = vmatpush3.bf16.msra.mxu1 %v15308_v8  ;;  %14608 = vmatprep.mubr.msk.bf16.mxu1 %vm3586_vm2, %v17291_v41 }
0x11b7   :  { %14602 = vmatprep.subr.bf16.mxu1 %v15309_v58 }
0x11ba   :  { %14603 = vmatpush3.bf16.msra.mxu1 %v15309_v58 }
0x11bb   :  { %14604 = vmatprep.subr.bf16.mxu1 %v15310_v59 }
0x11be   :  { %14605 = vmatpush3.bf16.msra.mxu1 %v15310_v59 }
0x11bf   :  { %14606 = vmatprep.subr.bf16.mxu1 %v15311_v2 }
0x11c2   :  { %14607 = vmatpush3.bf16.msra.mxu1 %v15311_v2 }
0x11c5   :  { %14609 = vmatmul.mubr.msk.bf16.vlgmr.msra.gmra.mxu1 %vm3586_vm2, %v17293_v43 }
0x11c6   :  { %14636 = vmatprep.mubr.msk.bf16.mxu1 %vm175_vm1, %v15318_v55 }
0x1265   :  { %v14578_v0 = vpop.f32.mrf.mxu1 }
0x1266   :  { %15736 = vtanh.f32 %v14578_v0 }
0x1267   :  { %v7655_v6 = vpop.f32.mrf.mxu1 }
0x1268   :  { %15738 = vtanh.f32 %v7655_v6 }
0x1269   :  { %v14579_v13 = vpop.f32.mrf.mxu1 }
0x126a   :  { %15740 = vtanh.f32 %v14579_v13  ;;  %v15320_v13 = vld [vmem:[%s18023_s15 + $0x98] sm:$0xff]  }
0x126b   :  { %v7658_v17 = vpop.f32.mrf.mxu1 }
0x126c   :  { %15742 = vtanh.f32 %v7658_v17  ;;  %v15319_v17 = vld [vmem:[%s18054_s1 + $0x38] sm:$0xff]  }
0x1273   :  { %v15737_v30 = vpop.eup %15736 }
0x1274   :  { %v13088_v18 = vpack.c.bf16 %v15737_v30, %v15737_v30  ;;  %v15321_v30 = vld [vmem:[%s18023_s15 + $0x90] sm:$0xff]  }
0x1275   :  { %v15739_v20 = vpop.eup %15738  ;;  %v14598_v21 = vpop.f32.mrf.mxu1 }
0x1276   :  { %7692 = vst [vmem:[#allocation2 + $0x68] sm:$0xf] %v13088_v18  ;;  %v13086_v22 = vpack.c.bf16 %v15739_v20, %v15739_v20  ;;  %15744 = vtanh.f32 %v14598_v21  ;;  %v15322_v18 = vld [vmem:[%s18023_s15 + $0x88] sm:$0xff]   ;;  %v15323_v20 = vld [vmem:[%s18023_s15 + $0x80] sm:$0xff]  }
0x1277   :  { %v15741_v62 = vpop.eup %15740  ;;  %v7840_v5 = vpop.f32.mrf.mxu1  ;;  %v15324_v21 = vld [vmem:[%s18054_s1 + $0x40] sm:$0xff]  }
0x1278   :  { %7690 = vst [vmem:[#allocation2] sm:$0xf] %v13086_v22  ;;  %v13089_v12 = vpack.c.bf16 %v15741_v62, %v15741_v62  ;;  %15746 = vtanh.f32 %v7840_v5 }
0x1279   :  { %v15743_v14 = vpop.eup %15742  ;;  %v14599_v19 = vpop.f32.mrf.mxu1 }
0x127a   :  { %7693 = vst [vmem:[#allocation2 + $0x9c] sm:$0xf] %v13089_v12  ;;  %v13087_v36 = vpack.c.bf16 %v15743_v14, %v15743_v14  ;;  %15748 = vtanh.f32 %v14599_v19 }
0x127b   :  { %v7843_v23 = vpop.f32.mrf.mxu1 }
0x127c   :  { %7691 = vst [vmem:[#allocation2 + $0x34] sm:$0xf] %v13087_v36  ;;  %15750 = vtanh.f32 %v7843_v23 }
0x1283   :  { %v15745_v24 = vpop.eup %15744 }
0x1284   :  { %v13092_v25 = vpack.c.bf16 %v15745_v24, %v15745_v24 }
0x1285   :  { %v15747_v26 = vpop.eup %15746  ;;  %v14610_v27 = vpop.f32.mrf.mxu1 }
0x1286   :  { %7877 = vst [vmem:[#allocation2 + $0x6c] sm:$0xf] %v13092_v25  ;;  %v13090_v28 = vpack.c.bf16 %v15747_v26, %v15747_v26  ;;  %v7963_v46 = vadd.f32 %v14610_v27, %v12530_v31  ;;  %v12586_v26 = vld [vmem:[%s18024_s16 + $0x4] ss:$0 sm:$0xff] }
0x1287   :  { %v15749_v29 = vpop.eup %15748  ;;  %v7954_v37 = vpop.f32.mrf.mxu1 }
0x1288   :  { %7875 = vst [vmem:[#allocation2 + $0x4] sm:$0xf] %v13090_v28  ;;  %v13093_v39 = vpack.c.bf16 %v15749_v29, %v15749_v29  ;;  %v7955_v53 = vadd.f32 %v12530_v31, %v7954_v37 }
0x1289   :  { %v15751_v33 = vpop.eup %15750  ;;  %v14611_v34 = vpop.f32.mrf.mxu1 }
0x128a   :  { %7878 = vst [vmem:[#allocation2 + $0xa0] sm:$0xf] %v13093_v39  ;;  %v13091_v38 = vpack.c.bf16 %v15751_v33, %v15751_v33  ;;  %v7966_v40 = vadd.f32 %v14611_v34, %v12530_v31 }
0x128b   :  { %v7957_v50 = vpop.f32.mrf.mxu1 }
0x128c   :  { %7876 = vst [vmem:[#allocation2 + $0x38] sm:$0xf] %v13091_v38  ;;  %v7974_v44 = vpack.c.bf16 %v7966_v40, %v7963_v46  ;;  %v7958_v48 = vadd.f32 %v12530_v31, %v7957_v50 }
0x128e   :  { %v7973_v57 = vpack.c.bf16 %v7958_v48, %v7955_v53  ;;  %14612 = vmatprep.subr.bf16.mxu0 %v7974_v44  ;;  %v15326_v53 = vld [vmem:[%s18023_s15 + $0xb8] sm:$0xff]   ;;  %v15327_v48 = vld [vmem:[%s18023_s15 + $0xb0] sm:$0xff]  }
0x128f   :  { %14613 = vmatpush3.bf16.msra.mxu0 %v7974_v44  ;;  %v15325_v44 = vld [vmem:[%s18054_s1 + $0x48] sm:$0xff]  }
0x1290   :  { %14614 = vmatprep.subr.bf16.mxu0 %v7973_v57 }
0x1293   :  { %14615 = vmatpush3.bf16.msra.mxu0 %v7973_v57  ;;  %v15328_v57 = vld [vmem:[%s18023_s15 + $0xa8] sm:$0xff]  }
0x1294   :  { %14620 = vmatprep.subr.bf16.mxu0 %v15314_v61 }
0x1296   :  { %14617 = vmatmul.mubr.msk.bf16.vlgmr.msra.gmra.mxu0 %vm175_vm1, %v15313_v49  ;;  %v15330_v49 = vld [vmem:[%s18054_s1 + $0x50] sm:$0xff]  }
0x1297   :  { %14621 = vmatpush3.bf16.msra.mxu0 %v15314_v61  ;;  %14628 = vmatprep.mubr.msk.bf16.mxu0 %vm3586_vm2, %v17291_v41  ;;  %v15329_v61 = vld [vmem:[%s18023_s15 + $0xa0] sm:$0xff]  }
0x1298   :  { %14622 = vmatprep.subr.bf16.mxu0 %v15315_v47 }
0x129b   :  { %14623 = vmatpush3.bf16.msra.mxu0 %v15315_v47 }
0x129c   :  { %14624 = vmatprep.subr.bf16.mxu0 %v15316_v52 }
0x129f   :  { %14625 = vmatpush3.bf16.msra.mxu0 %v15316_v52 }
0x12a0   :  { %14626 = vmatprep.subr.bf16.mxu0 %v15317_v51 }
0x12a3   :  { %14627 = vmatpush3.bf16.msra.mxu0 %v15317_v51 }
0x12a6   :  { %14629 = vmatmul.mubr.msk.bf16.vlgmr.msra.gmra.mxu0 %vm3586_vm2, %v17293_v43 }
0x12a7   :  { %14656 = vmatprep.mubr.msk.bf16.mxu0 %vm175_vm1, %v15324_v21 }
0x1356   :  { %v14618_v3 = vpop.f32.mrf.mxu0 }
0x1357   :  { %15752 = vtanh.f32 %v14618_v3 }
0x1358   :  { %v8025_v42 = vpop.f32.mrf.mxu0 }
0x1359   :  { %15754 = vtanh.f32 %v8025_v42 }
0x135a   :  { %v14619_v45 = vpop.f32.mrf.mxu0 }
0x135b   :  { %15756 = vtanh.f32 %v14619_v45 }
0x135c   :  { %v8028_v63 = vpop.f32.mrf.mxu0 }
0x135d   :  { %15758 = vtanh.f32 %v8028_v63 }
0x1364   :  { %v15753_v32 = vpop.eup %15752 }
0x1365   :  { %v13096_v56 = vpack.c.bf16 %v15753_v32, %v15753_v32 }
0x1366   :  { %v15755_v35 = vpop.eup %15754  ;;  %v14630_v60 = vpop.f32.mrf.mxu0 }
0x1367   :  { %8062 = vst [vmem:[#allocation2 + $0x70] sm:$0xf] %v13096_v56  ;;  %v13094_v15 = vpack.c.bf16 %v15755_v35, %v15755_v35  ;;  %v8148_v10 = vadd.f32 %v14630_v60, %v12558_v54  ;;  %v12614_v35 = vld [vmem:[%s18024_s16 + $0x5] ss:$0 sm:$0xff] }
0x1368   :  { %v15757_v11 = vpop.eup %15756  ;;  %v8139_v1 = vpop.f32.mrf.mxu0 }
0x1369   :  { %8060 = vst [vmem:[#allocation2 + $0x8] sm:$0xf] %v13094_v15  ;;  %v13097_v16 = vpack.c.bf16 %v15757_v11, %v15757_v11  ;;  %v8140_v2 = vadd.f32 %v12558_v54, %v8139_v1 }
0x136a   :  { %v15759_v7 = vpop.eup %15758  ;;  %v14631_v9 = vpop.f32.mrf.mxu0 }
0x136b   :  { %8063 = vst [vmem:[#allocation2 + $0xa4] sm:$0xf] %v13097_v16  ;;  %v13095_v8 = vpack.c.bf16 %v15759_v7, %v15759_v7  ;;  %v8151_v58 = vadd.f32 %v14631_v9, %v12558_v54 }
0x136c   :  { %v8142_v59 = vpop.f32.mrf.mxu0 }
0x136d   :  { %8061 = vst [vmem:[#allocation2 + $0x3c] sm:$0xf] %v13095_v8  ;;  %v8159_v4 = vpack.c.bf16 %v8151_v58, %v8148_v10  ;;  %v8143_v0 = vadd.f32 %v12558_v54, %v8142_v59 }
0x136f   :  { %v8158_v6 = vpack.c.bf16 %v8143_v0, %v8140_v2  ;;  %14632 = vmatprep.subr.bf16.mxu1 %v8159_v4  ;;  %v15332_v2 = vld [vmem:[%s18023_s15 + $0xd8] sm:$0xff]   ;;  %v15333_v0 = vld [vmem:[%s18023_s15 + $0xd0] sm:$0xff]  }
0x1370   :  { %14633 = vmatpush3.bf16.msra.mxu1 %v8159_v4  ;;  %v15331_v4 = vld [vmem:[%s18054_s1 + $0x58] sm:$0xff]  }
0x1371   :  { %14634 = vmatprep.subr.bf16.mxu1 %v8158_v6 }
0x1374   :  { %14635 = vmatpush3.bf16.msra.mxu1 %v8158_v6  ;;  %v15334_v6 = vld [vmem:[%s18023_s15 + $0xc8] sm:$0xff]  }
0x1375   :  { %14640 = vmatprep.subr.bf16.mxu1 %v15320_v13 }
0x1377   :  { %14637 = vmatmul.mubr.msk.bf16.vlgmr.msra.gmra.mxu1 %vm175_vm1, %v15319_v17  ;;  %v15336_v17 = vld [vmem:[%s18054_s1 + $0x60] sm:$0xff]  }
0x1378   :  { %14641 = vmatpush3.bf16.msra.mxu1 %v15320_v13  ;;  %14648 = vmatprep.mubr.msk.bf16.mxu1 %vm3586_vm2, %v17291_v41  ;;  %v15335_v13 = vld [vmem:[%s18023_s15 + $0xc0] sm:$0xff]  }
0x1379   :  { %14642 = vmatprep.subr.bf16.mxu1 %v15321_v30 }
0x137c   :  { %14643 = vmatpush3.bf16.msra.mxu1 %v15321_v30 }
0x137d   :  { %14644 = vmatprep.subr.bf16.mxu1 %v15322_v18 }
0x1380   :  { %14645 = vmatpush3.bf16.msra.mxu1 %v15322_v18 }
0x1381   :  { %14646 = vmatprep.subr.bf16.mxu1 %v15323_v20 }
0x1384   :  { %14647 = vmatpush3.bf16.msra.mxu1 %v15323_v20 }
0x1387   :  { %14649 = vmatmul.mubr.msk.bf16.vlgmr.msra.gmra.mxu1 %vm3586_vm2, %v17293_v43 }
0x1388   :  { %14676 = vmatprep.mubr.msk.bf16.mxu1 %vm175_vm1, %v15330_v49 }
0x1437   :  { %v14638_v22 = vpop.f32.mrf.mxu1 }
0x1438   :  { %15760 = vtanh.f32 %v14638_v22 }
0x1439   :  { %v8210_v62 = vpop.f32.mrf.mxu1 }
0x143a   :  { %15762 = vtanh.f32 %v8210_v62 }
0x143b   :  { %v14639_v5 = vpop.f32.mrf.mxu1 }
0x143c   :  { %15764 = vtanh.f32 %v14639_v5 }
0x143d   :  { %v8213_v12 = vpop.f32.mrf.mxu1 }
0x143e   :  { %15766 = vtanh.f32 %v8213_v12 }
0x1445   :  { %v15761_v14 = vpop.eup %15760 }
0x1446   :  { %v13100_v19 = vpack.c.bf16 %v15761_v14, %v15761_v14 }
0x1447   :  { %v15763_v36 = vpop.eup %15762  ;;  %v14650_v23 = vpop.f32.mrf.mxu1 }
0x1448   :  { %8247 = vst [vmem:[#allocation2 + $0x74] sm:$0xf] %v13100_v19  ;;  %v13098_v24 = vpack.c.bf16 %v15763_v36, %v15763_v36  ;;  %v8333_v39 = vadd.f32 %v14650_v23, %v12586_v26  ;;  %v12642_v36 = vld [vmem:[%s18024_s16 + $0x6] ss:$0 sm:$0xff] }
0x1449   :  { %v15765_v25 = vpop.eup %15764  ;;  %v8324_v27 = vpop.f32.mrf.mxu1 }
0x144a   :  { %8245 = vst [vmem:[#allocation2 + $0xc] sm:$0xf] %v13098_v24  ;;  %v13101_v28 = vpack.c.bf16 %v15765_v25, %v15765_v25  ;;  %v8325_v38 = vadd.f32 %v12586_v26, %v8324_v27 }
0x144b   :  { %v15767_v29 = vpop.eup %15766  ;;  %v14651_v31 = vpop.f32.mrf.mxu1 }
0x144c   :  { %8248 = vst [vmem:[#allocation2 + $0xa8] sm:$0xf] %v13101_v28  ;;  %v13099_v37 = vpack.c.bf16 %v15767_v29, %v15767_v29  ;;  %v8336_v33 = vadd.f32 %v14651_v31, %v12586_v26 }
0x144d   :  { %v8327_v34 = vpop.f32.mrf.mxu1 }
0x144e   :  { %8246 = vst [vmem:[#allocation2 + $0x40] sm:$0xf] %v13099_v37  ;;  %v8344_v46 = vpack.c.bf16 %v8336_v33, %v8333_v39  ;;  %v8328_v40 = vadd.f32 %v12586_v26, %v8327_v34 }
0x1450   :  { %v8343_v50 = vpack.c.bf16 %v8328_v40, %v8325_v38  ;;  %14652 = vmatprep.subr.bf16.mxu0 %v8344_v46  ;;  %v15338_v38 = vld [vmem:[%s18023_s15 + $0xf8] sm:$0xff]   ;;  %v15339_v40 = vld [vmem:[%s18023_s15 + $0xf0] sm:$0xff]  }
0x1451   :  { %14653 = vmatpush3.bf16.msra.mxu0 %v8344_v46  ;;  %v15337_v46 = vld [vmem:[%s18054_s1 + $0x68] sm:$0xff]  }
0x1452   :  { %14654 = vmatprep.subr.bf16.mxu0 %v8343_v50 }
0x1455   :  { %14655 = vmatpush3.bf16.msra.mxu0 %v8343_v50  ;;  %v15340_v50 = vld [vmem:[%s18023_s15 + $0xe8] sm:$0xff]  }
0x1456   :  { %14660 = vmatprep.subr.bf16.mxu0 %v15326_v53 }
0x1458   :  { %14657 = vmatmul.mubr.msk.bf16.vlgmr.msra.gmra.mxu0 %vm175_vm1, %v15325_v44  ;;  %v15342_v44 = vld [vmem:[%s18054_s1 + $0x70] sm:$0xff]  }
0x1459   :  { %14661 = vmatpush3.bf16.msra.mxu0 %v15326_v53  ;;  %14668 = vmatprep.mubr.msk.bf16.mxu0 %vm3586_vm2, %v17291_v41  ;;  %v15341_v53 = vld [vmem:[%s18023_s15 + $0xe0] sm:$0xff]  }
0x145a   :  { %14662 = vmatprep.subr.bf16.mxu0 %v15327_v48 }
0x145d   :  { %14663 = vmatpush3.bf16.msra.mxu0 %v15327_v48 }
0x145e   :  { %14664 = vmatprep.subr.bf16.mxu0 %v15328_v57 }
0x1461   :  { %14665 = vmatpush3.bf16.msra.mxu0 %v15328_v57 }
0x1462   :  { %14666 = vmatprep.subr.bf16.mxu0 %v15329_v61 }
0x1465   :  { %14667 = vmatpush3.bf16.msra.mxu0 %v15329_v61 }
0x1468   :  { %14669 = vmatmul.mubr.msk.bf16.vlgmr.msra.gmra.mxu0 %vm3586_vm2, %v17293_v43 }
0x1469   :  { %14696 = vmatprep.mubr.msk.bf16.mxu0 %vm175_vm1, %v15336_v17 }
0x1518   :  { %v14658_v47 = vpop.f32.mrf.mxu0 }
0x1519   :  { %15768 = vtanh.f32 %v14658_v47 }
0x151a   :  { %v8395_v52 = vpop.f32.mrf.mxu0 }
0x151b   :  { %15770 = vtanh.f32 %v8395_v52 }
0x151c   :  { %v14659_v51 = vpop.f32.mrf.mxu0 }
0x151d   :  { %15772 = vtanh.f32 %v14659_v51 }
0x151e   :  { %v8398_v55 = vpop.f32.mrf.mxu0 }
0x151f   :  { %15774 = vtanh.f32 %v8398_v55 }
0x1526   :  { %v15769_v3 = vpop.eup %15768 }
0x1527   :  { %v13104_v42 = vpack.c.bf16 %v15769_v3, %v15769_v3 }
0x1528   :  { %v15771_v45 = vpop.eup %15770  ;;  %v14670_v63 = vpop.f32.mrf.mxu0 }
0x1529   :  { %8432 = vst [vmem:[#allocation2 + $0x78] sm:$0xf] %v13104_v42  ;;  %v13102_v32 = vpack.c.bf16 %v15771_v45, %v15771_v45  ;;  %v8518_v16 = vadd.f32 %v14670_v63, %v12614_v35  ;;  %v12670_v45 = vld [vmem:[%s18024_s16 + $0x7] ss:$0 sm:$0xff] }
0x152a   :  { %v15773_v56 = vpop.eup %15772  ;;  %v8509_v60 = vpop.f32.mrf.mxu0 }
0x152b   :  { %8430 = vst [vmem:[#allocation2 + $0x10] sm:$0xf] %v13102_v32  ;;  %v13105_v15 = vpack.c.bf16 %v15773_v56, %v15773_v56  ;;  %v8510_v8 = vadd.f32 %v12614_v35, %v8509_v60 }
0x152c   :  { %v15775_v11 = vpop.eup %15774  ;;  %v14671_v54 = vpop.f32.mrf.mxu0 }
0x152d   :  { %8433 = vst [vmem:[#allocation2 + $0xac] sm:$0xf] %v13105_v15  ;;  %v13103_v1 = vpack.c.bf16 %v15775_v11, %v15775_v11  ;;  %v8521_v7 = vadd.f32 %v14671_v54, %v12614_v35 }
0x152e   :  { %v8512_v9 = vpop.f32.mrf.mxu0 }
0x152f   :  { %8431 = vst [vmem:[#allocation2 + $0x44] sm:$0xf] %v13103_v1  ;;  %v8529_v10 = vpack.c.bf16 %v8521_v7, %v8518_v16  ;;  %v8513_v58 = vadd.f32 %v12614_v35, %v8512_v9 }
0x1531   :  { %v8528_v59 = vpack.c.bf16 %v8513_v58, %v8510_v8  ;;  %14672 = vmatprep.subr.bf16.mxu1 %v8529_v10  ;;  %v15344_v8 = vld [vmem:[%s18023_s15 + $0x118] sm:$0xff]   ;;  %v15345_v58 = vld [vmem:[%s18023_s15 + $0x110] sm:$0xff]  }
0x1532   :  { %14673 = vmatpush3.bf16.msra.mxu1 %v8529_v10  ;;  %v15343_v10 = vld [vmem:[%s18054_s1 + $0x78] sm:$0xff]  }
0x1533   :  { %14674 = vmatprep.subr.bf16.mxu1 %v8528_v59 }
0x1536   :  { %14675 = vmatpush3.bf16.msra.mxu1 %v8528_v59  ;;  %v15346_v59 = vld [vmem:[%s18023_s15 + $0x108] sm:$0xff]  }
0x1537   :  { %14680 = vmatprep.subr.bf16.mxu1 %v15332_v2 }
0x1539   :  { %14677 = vmatmul.mubr.msk.bf16.vlgmr.msra.gmra.mxu1 %vm175_vm1, %v15331_v4  ;;  %v15348_v4 = vld [vmem:[%s18054_s1 + $0x80] sm:$0xff]  }
0x153a   :  { %14681 = vmatpush3.bf16.msra.mxu1 %v15332_v2  ;;  %14688 = vmatprep.mubr.msk.bf16.mxu1 %vm3586_vm2, %v17291_v41  ;;  %v15347_v2 = vld [vmem:[%s18023_s15 + $0x100] sm:$0xff]  }
0x153b   :  { %14682 = vmatprep.subr.bf16.mxu1 %v15333_v0 }
0x153e   :  { %14683 = vmatpush3.bf16.msra.mxu1 %v15333_v0 }
0x153f   :  { %14684 = vmatprep.subr.bf16.mxu1 %v15334_v6 }
0x1542   :  { %14685 = vmatpush3.bf16.msra.mxu1 %v15334_v6 }
0x1543   :  { %14686 = vmatprep.subr.bf16.mxu1 %v15335_v13 }
0x1546   :  { %14687 = vmatpush3.bf16.msra.mxu1 %v15335_v13 }
0x1549   :  { %14689 = vmatmul.mubr.msk.bf16.vlgmr.msra.gmra.mxu1 %vm3586_vm2, %v17293_v43 }
0x154a   :  { %14716 = vmatprep.mubr.msk.bf16.mxu1 %vm175_vm1, %v15342_v44 }
0x15f9   :  { %v14678_v30 = vpop.f32.mrf.mxu1 }
0x15fa   :  { %15776 = vtanh.f32 %v14678_v30 }
0x15fb   :  { %v8580_v18 = vpop.f32.mrf.mxu1 }
0x15fc   :  { %15778 = vtanh.f32 %v8580_v18 }
0x15fd   :  { %v14679_v20 = vpop.f32.mrf.mxu1 }
0x15fe   :  { %15780 = vtanh.f32 %v14679_v20 }
0x15ff   :  { %v8583_v21 = vpop.f32.mrf.mxu1 }
0x1600   :  { %15782 = vtanh.f32 %v8583_v21 }
0x1607   :  { %v15777_v22 = vpop.eup %15776 }
0x1608   :  { %v13108_v62 = vpack.c.bf16 %v15777_v22, %v15777_v22 }
0x1609   :  { %v15779_v5 = vpop.eup %15778  ;;  %v14690_v12 = vpop.f32.mrf.mxu1 }
0x160a   :  { %8617 = vst [vmem:[#allocation2 + $0x7c] sm:$0xf] %v13108_v62  ;;  %v13106_v14 = vpack.c.bf16 %v15779_v5, %v15779_v5  ;;  %v8703_v28 = vadd.f32 %v14690_v12, %v12642_v36  ;;  %v12698_v5 = vld [vmem:[%s18024_s16 + $0x8] ss:$0 sm:$0xff] }
0x160b   :  { %v15781_v19 = vpop.eup %15780  ;;  %v8694_v23 = vpop.f32.mrf.mxu1 }
0x160c   :  { %8615 = vst [vmem:[#allocation2 + $0x14] sm:$0xf] %v13106_v14  ;;  %v13109_v24 = vpack.c.bf16 %v15781_v19, %v15781_v19  ;;  %v8695_v37 = vadd.f32 %v12642_v36, %v8694_v23 }
0x160d   :  { %v15783_v25 = vpop.eup %15782  ;;  %v14691_v26 = vpop.f32.mrf.mxu1 }
0x160e   :  { %8618 = vst [vmem:[#allocation2 + $0xb0] sm:$0xf] %v13109_v24  ;;  %v13107_v27 = vpack.c.bf16 %v15783_v25, %v15783_v25  ;;  %v8706_v29 = vadd.f32 %v14691_v26, %v12642_v36 }
0x160f   :  { %v8697_v31 = vpop.f32.mrf.mxu1 }
0x1610   :  { %8616 = vst [vmem:[#allocation2 + $0x48] sm:$0xf] %v13107_v27  ;;  %v8714_v39 = vpack.c.bf16 %v8706_v29, %v8703_v28  ;;  %v8698_v33 = vadd.f32 %v12642_v36, %v8697_v31 }
0x1612   :  { %v8713_v34 = vpack.c.bf16 %v8698_v33, %v8695_v37  ;;  %14692 = vmatprep.subr.bf16.mxu0 %v8714_v39  ;;  %v15350_v37 = vld [vmem:[%s18023_s15 + $0x138] sm:$0xff]   ;;  %v15351_v33 = vld [vmem:[%s18023_s15 + $0x130] sm:$0xff]  }
0x1613   :  { %14693 = vmatpush3.bf16.msra.mxu0 %v8714_v39  ;;  %v15349_v39 = vld [vmem:[%s18054_s1 + $0x88] sm:$0xff]  }
0x1614   :  { %14694 = vmatprep.subr.bf16.mxu0 %v8713_v34 }
0x1617   :  { %14695 = vmatpush3.bf16.msra.mxu0 %v8713_v34  ;;  %v15352_v34 = vld [vmem:[%s18023_s15 + $0x128] sm:$0xff]  }
0x1618   :  { %14700 = vmatprep.subr.bf16.mxu0 %v15338_v38 }
0x161a   :  { %14697 = vmatmul.mubr.msk.bf16.vlgmr.msra.gmra.mxu0 %vm175_vm1, %v15337_v46  ;;  %v15354_v46 = vld [vmem:[%s18054_s1 + $0x90] sm:$0xff]  }
0x161b   :  { %14701 = vmatpush3.bf16.msra.mxu0 %v15338_v38  ;;  %14708 = vmatprep.mubr.msk.bf16.mxu0 %vm3586_vm2, %v17291_v41  ;;  %v15353_v38 = vld [vmem:[%s18023_s15 + $0x120] sm:$0xff]  }
0x161c   :  { %14702 = vmatprep.subr.bf16.mxu0 %v15339_v40 }
0x161f   :  { %14703 = vmatpush3.bf16.msra.mxu0 %v15339_v40 }
0x1620   :  { %14704 = vmatprep.subr.bf16.mxu0 %v15340_v50 }
0x1623   :  { %14705 = vmatpush3.bf16.msra.mxu0 %v15340_v50 }
0x1624   :  { %14706 = vmatprep.subr.bf16.mxu0 %v15341_v53 }
0x1627   :  { %14707 = vmatpush3.bf16.msra.mxu0 %v15341_v53 }
0x162a   :  { %14709 = vmatmul.mubr.msk.bf16.vlgmr.msra.gmra.mxu0 %vm3586_vm2, %v17293_v43 }
0x162b   :  { %14736 = vmatprep.mubr.msk.bf16.mxu0 %vm175_vm1, %v15348_v4 }
0x16da   :  { %v14698_v48 = vpop.f32.mrf.mxu0 }
0x16db   :  { %15784 = vtanh.f32 %v14698_v48 }
0x16dc   :  { %v8765_v57 = vpop.f32.mrf.mxu0 }
0x16dd   :  { %15786 = vtanh.f32 %v8765_v57 }
0x16de   :  { %v14699_v61 = vpop.f32.mrf.mxu0 }
0x16df   :  { %15788 = vtanh.f32 %v14699_v61 }
0x16e0   :  { %v8768_v49 = vpop.f32.mrf.mxu0 }
0x16e1   :  { %15790 = vtanh.f32 %v8768_v49 }
0x16e8   :  { %v15785_v47 = vpop.eup %15784 }
0x16e9   :  { %v13112_v52 = vpack.c.bf16 %v15785_v47, %v15785_v47 }
0x16ea   :  { %v15787_v51 = vpop.eup %15786  ;;  %v14710_v55 = vpop.f32.mrf.mxu0 }
0x16eb   :  { %8802 = vst [vmem:[#allocation2 + $0x80] sm:$0xf] %v13112_v52  ;;  %v13110_v3 = vpack.c.bf16 %v15787_v51, %v15787_v51  ;;  %v8888_v15 = vadd.f32 %v14710_v55, %v12670_v45  ;;  %v12726_v51 = vld [vmem:[%s18024_s16 + $0x9] ss:$0 sm:$0xff] }
0x16ec   :  { %v15789_v42 = vpop.eup %15788  ;;  %v8879_v63 = vpop.f32.mrf.mxu0 }
0x16ed   :  { %8800 = vst [vmem:[#allocation2 + $0x18] sm:$0xf] %v13110_v3  ;;  %v13113_v32 = vpack.c.bf16 %v15789_v42, %v15789_v42  ;;  %v8880_v1 = vadd.f32 %v12670_v45, %v8879_v63 }
0x16ee   :  { %v15791_v56 = vpop.eup %15790  ;;  %v14711_v35 = vpop.f32.mrf.mxu0 }
0x16ef   :  { %8803 = vst [vmem:[#allocation2 + $0xb4] sm:$0xf] %v13113_v32  ;;  %v13111_v60 = vpack.c.bf16 %v15791_v56, %v15791_v56  ;;  %v8891_v11 = vadd.f32 %v14711_v35, %v12670_v45 }
0x16f0   :  { %v8882_v54 = vpop.f32.mrf.mxu0 }
0x16f1   :  { %8801 = vst [vmem:[#allocation2 + $0x4c] sm:$0xf] %v13111_v60  ;;  %v8899_v16 = vpack.c.bf16 %v8891_v11, %v8888_v15  ;;  %v8883_v7 = vadd.f32 %v12670_v45, %v8882_v54 }
0x16f3   :  { %v8898_v9 = vpack.c.bf16 %v8883_v7, %v8880_v1  ;;  %14712 = vmatprep.subr.bf16.mxu1 %v8899_v16  ;;  %v15356_v1 = vld [vmem:[%s18023_s15 + $0x158] sm:$0xff]   ;;  %v15357_v7 = vld [vmem:[%s18023_s15 + $0x150] sm:$0xff]  }
0x16f4   :  { %14713 = vmatpush3.bf16.msra.mxu1 %v8899_v16  ;;  %v15355_v16 = vld [vmem:[%s18054_s1 + $0x98] sm:$0xff]  }
0x16f5   :  { %14714 = vmatprep.subr.bf16.mxu1 %v8898_v9 }
0x16f8   :  { %14715 = vmatpush3.bf16.msra.mxu1 %v8898_v9  ;;  %v15358_v9 = vld [vmem:[%s18023_s15 + $0x148] sm:$0xff]  }
0x16f9   :  { %14720 = vmatprep.subr.bf16.mxu1 %v15344_v8 }
0x16fb   :  { %14717 = vmatmul.mubr.msk.bf16.vlgmr.msra.gmra.mxu1 %vm175_vm1, %v15343_v10  ;;  %v15360_v10 = vld [vmem:[%s18054_s1 + $0xa0] sm:$0xff]  }
0x16fc   :  { %14721 = vmatpush3.bf16.msra.mxu1 %v15344_v8  ;;  %14728 = vmatprep.mubr.msk.bf16.mxu1 %vm3586_vm2, %v17291_v41  ;;  %v15359_v8 = vld [vmem:[%s18023_s15 + $0x140] sm:$0xff]  }
0x16fd   :  { %14722 = vmatprep.subr.bf16.mxu1 %v15345_v58 }
0x1700   :  { %14723 = vmatpush3.bf16.msra.mxu1 %v15345_v58 }
0x1701   :  { %14724 = vmatprep.subr.bf16.mxu1 %v15346_v59 }
0x1704   :  { %14725 = vmatpush3.bf16.msra.mxu1 %v15346_v59 }
0x1705   :  { %14726 = vmatprep.subr.bf16.mxu1 %v15347_v2 }
0x1708   :  { %14727 = vmatpush3.bf16.msra.mxu1 %v15347_v2 }
0x170b   :  { %14729 = vmatmul.mubr.msk.bf16.vlgmr.msra.gmra.mxu1 %vm3586_vm2, %v17293_v43 }
0x170c   :  { %14756 = vmatprep.mubr.msk.bf16.mxu1 %vm175_vm1, %v15354_v46 }
0x17bb   :  { %v14718_v0 = vpop.f32.mrf.mxu1 }
0x17bc   :  { %15792 = vtanh.f32 %v14718_v0 }
0x17bd   :  { %v8950_v6 = vpop.f32.mrf.mxu1 }
0x17be   :  { %15794 = vtanh.f32 %v8950_v6 }
0x17bf   :  { %v14719_v13 = vpop.f32.mrf.mxu1 }
0x17c0   :  { %15796 = vtanh.f32 %v14719_v13 }
0x17c1   :  { %v8953_v17 = vpop.f32.mrf.mxu1 }
0x17c2   :  { %15798 = vtanh.f32 %v8953_v17 }
0x17c9   :  { %v15793_v30 = vpop.eup %15792 }
0x17ca   :  { %v13116_v18 = vpack.c.bf16 %v15793_v30, %v15793_v30 }
0x17cb   :  { %v15795_v20 = vpop.eup %15794  ;;  %v14730_v21 = vpop.f32.mrf.mxu1 }
0x17cc   :  { %8987 = vst [vmem:[#allocation2 + $0x84] sm:$0xf] %v13116_v18  ;;  %v13114_v22 = vpack.c.bf16 %v15795_v20, %v15795_v20  ;;  %v9073_v24 = vadd.f32 %v14730_v21, %v12698_v5  ;;  %v12754_v20 = vld [vmem:[%s18024_s16 + $0xa] ss:$0 sm:$0xff] }
0x17cd   :  { %v15797_v62 = vpop.eup %15796  ;;  %v9064_v12 = vpop.f32.mrf.mxu1 }
0x17ce   :  { %8985 = vst [vmem:[#allocation2 + $0x1c] sm:$0xf] %v13114_v22  ;;  %v13117_v14 = vpack.c.bf16 %v15797_v62, %v15797_v62  ;;  %v9065_v27 = vadd.f32 %v12698_v5, %v9064_v12 }
0x17cf   :  { %v15799_v19 = vpop.eup %15798  ;;  %v14731_v36 = vpop.f32.mrf.mxu1 }
0x17d0   :  { %8988 = vst [vmem:[#allocation2 + $0xb8] sm:$0xf] %v13117_v14  ;;  %v13115_v23 = vpack.c.bf16 %v15799_v19, %v15799_v19  ;;  %v9076_v25 = vadd.f32 %v14731_v36, %v12698_v5 }
0x17d1   :  { %v9067_v26 = vpop.f32.mrf.mxu1 }
0x17d2   :  { %8986 = vst [vmem:[#allocation2 + $0x50] sm:$0xf] %v13115_v23  ;;  %v9084_v28 = vpack.c.bf16 %v9076_v25, %v9073_v24  ;;  %v9068_v29 = vadd.f32 %v12698_v5, %v9067_v26 }
0x17d4   :  { %v9083_v31 = vpack.c.bf16 %v9068_v29, %v9065_v27  ;;  %14732 = vmatprep.subr.bf16.mxu0 %v9084_v28  ;;  %v15362_v27 = vld [vmem:[%s18023_s15 + $0x178] sm:$0xff]   ;;  %v15363_v29 = vld [vmem:[%s18023_s15 + $0x170] sm:$0xff]  }
0x17d5   :  { %14733 = vmatpush3.bf16.msra.mxu0 %v9084_v28  ;;  %v15361_v28 = vld [vmem:[%s18054_s1 + $0xa8] sm:$0xff]  }
0x17d6   :  { %14734 = vmatprep.subr.bf16.mxu0 %v9083_v31 }
0x17d9   :  { %14735 = vmatpush3.bf16.msra.mxu0 %v9083_v31  ;;  %v15364_v31 = vld [vmem:[%s18023_s15 + $0x168] sm:$0xff]  }
0x17da   :  { %14740 = vmatprep.subr.bf16.mxu0 %v15350_v37 }
0x17dc   :  { %14737 = vmatmul.mubr.msk.bf16.vlgmr.msra.gmra.mxu0 %vm175_vm1, %v15349_v39  ;;  %v15366_v39 = vld [vmem:[%s18054_s1 + $0xb0] sm:$0xff]  }
0x17dd   :  { %14741 = vmatpush3.bf16.msra.mxu0 %v15350_v37  ;;  %14748 = vmatprep.mubr.msk.bf16.mxu0 %vm3586_vm2, %v17291_v41  ;;  %v15365_v37 = vld [vmem:[%s18023_s15 + $0x160] sm:$0xff]  }
0x17de   :  { %14742 = vmatprep.subr.bf16.mxu0 %v15351_v33 }
0x17e1   :  { %14743 = vmatpush3.bf16.msra.mxu0 %v15351_v33 }
0x17e2   :  { %14744 = vmatprep.subr.bf16.mxu0 %v15352_v34 }
0x17e5   :  { %14745 = vmatpush3.bf16.msra.mxu0 %v15352_v34 }
0x17e6   :  { %14746 = vmatprep.subr.bf16.mxu0 %v15353_v38 }
0x17e9   :  { %14747 = vmatpush3.bf16.msra.mxu0 %v15353_v38 }
0x17ec   :  { %14749 = vmatmul.mubr.msk.bf16.vlgmr.msra.gmra.mxu0 %vm3586_vm2, %v17293_v43 }
0x17ed   :  { %14776 = vmatprep.mubr.msk.bf16.mxu0 %vm175_vm1, %v15360_v10  ;;  %v15379_v10 = vld [vmem:[%s18025_s17 + $0xe8] sm:$0xff]  }
0x189c   :  { %v14738_v40 = vpop.f32.mrf.mxu0 }
0x189d   :  { %15800 = vtanh.f32 %v14738_v40 }
0x189e   :  { %v9135_v50 = vpop.f32.mrf.mxu0 }
0x189f   :  { %15802 = vtanh.f32 %v9135_v50 }
0x18a0   :  { %v14739_v53 = vpop.f32.mrf.mxu0 }
0x18a1   :  { %15804 = vtanh.f32 %v14739_v53 }
0x18a2   :  { %v9138_v44 = vpop.f32.mrf.mxu0 }
0x18a3   :  { %15806 = vtanh.f32 %v9138_v44 }
0x18aa   :  { %v15801_v48 = vpop.eup %15800 }
0x18ab   :  { %v13120_v57 = vpack.c.bf16 %v15801_v48, %v15801_v48 }
0x18ac   :  { %v15803_v61 = vpop.eup %15802  ;;  %v14750_v49 = vpop.f32.mrf.mxu0 }
0x18ad   :  { %9172 = vst [vmem:[#allocation2 + $0x88] sm:$0xf] %v13120_v57  ;;  %v13118_v47 = vpack.c.bf16 %v15803_v61, %v15803_v61  ;;  %v9258_v32 = vadd.f32 %v14750_v49, %v12726_v51  ;;  %v12782_v61 = vld [vmem:[%s18024_s16 + $0xb] ss:$0 sm:$0xff] }
0x18ae   :  { %v15805_v52 = vpop.eup %15804  ;;  %v9249_v55 = vpop.f32.mrf.mxu0 }
0x18af   :  { %9170 = vst [vmem:[#allocation2 + $0x20] sm:$0xf] %v13118_v47  ;;  %v13121_v3 = vpack.c.bf16 %v15805_v52, %v15805_v52  ;;  %v9250_v60 = vadd.f32 %v12726_v51, %v9249_v55 }
0x18b0   :  { %v15807_v42 = vpop.eup %15806  ;;  %v14751_v45 = vpop.f32.mrf.mxu0 }
0x18b1   :  { %9173 = vst [vmem:[#allocation2 + $0xbc] sm:$0xf] %v13121_v3  ;;  %v13119_v63 = vpack.c.bf16 %v15807_v42, %v15807_v42  ;;  %v9261_v56 = vadd.f32 %v14751_v45, %v12726_v51 }
0x18b2   :  { %v9252_v35 = vpop.f32.mrf.mxu0 }
0x18b3   :  { %9171 = vst [vmem:[#allocation2 + $0x54] sm:$0xf] %v13119_v63  ;;  %v9269_v15 = vpack.c.bf16 %v9261_v56, %v9258_v32  ;;  %v9253_v11 = vadd.f32 %v12726_v51, %v9252_v35 }
0x18b5   :  { %v9268_v54 = vpack.c.bf16 %v9253_v11, %v9250_v60  ;;  %14752 = vmatprep.subr.bf16.mxu1 %v9269_v15  ;;  %v15368_v60 = vld [vmem:[%s18023_s15 + $0x198] sm:$0xff]   ;;  %v15369_v11 = vld [vmem:[%s18023_s15 + $0x190] sm:$0xff]  }
0x18b6   :  { %14753 = vmatpush3.bf16.msra.mxu1 %v9269_v15  ;;  %v15367_v15 = vld [vmem:[%s18054_s1 + $0xb8] sm:$0xff]  }
0x18b7   :  { %14754 = vmatprep.subr.bf16.mxu1 %v9268_v54 }
0x18ba   :  { %14755 = vmatpush3.bf16.msra.mxu1 %v9268_v54  ;;  %v15370_v54 = vld [vmem:[%s18023_s15 + $0x188] sm:$0xff]  }
0x18bb   :  { %14760 = vmatprep.subr.bf16.mxu1 %v15356_v1 }
0x18bd   :  { %14757 = vmatmul.mubr.msk.bf16.vlgmr.msra.gmra.mxu1 %vm175_vm1, %v15355_v16  ;;  %v15372_v16 = vld [vmem:[%s18025_s17 + $0xf8] sm:$0xff]  }
0x18be   :  { %14761 = vmatpush3.bf16.msra.mxu1 %v15356_v1  ;;  %14768 = vmatprep.mubr.msk.bf16.mxu1 %vm3586_vm2, %v17291_v41  ;;  %v15371_v1 = vld [vmem:[%s18023_s15 + $0x180] sm:$0xff]  }
0x18bf   :  { %14762 = vmatprep.subr.bf16.mxu1 %v15357_v7 }
0x18c2   :  { %14763 = vmatpush3.bf16.msra.mxu1 %v15357_v7  ;;  %v15377_v7 = vld [vmem:[%s18025_s17 + $0xf0] sm:$0xff]  }
0x18c3   :  { %14764 = vmatprep.subr.bf16.mxu1 %v15358_v9 }
0x18c6   :  { %14765 = vmatpush3.bf16.msra.mxu1 %v15358_v9  ;;  %v15376_v9 = vld [vmem:[#allocation2 + $0xc] ss:$52 sps:$4 sm:$0xff]  }
0x18c7   :  { %14766 = vmatprep.subr.bf16.mxu1 %v15359_v8 }
0x18ca   :  { %14767 = vmatpush3.bf16.msra.mxu1 %v15359_v8  ;;  %v15378_v8 = vld [vmem:[%s18025_s17 + $0xb0] sm:$0xff]  }
0x18cd   :  { %14769 = vmatmul.mubr.msk.bf16.vlgmr.msra.gmra.mxu1 %vm3586_vm2, %v17293_v43 }
0x18ce   :  { %14796 = vmatprep.mubr.msk.bf16.mxu1 %vm175_vm1, %v15366_v39  ;;  %v15411_v39 = vld [vmem:[%s18025_s17 + $0x1c0] sm:$0xff]  }
0x197d   :  { %v14758_v58 = vpop.f32.mrf.mxu1 }
0x197e   :  { %15808 = vtanh.f32 %v14758_v58  ;;  %v15380_v58 = vld [vmem:[%s18025_s17 + $0xa8] sm:$0xff]  }
0x197f   :  { %v9320_v59 = vpop.f32.mrf.mxu1 }
0x1980   :  { %15810 = vtanh.f32 %v9320_v59  ;;  %v15382_v59 = vld [vmem:[%s18025_s17 + $0xa0] sm:$0xff]  }
0x1981   :  { %v14759_v2 = vpop.f32.mrf.mxu1 }
0x1982   :  { %15812 = vtanh.f32 %v14759_v2  ;;  %v15383_v2 = vld [vmem:[%s18025_s17 + $0xd8] sm:$0xff]  }
0x1983   :  { %v9323_v4 = vpop.f32.mrf.mxu1 }
0x1984   :  { %15814 = vtanh.f32 %v9323_v4  ;;  %v15384_v4 = vld [vmem:[%s18025_s17 + $0x98] sm:$0xff]  }
0x198b   :  { %v15809_v0 = vpop.eup %15808 }
0x198c   :  { %v13124_v6 = vpack.c.bf16 %v15809_v0, %v15809_v0  ;;  %v15385_v0 = vld [vmem:[%s18025_s17 + $0xd0] sm:$0xff]  }
0x198d   :  { %v15811_v13 = vpop.eup %15810  ;;  %v14770_v17 = vpop.f32.mrf.mxu1 }
0x198e   :  { %9357 = vst [vmem:[#allocation2 + $0x8c] sm:$0xf] %v13124_v6  ;;  %v13122_v30 = vpack.c.bf16 %v15811_v13, %v15811_v13  ;;  %v9443_v14 = vadd.f32 %v14770_v17, %v12754_v20  ;;  %v15386_v6 = vld [vmem:[%s18025_s17 + $0x90] sm:$0xff]   ;;  %v15387_v13 = vld [vmem:[%s18025_s17 + $0xc8] sm:$0xff]  }
0x198f   :  { %v15813_v18 = vpop.eup %15812  ;;  %v9434_v21 = vpop.f32.mrf.mxu1  ;;  %v15388_v17 = vld [vmem:[%s18025_s17 + $0x88] sm:$0xff]  }
0x1990   :  { %9355 = vst [vmem:[#allocation2 + $0x24] sm:$0xf] %v13122_v30  ;;  %v13125_v22 = vpack.c.bf16 %v15813_v18, %v15813_v18  ;;  %v9435_v23 = vadd.f32 %v12754_v20, %v9434_v21  ;;  %v15389_v30 = vld [vmem:[%s18025_s17 + $0xc0] sm:$0xff]   ;;  %v15395_v21 = vld [vmem:[%s18025_s17 + $0x1b8] sm:$0xff]  }
0x1991   :  { %v15815_v62 = vpop.eup %15814  ;;  %v14771_v5 = vpop.f32.mrf.mxu1  ;;  %v15390_v18 = vld [vmem:[%s18025_s17 + $0x80] sm:$0xff]  }
0x1992   :  { %9358 = vst [vmem:[#allocation2 + $0xc0] sm:$0xf] %v13125_v22  ;;  %v13123_v12 = vpack.c.bf16 %v15815_v62, %v15815_v62  ;;  %v9446_v19 = vadd.f32 %v14771_v5, %v12754_v20  ;;  %v15374_v22 = vld [vmem:[#allocation2 + $0x8] ss:$52 sps:$4 sm:$0xff]   ;;  %v15396_v62 = vld [vmem:[%s18025_s17 + $0x1f0] sm:$0xff]  }
0x1993   :  { %v9437_v36 = vpop.f32.mrf.mxu1  ;;  %v15394_v5 = vld [vmem:[#allocation2 + $0x74] ss:$52 sps:$4 sm:$0xff]  }
0x1994   :  { %9356 = vst [vmem:[#allocation2 + $0x58] sm:$0xf] %v13123_v12  ;;  %v9454_v24 = vpack.c.bf16 %v9446_v19, %v9443_v14  ;;  %v9438_v25 = vadd.f32 %v12754_v20, %v9437_v36  ;;  %v15391_v20 = vld [vmem:[%s18025_s17 + $0x1f8] sm:$0xff]   ;;  %v15397_v12 = vld [vmem:[%s18025_s17 + $0x1b0] sm:$0xff]   ;;  %v15398_v14 = vld [vmem:[%s18025_s17 + $0x1e8] sm:$0xff]  }
0x1995   :  { %v15399_v19 = vld [vmem:[%s18025_s17 + $0x1a8] sm:$0xff]   ;;  %v15392_v36 = vld [vmem:[#allocation2 + $0x70] ss:$52 sps:$4 sm:$0xff]  }
0x1996   :  { %v9453_v26 = vpack.c.bf16 %v9438_v25, %v9435_v23  ;;  %14772 = vmatprep.subr.bf16.mxu0 %v9454_v24  ;;  %v15403_v23 = vld [vmem:[%s18025_s17 + $0x1e0] sm:$0xff]  }
0x1997   :  { %14773 = vmatpush3.bf16.msra.mxu0 %v9454_v24  ;;  %v15402_v24 = vld [vmem:[#allocation2 + $0x1c] ss:$52 sps:$4 sm:$0xff]   ;;  %v15404_v25 = vld [vmem:[%s18025_s17 + $0x1a0] sm:$0xff]  }
0x1998   :  { %14774 = vmatprep.subr.bf16.mxu0 %v9453_v26 }
0x199b   :  { %14775 = vmatpush3.bf16.msra.mxu0 %v9453_v26  ;;  %v15405_v26 = vld [vmem:[%s18025_s17 + $0x1d8] sm:$0xff]  }
0x199c   :  { %14780 = vmatprep.subr.bf16.mxu0 %v15362_v27 }
0x199e   :  { %14777 = vmatmul.mubr.msk.bf16.vlgmr.msra.gmra.mxu0 %vm175_vm1, %v15361_v28  ;;  %v15407_v28 = vld [vmem:[%s18025_s17 + $0x1d0] sm:$0xff]  }
0x199f   :  { %14781 = vmatpush3.bf16.msra.mxu0 %v15362_v27  ;;  %14788 = vmatprep.mubr.msk.bf16.mxu0 %vm3586_vm2, %v17291_v41  ;;  %v15406_v27 = vld [vmem:[%s18025_s17 + $0x198] sm:$0xff]  }
0x19a0   :  { %14782 = vmatprep.subr.bf16.mxu0 %v15363_v29 }
0x19a3   :  { %14783 = vmatpush3.bf16.msra.mxu0 %v15363_v29  ;;  %v15408_v29 = vld [vmem:[%s18025_s17 + $0x190] sm:$0xff]  }
0x19a4   :  { %14784 = vmatprep.subr.bf16.mxu0 %v15364_v31 }
0x19a7   :  { %14785 = vmatpush3.bf16.msra.mxu0 %v15364_v31  ;;  %v15409_v31 = vld [vmem:[%s18025_s17 + $0x1c8] sm:$0xff]  }
0x19a8   :  { %14786 = vmatprep.subr.bf16.mxu0 %v15365_v37 }
0x19ab   :  { %14787 = vmatpush3.bf16.msra.mxu0 %v15365_v37  ;;  %v15410_v37 = vld [vmem:[%s18025_s17 + $0x188] sm:$0xff]  }
0x19ae   :  { %14789 = vmatmul.mubr.msk.bf16.vlgmr.msra.gmra.mxu0 %vm3586_vm2, %v17293_v43 }
0x1a5e   :  { %v14778_v33 = vpop.f32.mrf.mxu0 }
0x1a5f   :  { %15816 = vtanh.f32 %v14778_v33  ;;  %v15412_v33 = vld [vmem:[%s18025_s17 + $0x180] sm:$0xff]  }
0x1a60   :  { %v9505_v34 = vpop.f32.mrf.mxu0 }
0x1a61   :  { %15818 = vtanh.f32 %v9505_v34  ;;  %v15416_v34 = vld [vmem:[%s18025_s17 + $0x2f8] sm:$0xff]  }
0x1a62   :  { %v14779_v38 = vpop.f32.mrf.mxu0 }
0x1a63   :  { %15820 = vtanh.f32 %v14779_v38  ;;  %v15417_v38 = vld [vmem:[%s18025_s17 + $0x2b8] sm:$0xff]  }
0x1a64   :  { %v9508_v46 = vpop.f32.mrf.mxu0 }
0x1a65   :  { %15822 = vtanh.f32 %v9508_v46  ;;  %v15400_v46 = vld [vmem:[#allocation2 + $0x18] ss:$52 sps:$4 sm:$0xff]  }
0x1a6c   :  { %v15817_v40 = vpop.eup %15816 }
0x1a6d   :  { %v13128_v50 = vpack.c.bf16 %v15817_v40, %v15817_v40  ;;  %v15418_v40 = vld [vmem:[%s18025_s17 + $0x2f0] sm:$0xff]  }
0x1a6e   :  { %v15819_v53 = vpop.eup %15818  ;;  %v14790_v44 = vpop.f32.mrf.mxu0 }
0x1a6f   :  { %9542 = vst [vmem:[#allocation2 + $0x90] sm:$0xf] %v13128_v50  ;;  %v13126_v48 = vpack.c.bf16 %v15819_v53, %v15819_v53  ;;  %v9628_v3 = vadd.f32 %v14790_v44, %v12782_v61  ;;  %v15415_v50 = vld [vmem:[#allocation2 + $0x84] ss:$52 sps:$4 sm:$0xff]   ;;  %v15419_v53 = vld [vmem:[%s18025_s17 + $0x2b0] sm:$0xff]   ;;  %v15420_v44 = vld [vmem:[%s18025_s17 + $0x2e8] sm:$0xff]  }
0x1a70   :  { %v15821_v57 = vpop.eup %15820  ;;  %v9619_v49 = vpop.f32.mrf.mxu0 }
0x1a71   :  { %9540 = vst [vmem:[#allocation2 + $0x28] sm:$0xf] %v13126_v48  ;;  %v13129_v47 = vpack.c.bf16 %v15821_v57, %v15821_v57  ;;  %v9620_v63 = vadd.f32 %v12782_v61, %v9619_v49  ;;  %v15421_v48 = vld [vmem:[%s18025_s17 + $0x2a8] sm:$0xff]   ;;  %v15413_v57 = vld [vmem:[#allocation2 + $0x80] ss:$52 sps:$4 sm:$0xff]  }
0x1a72   :  { %v15823_v52 = vpop.eup %15822  ;;  %v14791_v51 = vpop.f32.mrf.mxu0  ;;  %v15423_v49 = vld [vmem:[%s18025_s17 + $0x2a0] sm:$0xff]  }
0x1a73   :  { %9543 = vst [vmem:[#allocation2 + $0xc4] sm:$0xf] %v13129_v47  ;;  %v13127_v55 = vpack.c.bf16 %v15823_v52, %v15823_v52  ;;  %v9631_v42 = vadd.f32 %v14791_v51, %v12782_v61  ;;  %v15424_v47 = vld [vmem:[%s18025_s17 + $0x2d8] sm:$0xff]   ;;  %v15426_v51 = vld [vmem:[%s18025_s17 + $0x2d0] sm:$0xff]  }
0x1a74   :  { %v9622_v45 = vpop.f32.mrf.mxu0  ;;  %v15425_v52 = vld [vmem:[%s18025_s17 + $0x298] sm:$0xff]  }
0x1a75   :  { %9541 = vst [vmem:[#allocation2 + $0x5c] sm:$0xf] %v13127_v55  ;;  %v9639_v32 = vpack.c.bf16 %v9631_v42, %v9628_v3  ;;  %v9623_v56 = vadd.f32 %v12782_v61, %v9622_v45  ;;  %v15422_v61 = vld [vmem:[%s18025_s17 + $0x2e0] sm:$0xff]   ;;  %v15427_v3 = vld [vmem:[%s18025_s17 + $0x290] sm:$0xff]   ;;  %v15428_v42 = vld [vmem:[%s18025_s17 + $0x2c8] sm:$0xff]  }
0x1a76   :  { %v15432_v55 = vld [vmem:[%s18054_s1 + $0xc0] sm:$0xff]   ;;  %v15429_v45 = vld [vmem:[%s18025_s17 + $0x288] sm:$0xff]  }
0x1a77   :  { %v9638_v35 = vpack.c.bf16 %v9623_v56, %v9620_v63  ;;  %14792 = vmatprep.subr.bf16.mxu1 %v9639_v32  ;;  %14816 = vmatprep.mubr.msk.bf16.mxu0 %vm175_vm1, %v15432_v55  ;;  %v15430_v63 = vld [vmem:[%s18025_s17 + $0x2c0] sm:$0xff]   ;;  %v15474_v55 = vld [vmem:[%s18025_s17 + $0x118] sm:$0xff]  }
0x1a78   :  { %14793 = vmatpush3.bf16.msra.mxu1 %v9639_v32  ;;  %v15431_v32 = vld [vmem:[%s18025_s17 + $0x280] sm:$0xff]  }
0x1a79   :  { %14794 = vmatprep.subr.bf16.mxu1 %v9638_v35 }
0x1a7c   :  { %14795 = vmatpush3.bf16.msra.mxu1 %v9638_v35 }
0x1a7d   :  { %14800 = vmatprep.subr.bf16.mxu1 %v15368_v60 }
0x1a7f   :  { %14797 = vmatmul.mubr.msk.bf16.vlgmr.msra.gmra.mxu1 %vm175_vm1, %v15367_v15 }
0x1a80   :  { %14801 = vmatpush3.bf16.msra.mxu1 %v15368_v60  ;;  %14808 = vmatprep.mubr.msk.bf16.mxu1 %vm3586_vm2, %v17291_v41  ;;  %v15373_v41 = vld [vmem:[%s18025_s17 + $0xb8] sm:$0xff]  }
0x1a81   :  { %14802 = vmatprep.subr.bf16.mxu1 %v15369_v11 }
0x1a84   :  { %14803 = vmatpush3.bf16.msra.mxu1 %v15369_v11 }
0x1a85   :  { %14804 = vmatprep.subr.bf16.mxu1 %v15370_v54 }
0x1a88   :  { %14805 = vmatpush3.bf16.msra.mxu1 %v15370_v54 }
0x1a89   :  { %14806 = vmatprep.subr.bf16.mxu1 %v15371_v1 }
0x1a8c   :  { %14807 = vmatpush3.bf16.msra.mxu1 %v15371_v1 }
0x1a8d   :  { %13885 = vmatprep.subr.bf16.mxu1 %v15372_v16 }
0x1a8f   :  { %14809 = vmatmul.mubr.msk.bf16.vlgmr.msra.gmra.mxu1 %vm3586_vm2, %v17293_v43  ;;  %v15381_v43 = vld [vmem:[%s18025_s17 + $0xe0] sm:$0xff]  }
0x1a90   :  { %13886 = vmatpush3.bf16.msra.mxu1 %v15373_v41  ;;  %10994 = vmatprep.mubr.bf16.mxu1 %v15376_v9  ;;  %v12810_v9 = vld [vmem:[%s18024_s16 + $0xc] ss:$0 sm:$0xff] }
0x1a91   :  { %13887 = vmatprep.subr.bf16.mxu1 %v15377_v7 }
0x1a94   :  { %13888 = vmatpush3.bf16.msra.mxu1 %v15378_v8 }
0x1a95   :  { %13889 = vmatprep.subr.bf16.mxu1 %v15379_v10 }
0x1a98   :  { %13890 = vmatpush3.bf16.msra.mxu1 %v15380_v58 }
0x1a99   :  { %13891 = vmatprep.subr.bf16.mxu1 %v15381_v43 }
0x1a9c   :  { %13892 = vmatpush3.bf16.msra.mxu1 %v15382_v59 }
0x1a9d   :  { %13893 = vmatprep.subr.bf16.mxu1 %v15383_v2 }
0x1aa0   :  { %13894 = vmatpush3.bf16.msra.mxu1 %v15384_v4 }
0x1aa1   :  { %13895 = vmatprep.subr.bf16.mxu1 %v15385_v0 }
0x1aa4   :  { %13896 = vmatpush3.bf16.msra.mxu1 %v15386_v6 }
0x1aa5   :  { %13897 = vmatprep.subr.bf16.mxu1 %v15387_v13 }
0x1aa8   :  { %13898 = vmatpush3.bf16.msra.mxu1 %v15388_v17 }
0x1aa9   :  { %13899 = vmatprep.subr.bf16.mxu1 %v15389_v30 }
0x1aac   :  { %13900 = vmatpush3.bf16.msra.mxu1 %v15390_v18  ;;  %v15434_v18 = vld [vmem:[%s18025_s17 + $0x78] sm:$0xff]  }
0x1aad   :  { %13941 = vmatprep.subr.bf16.mxu1 %v15391_v20  ;;  %v15433_v20 = vld [vmem:[%s18054_s1 + $0xc8] sm:$0xff]   ;;  %s18061_s1 = sld [smem:[#allocation16_spill]] }
0x1aaf   :  { %10995 = vmatmul.mubr.bf16.vlgmr.msra.gmra.mxu1 %v15374_v22  ;;  %v15435_v22 = vld [vmem:[#allocation2 + $0x28] ss:$52 sps:$4 sm:$0xff]  }
0x1ab0   :  { %11002 = vmatprep.mubr.bf16.mxu1 %v15394_v5  ;;  %13942 = vmatpush3.bf16.msra.mxu1 %v15395_v21  ;;  %v15438_v21 = vld [vmem:[%s18025_s17 + $0x38] sm:$0xff]   ;;  %v15445_v5 = vld [vmem:[%s18025_s17 + $0x70] sm:$0xff]  }
0x1ab1   :  { %13943 = vmatprep.subr.bf16.mxu1 %v15396_v62 }
0x1ab4   :  { %13944 = vmatpush3.bf16.msra.mxu1 %v15397_v12  ;;  %v15441_v12 = vld [vmem:[#allocation2 + $0x4] ss:$52 sps:$4 sm:$0xff]  }
0x1ab5   :  { %13945 = vmatprep.subr.bf16.mxu1 %v15398_v14 }
0x1ab7   :  { %11003 = vmatmul.mubr.bf16.gmra.mxu1 %v15392_v36  ;;  %v15447_v36 = vld [vmem:[%s18025_s17 + $0x68] sm:$0xff]  }
0x1ab8   :  { %13946 = vmatpush3.bf16.msra.mxu1 %v15399_v19  ;;  %11092 = vmatprep.mubr.bf16.mxu1 %v15402_v24  ;;  %v15446_v19 = vld [vmem:[%s18025_s17 + $0x30] sm:$0xff]  }
0x1ab9   :  { %13947 = vmatprep.subr.bf16.mxu1 %v15403_v23  ;;  %v15448_v23 = vld [vmem:[%s18025_s17 + $0x28] sm:$0xff]   ;;  %v15442_v24 = vld [vmem:[#allocation2 + $0x90] ss:$52 sps:$4 sm:$0xff]  }
0x1abc   :  { %13948 = vmatpush3.bf16.msra.mxu1 %v15404_v25  ;;  %v15449_v25 = vld [vmem:[%s18025_s17 + $0x60] sm:$0xff]  }
0x1abd   :  { %13949 = vmatprep.subr.bf16.mxu1 %v15405_v26  ;;  %v15450_v26 = vld [vmem:[%s18025_s17 + $0x20] sm:$0xff]  }
0x1ac0   :  { %13950 = vmatpush3.bf16.msra.mxu1 %v15406_v27  ;;  %v15451_v27 = vld [vmem:[%s18025_s17 + $0x58] sm:$0xff]  }
0x1ac1   :  { %13951 = vmatprep.subr.bf16.mxu1 %v15407_v28  ;;  %v15452_v28 = vld [vmem:[%s18025_s17 + $0x18] sm:$0xff]  }
0x1ac4   :  { %13952 = vmatpush3.bf16.msra.mxu1 %v15408_v29  ;;  %v15453_v29 = vld [vmem:[%s18025_s17 + $0x50] sm:$0xff]  }
0x1ac5   :  { %13953 = vmatprep.subr.bf16.mxu1 %v15409_v31  ;;  %v15454_v31 = vld [vmem:[%s18025_s17 + $0x10] sm:$0xff]  }
0x1ac8   :  { %13954 = vmatpush3.bf16.msra.mxu1 %v15410_v37  ;;  %v15455_v37 = vld [vmem:[%s18025_s17 + $0x48] sm:$0xff]  }
0x1ac9   :  { %13955 = vmatprep.subr.bf16.mxu1 %v15411_v39  ;;  %v15456_v39 = vld [vmem:[%s18025_s17 + $0x8] sm:$0xff]  }
0x1acc   :  { %13956 = vmatpush3.bf16.msra.mxu1 %v15412_v33  ;;  %v15457_v33 = vld [vmem:[%s18025_s17 + $0x40] sm:$0xff]  }
0x1acd   :  { %13997 = vmatprep.subr.bf16.mxu1 %v15416_v34  ;;  %v15458_v34 = vld [vmem:[%s18025_s17] sm:$0xff]  }
0x1acf   :  { %11093 = vmatmul.mubr.bf16.vlgmr.msra.gmra.mxu1 %v15400_v46  ;;  %v15463_v46 = vld [vmem:[%s18025_s17 + $0x138] sm:$0xff]  }
0x1ad0   :  { %11100 = vmatprep.mubr.bf16.mxu1 %v15415_v50  ;;  %13998 = vmatpush3.bf16.msra.mxu1 %v15417_v38  ;;  %v15459_v38 = vld [vmem:[%s18025_s17 + $0x178] sm:$0xff]   ;;  %v15464_v50 = vld [vmem:[%s18025_s17 + $0x170] sm:$0xff]  }
0x1ad1   :  { %13999 = vmatprep.subr.bf16.mxu1 %v15418_v40  ;;  %v15439_v40 = vld [vmem:[#allocation2] ss:$52 sps:$4 sm:$0xff]  }
0x1ad4   :  { %14000 = vmatpush3.bf16.msra.mxu1 %v15419_v53  ;;  %v15462_v53 = vld [vmem:[#allocation2 + $0x6c] ss:$52 sps:$4 sm:$0xff]  }
0x1ad5   :  { %14001 = vmatprep.subr.bf16.mxu1 %v15420_v44  ;;  %v15465_v44 = vld [vmem:[%s18025_s17 + $0x130] sm:$0xff]  }
0x1ad7   :  { %11101 = vmatmul.mubr.bf16.gmra.mxu1 %v15413_v57  ;;  %v15467_v57 = vld [vmem:[%s18025_s17 + $0x128] sm:$0xff]  }
0x1ad8   :  { %14002 = vmatpush3.bf16.msra.mxu1 %v15421_v48  ;;  %v15466_v48 = vld [vmem:[%s18025_s17 + $0x168] sm:$0xff]  }
0x1ad9   :  { %14003 = vmatprep.subr.bf16.mxu1 %v15422_v61  ;;  %v15460_v61 = vld [vmem:[#allocation2 + $0x68] ss:$52 sps:$4 sm:$0xff]  }
0x1adc   :  { %14004 = vmatpush3.bf16.msra.mxu1 %v15423_v49  ;;  %v15471_v49 = vld [vmem:[%s18025_s17 + $0x160] sm:$0xff]  }
0x1add   :  { %14005 = vmatprep.subr.bf16.mxu1 %v15424_v47  ;;  %v15470_v47 = vld [vmem:[#allocation2 + $0x14] ss:$52 sps:$4 sm:$0xff]  }
0x1ae0   :  { %14006 = vmatpush3.bf16.msra.mxu1 %v15425_v52  ;;  %v15472_v52 = vld [vmem:[%s18025_s17 + $0x120] sm:$0xff]  }
0x1ae1   :  { %14007 = vmatprep.subr.bf16.mxu1 %v15426_v51  ;;  %v15473_v51 = vld [vmem:[%s18025_s17 + $0x158] sm:$0xff]  }
0x1ae4   :  { %14008 = vmatpush3.bf16.msra.mxu1 %v15427_v3  ;;  %v15475_v3 = vld [vmem:[%s18025_s17 + $0x150] sm:$0xff]  }
0x1ae5   :  { %14009 = vmatprep.subr.bf16.mxu1 %v15428_v42  ;;  %v15476_v42 = vld [vmem:[%s18025_s17 + $0x110] sm:$0xff]  }
0x1ae8   :  { %14010 = vmatpush3.bf16.msra.mxu1 %v15429_v45  ;;  %v15477_v45 = vld [vmem:[%s18025_s17 + $0x148] sm:$0xff]  }
0x1ae9   :  { %14011 = vmatprep.subr.bf16.mxu1 %v15430_v63  ;;  %v15478_v63 = vld [vmem:[%s18025_s17 + $0x108] sm:$0xff]  }
0x1aec   :  { %14012 = vmatpush3.bf16.msra.mxu1 %v15431_v32  ;;  %v15479_v32 = vld [vmem:[%s18025_s17 + $0x140] sm:$0xff]  }
0x1b3f   :  { %v14798_v56 = vpop.f32.mrf.mxu1 }
0x1b40   :  { %15824 = vtanh.f32 %v14798_v56  ;;  %v15480_v56 = vld [vmem:[%s18025_s17 + $0x100] sm:$0xff]  }
0x1b41   :  { %v9690_v35 = vpop.f32.mrf.mxu1 }
0x1b42   :  { %15826 = vtanh.f32 %v9690_v35  ;;  %v15481_v35 = vld [vmem:[%s18025_s17 + $0x278] sm:$0xff]  }
0x1b43   :  { %v14799_v60 = vpop.f32.mrf.mxu1 }
0x1b44   :  { %15828 = vtanh.f32 %v14799_v60  ;;  %v15485_v60 = vld [vmem:[%s18025_s17 + $0x238] sm:$0xff]  }
0x1b45   :  { %v9693_v15 = vpop.f32.mrf.mxu1 }
0x1b46   :  { %15830 = vtanh.f32 %v9693_v15  ;;  %v15468_v15 = vld [vmem:[#allocation2 + $0x10] ss:$52 sps:$4 sm:$0xff]  }
0x1b4d   :  { %v15825_v11 = vpop.eup %15824 }
0x1b4e   :  { %v13132_v54 = vpack.c.bf16 %v15825_v11, %v15825_v11  ;;  %v15486_v11 = vld [vmem:[%s18025_s17 + $0x270] sm:$0xff]  }
0x1b4f   :  { %v15827_v1 = vpop.eup %15826  ;;  %v14810_v16 = vpop.f32.mrf.mxu1 }
0x1b50   :  { %9727 = vst [vmem:[#allocation2 + $0x94] sm:$0xf] %v13132_v54  ;;  %v13130_v41 = vpack.c.bf16 %v15827_v1, %v15827_v1  ;;  %v9813_v2 = vadd.f32 %v14810_v16, %v12810_v9  ;;  %v15484_v54 = vld [vmem:[#allocation2 + $0x7c] ss:$52 sps:$4 sm:$0xff]   ;;  %v15488_v16 = vld [vmem:[%s18025_s17 + $0x268] sm:$0xff]  }
0x1b51   :  { %v15829_v7 = vpop.eup %15828  ;;  %v9804_v8 = vpop.f32.mrf.mxu1  ;;  %v15487_v1 = vld [vmem:[%s18025_s17 + $0x230] sm:$0xff]  }
0x1b52   :  { %9725 = vst [vmem:[#allocation2 + $0x2c] sm:$0xf] %v13130_v41  ;;  %v13133_v10 = vpack.c.bf16 %v15829_v7, %v15829_v7  ;;  %v9805_v6 = vadd.f32 %v12810_v9, %v9804_v8  ;;  %v15489_v41 = vld [vmem:[%s18025_s17 + $0x228] sm:$0xff]   ;;  %v15492_v8 = vld [vmem:[#allocation2 + $0x24] ss:$52 sps:$4 sm:$0xff]  }
0x1b53   :  { %v15831_v58 = vpop.eup %15830  ;;  %v14811_v43 = vpop.f32.mrf.mxu1  ;;  %v15482_v7 = vld [vmem:[#allocation2 + $0x78] ss:$52 sps:$4 sm:$0xff]  }
0x1b54   :  { %9728 = vst [vmem:[#allocation2 + $0xc8] sm:$0xf] %v13133_v10  ;;  %v13131_v59 = vpack.c.bf16 %v15831_v58, %v15831_v58  ;;  %v9816_v4 = vadd.f32 %v14811_v43, %v12810_v9  ;;  %v15494_v10 = vld [vmem:[%s18025_s17 + $0x220] sm:$0xff]   ;;  %v15495_v58 = vld [vmem:[%s18025_s17 + $0x258] sm:$0xff]  }
0x1b55   :  { %v9807_v0 = vpop.f32.mrf.mxu1  ;;  %v15496_v43 = vld [vmem:[%s18025_s17 + $0x218] sm:$0xff]  }
0x1b56   :  { %9726 = vst [vmem:[#allocation2 + $0x60] sm:$0xf] %v13131_v59  ;;  %v9824_v13 = vpack.c.bf16 %v9816_v4, %v9813_v2  ;;  %v9808_v17 = vadd.f32 %v12810_v9, %v9807_v0  ;;  %v15493_v9 = vld [vmem:[%s18025_s17 + $0x260] sm:$0xff]   ;;  %v15497_v59 = vld [vmem:[%s18025_s17 + $0x250] sm:$0xff]   ;;  %v15499_v4 = vld [vmem:[%s18025_s17 + $0x248] sm:$0xff]  }
0x1b57   :  { %v15498_v2 = vld [vmem:[%s18025_s17 + $0x210] sm:$0xff]   ;;  %v15500_v0 = vld [vmem:[%s18025_s17 + $0x208] sm:$0xff]  }
0x1b58   :  { %v9823_v30 = vpack.c.bf16 %v9808_v17, %v9805_v6  ;;  %14812 = vmatprep.subr.bf16.mxu0 %v9824_v13  ;;  %v15501_v6 = vld [vmem:[%s18025_s17 + $0x240] sm:$0xff]   ;;  %v15506_v17 = vld [vmem:[%s18025_s17 + $0x338] sm:$0xff]  }
0x1b59   :  { %14813 = vmatpush3.bf16.msra.mxu0 %v9824_v13  ;;  %v15502_v13 = vld [vmem:[%s18025_s17 + $0x200] sm:$0xff]  }
0x1b5a   :  { %14814 = vmatprep.subr.bf16.mxu0 %v9823_v30 }
0x1b5b   :  { %v15444_v14 = vld [vmem:[#allocation2 + $0x94] ss:$52 sps:$4 sm:$0xff]  }
0x1b5d   :  { %14815 = vmatpush3.bf16.msra.mxu0 %v9823_v30  ;;  %v15437_v62 = vld [vmem:[#allocation2 + $0x2c] ss:$52 sps:$4 sm:$0xff]  }
0x1b5e   :  { %13857 = vmatprep.subr.bf16.mxu0 %v15434_v18  ;;  %11190 = vmatprep.mubr.bf16.mxu1 %v15437_v62  ;;  %v15490_v30 = vld [vmem:[#allocation2 + $0x20] ss:$52 sps:$4 sm:$0xff]  }
0x1b5f   :  { %11191 = vmatmul.mubr.bf16.vlgmr.msra.gmra.mxu1 %v15435_v22  ;;  %v15507_v18 = vld [vmem:[%s18025_s17 + $0x330] sm:$0xff]   ;;  %v15503_v22 = vld [vmem:[#allocation2 + $0x88] ss:$52 sps:$4 sm:$0xff]   ;;  %v15509_v62 = vld [vmem:[%s18025_s17 + $0x320] sm:$0xff]  }
0x1b60   :  { %14817 = vmatmul.mubr.msk.bf16.vlgmr.msra.gmra.mxu0 %vm175_vm1, %v15433_v20  ;;  %11198 = vmatprep.mubr.bf16.mxu1 %v15444_v14  ;;  %v15505_v20 = vld [vmem:[#allocation2 + $0x8c] ss:$52 sps:$4 sm:$0xff]  }
0x1b61   :  { %13858 = vmatpush3.bf16.msra.mxu0 %v15438_v21  ;;  %10945 = vmatprep.mubr.bf16.mxu0 %v15441_v12  ;;  %v15508_v21 = vld [vmem:[%s18025_s17 + $0x328] sm:$0xff]   ;;  %v15511_v12 = vld [vmem:[%s18025_s17 + $0x310] sm:$0xff]  }
0x1b62   :  { %13859 = vmatprep.subr.bf16.mxu0 %v15445_v5  ;;  %v15510_v5 = vld [vmem:[%s18025_s17 + $0x318] sm:$0xff]   ;;  %v15512_v14 = vld [vmem:[%s18025_s17 + $0x308] sm:$0xff]  }
0x1b65   :  { %13860 = vmatpush3.bf16.msra.mxu0 %v15446_v19  ;;  %v15513_v19 = vld [vmem:[%s18025_s17 + $0x300] sm:$0xff]  }
0x1b66   :  { %13861 = vmatprep.subr.bf16.mxu0 %v15447_v36  ;;  %v15516_v36 = vld [vmem:[%s18027_s19 + $0x18] sm:$0xff]  }
0x1b67   :  { %11199 = vmatmul.mubr.bf16.gmra.mxu1 %v15442_v24  ;;  %14840 = vmatprep.subr.bf16.mxu1 %v15516_v36 }
0x1b68   :  { %14841 = vmatpush3.bf16.msra.mxu1 %v15516_v36 }
0x1b69   :  { %13862 = vmatpush3.bf16.msra.mxu0 %v15448_v23 }
0x1b6a   :  { %13863 = vmatprep.subr.bf16.mxu0 %v15449_v25 }
0x1b6d   :  { %13864 = vmatpush3.bf16.msra.mxu0 %v15450_v26 }
0x1b6e   :  { %13865 = vmatprep.subr.bf16.mxu0 %v15451_v27 }
0x1b71   :  { %13866 = vmatpush3.bf16.msra.mxu0 %v15452_v28 }
0x1b72   :  { %13867 = vmatprep.subr.bf16.mxu0 %v15453_v29 }
0x1b75   :  { %13868 = vmatpush3.bf16.msra.mxu0 %v15454_v31 }
0x1b76   :  { %13869 = vmatprep.subr.bf16.mxu0 %v15455_v37 }
0x1b79   :  { %13870 = vmatpush3.bf16.msra.mxu0 %v15456_v39 }
0x1b7a   :  { %13871 = vmatprep.subr.bf16.mxu0 %v15457_v33 }
0x1b7d   :  { %13872 = vmatpush3.bf16.msra.mxu0 %v15458_v34 }
0x1b7e   :  { %13913 = vmatprep.subr.bf16.mxu0 %v15459_v38 }
0x1b80   :  { %10946 = vmatmul.mubr.bf16.vlgmr.msra.gmra.mxu0 %v15439_v40  ;;  %v15517_v40 = vld [vmem:[%s18027_s19 + $0x10] sm:$0xff]  }
0x1b81   :  { %10953 = vmatprep.mubr.bf16.mxu0 %v15462_v53  ;;  %13914 = vmatpush3.bf16.msra.mxu0 %v15463_v46  ;;  %v15519_v53 = vld [vmem:[%s18027_s19] sm:$0xff]  }
0x1b82   :  { %13915 = vmatprep.subr.bf16.mxu0 %v15464_v50  ;;  %14842 = vmatprep.subr.bf16.mxu1 %v15517_v40  ;;  %v15518_v50 = vld [vmem:[%s18027_s19 + $0x8] sm:$0xff]  }
0x1b83   :  { %14843 = vmatpush3.bf16.msra.mxu1 %v15517_v40 }
0x1b84   :  { %14844 = vmatprep.subr.bf16.mxu1 %v15518_v50 }
0x1b85   :  { %13916 = vmatpush3.bf16.msra.mxu0 %v15465_v44 }
0x1b86   :  { %13917 = vmatprep.subr.bf16.mxu0 %v15466_v48 }
0x1b87   :  { %14845 = vmatpush3.bf16.msra.mxu1 %v15518_v50 }
0x1b88   :  { %10954 = vmatmul.mubr.bf16.gmra.mxu0 %v15460_v61  ;;  %14846 = vmatprep.subr.bf16.mxu1 %v15519_v53 }
0x1b89   :  { %13918 = vmatpush3.bf16.msra.mxu0 %v15467_v57  ;;  %11043 = vmatprep.mubr.bf16.mxu0 %v15470_v47  ;;  %v13901_v57 = vpop.f32.mrf.mxu1 }
0x1b8a   :  { %13919 = vmatprep.subr.bf16.mxu0 %v15471_v49 }
0x1b8b   :  { %14847 = vmatpush3.bf16.msra.mxu1 %v15519_v53  ;;  %v13902_v49 = vpop.f32.mrf.mxu1 }
0x1b8d   :  { %13920 = vmatpush3.bf16.msra.mxu0 %v15472_v52  ;;  %v13904_v52 = vpop.f32.mrf.mxu1 }
0x1b8e   :  { %13921 = vmatprep.subr.bf16.mxu0 %v15473_v51 }
0x1b91   :  { %13922 = vmatpush3.bf16.msra.mxu0 %v15474_v55  ;;  %v13905_v55 = vpop.f32.mrf.mxu1 }
0x1b92   :  { %13923 = vmatprep.subr.bf16.mxu0 %v15475_v3 }
0x1b95   :  { %13924 = vmatpush3.bf16.msra.mxu0 %v15476_v42  ;;  %v13907_v42 = vpop.f32.mrf.mxu1 }
0x1b96   :  { %13925 = vmatprep.subr.bf16.mxu0 %v15477_v45 }
0x1b99   :  { %13926 = vmatpush3.bf16.msra.mxu0 %v15478_v63  ;;  %v13908_v63 = vpop.f32.mrf.mxu1 }
0x1b9a   :  { %13927 = vmatprep.subr.bf16.mxu0 %v15479_v32 }
0x1b9d   :  { %13928 = vmatpush3.bf16.msra.mxu0 %v15480_v56  ;;  %v13910_v56 = vpop.f32.mrf.mxu1 }
0x1b9e   :  { %13969 = vmatprep.subr.bf16.mxu0 %v15481_v35 }
0x1ba0   :  { %11044 = vmatmul.mubr.bf16.vlgmr.msra.gmra.mxu0 %v15468_v15 }
0x1ba1   :  { %11051 = vmatprep.mubr.bf16.mxu0 %v15484_v54  ;;  %13970 = vmatpush3.bf16.msra.mxu0 %v15485_v60  ;;  %v13911_v60 = vpop.f32.mrf.mxu1 }
0x1ba2   :  { %13971 = vmatprep.subr.bf16.mxu0 %v15486_v11 }
0x1ba3   :  { %v13957_v11 = vpop.f32.mrf.mxu1 }
0x1ba5   :  { %13972 = vmatpush3.bf16.msra.mxu0 %v15487_v1  ;;  %v13958_v1 = vpop.f32.mrf.mxu1 }
0x1ba6   :  { %13973 = vmatprep.subr.bf16.mxu0 %v15488_v16 }
0x1ba8   :  { %11052 = vmatmul.mubr.bf16.gmra.mxu0 %v15482_v7 }
0x1ba9   :  { %13974 = vmatpush3.bf16.msra.mxu0 %v15489_v41  ;;  %11141 = vmatprep.mubr.bf16.mxu0 %v15492_v8  ;;  %v13960_v41 = vpop.f32.mrf.mxu1 }
0x1baa   :  { %13975 = vmatprep.subr.bf16.mxu0 %v15493_v9 }
0x1bab   :  { %v13961_v9 = vpop.f32.mrf.mxu1 }
0x1bad   :  { %13976 = vmatpush3.bf16.msra.mxu0 %v15494_v10  ;;  %v13963_v10 = vpop.f32.mrf.mxu1 }
0x1bae   :  { %13977 = vmatprep.subr.bf16.mxu0 %v15495_v58 }
0x1bb1   :  { %13978 = vmatpush3.bf16.msra.mxu0 %v15496_v43  ;;  %v13964_v43 = vpop.f32.mrf.mxu1 }
0x1bb2   :  { %13979 = vmatprep.subr.bf16.mxu0 %v15497_v59 }
0x1bb5   :  { %13980 = vmatpush3.bf16.msra.mxu0 %v15498_v2  ;;  %v13966_v2 = vpop.f32.mrf.mxu1 }
0x1bb6   :  { %13981 = vmatprep.subr.bf16.mxu0 %v15499_v4 }
0x1bb9   :  { %13982 = vmatpush3.bf16.msra.mxu0 %v15500_v0  ;;  %v13967_v0 = vpop.f32.mrf.mxu1 }
0x1bba   :  { %13983 = vmatprep.subr.bf16.mxu0 %v15501_v6 }
0x1bbd   :  { %13984 = vmatpush3.bf16.msra.mxu0 %v15502_v13 }
0x1bbe   :  { %14820 = vmatprep.subr.bf16.mxu0 %v15506_v17 }
0x1bc0   :  { %11142 = vmatmul.mubr.bf16.vlgmr.msra.gmra.mxu0 %v15490_v30 }
0x1bc1   :  { %11149 = vmatprep.mubr.bf16.mxu0 %v15505_v20  ;;  %14821 = vmatpush3.bf16.msra.mxu0 %v15506_v17 }
0x1bc2   :  { %14822 = vmatprep.subr.bf16.mxu0 %v15507_v18 }
0x1bc5   :  { %14823 = vmatpush3.bf16.msra.mxu0 %v15507_v18 }
0x1bc6   :  { %14824 = vmatprep.subr.bf16.mxu0 %v15508_v21 }
0x1bc8   :  { %11150 = vmatmul.mubr.bf16.gmra.mxu0 %v15503_v22 }
0x1bc9   :  { %14825 = vmatpush3.bf16.msra.mxu0 %v15508_v21 }
0x1bca   :  { %14826 = vmatprep.subr.bf16.mxu0 %v15509_v62 }
0x1bcd   :  { %14827 = vmatpush3.bf16.msra.mxu0 %v15509_v62 }
0x1bce   :  { %14828 = vmatprep.subr.bf16.mxu0 %v15510_v5 }
0x1bd1   :  { %14829 = vmatpush3.bf16.msra.mxu0 %v15510_v5 }
0x1bd2   :  { %14830 = vmatprep.subr.bf16.mxu0 %v15511_v12 }
0x1bd5   :  { %14831 = vmatpush3.bf16.msra.mxu0 %v15511_v12  ;;  %v12829_v12 = vld [vmem:[%s18026_s18] ss:$0 sm:$0xff] }
0x1bd6   :  { %14832 = vmatprep.subr.bf16.mxu0 %v15512_v14 }
0x1bd9   :  { %14833 = vmatpush3.bf16.msra.mxu0 %v15512_v14 }
0x1bda   :  { %14834 = vmatprep.subr.bf16.mxu0 %v15513_v19 }
0x1bdd   :  { %14835 = vmatpush3.bf16.msra.mxu0 %v15513_v19 }
0x1c1f   :  { %v14013_v13 = vpop.f32.mrf.mxu1 }
0x1c20   :  { %v14818_v23 = vpop.f32.mrf.mxu0 }
0x1c21   :  { %15832 = vtanh.f32 %v14818_v23  ;;  %v14014_v30 = vpop.f32.mrf.mxu1 }
0x1c22   :  { %v9875_v24 = vpop.f32.mrf.mxu0 }
0x1c23   :  { %15834 = vtanh.f32 %v9875_v24  ;;  %v14016_v20 = vpop.f32.mrf.mxu1 }
0x1c24   :  { %v14819_v25 = vpop.f32.mrf.mxu0 }
0x1c25   :  { %15836 = vtanh.f32 %v14819_v25  ;;  %v14017_v22 = vpop.f32.mrf.mxu1 }
0x1c26   :  { %v9878_v26 = vpop.f32.mrf.mxu0 }
0x1c27   :  { %15838 = vtanh.f32 %v9878_v26  ;;  %v14019_v23 = vpop.f32.mrf.mxu1  ;;  %v13903_v26 = vadd.f32 %v13902_v49, %v13901_v57 }
0x1c2e   :  { %v15833_v27 = vpop.eup %15832 }
0x1c2f   :  { %v13136_v28 = vpack.c.bf16 %v15833_v27, %v15833_v27 }
0x1c30   :  { %v15835_v29 = vpop.eup %15834 }
0x1c31   :  { %9912 = vst [vmem:[#allocation2 + $0x98] sm:$0xf] %v13136_v28  ;;  %v13134_v31 = vpack.c.bf16 %v15835_v29, %v15835_v29  ;;  %v13912_v29 = vadd.f32 %v13911_v60, %v13910_v56  ;;  %v13965_v60 = vadd.f32 %v13964_v43, %v13963_v10 }
0x1c32   :  { %v15837_v37 = vpop.eup %15836 }
0x1c33   :  { %9910 = vst [vmem:[#allocation2 + $0x30] sm:$0xf] %v13134_v31  ;;  %v13137_v39 = vpack.c.bf16 %v15837_v37, %v15837_v37 }
0x1c34   :  { %v15839_v33 = vpop.eup %15838 }
0x1c35   :  { %9913 = vst [vmem:[#allocation2 + $0xcc] sm:$0xf] %v13137_v39  ;;  %v13135_v34 = vpack.c.bf16 %v15839_v33, %v15839_v33  ;;  %v13909_v33 = vadd.f32 %v13908_v63, %v13907_v42  ;;  %v13962_v63 = vadd.f32 %v13961_v9, %v13960_v41 }
0x1c37   :  { %9911 = vst [vmem:[#allocation2 + $0x64] sm:$0xf] %v13135_v34  ;;  %v14020_v34 = vpop.f32.mrf.mxu1 }
0x1c39   :  { %v14022_v57 = vpop.f32.mrf.mxu1 }
0x1c3c   :  { %v15515_v46 = vld [vmem:[#allocation2 + $0x98] ss:$52 sps:$4 sm:$0xff]  }
0x1c3e   :  { %v15514_v38 = vld [vmem:[#allocation2 + $0x30] ss:$52 sps:$4 sm:$0xff]  }
0x1c3f   :  { %14836 = vmatprep.mubr.bf16.mxu0 %v15514_v38 }
0x1c40   :  { %14837 = vmatmul.mubr.bf16.vlgmr.msra.gmra.mxu0 %v15515_v46  ;;  %v13873_v44 = vpop.f32.mrf.mxu0  ;;  %v13906_v46 = vadd.f32 %v13905_v55, %v13904_v52 }
0x1c42   :  { %v13874_v48 = vpop.f32.mrf.mxu0 }
0x1c43   :  { %v13875_v62 = vadd.f32 %v13874_v48, %v13873_v44 }
0x1c44   :  { %v13876_v61 = vpop.f32.mrf.mxu0 }
0x1c45   :  { %v10948_v24 = vadd.f32 %v13875_v62, %v12829_v12 }
0x1c46   :  { %v13877_v47 = vpop.f32.mrf.mxu0 }
0x1c47   :  { %v13878_v36 = vadd.f32 %v13877_v47, %v13876_v61  ;;  %v10997_v40 = vadd.f32 %v13903_v26, %v10948_v24  ;;  %v11361_v26 = vlaneseq }
0x1c48   :  { %v13879_v51 = vpop.f32.mrf.mxu0 }
0x1c49   :  { %v10951_v31 = vadd.f32 %v13878_v36, %v12829_v12 }
0x1c4a   :  { %v13880_v3 = vpop.f32.mrf.mxu0 }
0x1c4b   :  { %v13881_v14 = vadd.f32 %v13880_v3, %v13879_v51  ;;  %v11000_v47 = vadd.f32 %v13906_v46, %v10951_v31  ;;  %v13959_v3 = vadd.f32 %v13958_v1, %v13957_v11  ;;  %v14015_v11 = vadd.f32 %v14014_v30, %v14013_v13 }
0x1c4c   :  { %v13882_v45 = vpop.f32.mrf.mxu0  ;;  %v11362_v31 = vshrl.u32 %v11361_v26, 7 }
0x1c4d   :  { %v10956_v27 = vadd.f32 %v13881_v14, %v12829_v12 }
0x1c4e   :  { %v13883_v32 = vpop.f32.mrf.mxu0 }
0x1c4f   :  { %v13884_v5 = vadd.f32 %v13883_v32, %v13882_v45  ;;  %v11005_v44 = vadd.f32 %v13909_v33, %v10956_v27  ;;  %v13968_v45 = vadd.f32 %v13967_v0, %v13966_v2  ;;  %v14021_v2 = vadd.f32 %v14020_v34, %v14019_v23  ;;  %v12960_v23 = vld [vmem:[%s18061_s1] ss:$0 sm:$0xff] }
0x1c51   :  { %v10959_v25 = vadd.f32 %v13884_v5, %v12829_v12 }
0x1c53   :  { %v11008_v53 = vadd.f32 %v13912_v29, %v10959_v25 }
0x1c60   :  { %v13929_v35 = vpop.f32.mrf.mxu0 }
0x1c62   :  { %v13930_v15 = vpop.f32.mrf.mxu0 }
0x1c63   :  { %v13931_v37 = vadd.f32 %v13930_v15, %v13929_v35 }
0x1c64   :  { %v13932_v54 = vpop.f32.mrf.mxu0 }
0x1c65   :  { %v11046_v61 = vadd.f32 %v13931_v37, %v10997_v40 }
0x1c66   :  { %v13933_v16 = vpop.f32.mrf.mxu0 }
0x1c67   :  { %v13934_v50 = vadd.f32 %v13933_v16, %v13932_v54  ;;  %v11095_v15 = vadd.f32 %v13959_v3, %v11046_v61  ;;  %v14023_v54 = vpop.f32.mrf.mxu1  ;;  %v15521_v3 = vld [vmem:[%s18029_s21 + $0x10] sm:$0xff]  }
0x1c68   :  { %v13935_v7 = vpop.f32.mrf.mxu0  ;;  %v14024_v1 = vadd.f32 %v14023_v54, %v14022_v57  ;;  %v15522_v57 = vld [vmem:[%s18029_s21 + $0x8] sm:$0xff]  }
0x1c69   :  { %v11049_v32 = vadd.f32 %v13934_v50, %v11000_v47 }
0x1c6a   :  { %v13936_v8 = vpop.f32.mrf.mxu0 }
0x1c6b   :  { %v13937_v38 = vadd.f32 %v13936_v8, %v13935_v7  ;;  %v11098_v8 = vadd.f32 %v13962_v63, %v11049_v32  ;;  %v15525_v32 = vld [vmem:[%s18031_s23 + $0x10] sm:$0xff]  }
0x1c6c   :  { %v13938_v58 = vpop.f32.mrf.mxu0 }
0x1c6d   :  { %v11054_v49 = vadd.f32 %v13937_v38, %v11005_v44 }
0x1c6e   :  { %v13939_v59 = vpop.f32.mrf.mxu0 }
0x1c6f   :  { %v13940_v39 = vadd.f32 %v13939_v59, %v13938_v58  ;;  %v11103_v16 = vadd.f32 %v13965_v60, %v11054_v49  ;;  %v15523_v49 = vld [vmem:[%s18029_s21] sm:$0xff]  }
0x1c71   :  { %v11057_v51 = vadd.f32 %v13940_v39, %v11008_v53  ;;  %v12967_v39 = vld [vmem:[%s18062_s12] ss:$0 sm:$0xff] }
0x1c72   :  { %vm11367_vm4 = vcmp.eq.s32.totalorder %v11362_v31, %v12967_v39 }
0x1c73   :  { %v11106_v55 = vadd.f32 %v13968_v45, %v11057_v51  ;;  %v15520_v51 = vld [vmem:[%s18029_s21 + $0x18] sm:$0xff]  }
0x1c74   :  { %v15524_v45 = vld [vmem:[%s18031_s23 + $0x18] sm:$0xff]  }
0x1c80   :  { %v13985_v4 = vpop.f32.mrf.mxu0 }
0x1c82   :  { %v13986_v6 = vpop.f32.mrf.mxu0 }
0x1c83   :  { %v13987_v56 = vadd.f32 %v13986_v6, %v13985_v4  ;;  %v14018_v4 = vadd.f32 %v14017_v22, %v14016_v20  ;;  %v15866_v20 = vmov 0.0  }
0x1c84   :  { %v13988_v17 = vpop.f32.mrf.mxu0  ;;  %14852 = vmatprep.subr.bf16.mxu1 %v15866_v20  ;;  %14872 = vmatprep.subr.bf16.mxu0 %v15866_v20 }
0x1c85   :  { %v11144_v7 = vadd.f32 %v13987_v56, %v11095_v15  ;;  %14880 = vmatprep.mubr.msk.bf16.mxu0 %vm15867_vm3, %v15866_v20  ;;  %14873 = vmatpush3.bf16.msra.mxu0 %v15524_v45  ;;  %v15526_v15 = vld [vmem:[%s18031_s23 + $0x8] sm:$0xff]  }
0x1c86   :  { %v13989_v18 = vpop.f32.mrf.mxu0  ;;  %14874 = vmatprep.subr.bf16.mxu0 %v15866_v20 }
0x1c87   :  { %v13990_v52 = vadd.f32 %v13989_v18, %v13988_v17  ;;  %v11193_v6 = vadd.f32 %v14015_v11, %v11144_v7  ;;  %v12976_v11 = vld [vmem:[%s18032_s24] ss:$0 sm:$0xff] }
0x1c88   :  { %v13991_v21 = vpop.f32.mrf.mxu0 }
0x1c89   :  { %v11147_v5 = vadd.f32 %v13990_v52, %v11098_v8  ;;  %14875 = vmatpush3.bf16.msra.mxu0 %v15525_v32  ;;  %v15527_v52 = vld [vmem:[%s18031_s23] sm:$0xff]  }
0x1c8a   :  { %v13992_v19 = vpop.f32.mrf.mxu0  ;;  %14876 = vmatprep.subr.bf16.mxu0 %v15866_v20 }
0x1c8b   :  { %v13993_v42 = vadd.f32 %v13992_v19, %v13991_v21  ;;  %v11196_v18 = vadd.f32 %v14018_v4, %v11147_v5 }
0x1c8c   :  { %v13994_v28 = vpop.f32.mrf.mxu0 }
0x1c8d   :  { %v11152_v59 = vadd.f32 %v13993_v42, %v11103_v16  ;;  %14877 = vmatpush3.bf16.msra.mxu0 %v15526_v15 }
0x1c8e   :  { %v13995_v48 = vpop.f32.mrf.mxu0  ;;  %14878 = vmatprep.subr.bf16.mxu0 %v15866_v20 }
0x1c8f   :  { %v13996_v35 = vadd.f32 %v13995_v48, %v13994_v28  ;;  %v11201_v43 = vadd.f32 %v14021_v2, %v11152_v59  ;;  %v12968_v48 = vsel %vm11367_vm4, 1.0, %v15866_v20 }
0x1c90   :  { %v11370_v47 = vpack.c.bf16 %v12968_v48, %v12968_v48 }
0x1c91   :  { %v11155_v58 = vadd.f32 %v13996_v35, %v11106_v55  ;;  %14879 = vmatpush3.bf16.msra.mxu0 %v15527_v52  ;;  %v12970_v55 = vld [vmem:[%s18030_s22] ss:$0 sm:$0xff]  ;;  %s15868_s22 = smov [#allocation3]  }
0x1c92   :  { %s11603_s23 = sshll.u32 %s15868_s22, 4  ;;  %s11604_s23 = int_to_ptr.vmem [resolvable:$true] %s11603_s23 }
0x1c93   :  { %v11204_v10 = vadd.f32 %v14024_v1, %v11155_v58  ;;  %s15844_s24 = scalar_lea.vmem %s11604_s23, 64  ;;  %p15849_p1 = scmp.lt.s32.totalorder %s11604_s23, %s11604_s23 }
0x1c94   :  { %p15845_p0 = scmp.ne.s32.totalorder %s11604_s23, %s15844_s24  ;;  %p15850_p2 = scmp.lt.s32.totalorder %s15844_s24, %s15844_s24 }
0x1c96   :  { %p15851_p3 = por %p15850_p2, %p15849_p1 }
0x1c98   :  { %p15852_p4 = pnand %p15851_p3, %p15845_p0 }
0x1d00   :  { %v14838_v62 = vpop.f32.mrf.mxu0 }
0x1d01   :  { %v11250_v21 = vadd.f32 %v14838_v62, %v11201_v43 }
0x1d02   :  { %v11241_v0 = vpop.f32.mrf.mxu0 }
0x1d03   :  { %v11242_v9 = vadd.f32 %v11241_v0, %v11193_v6  ;;  %v11258_v25 = vmax.f32 %v11250_v21, 0.0 }
0x1d04   :  { %v14839_v41 = vpop.f32.mrf.mxu0 }
0x1d05   :  { %v11253_v17 = vadd.f32 %v14839_v41, %v11204_v10  ;;  %v11256_v36 = vmax.f32 %v11242_v9, 0.0 }
0x1d06   :  { %v11244_v12 = vpop.f32.mrf.mxu0 }
0x1d07   :  { %v11245_v14 = vadd.f32 %v11244_v12, %v11196_v18  ;;  %v11259_v19 = vmax.f32 %v11253_v17, 0.0 }
0x1d09   :  { %v11257_v24 = vmax.f32 %v11245_v14, 0.0  ;;  %v11261_v30 = vpack.c.bf16 %v11259_v19, %v11258_v25 }
0x1d0b   :  { %v11260_v13 = vpack.c.bf16 %v11257_v24, %v11256_v36 }
0x1d0d   :  { %14848 = vmatprep.mubr.msk.bf16.mxu1 %vm3586_vm2, %v11260_v13 }
0x1d0e   :  { %14849 = vmatmul.mubr.msk.bf16.vlgmr.msra.gmra.mxu1 %vm3586_vm2, %v11261_v30 }
0x1d0f   :  { %14856 = vmatprep.mubr.msk.bf16.mxu1 %vm15867_vm3, %v15866_v20 }
0x1dce   :  { %v14850_v22 = vpop.f32.mrf.mxu1 }
0x1dcf   :  { %v11350_v28 = vadd.f32 %v14850_v22, %v12960_v23 }
0x1dd0   :  { %v11341_v27 = vpop.f32.mrf.mxu1 }
0x1dd1   :  { %v11358_v34 = vmax.f32 %v11350_v28, 0.0  ;;  %v11342_v38 = vadd.f32 %v12960_v23, %v11341_v27 }
0x1dd2   :  { %v14851_v29 = vpop.f32.mrf.mxu1 }
0x1dd3   :  { %v11353_v37 = vadd.f32 %v14851_v29, %v12960_v23  ;;  %v11356_v44 = vmax.f32 %v11342_v38, 0.0 }
0x1dd4   :  { %v11344_v33 = vpop.f32.mrf.mxu1 }
0x1dd5   :  { %v11359_v46 = vmax.f32 %v11353_v37, 0.0  ;;  %v11345_v40 = vadd.f32 %v12960_v23, %v11344_v33 }
0x1dd7   :  { %v11372_v50 = vpack.c.bf16 %v11359_v46, %v11358_v34  ;;  %v11357_v53 = vmax.f32 %v11345_v40, 0.0 }
0x1dd9   :  { %14853 = vmatpush3.bf16.msra.mxu1 %v11372_v50  ;;  %v11371_v61 = vpack.c.bf16 %v11357_v53, %v11356_v44 }
0x1dda   :  { %14854 = vmatprep.subr.bf16.mxu1 %v15866_v20 }
0x1ddd   :  { %14855 = vmatpush3.bf16.msra.mxu1 %v11371_v61 }
0x1dde   :  { %14860 = vmatprep.subr.bf16.mxu1 %v15866_v20 }
0x1de0   :  { %14857 = vmatmul.mubr.msk.bf16.vlgmr.msra.gmra.mxu1 %vm175_vm1, %v11370_v47 }
0x1de1   :  { %14861 = vmatpush3.bf16.msra.mxu1 %v15520_v51  ;;  %14868 = vmatprep.mubr.msk.bf16.mxu1 %vm15867_vm3, %v15866_v20 }
0x1de2   :  { %14862 = vmatprep.subr.bf16.mxu1 %v15866_v20 }
0x1de5   :  { %14863 = vmatpush3.bf16.msra.mxu1 %v15521_v3 }
0x1de6   :  { %14864 = vmatprep.subr.bf16.mxu1 %v15866_v20 }
0x1de9   :  { %14865 = vmatpush3.bf16.msra.mxu1 %v15522_v57 }
0x1dea   :  { %14866 = vmatprep.subr.bf16.mxu1 %v15866_v20 }
0x1ded   :  { %14867 = vmatpush3.bf16.msra.mxu1 %v15523_v49 }
0x1ea0   :  { %v11410_v56 = vpop.f32.mrf.mxu1 }
0x1ea1   :  { %v11416_v35 = vpack.c.bf16 %v11410_v56, %v11410_v56 }
0x1ea2   :  { %v14858_v60 = vpop.f32.mrf.mxu1 }
0x1ea3   :  { %14869 = vmatmul.mubr.msk.bf16.vlgmr.msra.gmra.mxu1 %vm3586_vm2, %v11416_v35 }
0x1ea4   :  { %v11413_v42 = vpop.f32.mrf.mxu1 }
0x1ea6   :  { %v14859_v63 = vpop.f32.mrf.mxu1 }
0x1f63   :  { %v11493_v54 = vpop.f32.mrf.mxu1 }
0x1f64   :  { %v11494_v16 = vadd.f32 %v12970_v55, %v11493_v54 }
0x1f65   :  { %v14870_v7 = vpop.f32.mrf.mxu1 }
0x1f66   :  { %v11499_v8 = vmax.f32 %v11494_v16, 0.0 }
0x1f67   :  { %v11496_v58 = vpop.f32.mrf.mxu1 }
0x1f68   :  { %v11500_v59 = vpack.c.bf16 %v11499_v8, %v11499_v8 }
0x1f69   :  { %v14871_v62 = vpop.f32.mrf.mxu1 }
0x1f6a   :  { %14881 = vmatmul.mubr.msk.bf16.vlgmr.msra.gmra.mxu0 %vm3586_vm2, %v11500_v59 }
0x202a   :  { %v11577_v1 = vpop.f32.mrf.mxu0 }
0x202b   :  { %v11578_v5 = vadd.f32 %v12976_v11, %v11577_v1 }
0x202c   :  { %v14882_v2 = vpop.f32.mrf.mxu0 }
0x202d   :  { %v11584_v0 = vsel %vm11583_vm5, %v11578_v5, -inf }
0x202e   :  { %11585 = vmax.xlane.f32.xlu0 %v11584_v0  ;;  %v11580_v4 = vpop.f32.mrf.mxu0 }
0x2030   :  { %v14883_v6 = vpop.f32.mrf.mxu0 }
0x20b7   :  { %v11586_v10 = vpop.xlane.xlu0 %11585 }
0x20b8   :  { %v11587_v43 = vsub.f32 %v11578_v5, %v11586_v10 }
0x20ba   :  { %v11588_v41 = vmul.f32 1.442695, %v11587_v43 }
0x20bc   :  { %15840 = vpow2.f32 %v11588_v41 }
0x20c9   :  { %v15841_v9 = vpop.eup %15840 }
0x20ca   :  { %v11590_v17 = vsel %vm11583_vm5, %v15841_v9, 0.0 }
0x20cb   :  { %11591 = vadd.xlane.f32.xlu0 %v11590_v17 }
0x2154   :  { %v11592_v18 = vpop.xlane.xlu0 %11591 }
0x2155   :  { %15842 = vlog2.f32 %v11592_v18 }
0x2162   :  { %v15843_v21 = vpop.eup %15842 }
0x2163   :  { %v11594_v12 = vmul.f32 0.6931472, %v15843_v21 }
0x2165   :  { %v11595_v14 = vsub.f32 %v11587_v43, %v11594_v12 }
0x2167   :  { %11596 = vst.msk [vmem:[#allocation3] sm:$0xf] %vm11583_vm5, %v11595_v14 }
0x2168   :  { %15855 = shalt.err (!%p15852_p4)
}
0x2169   :  { %11606 = dma.vmem_to_hbm [thread:$0]  %s11604_s23, 64, %s18033_s25, [#allocation4]  }
0x216a   :  { %15864 = dma.done.wait [#allocation4], 64  }
0x216b   :  { %15865 = vsyncadd [#allocation4], 4294967232 }
0x216c   :  { %11610 = vsyncpa [#allocation4], 1 }

</bundles_post_ra>
